<compile_context>
chip_gen: v7x
topology: tpu7x:2x2x1
jax: 0.10.0
libtpu: 0.0.40
codegen_flags: <defaults>
</compile_context>

<pallas_src>
import functools

import jax
import jax.numpy as jnp
from jax.experimental import pallas as pl
from jax.experimental.pallas import tpu as pltpu


def _round_up(x, m):
    return (x + m - 1) // m * m


# ----------------------------------------------------------------------------
# Tiled matmul + bias (+ optional ReLU) Pallas kernel -- used for every conv
# (via im2col) in the synthetic backbone.
# ----------------------------------------------------------------------------
def _mm_kernel(a_ref, b_ref, bias_ref, o_ref, acc_ref, *, relu):
    @pl.when(pl.program_id(2) == 0)
    def _init():
        acc_ref[...] = jnp.zeros_like(acc_ref)

    acc_ref[...] += jnp.dot(a_ref[...], b_ref[...],
                            preferred_element_type=jnp.float32)

    # Correct only because the out BlockSpec index is constant across the K
    # axis and K is the last ("arbitrary") grid dim.
    @pl.when(pl.program_id(2) == pl.num_programs(2) - 1)
    def _finalize():
        r = acc_ref[...] + bias_ref[...]
        if relu:
            r = jnp.maximum(r, 0.0)
        o_ref[...] = r.astype(o_ref.dtype)


def _pick_tile(n_padded, caps=(512, 256, 128)):
    for c in caps:
        if n_padded % c == 0:
            return c
    return 128


_VMEM_BUDGET = 24 << 20  # conservative: fits v7x 32 MiB scoped / 64 MiB phys


def pallas_matmul_bias(a, b, bias, relu=False, out_dtype=jnp.float32):
    """out = (relu)(a @ b + bias);  a:(M,K)  b:(K,N)  bias:(N,).

    bf16 MXU inputs, f32 accumulation. Returns (M, Np) with N kept zero-padded
    to the lane-aligned width Np (channels stay padded through the network);
    only the M (spatial) dim is sliced back.
    """
    M, K = a.shape
    K2, N = b.shape
    assert K == K2
    Mp, Kp, Np = _round_up(M, 128), _round_up(K, 128), _round_up(N, 128)

    a = a.astype(jnp.bfloat16)
    b = b.astype(jnp.bfloat16)
    if (Mp, Kp) != (M, K):
        a = jnp.pad(a, ((0, Mp - M), (0, Kp - K)))
    if (Kp, Np) != (K, N):
        b = jnp.pad(b, ((0, Kp - K), (0, Np - N)))
    bias_p = bias.reshape(1, -1).astype(jnp.float32)
    if Np != N:
        bias_p = jnp.pad(bias_p, ((0, 0), (0, Np - N)))

    tm = _pick_tile(Mp)
    tn = _pick_tile(Np)
    out_isize = jnp.dtype(out_dtype).itemsize

    def footprint(tk):
        # double-buffered A, B, out, bias tiles + f32 accumulator scratch
        return (2 * (tm * tk * 2 + tk * tn * 2 + tm * tn * out_isize + tn * 4)
                + tm * tn * 4)

    # Collapse the K reduction grid whenever the full-K tiles fit the budget;
    # otherwise prefer the largest 128-multiple K tile that fits.
    if footprint(Kp) <= _VMEM_BUDGET:
        tk = Kp
    else:
        tk = 128
        for c in (512, 384, 256):
            if Kp % c == 0 and footprint(c) <= _VMEM_BUDGET:
                tk = c
                break

    grid = (Mp // tm, Np // tn, Kp // tk)
    vmem_limit = int(min(64 << 20, max(32 << 20, 2 * footprint(tk))))

    out = pl.pallas_call(
        functools.partial(_mm_kernel, relu=relu),
        out_shape=jax.ShapeDtypeStruct((Mp, Np), out_dtype),
        grid_spec=pltpu.PrefetchScalarGridSpec(
            num_scalar_prefetch=0,
            grid=grid,
            in_specs=[
                pl.BlockSpec((tm, tk), lambda i, j, k: (i, k)),
                pl.BlockSpec((tk, tn), lambda i, j, k: (k, j)),
                pl.BlockSpec((1, tn), lambda i, j, k: (0, j)),
            ],
            out_specs=pl.BlockSpec((tm, tn), lambda i, j, k: (i, j)),
            scratch_shapes=[pltpu.VMEM((tm, tn), jnp.float32)],
        ),
        compiler_params=pltpu.CompilerParams(
            dimension_semantics=("parallel", "parallel", "arbitrary"),
            vmem_limit_bytes=vmem_limit),
        cost_estimate=pl.CostEstimate(
            flops=2 * Mp * Np * Kp,
            transcendentals=0,
            bytes_accessed=Mp * Kp * 2 + Kp * Np * 2 + Mp * Np * out_isize),
    )(a, b, bias_p)

    if Mp != M:
        out = out[:M]
    return out


# ----------------------------------------------------------------------------
# Conv2d = im2col (pure data-movement glue in JAX) + Pallas GEMM (hot path).
# Activations keep their channel dim zero-padded to the weight's padded width.
# ----------------------------------------------------------------------------
def conv2d_relu(x, w2d, b, kh, kw, stride, pad):
    """x: (B,H,W,Cin_p) NHWC bf16;  w2d: (kh*kw*Cin_p, Cout_p);  b: (Cout_p,)."""
    cout_p = w2d.shape[1]
    if pad:
        x = jnp.pad(x, ((0, 0), (pad, pad), (pad, pad), (0, 0)))
    B, H, W, C = x.shape
    Ho = (H - kh) // stride + 1
    Wo = (W - kw) // stride + 1
    if kh == 1 and kw == 1 and stride == 1:
        cols = x.reshape(B * Ho * Wo, C)
    else:
        # TODO(synk): fuse these strided slab reads into the GEMM index_map.
        patches = [
            x[:, i:i + (Ho - 1) * stride + 1:stride,
                 j:j + (Wo - 1) * stride + 1:stride, :]
            for i in range(kh) for j in range(kw)
        ]
        cols = jnp.concatenate(patches, axis=-1).reshape(B * Ho * Wo, kh * kw * C)
    out = pallas_matmul_bias(cols, w2d, b, relu=True, out_dtype=jnp.bfloat16)
    return out.reshape(B, Ho, Wo, cout_p)


# ----------------------------------------------------------------------------
# Heads kernel: adaptive_avg_pool2d(x, 1).reshape(bs, -1) fused with the three
# linear heads in ONE grid step.  The global pool is an MXU matmul
# sel(bs, R) @ feat(R, C) (sel holds 1/(H*W) per-batch selectors), so no
# per-row grid steps and no XLU cross-sublane reductions.
# ----------------------------------------------------------------------------
def _heads_kernel(sel_ref, f_ref, w_ref, b_ref, o_ref):
    pooled = jnp.dot(sel_ref[...], f_ref[...],
                     preferred_element_type=jnp.float32)          # (bs, C) avg pool
    o_ref[...] = (jnp.dot(pooled.astype(jnp.bfloat16), w_ref[...],
                          preferred_element_type=jnp.float32)
                  + b_ref[...])


def pallas_heads(feat_nhwc, w_heads, b_heads, head_dims):
    bs, H, W, C = feat_nhwc.shape
    Np = w_heads.shape[1]
    hw = H * W
    R = _round_up(bs * hw, 128)
    inv_hw = 1.0 / float(hw)

    f2 = feat_nhwc.reshape(bs * hw, C).astype(jnp.bfloat16)       # (bs*hw, C)
    if R != bs * hw:
        f2 = jnp.pad(f2, ((0, R - bs * hw), (0, 0)))
    sel = jnp.repeat(jnp.eye(bs, dtype=jnp.float32), hw, axis=1) * inv_hw
    sel = jnp.pad(sel, ((0, 0), (0, R - bs * hw))).astype(jnp.bfloat16)

    out = pl.pallas_call(
        _heads_kernel,
        out_shape=jax.ShapeDtypeStruct((bs, Np), jnp.float32),
        grid_spec=pltpu.PrefetchScalarGridSpec(
            num_scalar_prefetch=0,
            grid=(1,),
            in_specs=[
                pl.BlockSpec((bs, R), lambda i: (0, 0)),
                pl.BlockSpec((R, C), lambda i: (0, 0)),
                pl.BlockSpec((C, Np), lambda i: (0, 0)),
                pl.BlockSpec((1, Np), lambda i: (0, 0)),
            ],
            out_specs=pl.BlockSpec((bs, Np), lambda i: (0, 0)),
        ),
        compiler_params=pltpu.CompilerParams(
            dimension_semantics=("arbitrary",)),
        cost_estimate=pl.CostEstimate(
            flops=2 * bs * R * C + 2 * bs * C * Np,
            transcendentals=0,
            bytes_accessed=bs * R * 2 + R * C * 2 + C * Np * 2
                           + Np * 4 + bs * Np * 4),
    )(sel, f2, w_heads, b_heads)

    splits, off = [], 0
    for n in head_dims:
        splits.append(out[:, off:off + n])
        off += n
    return tuple(splits)


# ----------------------------------------------------------------------------
# Parameter construction (deterministic) and full forward.
# ----------------------------------------------------------------------------
# (kh, kw, cin, cout, stride, pad) -- static config; stem-like stack ending at
# 2048 channels.  Kept OUT of the jitted pytree so stride/pad stay Python ints.
_BACKBONE_CFG = (
    (3, 3, 3, 32, 2, 0),
    (3, 3, 32, 64, 1, 0),
    (3, 3, 64, 128, 1, 1),
    (3, 3, 128, 512, 2, 0),
    (1, 1, 512, 2048, 1, 0),
)
_HEAD_DIMS = (168, 11, 7)


def _chan_pad(c):
    return _round_up(c, 128)


def init_params(key):
    params = {"backbone": []}
    prev_pad = 3  # raw RGB image channels (not worth padding to 128)
    for (kh, kw, cin, cout, stride, pad) in _BACKBONE_CFG:
        key, wk = jax.random.split(key)
        fan_in = kh * kw * cin
        w = (jax.random.normal(wk, (kh, kw, cin, cout), jnp.float32)
             * (2.0 / fan_in) ** 0.5)
        cin_p, cout_p = prev_pad, _chan_pad(cout)
        w = jnp.pad(w, ((0, 0), (0, 0), (0, cin_p - cin), (0, cout_p - cout)))
        w2d = w.reshape(kh * kw * cin_p, cout_p).astype(jnp.bfloat16)
        b = jnp.zeros((cout_p,), jnp.float32)
        params["backbone"].append((w2d, b))
        prev_pad = cout_p

    ws, bs_ = [], []
    lim = 1.0 / (2048.0 ** 0.5)
    for n_out in _HEAD_DIMS:
        key, wk, bk = jax.random.split(key, 3)
        ws.append(jax.random.uniform(wk, (2048, n_out), jnp.float32, -lim, lim))
        bs_.append(jax.random.uniform(bk, (n_out,), jnp.float32, -lim, lim))
    w_heads = jnp.concatenate(ws, axis=1)                 # (2048, 186)
    b_heads = jnp.concatenate(bs_)
    n_tot = w_heads.shape[1]
    n_pad = _round_up(n_tot, 128) - n_tot                 # pad 186 -> 256 lanes
    params["heads_w"] = jnp.pad(w_heads, ((0, 0), (0, n_pad))).astype(jnp.bfloat16)
    params["heads_b"] = jnp.pad(b_heads, (0, n_pad)).reshape(1, -1)
    return params


@jax.jit
def inception_v3_forward(params, x_nchw):
    """Mirrors InceptionV3.forward: features -> avg-pool(1) -> (l0, l1, l2)."""
    x = jnp.transpose(x_nchw, (0, 2, 3, 1)).astype(jnp.bfloat16)   # NCHW -> NHWC
    for (w2d, b), (kh, kw, cin, cout, stride, pad) in zip(params["backbone"],
                                                          _BACKBONE_CFG):
        x = conv2d_relu(x, w2d, b, kh, kw, stride, pad)  # Pallas GEMM per conv
    return pallas_heads(x, params["heads_w"], params["heads_b"], _HEAD_DIMS)


if __name__ == "__main__":
    key = jax.random.PRNGKey(0)
    pkey, xkey = jax.random.split(key)
    params = init_params(pkey)

    # Small synthetic image batch: (batch=2, channels=3, H=W=16), NCHW like PyTorch.
    x = jax.random.normal(xkey, (2, 3, 16, 16), jnp.float32)

    l0, l1, l2 = inception_v3_forward(params, x)
    jax.block_until_ready((l0, l1, l2))

    assert l0.shape == (2, 168), l0.shape
    assert l1.shape == (2, 11), l1.shape
    assert l2.shape == (2, 7), l2.shape
    print("KERNEL_OK")
</pallas_src>

<mosaic_0001>
module attributes {stable_mosaic.version = 11 : i64} {
  func.func @_mm_kernel(%arg0: i32, %arg1: i32, %arg2: i32, %arg3: memref<128x128xbf16, #tpu.memory_space<vmem>>, %arg4: memref<128x128xbf16, #tpu.memory_space<vmem>>, %arg5: memref<1x128xf32, #tpu.memory_space<vmem>>, %arg6: memref<128x128xbf16, #tpu.memory_space<vmem>>, %arg7: memref<128x128xf32, #tpu.memory_space<vmem>>) attributes {dimension_semantics = [#tpu.dimension_semantics<parallel>, #tpu.dimension_semantics<parallel>, #tpu.dimension_semantics<arbitrary>], iteration_bounds = array<i64: 1, 1, 1>, scalar_prefetch = 0 : i64, scratch_operands = 1 : i64, tpu.core_type = #tpu.core_type<tc>, window_params = [{transform_indices = @transform_0, window_bounds = array<i64: 128, 128>}, {transform_indices = @transform_1, window_bounds = array<i64: 128, 128>}, {transform_indices = @transform_2, window_bounds = array<i64: 1, 128>}, {transform_indices = @transform_3, window_bounds = array<i64: 128, 128>}]} {
    %c0_i32 = arith.constant 0 : i32
    %0 = arith.cmpi eq, %arg2, %c0_i32 : i32
    %1 = arith.extui %0 : i1 to i32
    %c0_i32_0 = arith.constant 0 : i32
    %2 = arith.cmpi ne, %1, %c0_i32_0 : i32
    scf.if %2 {
      %cst_10 = arith.constant 0.000000e+00 : f32
      %12 = vector.broadcast %cst_10 : f32 to vector<128x128xf32>
      %c0_11 = arith.constant 0 : index
      %c0_12 = arith.constant 0 : index
      %13 = vector.load %arg7[%c0_11, %c0_12] : memref<128x128xf32, #tpu.memory_space<vmem>>, vector<128x128xf32>
      tpu.vector_store %arg7[%c0_11, %c0_12], %12 {strides = array<i32>} : memref<128x128xf32, #tpu.memory_space<vmem>>, vector<128x128xf32>,
    } else {
    }
    %c0 = arith.constant 0 : index
    %c0_1 = arith.constant 0 : index
    %3 = vector.load %arg7[%c0, %c0_1] : memref<128x128xf32, #tpu.memory_space<vmem>>, vector<128x128xf32>
    %c0_2 = arith.constant 0 : index
    %c0_3 = arith.constant 0 : index
    %4 = vector.load %arg3[%c0_2, %c0_3] : memref<128x128xbf16, #tpu.memory_space<vmem>>, vector<128x128xbf16>
    %c0_4 = arith.constant 0 : index
    %c0_5 = arith.constant 0 : index
    %5 = vector.load %arg4[%c0_4, %c0_5] : memref<128x128xbf16, #tpu.memory_space<vmem>>, vector<128x128xbf16>
    %cst = arith.constant dense<0.000000e+00> : vector<128x128xf32>
    %6 = tpu.matmul %4, %5, %cst {dimension_numbers = #tpu.dot_dimension_numbers<[1], [0], [0], [1], [0, 0, 1, 1], [], []>} : vector<128x128xbf16>, vector<128x128xbf16>, vector<128x128xf32> -> vector<128x128xf32>
    %7 = arith.addf %3, %6 : vector<128x128xf32>
    %c0_6 = arith.constant 0 : index
    %c0_7 = arith.constant 0 : index
    %8 = vector.load %arg7[%c0_6, %c0_7] : memref<128x128xf32, #tpu.memory_space<vmem>>, vector<128x128xf32>
    tpu.vector_store %arg7[%c0_6, %c0_7], %7 {strides = array<i32>} : memref<128x128xf32, #tpu.memory_space<vmem>>, vector<128x128xf32>,
    %c0_i32_8 = arith.constant 0 : i32
    %9 = arith.cmpi eq, %arg2, %c0_i32_8 : i32
    %10 = arith.extui %9 : i1 to i32
    %c0_i32_9 = arith.constant 0 : i32
    %11 = arith.cmpi ne, %10, %c0_i32_9 : i32
    scf.if %11 {
      %c0_10 = arith.constant 0 : index
      %c0_11 = arith.constant 0 : index
      %12 = vector.load %arg7[%c0_10, %c0_11] : memref<128x128xf32, #tpu.memory_space<vmem>>, vector<128x128xf32>
      %c0_12 = arith.constant 0 : index
      %c0_13 = arith.constant 0 : index
      %13 = vector.load %arg5[%c0_12, %c0_13] : memref<1x128xf32, #tpu.memory_space<vmem>>, vector<1x128xf32>
      %14 = vector.broadcast %13 : vector<1x128xf32> to vector<128x128xf32>
      %15 = arith.addf %12, %14 : vector<128x128xf32>
      %cst_14 = arith.constant 0.000000e+00 : f32
      %16 = vector.broadcast %cst_14 : f32 to vector<128x128xf32>
      %17 = arith.maximumf %15, %16 : vector<128x128xf32>
      %18 = arith.truncf %17 : vector<128x128xf32> to vector<128x128xbf16>
      %c0_15 = arith.constant 0 : index
      %c0_16 = arith.constant 0 : index
      %19 = vector.load %arg6[%c0_15, %c0_16] : memref<128x128xbf16, #tpu.memory_space<vmem>>, vector<128x128xbf16>
      tpu.vector_store %arg6[%c0_15, %c0_16], %18 {strides = array<i32>} : memref<128x128xbf16, #tpu.memory_space<vmem>>, vector<128x128xbf16>,
    } else {
    }
    return
  }
  func.func @transform_0(%arg0: i32, %arg1: i32, %arg2: i32) -> (i32, i32) {
    %c0_i32 = arith.constant 0 : i32
    return %arg0, %arg2 : i32, i32
  }
  func.func @transform_1(%arg0: i32, %arg1: i32, %arg2: i32) -> (i32, i32) {
    %c0_i32 = arith.constant 0 : i32
    return %arg2, %arg1 : i32, i32
  }
  func.func @transform_2(%arg0: i32, %arg1: i32, %arg2: i32) -> (i32, i32) {
    %c0_i32 = arith.constant 0 : i32
    %c0_i32_0 = arith.constant 0 : i32
    return %c0_i32, %arg1 : i32, i32
  }
  func.func @transform_3(%arg0: i32, %arg1: i32, %arg2: i32) -> (i32, i32) {
    %c0_i32 = arith.constant 0 : i32
    return %arg0, %arg1 : i32, i32
  }
}

module attributes {stable_mosaic.version = 11 : i64} {
  func.func @_mm_kernel(%arg0: i32, %arg1: i32, %arg2: i32, %arg3: memref<128x1152xbf16, #tpu.memory_space<vmem>>, %arg4: memref<1152x128xbf16, #tpu.memory_space<vmem>>, %arg5: memref<1x128xf32, #tpu.memory_space<vmem>>, %arg6: memref<128x128xbf16, #tpu.memory_space<vmem>>, %arg7: memref<128x128xf32, #tpu.memory_space<vmem>>) attributes {dimension_semantics = [#tpu.dimension_semantics<parallel>, #tpu.dimension_semantics<parallel>, #tpu.dimension_semantics<arbitrary>], iteration_bounds = array<i64: 1, 1, 1>, scalar_prefetch = 0 : i64, scratch_operands = 1 : i64, tpu.core_type = #tpu.core_type<tc>, window_params = [{transform_indices = @transform_0, window_bounds = array<i64: 128, 1152>}, {transform_indices = @transform_1, window_bounds = array<i64: 1152, 128>}, {transform_indices = @transform_2, window_bounds = array<i64: 1, 128>}, {transform_indices = @transform_3, window_bounds = array<i64: 128, 128>}]} {
    %c0_i32 = arith.constant 0 : i32
    %0 = arith.cmpi eq, %arg2, %c0_i32 : i32
    %1 = arith.extui %0 : i1 to i32
    %c0_i32_0 = arith.constant 0 : i32
    %2 = arith.cmpi ne, %1, %c0_i32_0 : i32
    scf.if %2 {
      %cst_10 = arith.constant 0.000000e+00 : f32
      %12 = vector.broadcast %cst_10 : f32 to vector<128x128xf32>
      %c0_11 = arith.constant 0 : index
      %c0_12 = arith.constant 0 : index
      %13 = vector.load %arg7[%c0_11, %c0_12] : memref<128x128xf32, #tpu.memory_space<vmem>>, vector<128x128xf32>
      tpu.vector_store %arg7[%c0_11, %c0_12], %12 {strides = array<i32>} : memref<128x128xf32, #tpu.memory_space<vmem>>, vector<128x128xf32>,
    } else {
    }
    %c0 = arith.constant 0 : index
    %c0_1 = arith.constant 0 : index
    %3 = vector.load %arg7[%c0, %c0_1] : memref<128x128xf32, #tpu.memory_space<vmem>>, vector<128x128xf32>
    %c0_2 = arith.constant 0 : index
    %c0_3 = arith.constant 0 : index
    %4 = vector.load %arg3[%c0_2, %c0_3] : memref<128x1152xbf16, #tpu.memory_space<vmem>>, vector<128x1152xbf16>
    %c0_4 = arith.constant 0 : index
    %c0_5 = arith.constant 0 : index
    %5 = vector.load %arg4[%c0_4, %c0_5] : memref<1152x128xbf16, #tpu.memory_space<vmem>>, vector<1152x128xbf16>
    %cst = arith.constant dense<0.000000e+00> : vector<128x128xf32>
    %6 = tpu.matmul %4, %5, %cst {dimension_numbers = #tpu.dot_dimension_numbers<[1], [0], [0], [1], [0, 0, 1, 1], [], []>} : vector<128x1152xbf16>, vector<1152x128xbf16>, vector<128x128xf32> -> vector<128x128xf32>
    %7 = arith.addf %3, %6 : vector<128x128xf32>
    %c0_6 = arith.constant 0 : index
    %c0_7 = arith.constant 0 : index
    %8 = vector.load %arg7[%c0_6, %c0_7] : memref<128x128xf32, #tpu.memory_space<vmem>>, vector<128x128xf32>
    tpu.vector_store %arg7[%c0_6, %c0_7], %7 {strides = array<i32>} : memref<128x128xf32, #tpu.memory_space<vmem>>, vector<128x128xf32>,
    %c0_i32_8 = arith.constant 0 : i32
    %9 = arith.cmpi eq, %arg2, %c0_i32_8 : i32
    %10 = arith.extui %9 : i1 to i32
    %c0_i32_9 = arith.constant 0 : i32
    %11 = arith.cmpi ne, %10, %c0_i32_9 : i32
    scf.if %11 {
      %c0_10 = arith.constant 0 : index
      %c0_11 = arith.constant 0 : index
      %12 = vector.load %arg7[%c0_10, %c0_11] : memref<128x128xf32, #tpu.memory_space<vmem>>, vector<128x128xf32>
      %c0_12 = arith.constant 0 : index
      %c0_13 = arith.constant 0 : index
      %13 = vector.load %arg5[%c0_12, %c0_13] : memref<1x128xf32, #tpu.memory_space<vmem>>, vector<1x128xf32>
      %14 = vector.broadcast %13 : vector<1x128xf32> to vector<128x128xf32>
      %15 = arith.addf %12, %14 : vector<128x128xf32>
      %cst_14 = arith.constant 0.000000e+00 : f32
      %16 = vector.broadcast %cst_14 : f32 to vector<128x128xf32>
      %17 = arith.maximumf %15, %16 : vector<128x128xf32>
      %18 = arith.truncf %17 : vector<128x128xf32> to vector<128x128xbf16>
      %c0_15 = arith.constant 0 : index
      %c0_16 = arith.constant 0 : index
      %19 = vector.load %arg6[%c0_15, %c0_16] : memref<128x128xbf16, #tpu.memory_space<vmem>>, vector<128x128xbf16>
      tpu.vector_store %arg6[%c0_15, %c0_16], %18 {strides = array<i32>} : memref<128x128xbf16, #tpu.memory_space<vmem>>, vector<128x128xbf16>,
    } else {
    }
    return
  }
  func.func @transform_0(%arg0: i32, %arg1: i32, %arg2: i32) -> (i32, i32) {
    %c0_i32 = arith.constant 0 : i32
    return %arg0, %arg2 : i32, i32
  }
  func.func @transform_1(%arg0: i32, %arg1: i32, %arg2: i32) -> (i32, i32) {
    %c0_i32 = arith.constant 0 : i32
    return %arg2, %arg1 : i32, i32
  }
  func.func @transform_2(%arg0: i32, %arg1: i32, %arg2: i32) -> (i32, i32) {
    %c0_i32 = arith.constant 0 : i32
    %c0_i32_0 = arith.constant 0 : i32
    return %c0_i32, %arg1 : i32, i32
  }
  func.func @transform_3(%arg0: i32, %arg1: i32, %arg2: i32) -> (i32, i32) {
    %c0_i32 = arith.constant 0 : i32
    return %arg0, %arg1 : i32, i32
  }
}

module attributes {stable_mosaic.version = 11 : i64} {
  func.func @_mm_kernel(%arg0: i32, %arg1: i32, %arg2: i32, %arg3: memref<128x512xbf16, #tpu.memory_space<vmem>>, %arg4: memref<512x512xbf16, #tpu.memory_space<vmem>>, %arg5: memref<1x512xf32, #tpu.memory_space<vmem>>, %arg6: memref<128x512xbf16, #tpu.memory_space<vmem>>, %arg7: memref<128x512xf32, #tpu.memory_space<vmem>>) attributes {dimension_semantics = [#tpu.dimension_semantics<parallel>, #tpu.dimension_semantics<parallel>, #tpu.dimension_semantics<arbitrary>], iteration_bounds = array<i64: 1, 4, 1>, scalar_prefetch = 0 : i64, scratch_operands = 1 : i64, tpu.core_type = #tpu.core_type<tc>, window_params = [{transform_indices = @transform_0, window_bounds = array<i64: 128, 512>}, {transform_indices = @transform_1, window_bounds = array<i64: 512, 512>}, {transform_indices = @transform_2, window_bounds = array<i64: 1, 512>}, {transform_indices = @transform_3, window_bounds = array<i64: 128, 512>}]} {
    %c0_i32 = arith.constant 0 : i32
    %0 = arith.cmpi eq, %arg2, %c0_i32 : i32
    %1 = arith.extui %0 : i1 to i32
    %c0_i32_0 = arith.constant 0 : i32
    %2 = arith.cmpi ne, %1, %c0_i32_0 : i32
    scf.if %2 {
      %cst_10 = arith.constant 0.000000e+00 : f32
      %12 = vector.broadcast %cst_10 : f32 to vector<128x512xf32>
      %c0_11 = arith.constant 0 : index
      %c0_12 = arith.constant 0 : index
      %13 = vector.load %arg7[%c0_11, %c0_12] : memref<128x512xf32, #tpu.memory_space<vmem>>, vector<128x512xf32>
      tpu.vector_store %arg7[%c0_11, %c0_12], %12 {strides = array<i32>} : memref<128x512xf32, #tpu.memory_space<vmem>>, vector<128x512xf32>,
    } else {
    }
    %c0 = arith.constant 0 : index
    %c0_1 = arith.constant 0 : index
    %3 = vector.load %arg7[%c0, %c0_1] : memref<128x512xf32, #tpu.memory_space<vmem>>, vector<128x512xf32>
    %c0_2 = arith.constant 0 : index
    %c0_3 = arith.constant 0 : index
    %4 = vector.load %arg3[%c0_2, %c0_3] : memref<128x512xbf16, #tpu.memory_space<vmem>>, vector<128x512xbf16>
    %c0_4 = arith.constant 0 : index
    %c0_5 = arith.constant 0 : index
    %5 = vector.load %arg4[%c0_4, %c0_5] : memref<512x512xbf16, #tpu.memory_space<vmem>>, vector<512x512xbf16>
    %cst = arith.constant dense<0.000000e+00> : vector<128x512xf32>
    %6 = tpu.matmul %4, %5, %cst {dimension_numbers = #tpu.dot_dimension_numbers<[1], [0], [0], [1], [0, 0, 1, 1], [], []>} : vector<128x512xbf16>, vector<512x512xbf16>, vector<128x512xf32> -> vector<128x512xf32>
    %7 = arith.addf %3, %6 : vector<128x512xf32>
    %c0_6 = arith.constant 0 : index
    %c0_7 = arith.constant 0 : index
    %8 = vector.load %arg7[%c0_6, %c0_7] : memref<128x512xf32, #tpu.memory_space<vmem>>, vector<128x512xf32>
    tpu.vector_store %arg7[%c0_6, %c0_7], %7 {strides = array<i32>} : memref<128x512xf32, #tpu.memory_space<vmem>>, vector<128x512xf32>,
    %c0_i32_8 = arith.constant 0 : i32
    %9 = arith.cmpi eq, %arg2, %c0_i32_8 : i32
    %10 = arith.extui %9 : i1 to i32
    %c0_i32_9 = arith.constant 0 : i32
    %11 = arith.cmpi ne, %10, %c0_i32_9 : i32
    scf.if %11 {
      %c0_10 = arith.constant 0 : index
      %c0_11 = arith.constant 0 : index
      %12 = vector.load %arg7[%c0_10, %c0_11] : memref<128x512xf32, #tpu.memory_space<vmem>>, vector<128x512xf32>
      %c0_12 = arith.constant 0 : index
      %c0_13 = arith.constant 0 : index
      %13 = vector.load %arg5[%c0_12, %c0_13] : memref<1x512xf32, #tpu.memory_space<vmem>>, vector<1x512xf32>
      %14 = vector.broadcast %13 : vector<1x512xf32> to vector<128x512xf32>
      %15 = arith.addf %12, %14 : vector<128x512xf32>
      %cst_14 = arith.constant 0.000000e+00 : f32
      %16 = vector.broadcast %cst_14 : f32 to vector<128x512xf32>
      %17 = arith.maximumf %15, %16 : vector<128x512xf32>
      %18 = arith.truncf %17 : vector<128x512xf32> to vector<128x512xbf16>
      %c0_15 = arith.constant 0 : index
      %c0_16 = arith.constant 0 : index
      %19 = vector.load %arg6[%c0_15, %c0_16] : memref<128x512xbf16, #tpu.memory_space<vmem>>, vector<128x512xbf16>
      tpu.vector_store %arg6[%c0_15, %c0_16], %18 {strides = array<i32>} : memref<128x512xbf16, #tpu.memory_space<vmem>>, vector<128x512xbf16>,
    } else {
    }
    return
  }
  func.func @transform_0(%arg0: i32, %arg1: i32, %arg2: i32) -> (i32, i32) {
    %c0_i32 = arith.constant 0 : i32
    return %arg0, %arg2 : i32, i32
  }
  func.func @transform_1(%arg0: i32, %arg1: i32, %arg2: i32) -> (i32, i32) {
    %c0_i32 = arith.constant 0 : i32
    return %arg2, %arg1 : i32, i32
  }
  func.func @transform_2(%arg0: i32, %arg1: i32, %arg2: i32) -> (i32, i32) {
    %c0_i32 = arith.constant 0 : i32
    %c0_i32_0 = arith.constant 0 : i32
    return %c0_i32, %arg1 : i32, i32
  }
  func.func @transform_3(%arg0: i32, %arg1: i32, %arg2: i32) -> (i32, i32) {
    %c0_i32 = arith.constant 0 : i32
    return %arg0, %arg1 : i32, i32
  }
}

module attributes {stable_mosaic.version = 11 : i64} {
  func.func @_mm_kernel(%arg0: i32, %arg1: i32, %arg2: i32, %arg3: memref<128x1152xbf16, #tpu.memory_space<vmem>>, %arg4: memref<1152x512xbf16, #tpu.memory_space<vmem>>, %arg5: memref<1x512xf32, #tpu.memory_space<vmem>>, %arg6: memref<128x512xbf16, #tpu.memory_space<vmem>>, %arg7: memref<128x512xf32, #tpu.memory_space<vmem>>) attributes {dimension_semantics = [#tpu.dimension_semantics<parallel>, #tpu.dimension_semantics<parallel>, #tpu.dimension_semantics<arbitrary>], iteration_bounds = array<i64: 1, 1, 1>, scalar_prefetch = 0 : i64, scratch_operands = 1 : i64, tpu.core_type = #tpu.core_type<tc>, window_params = [{transform_indices = @transform_0, window_bounds = array<i64: 128, 1152>}, {transform_indices = @transform_1, window_bounds = array<i64: 1152, 512>}, {transform_indices = @transform_2, window_bounds = array<i64: 1, 512>}, {transform_indices = @transform_3, window_bounds = array<i64: 128, 512>}]} {
    %c0_i32 = arith.constant 0 : i32
    %0 = arith.cmpi eq, %arg2, %c0_i32 : i32
    %1 = arith.extui %0 : i1 to i32
    %c0_i32_0 = arith.constant 0 : i32
    %2 = arith.cmpi ne, %1, %c0_i32_0 : i32
    scf.if %2 {
      %cst_10 = arith.constant 0.000000e+00 : f32
      %12 = vector.broadcast %cst_10 : f32 to vector<128x512xf32>
      %c0_11 = arith.constant 0 : index
      %c0_12 = arith.constant 0 : index
      %13 = vector.load %arg7[%c0_11, %c0_12] : memref<128x512xf32, #tpu.memory_space<vmem>>, vector<128x512xf32>
      tpu.vector_store %arg7[%c0_11, %c0_12], %12 {strides = array<i32>} : memref<128x512xf32, #tpu.memory_space<vmem>>, vector<128x512xf32>,
    } else {
    }
    %c0 = arith.constant 0 : index
    %c0_1 = arith.constant 0 : index
    %3 = vector.load %arg7[%c0, %c0_1] : memref<128x512xf32, #tpu.memory_space<vmem>>, vector<128x512xf32>
    %c0_2 = arith.constant 0 : index
    %c0_3 = arith.constant 0 : index
    %4 = vector.load %arg3[%c0_2, %c0_3] : memref<128x1152xbf16, #tpu.memory_space<vmem>>, vector<128x1152xbf16>
    %c0_4 = arith.constant 0 : index
    %c0_5 = arith.constant 0 : index
    %5 = vector.load %arg4[%c0_4, %c0_5] : memref<1152x512xbf16, #tpu.memory_space<vmem>>, vector<1152x512xbf16>
    %cst = arith.constant dense<0.000000e+00> : vector<128x512xf32>
    %6 = tpu.matmul %4, %5, %cst {dimension_numbers = #tpu.dot_dimension_numbers<[1], [0], [0], [1], [0, 0, 1, 1], [], []>} : vector<128x1152xbf16>, vector<1152x512xbf16>, vector<128x512xf32> -> vector<128x512xf32>
    %7 = arith.addf %3, %6 : vector<128x512xf32>
    %c0_6 = arith.constant 0 : index
    %c0_7 = arith.constant 0 : index
    %8 = vector.load %arg7[%c0_6, %c0_7] : memref<128x512xf32, #tpu.memory_space<vmem>>, vector<128x512xf32>
    tpu.vector_store %arg7[%c0_6, %c0_7], %7 {strides = array<i32>} : memref<128x512xf32, #tpu.memory_space<vmem>>, vector<128x512xf32>,
    %c0_i32_8 = arith.constant 0 : i32
    %9 = arith.cmpi eq, %arg2, %c0_i32_8 : i32
    %10 = arith.extui %9 : i1 to i32
    %c0_i32_9 = arith.constant 0 : i32
    %11 = arith.cmpi ne, %10, %c0_i32_9 : i32
    scf.if %11 {
      %c0_10 = arith.constant 0 : index
      %c0_11 = arith.constant 0 : index
      %12 = vector.load %arg7[%c0_10, %c0_11] : memref<128x512xf32, #tpu.memory_space<vmem>>, vector<128x512xf32>
      %c0_12 = arith.constant 0 : index
      %c0_13 = arith.constant 0 : index
      %13 = vector.load %arg5[%c0_12, %c0_13] : memref<1x512xf32, #tpu.memory_space<vmem>>, vector<1x512xf32>
      %14 = vector.broadcast %13 : vector<1x512xf32> to vector<128x512xf32>
      %15 = arith.addf %12, %14 : vector<128x512xf32>
      %cst_14 = arith.constant 0.000000e+00 : f32
      %16 = vector.broadcast %cst_14 : f32 to vector<128x512xf32>
      %17 = arith.maximumf %15, %16 : vector<128x512xf32>
      %18 = arith.truncf %17 : vector<128x512xf32> to vector<128x512xbf16>
      %c0_15 = arith.constant 0 : index
      %c0_16 = arith.constant 0 : index
      %19 = vector.load %arg6[%c0_15, %c0_16] : memref<128x512xbf16, #tpu.memory_space<vmem>>, vector<128x512xbf16>
      tpu.vector_store %arg6[%c0_15, %c0_16], %18 {strides = array<i32>} : memref<128x512xbf16, #tpu.memory_space<vmem>>, vector<128x512xbf16>,
    } else {
    }
    return
  }
  func.func @transform_0(%arg0: i32, %arg1: i32, %arg2: i32) -> (i32, i32) {
    %c0_i32 = arith.constant 0 : i32
    return %arg0, %arg2 : i32, i32
  }
  func.func @transform_1(%arg0: i32, %arg1: i32, %arg2: i32) -> (i32, i32) {
    %c0_i32 = arith.constant 0 : i32
    return %arg2, %arg1 : i32, i32
  }
  func.func @transform_2(%arg0: i32, %arg1: i32, %arg2: i32) -> (i32, i32) {
    %c0_i32 = arith.constant 0 : i32
    %c0_i32_0 = arith.constant 0 : i32
    return %c0_i32, %arg1 : i32, i32
  }
  func.func @transform_3(%arg0: i32, %arg1: i32, %arg2: i32) -> (i32, i32) {
    %c0_i32 = arith.constant 0 : i32
    return %arg0, %arg1 : i32, i32
  }
}

module attributes {stable_mosaic.version = 11 : i64} {
  func.func @_heads_kernel(%arg0: i32, %arg1: memref<2x128xbf16, #tpu.memory_space<vmem>>, %arg2: memref<128x2048xbf16, #tpu.memory_space<vmem>>, %arg3: memref<2048x256xbf16, #tpu.memory_space<vmem>>, %arg4: memref<1x256xf32, #tpu.memory_space<vmem>>, %arg5: memref<2x256xf32, #tpu.memory_space<vmem>>) attributes {dimension_semantics = [#tpu.dimension_semantics<arbitrary>], iteration_bounds = array<i64: 1>, scalar_prefetch = 0 : i64, scratch_operands = 0 : i64, tpu.core_type = #tpu.core_type<tc>, window_params = [{pipeline_mode = #tpu.pipeline_mode<synchronous>, transform_indices = @transform_0, window_bounds = array<i64: 2, 128>}, {pipeline_mode = #tpu.pipeline_mode<synchronous>, transform_indices = @transform_1, window_bounds = array<i64: 128, 2048>}, {pipeline_mode = #tpu.pipeline_mode<synchronous>, transform_indices = @transform_2, window_bounds = array<i64: 2048, 256>}, {pipeline_mode = #tpu.pipeline_mode<synchronous>, transform_indices = @transform_3, window_bounds = array<i64: 1, 256>}, {pipeline_mode = #tpu.pipeline_mode<synchronous>, transform_indices = @transform_4, window_bounds = array<i64: 2, 256>}]} {
    %c0 = arith.constant 0 : index
    %c0_0 = arith.constant 0 : index
    %0 = vector.load %arg1[%c0, %c0_0] : memref<2x128xbf16, #tpu.memory_space<vmem>>, vector<2x128xbf16>
    %c0_1 = arith.constant 0 : index
    %c0_2 = arith.constant 0 : index
    %1 = vector.load %arg2[%c0_1, %c0_2] : memref<128x2048xbf16, #tpu.memory_space<vmem>>, vector<128x2048xbf16>
    %cst = arith.constant dense<0.000000e+00> : vector<2x2048xf32>
    %2 = tpu.matmul %0, %1, %cst {dimension_numbers = #tpu.dot_dimension_numbers<[1], [0], [0], [1], [0, 0, 1, 1], [], []>} : vector<2x128xbf16>, vector<128x2048xbf16>, vector<2x2048xf32> -> vector<2x2048xf32>
    %3 = arith.truncf %2 : vector<2x2048xf32> to vector<2x2048xbf16>
    %c0_3 = arith.constant 0 : index
    %c0_4 = arith.constant 0 : index
    %4 = vector.load %arg3[%c0_3, %c0_4] : memref<2048x256xbf16, #tpu.memory_space<vmem>>, vector<2048x256xbf16>
    %cst_5 = arith.constant dense<0.000000e+00> : vector<2x256xf32>
    %5 = tpu.matmul %3, %4, %cst_5 {dimension_numbers = #tpu.dot_dimension_numbers<[1], [0], [0], [1], [0, 0, 1, 1], [], []>} : vector<2x2048xbf16>, vector<2048x256xbf16>, vector<2x256xf32> -> vector<2x256xf32>
    %c0_6 = arith.constant 0 : index
    %c0_7 = arith.constant 0 : index
    %6 = vector.load %arg4[%c0_6, %c0_7] : memref<1x256xf32, #tpu.memory_space<vmem>>, vector<1x256xf32>
    %7 = vector.broadcast %6 : vector<1x256xf32> to vector<2x256xf32>
    %8 = arith.addf %5, %7 : vector<2x256xf32>
    %c0_8 = arith.constant 0 : index
    %c0_9 = arith.constant 0 : index
    %9 = vector.load %arg5[%c0_8, %c0_9] : memref<2x256xf32, #tpu.memory_space<vmem>>, vector<2x256xf32>
    tpu.vector_store %arg5[%c0_8, %c0_9], %8 {strides = array<i32>} : memref<2x256xf32, #tpu.memory_space<vmem>>, vector<2x256xf32>,
    return
  }
  func.func @transform_0(%arg0: i32) -> (i32, i32) {
    %c0_i32 = arith.constant 0 : i32
    %c0_i32_0 = arith.constant 0 : i32
    %c0_i32_1 = arith.constant 0 : i32
    return %c0_i32, %c0_i32_0 : i32, i32
  }
  func.func @transform_1(%arg0: i32) -> (i32, i32) {
    %c0_i32 = arith.constant 0 : i32
    %c0_i32_0 = arith.constant 0 : i32
    %c0_i32_1 = arith.constant 0 : i32
    return %c0_i32, %c0_i32_0 : i32, i32
  }
  func.func @transform_2(%arg0: i32) -> (i32, i32) {
    %c0_i32 = arith.constant 0 : i32
    %c0_i32_0 = arith.constant 0 : i32
    %c0_i32_1 = arith.constant 0 : i32
    return %c0_i32, %c0_i32_0 : i32, i32
  }
  func.func @transform_3(%arg0: i32) -> (i32, i32) {
    %c0_i32 = arith.constant 0 : i32
    %c0_i32_0 = arith.constant 0 : i32
    %c0_i32_1 = arith.constant 0 : i32
    return %c0_i32, %c0_i32_0 : i32, i32
  }
  func.func @transform_4(%arg0: i32) -> (i32, i32) {
    %c0_i32 = arith.constant 0 : i32
    %c0_i32_0 = arith.constant 0 : i32
    %c0_i32_1 = arith.constant 0 : i32
    return %c0_i32, %c0_i32_0 : i32, i32
  }
}

</mosaic_0001>

<bundles_post_ra>
// kernel: inception_v3_forward.6
= control target key start
LH: loop header
LB: loop body
LE: loop exit
PB: predicated region body
PF: predicated region fallthrough
CT: control target
= control target key end

     0   :  { %8 = vsyncpa [#allocation4], 0  ;;  %s664_s12 = smov [#allocation3]   ;;  %s769_s0 = inlined_call_operand.vmem [shape: bf16[128,128], index: 0, kind: input, shape index: {}]   ;;  %s770_s1 = inlined_call_operand.vmem [shape: bf16[128,128], index: 1, kind: input, shape index: {}]   ;;  %s771_s2 = inlined_call_operand.hbm [shape: f32[1,128], index: 2, kind: input, shape index: {}]   ;;  %s772_s3 = inlined_call_operand.vmem [shape: bf16[128,128], index: 3, kind: output, shape index: {}]  }
   0x1   :  { %s19_s13 = sshll.u32 %s664_s12, 4  ;;  %s640_s16 = scalar_lea.hbm %s771_s2, 16  ;;  %s20_s13 = int_to_ptr.vmem [resolvable:$true] %s19_s13 }
   0x2   :  { %p641_p0 = scmp.ne.s32.totalorder %s771_s2, %s640_s16  ;;  %p644_p1 = scmp.lt.u32.totalorder %s640_s16, %s771_s2 }
   0x4   :  { %p646_p2 = pnand %p644_p1, %p641_p0 }
   0x6   :  { %649 = shalt.err (!%p646_p2)
}
   0x7   :  { %s650_s21 = scalar_lea.vmem %s20_s13, 16  ;;  %s654_s22 = scalar_lea.vmem %s20_s13, 32 }
   0x8   :  { %p651_p3 = scmp.ne.s32.totalorder %s20_s13, %s650_s21  ;;  %p655_p4 = scmp.lt.s32.totalorder %s20_s13, %s20_s13 }
   0x9   :  { %p656_p5 = scmp.lt.s32.totalorder %s654_s22, %s650_s21 }
   0xb   :  { %p657_p6 = por %p656_p5, %p655_p4 }
   0xd   :  { %p658_p7 = pnand %p657_p6, %p651_p3 }
   0xf   :  { %661 = shalt.err (!%p658_p7)
}
  0x10   :  { %22 = dma.hbm_to_vmem [thread:$0]  %s771_s2, 16, %s20_s13, [#allocation4]  }
  0x11   :  { %662 = dma.done.wait [#allocation4], 16  }
  0x12   :  { %663 = vsyncadd [#allocation4], 4294967280  ;;  %v624_v0 = vld [vmem:[%s770_s1] sm:$0xff]   ;;  %v625_v1 = vld [vmem:[%s770_s1 + $0x8] sm:$0xff]  }
  0x13   :  { %575 = vmatprep.subr.bf16.mxu0 %v624_v0  ;;  %607 = vmatprep.subr.bf16.mxu1 %v624_v0  ;;  %v626_v2 = vld [vmem:[%s770_s1 + $0x10] sm:$0xff]   ;;  %v627_v3 = vld [vmem:[%s770_s1 + $0x18] sm:$0xff]   ;;  %v632_v4 = vld [vmem:[%s769_s0] sm:$0xff]  }
  0x14   :  { %576 = vmatpush3.bf16.msra.mxu0 %v624_v0  ;;  %615 = vmatpush3.bf16.msra.mxu1 %v624_v0  ;;  %v633_v5 = vld [vmem:[%s769_s0 + $0x20] sm:$0xff]   ;;  %v629_v7 = vld [vmem:[%s770_s1 + $0x28] sm:$0xff]   ;;  %v630_v8 = vld [vmem:[%s770_s1 + $0x30] sm:$0xff]  }
  0x15   :  { %577 = vmatprep.subr.bf16.mxu0 %v625_v1  ;;  %608 = vmatprep.subr.bf16.mxu1 %v625_v1  ;;  %v628_v6 = vld [vmem:[%s770_s1 + $0x20] sm:$0xff]   ;;  %v631_v9 = vld [vmem:[%s770_s1 + $0x38] sm:$0xff]   ;;  %v634_v10 = vld [vmem:[%s769_s0 + $0x8] sm:$0xff]  }
  0x16   :  { %591 = vmatprep.mubr.bf16.mxu0 %v632_v4  ;;  %599 = vmatprep.mubr.bf16.mxu1 %v633_v5  ;;  %v635_v11 = vld [vmem:[%s769_s0 + $0x28] sm:$0xff]   ;;  %v636_v12 = vld [vmem:[%s769_s0 + $0x10] sm:$0xff]   ;;  %v638_v14 = vld [vmem:[%s769_s0 + $0x18] sm:$0xff]  }
  0x17   :  { %v637_v13 = vld [vmem:[%s769_s0 + $0x30] sm:$0xff]   ;;  %v639_v15 = vld [vmem:[%s769_s0 + $0x38] sm:$0xff]   ;;  %v479_v16 = vld [vmem:[#allocation3] ss:$0 sm:$0xff] }
  0x18   :  { %578 = vmatpush3.bf16.msra.mxu0 %v625_v1  ;;  %616 = vmatpush3.bf16.msra.mxu1 %v625_v1 }
  0x19   :  { %579 = vmatprep.subr.bf16.mxu0 %v626_v2  ;;  %609 = vmatprep.subr.bf16.mxu1 %v626_v2 }
  0x1c   :  { %580 = vmatpush3.bf16.msra.mxu0 %v626_v2  ;;  %617 = vmatpush3.bf16.msra.mxu1 %v626_v2 }
  0x1d   :  { %581 = vmatprep.subr.bf16.mxu0 %v627_v3  ;;  %610 = vmatprep.subr.bf16.mxu1 %v627_v3 }
  0x20   :  { %582 = vmatpush3.bf16.msra.mxu0 %v627_v3  ;;  %618 = vmatpush3.bf16.msra.mxu1 %v627_v3 }
  0x21   :  { %583 = vmatprep.subr.bf16.mxu0 %v628_v6  ;;  %611 = vmatprep.subr.bf16.mxu1 %v628_v6 }
  0x24   :  { %584 = vmatpush3.bf16.msra.mxu0 %v628_v6  ;;  %619 = vmatpush3.bf16.msra.mxu1 %v628_v6 }
  0x25   :  { %585 = vmatprep.subr.bf16.mxu0 %v629_v7  ;;  %612 = vmatprep.subr.bf16.mxu1 %v629_v7 }
  0x28   :  { %586 = vmatpush3.bf16.msra.mxu0 %v629_v7  ;;  %620 = vmatpush3.bf16.msra.mxu1 %v629_v7 }
  0x29   :  { %587 = vmatprep.subr.bf16.mxu0 %v630_v8  ;;  %613 = vmatprep.subr.bf16.mxu1 %v630_v8 }
  0x2c   :  { %588 = vmatpush3.bf16.msra.mxu0 %v630_v8  ;;  %621 = vmatpush3.bf16.msra.mxu1 %v630_v8 }
  0x2d   :  { %589 = vmatprep.subr.bf16.mxu0 %v631_v9  ;;  %614 = vmatprep.subr.bf16.mxu1 %v631_v9 }
  0x30   :  { %590 = vmatpush3.bf16.msra.mxu0 %v631_v9  ;;  %622 = vmatpush3.bf16.msra.mxu1 %v631_v9 }
  0x33   :  { %592 = vmatmul.mubr.bf16.vlgmr.msra.gmra.mrb[0].mxu0 %v634_v10  ;;  %600 = vmatmul.mubr.bf16.vlgmr.msra.gmra.mrb[0].mxu1 %v635_v11 }
  0x34   :  { %595 = vmatprep.mubr.bf16.mxu0 %v636_v12  ;;  %603 = vmatprep.mubr.bf16.mxu1 %v637_v13 }
  0x3b   :  { %596 = vmatmul.mubr.bf16.gmra.mrb[4].mxu0 %v638_v14  ;;  %604 = vmatmul.mubr.bf16.gmra.mrb[4].mxu1 %v639_v15 }
 0x106   :  { %v593_v17 = vpop.f32.mrb[0].mxu0  ;;  %v601_v18 = vpop.f32.mrb[0].mxu1 }
 0x107   :  { %v348_v19 = vadd.f32 %v593_v17, %v479_v16  ;;  %v356_v20 = vadd.f32 %v601_v18, %v479_v16  ;;  %v225_v21 = vpop.f32.mrb[1].mxu0  ;;  %v257_v22 = vpop.f32.mrb[1].mxu1 }
 0x108   :  { %v346_v23 = vadd.f32 %v479_v16, %v225_v21  ;;  %v354_v24 = vadd.f32 %v479_v16, %v257_v22  ;;  %v594_v25 = vpop.f32.mrb[2].mxu0  ;;  %v602_v26 = vpop.f32.mrb[2].mxu1 }
 0x109   :  { %v349_v27 = vadd.f32 %v594_v25, %v479_v16  ;;  %v357_v28 = vadd.f32 %v602_v26, %v479_v16  ;;  %v228_v29 = vpop.f32.mrb[3].mxu0  ;;  %v260_v30 = vpop.f32.mrb[3].mxu1  ;;  %v364_v33 = vmax.f32 %v348_v19, 0.0  ;;  %v372_v34 = vmax.f32 %v356_v20, 0.0 }
 0x10a   :  { %v347_v31 = vadd.f32 %v479_v16, %v228_v29  ;;  %v355_v32 = vadd.f32 %v479_v16, %v260_v30  ;;  %v362_v37 = vmax.f32 %v346_v23, 0.0  ;;  %v370_v38 = vmax.f32 %v354_v24, 0.0 }
 0x10b   :  { %v365_v35 = vmax.f32 %v349_v27, 0.0  ;;  %v373_v36 = vmax.f32 %v357_v28, 0.0 }
 0x10c   :  { %v363_v39 = vmax.f32 %v347_v31, 0.0  ;;  %v371_v40 = vmax.f32 %v355_v32, 0.0 }
 0x10d   :  { %v520_v41 = vpack.c.bf16 %v365_v35, %v364_v33  ;;  %v540_v42 = vpack.c.bf16 %v373_v36, %v372_v34 }
 0x10e   :  { %v515_v43 = vpack.c.bf16 %v363_v39, %v362_v37  ;;  %v535_v44 = vpack.c.bf16 %v371_v40, %v370_v38  ;;  %v597_v45 = vpop.f32.mrb[4].mxu0  ;;  %v605_v46 = vpop.f32.mrb[4].mxu1 }
 0x10f   :  { %552 = vst [vmem:[%s772_s3 + $0x8] sm:$0xff] %v520_v41   ;;  %556 = vst [vmem:[%s772_s3 + $0x28] sm:$0xff] %v540_v42   ;;  %v352_v47 = vadd.f32 %v597_v45, %v479_v16  ;;  %v360_v48 = vadd.f32 %v605_v46, %v479_v16  ;;  %v241_v49 = vpop.f32.mrb[5].mxu0  ;;  %v273_v50 = vpop.f32.mrb[5].mxu1 }
 0x110   :  { %516 = vst [vmem:[%s772_s3] sm:$0xff] %v515_v43   ;;  %555 = vst [vmem:[%s772_s3 + $0x20] sm:$0xff] %v535_v44   ;;  %v350_v51 = vadd.f32 %v479_v16, %v241_v49  ;;  %v358_v52 = vadd.f32 %v479_v16, %v273_v50  ;;  %v598_v53 = vpop.f32.mrb[6].mxu0  ;;  %v606_v54 = vpop.f32.mrb[6].mxu1 }
 0x111   :  { %v353_v55 = vadd.f32 %v598_v53, %v479_v16  ;;  %v361_v56 = vadd.f32 %v606_v54, %v479_v16  ;;  %v244_v57 = vpop.f32.mrb[7].mxu0  ;;  %v276_v58 = vpop.f32.mrb[7].mxu1  ;;  %v368_v61 = vmax.f32 %v352_v47, 0.0  ;;  %v376_v62 = vmax.f32 %v360_v48, 0.0 }
 0x112   :  { %v351_v59 = vadd.f32 %v479_v16, %v244_v57  ;;  %v359_v60 = vadd.f32 %v479_v16, %v276_v58  ;;  %v366_v1 = vmax.f32 %v350_v51, 0.0  ;;  %v374_v2 = vmax.f32 %v358_v52, 0.0 }
 0x113   :  { %v369_v63 = vmax.f32 %v353_v55, 0.0  ;;  %v377_v0 = vmax.f32 %v361_v56, 0.0 }
 0x114   :  { %v367_v3 = vmax.f32 %v351_v59, 0.0  ;;  %v375_v4 = vmax.f32 %v359_v60, 0.0 }
 0x115   :  { %v530_v5 = vpack.c.bf16 %v369_v63, %v368_v61  ;;  %v550_v6 = vpack.c.bf16 %v377_v0, %v376_v62 }
 0x116   :  { %v525_v7 = vpack.c.bf16 %v367_v3, %v366_v1  ;;  %v545_v8 = vpack.c.bf16 %v375_v4, %v374_v2 }
 0x117   :  { %554 = vst [vmem:[%s772_s3 + $0x18] sm:$0xff] %v530_v5   ;;  %558 = vst [vmem:[%s772_s3 + $0x38] sm:$0xff] %v550_v6  }
 0x118   :  { %553 = vst [vmem:[%s772_s3 + $0x10] sm:$0xff] %v525_v7   ;;  %557 = vst [vmem:[%s772_s3 + $0x30] sm:$0xff] %v545_v8  }
 0x119   :  { %462 = vsyncpa [#allocation4], 1 }

// kernel: inception_v3_forward.7
= control target key start
LH: loop header
LB: loop body
LE: loop exit
PB: predicated region body
PF: predicated region fallthrough
CT: control target
= control target key end

     0   :  { %s3032_s1 = inlined_call_operand.vmem [shape: bf16[1152,128], index: 1, kind: input, shape index: {}]   ;;  %s3033_s0 = inlined_call_operand.vmem [shape: bf16[128,1152], index: 0, kind: input, shape index: {}]   ;;  %s3034_s2 = inlined_call_operand.vmem [shape: f32[1,128], index: 2, kind: input, shape index: {}]   ;;  %s3035_s3 = inlined_call_operand.vmem [shape: bf16[128,128], index: 3, kind: output, shape index: {}]  }
   0x1   :  { %v2278_v0 = vld [vmem:[%s3032_s1 + $0x40] sm:$0xff]   ;;  %v2282_v4 = vld [vmem:[%s3032_s1 + $0x48] sm:$0xff]   ;;  %v2286_v8 = vld [vmem:[%s3032_s1 + $0x50] sm:$0xff]  }
   0x2   :  { %v2279_v1 = vld [vmem:[%s3032_s1 + $0xc0] sm:$0xff]   ;;  %1958 = vmatprep.subr.bf16.mxu0 %v2278_v0  ;;  %v2283_v5 = vld [vmem:[%s3032_s1 + $0xc8] sm:$0xff]   ;;  %v2287_v9 = vld [vmem:[%s3032_s1 + $0xd0] sm:$0xff]  }
   0x3   :  { %v2280_v2 = vld [vmem:[%s3032_s1] sm:$0xff]   ;;  %2022 = vmatprep.subr.bf16.mxu1 %v2279_v1  ;;  %v2284_v6 = vld [vmem:[%s3032_s1 + $0x8] sm:$0xff]   ;;  %v2288_v10 = vld [vmem:[%s3032_s1 + $0x10] sm:$0xff]  }
   0x4   :  { %v2281_v3 = vld [vmem:[%s3032_s1 + $0x80] sm:$0xff]   ;;  %1959 = vmatpush3.bf16.msra.mxu0 %v2280_v2  ;;  %v2285_v7 = vld [vmem:[%s3032_s1 + $0x88] sm:$0xff]   ;;  %v2289_v11 = vld [vmem:[%s3032_s1 + $0x90] sm:$0xff]  }
   0x5   :  { %2023 = vmatpush3.bf16.msra.mxu1 %v2281_v3  ;;  %1960 = vmatprep.subr.bf16.mxu0 %v2282_v4  ;;  %v2290_v12 = vld [vmem:[%s3032_s1 + $0x58] sm:$0xff]   ;;  %v2294_v16 = vld [vmem:[%s3032_s1 + $0x60] sm:$0xff]   ;;  %v2298_v20 = vld [vmem:[%s3032_s1 + $0x68] sm:$0xff]  }
   0x6   :  { %2024 = vmatprep.subr.bf16.mxu1 %v2283_v5  ;;  %v2291_v13 = vld [vmem:[%s3032_s1 + $0xd8] sm:$0xff]   ;;  %v2295_v17 = vld [vmem:[%s3032_s1 + $0xe0] sm:$0xff]   ;;  %v2299_v21 = vld [vmem:[%s3032_s1 + $0xe8] sm:$0xff]  }
   0x7   :  { %v2292_v14 = vld [vmem:[%s3032_s1 + $0x18] sm:$0xff]   ;;  %v2296_v18 = vld [vmem:[%s3032_s1 + $0x20] sm:$0xff]   ;;  %v2300_v22 = vld [vmem:[%s3032_s1 + $0x28] sm:$0xff]  }
   0x8   :  { %1961 = vmatpush3.bf16.msra.mxu0 %v2284_v6  ;;  %v2293_v15 = vld [vmem:[%s3032_s1 + $0x98] sm:$0xff]   ;;  %v2297_v19 = vld [vmem:[%s3032_s1 + $0xa0] sm:$0xff]   ;;  %v2301_v23 = vld [vmem:[%s3032_s1 + $0xa8] sm:$0xff]  }
   0x9   :  { %2025 = vmatpush3.bf16.msra.mxu1 %v2285_v7  ;;  %1962 = vmatprep.subr.bf16.mxu0 %v2286_v8  ;;  %v2302_v24 = vld [vmem:[%s3032_s1 + $0x70] sm:$0xff]   ;;  %v2306_v28 = vld [vmem:[%s3032_s1 + $0x78] sm:$0xff]   ;;  %v2310_v32 = vld [vmem:[%s3033_s0] ss:$36 sps:$4 sm:$0xff]  }
   0xa   :  { %2026 = vmatprep.subr.bf16.mxu1 %v2287_v9  ;;  %v2303_v25 = vld [vmem:[%s3032_s1 + $0xf0] sm:$0xff]   ;;  %v2307_v29 = vld [vmem:[%s3032_s1 + $0xf8] sm:$0xff]   ;;  %v2312_v33 = vld [vmem:[%s3033_s0 + $0x4] ss:$36 sps:$4 sm:$0xff]  }
   0xb   :  { %v2304_v26 = vld [vmem:[%s3032_s1 + $0x30] sm:$0xff]   ;;  %v2308_v30 = vld [vmem:[%s3032_s1 + $0x38] sm:$0xff]   ;;  %v2313_v34 = vld [vmem:[%s3033_s0 + $0x8] ss:$36 sps:$4 sm:$0xff]   ;;  %1107 = vmatprep.mubr.bf16.mxu0 %v2312_v33 }
   0xc   :  { %1963 = vmatpush3.bf16.msra.mxu0 %v2288_v10  ;;  %v2305_v27 = vld [vmem:[%s3032_s1 + $0xb0] sm:$0xff]   ;;  %v2309_v31 = vld [vmem:[%s3032_s1 + $0xb8] sm:$0xff]   ;;  %v2316_v36 = vld [vmem:[%s3032_s1 + $0x140] sm:$0xff]  }
   0xd   :  { %2027 = vmatpush3.bf16.msra.mxu1 %v2289_v11  ;;  %1964 = vmatprep.subr.bf16.mxu0 %v2290_v12  ;;  %v2315_v35 = vld [vmem:[%s3033_s0 + $0xc] ss:$36 sps:$4 sm:$0xff]   ;;  %v2317_v37 = vld [vmem:[%s3032_s1 + $0x1c0] sm:$0xff]   ;;  %v2322_v41 = vld [vmem:[%s3033_s0 + $0x54] ss:$36 sps:$4 sm:$0xff]  }
   0xe   :  { %2028 = vmatprep.subr.bf16.mxu1 %v2291_v13  ;;  %1204 = vmatprep.mubr.bf16.mxu1 %v2315_v35  ;;  %v2318_v38 = vld [vmem:[%s3032_s1 + $0x100] sm:$0xff]   ;;  %v2320_v40 = vld [vmem:[%s3033_s0 + $0x4c] ss:$36 sps:$4 sm:$0xff]   ;;  %v2330_v48 = vld [vmem:[%s3033_s0 + $0x94] ss:$36 sps:$4 sm:$0xff]  }
   0xf   :  { %v2319_v39 = vld [vmem:[%s3032_s1 + $0x180] sm:$0xff]   ;;  %v2324_v42 = vld [vmem:[%s3033_s0 + $0x48] ss:$36 sps:$4 sm:$0xff]   ;;  %v2325_v43 = vld [vmem:[%s3033_s0 + $0x50] ss:$36 sps:$4 sm:$0xff]  }
  0x10   :  { %1965 = vmatpush3.bf16.msra.mxu0 %v2292_v14  ;;  %v2326_v44 = vld [vmem:[%s3032_s1 + $0x148] sm:$0xff]   ;;  %v2332_v49 = vld [vmem:[%s3033_s0 + $0x9c] ss:$36 sps:$4 sm:$0xff]   ;;  %v2334_v50 = vld [vmem:[%s3033_s0 + $0x90] ss:$36 sps:$4 sm:$0xff]  }
  0x11   :  { %2029 = vmatpush3.bf16.msra.mxu1 %v2293_v15  ;;  %1966 = vmatprep.subr.bf16.mxu0 %v2294_v16  ;;  %v2327_v45 = vld [vmem:[%s3032_s1 + $0x1c8] sm:$0xff]   ;;  %v2335_v51 = vld [vmem:[%s3033_s0 + $0x98] ss:$36 sps:$4 sm:$0xff]   ;;  %v2336_v52 = vld [vmem:[%s3032_s1 + $0x150] sm:$0xff]  }
  0x12   :  { %2030 = vmatprep.subr.bf16.mxu1 %v2295_v17  ;;  %v2328_v46 = vld [vmem:[%s3032_s1 + $0x108] sm:$0xff]   ;;  %v2337_v53 = vld [vmem:[%s3032_s1 + $0x1d0] sm:$0xff]   ;;  %v2340_v56 = vld [vmem:[%s3033_s0 + $0xdc] ss:$36 sps:$4 sm:$0xff]  }
  0x13   :  { %v2329_v47 = vld [vmem:[%s3032_s1 + $0x188] sm:$0xff]   ;;  %v2338_v54 = vld [vmem:[%s3032_s1 + $0x110] sm:$0xff]   ;;  %v2344_v58 = vld [vmem:[%s3033_s0 + $0xd8] ss:$36 sps:$4 sm:$0xff]  }
  0x14   :  { %1967 = vmatpush3.bf16.msra.mxu0 %v2296_v18  ;;  %v2339_v55 = vld [vmem:[%s3032_s1 + $0x190] sm:$0xff]   ;;  %v2342_v57 = vld [vmem:[%s3033_s0 + $0xe4] ss:$36 sps:$4 sm:$0xff]   ;;  %v2346_v60 = vld [vmem:[%s3032_s1 + $0x158] sm:$0xff]  }
  0x15   :  { %2031 = vmatpush3.bf16.msra.mxu1 %v2297_v19  ;;  %1968 = vmatprep.subr.bf16.mxu0 %v2298_v20  ;;  %v2345_v59 = vld [vmem:[%s3033_s0 + $0xe0] ss:$36 sps:$4 sm:$0xff]   ;;  %v2347_v61 = vld [vmem:[%s3032_s1 + $0x1d8] sm:$0xff]   ;;  %v2352_v1 = vld [vmem:[%s3033_s0 + $0x12c] ss:$36 sps:$4 sm:$0xff]  }
  0x16   :  { %2032 = vmatprep.subr.bf16.mxu1 %v2299_v21  ;;  %v2348_v62 = vld [vmem:[%s3032_s1 + $0x118] sm:$0xff]   ;;  %v2350_v0 = vld [vmem:[%s3033_s0 + $0x124] ss:$36 sps:$4 sm:$0xff]   ;;  %v2360_v8 = vld [vmem:[%s3033_s0 + $0x16c] ss:$36 sps:$4 sm:$0xff]  }
  0x17   :  { %v2349_v63 = vld [vmem:[%s3032_s1 + $0x198] sm:$0xff]   ;;  %v2354_v2 = vld [vmem:[%s3033_s0 + $0x120] ss:$36 sps:$4 sm:$0xff]   ;;  %v2355_v4 = vld [vmem:[%s3033_s0 + $0x128] ss:$36 sps:$4 sm:$0xff]  }
  0x18   :  { %1969 = vmatpush3.bf16.msra.mxu0 %v2300_v22  ;;  %v2356_v3 = vld [vmem:[%s3032_s1 + $0x160] sm:$0xff]   ;;  %v2362_v9 = vld [vmem:[%s3033_s0 + $0x174] ss:$36 sps:$4 sm:$0xff]   ;;  %v2366_v10 = vld [vmem:[%s3032_s1 + $0x168] sm:$0xff]  }
  0x19   :  { %2033 = vmatpush3.bf16.msra.mxu1 %v2301_v23  ;;  %1970 = vmatprep.subr.bf16.mxu0 %v2302_v24  ;;  %v2357_v5 = vld [vmem:[%s3032_s1 + $0x1e0] sm:$0xff]   ;;  %v2367_v11 = vld [vmem:[%s3032_s1 + $0x1e8] sm:$0xff]   ;;  %v2365_v15 = vld [vmem:[%s3033_s0 + $0x170] ss:$36 sps:$4 sm:$0xff]  }
  0x1a   :  { %2034 = vmatprep.subr.bf16.mxu1 %v2303_v25  ;;  %v2358_v6 = vld [vmem:[%s3032_s1 + $0x120] sm:$0xff]   ;;  %v2364_v12 = vld [vmem:[%s3033_s0 + $0x168] ss:$36 sps:$4 sm:$0xff]   ;;  %v2370_v16 = vld [vmem:[%s3033_s0 + $0x1b4] ss:$36 sps:$4 sm:$0xff]  }
  0x1b   :  { %v2359_v7 = vld [vmem:[%s3032_s1 + $0x1a0] sm:$0xff]   ;;  %v2368_v13 = vld [vmem:[%s3032_s1 + $0x128] sm:$0xff]   ;;  %v2376_v18 = vld [vmem:[%s3032_s1 + $0x170] sm:$0xff]  }
  0x1c   :  { %1971 = vmatpush3.bf16.msra.mxu0 %v2304_v26  ;;  %v2369_v14 = vld [vmem:[%s3032_s1 + $0x1a8] sm:$0xff]   ;;  %v2372_v17 = vld [vmem:[%s3033_s0 + $0x1bc] ss:$36 sps:$4 sm:$0xff]   ;;  %v2377_v19 = vld [vmem:[%s3032_s1 + $0x1f0] sm:$0xff]  }
  0x1d   :  { %2035 = vmatpush3.bf16.msra.mxu1 %v2305_v27  ;;  %1972 = vmatprep.subr.bf16.mxu0 %v2306_v28  ;;  %v2378_v20 = vld [vmem:[%s3032_s1 + $0x130] sm:$0xff]   ;;  %v2375_v23 = vld [vmem:[%s3033_s0 + $0x1b8] ss:$36 sps:$4 sm:$0xff]   ;;  %v2382_v25 = vld [vmem:[%s3033_s0 + $0x204] ss:$36 sps:$4 sm:$0xff]  }
  0x1e   :  { %2036 = vmatprep.subr.bf16.mxu1 %v2307_v29  ;;  %v2379_v21 = vld [vmem:[%s3032_s1 + $0x1b0] sm:$0xff]   ;;  %v2380_v24 = vld [vmem:[%s3033_s0 + $0x1fc] ss:$36 sps:$4 sm:$0xff]  }
  0x1f   :  { %v2374_v22 = vld [vmem:[%s3033_s0 + $0x1b0] ss:$36 sps:$4 sm:$0xff]   ;;  %v2386_v26 = vld [vmem:[%s3032_s1 + $0x178] sm:$0xff]  }
  0x20   :  { %1973 = vmatpush3.bf16.msra.mxu0 %v2308_v30  ;;  %v2387_v27 = vld [vmem:[%s3032_s1 + $0x1f8] sm:$0xff]   ;;  %v2390_v35 = vld [vmem:[%s3033_s0 + $0x10] ss:$36 sps:$4 sm:$0xff]  }
  0x21   :  { %2037 = vmatpush3.bf16.msra.mxu1 %v2309_v31  ;;  %2086 = vmatprep.subr.bf16.mxu0 %v2316_v36  ;;  %v2388_v28 = vld [vmem:[%s3032_s1 + $0x138] sm:$0xff]   ;;  %v2385_v31 = vld [vmem:[%s3033_s0 + $0x200] ss:$36 sps:$4 sm:$0xff]  }
  0x22   :  { %2150 = vmatprep.subr.bf16.mxu1 %v2317_v37  ;;  %v2389_v29 = vld [vmem:[%s3032_s1 + $0x1b8] sm:$0xff]  }
  0x23   :  { %1108 = vmatmul.mubr.bf16.vlgmr.msra.gmra.mrb[0].mxu0 %v2310_v32  ;;  %v2384_v30 = vld [vmem:[%s3033_s0 + $0x1f8] ss:$36 sps:$4 sm:$0xff]   ;;  %v2396_v32 = vld [vmem:[%s3032_s1 + $0x200] sm:$0xff]  }
  0x24   :  { %1205 = vmatmul.mubr.bf16.vlgmr.msra.gmra.mrb[0].mxu1 %v2313_v34  ;;  %2087 = vmatpush3.bf16.msra.mxu0 %v2318_v38  ;;  %v2392_v33 = vld [vmem:[%s3033_s0 + $0x14] ss:$36 sps:$4 sm:$0xff]   ;;  %v2395_v34 = vld [vmem:[%s3033_s0 + $0x1c] ss:$36 sps:$4 sm:$0xff]   ;;  %v2399_v38 = vld [vmem:[%s3033_s0 + $0x64] ss:$36 sps:$4 sm:$0xff]  }
  0x25   :  { %2151 = vmatpush3.bf16.msra.mxu1 %v2319_v39  ;;  %1115 = vmatprep.mubr.bf16.mxu0 %v2320_v40  ;;  %v2393_v36 = vld [vmem:[%s3033_s0 + $0x18] ss:$36 sps:$4 sm:$0xff]   ;;  %v2403_v39 = vld [vmem:[%s3032_s1 + $0x208] sm:$0xff]   ;;  %v2410_v40 = vld [vmem:[%s3032_s1 + $0x210] sm:$0xff]  }
  0x26   :  { %1212 = vmatprep.mubr.bf16.mxu1 %v2322_v41  ;;  %2088 = vmatprep.subr.bf16.mxu0 %v2326_v44  ;;  %v2397_v37 = vld [vmem:[%s3033_s0 + $0x5c] ss:$36 sps:$4 sm:$0xff]   ;;  %v2406_v44 = vld [vmem:[%s3033_s0 + $0xac] ss:$36 sps:$4 sm:$0xff]  }
  0x27   :  { %2152 = vmatprep.subr.bf16.mxu1 %v2327_v45  ;;  %v2401_v41 = vld [vmem:[%s3033_s0 + $0x58] ss:$36 sps:$4 sm:$0xff]  }
  0x28   :  { %2089 = vmatpush3.bf16.msra.mxu0 %v2328_v46  ;;  %v2417_v45 = vld [vmem:[%s3032_s1 + $0x218] sm:$0xff]   ;;  %v2424_v46 = vld [vmem:[%s3032_s1 + $0x220] sm:$0xff]  }
  0x29   :  { %2153 = vmatpush3.bf16.msra.mxu1 %v2329_v47  ;;  %2090 = vmatprep.subr.bf16.mxu0 %v2336_v52  ;;  %v2408_v47 = vld [vmem:[%s3033_s0 + $0xa0] ss:$36 sps:$4 sm:$0xff]   ;;  %v2415_v52 = vld [vmem:[%s3033_s0 + $0xe8] ss:$36 sps:$4 sm:$0xff]  }
  0x2a   :  { %2154 = vmatprep.subr.bf16.mxu1 %v2337_v53  ;;  %v2438_v53 = vld [vmem:[%s3032_s1 + $0x230] sm:$0xff]  }
  0x2b   :  { %1116 = vmatmul.mubr.bf16.gmra.mrb[4].mxu0 %v2324_v42  ;;  %v2402_v42 = vld [vmem:[%s3033_s0 + $0x60] ss:$36 sps:$4 sm:$0xff]  }
  0x2c   :  { %1213 = vmatmul.mubr.bf16.gmra.mrb[4].mxu1 %v2325_v43  ;;  %1123 = vmatprep.mubr.bf16.mxu0 %v2330_v48  ;;  %v2404_v43 = vld [vmem:[%s3033_s0 + $0xa4] ss:$36 sps:$4 sm:$0xff]  }
  0x2d   :  { %1220 = vmatprep.mubr.bf16.mxu1 %v2332_v49  ;;  %2091 = vmatpush3.bf16.msra.mxu0 %v2338_v54  ;;  %v2409_v48 = vld [vmem:[%s3033_s0 + $0xa8] ss:$36 sps:$4 sm:$0xff]   ;;  %v2416_v54 = vld [vmem:[%s3033_s0 + $0xf0] ss:$36 sps:$4 sm:$0xff]  }
  0x2e   :  { %2155 = vmatpush3.bf16.msra.mxu1 %v2339_v55  ;;  %2092 = vmatprep.subr.bf16.mxu0 %v2346_v60  ;;  %v2411_v49 = vld [vmem:[%s3033_s0 + $0xec] ss:$36 sps:$4 sm:$0xff]   ;;  %v2418_v55 = vld [vmem:[%s3033_s0 + $0x134] ss:$36 sps:$4 sm:$0xff]   ;;  %v2425_v60 = vld [vmem:[%s3033_s0 + $0x17c] ss:$36 sps:$4 sm:$0xff]  }
  0x2f   :  { %2156 = vmatprep.subr.bf16.mxu1 %v2347_v61  ;;  %v2427_v61 = vld [vmem:[%s3033_s0 + $0x184] ss:$36 sps:$4 sm:$0xff]  }
  0x31   :  { %2093 = vmatpush3.bf16.msra.mxu0 %v2348_v62  ;;  %v2429_v62 = vld [vmem:[%s3033_s0 + $0x178] ss:$36 sps:$4 sm:$0xff]  }
  0x32   :  { %2157 = vmatpush3.bf16.msra.mxu1 %v2349_v63  ;;  %2094 = vmatprep.subr.bf16.mxu0 %v2356_v3  ;;  %v2430_v63 = vld [vmem:[%s3033_s0 + $0x180] ss:$36 sps:$4 sm:$0xff]   ;;  %v2437_v3 = vld [vmem:[%s3033_s0 + $0x1c8] ss:$36 sps:$4 sm:$0xff]  }
  0x33   :  { %1124 = vmatmul.mubr.bf16.gmra.mrb[8].mxu0 %v2334_v50  ;;  %2158 = vmatprep.subr.bf16.mxu1 %v2357_v5  ;;  %v2413_v50 = vld [vmem:[%s3033_s0 + $0xf4] ss:$36 sps:$4 sm:$0xff]  }
  0x34   :  { %1221 = vmatmul.mubr.bf16.gmra.mrb[8].mxu1 %v2335_v51  ;;  %1131 = vmatprep.mubr.bf16.mxu0 %v2340_v56  ;;  %v2431_v51 = vld [vmem:[%s3032_s1 + $0x228] sm:$0xff]   ;;  %v2420_v56 = vld [vmem:[%s3033_s0 + $0x13c] ss:$36 sps:$4 sm:$0xff]   ;;  %v2441_v5 = vld [vmem:[%s3033_s0 + $0x214] ss:$36 sps:$4 sm:$0xff]  }
  0x35   :  { %1228 = vmatprep.mubr.bf16.mxu1 %v2342_v57  ;;  %2095 = vmatpush3.bf16.msra.mxu0 %v2358_v6  ;;  %v2445_v57 = vld [vmem:[%s3032_s1 + $0x238] sm:$0xff]   ;;  %v2443_v6 = vld [vmem:[%s3033_s0 + $0x208] ss:$36 sps:$4 sm:$0xff]  }
  0x36   :  { %2159 = vmatpush3.bf16.msra.mxu1 %v2359_v7  ;;  %2096 = vmatprep.subr.bf16.mxu0 %v2366_v10  ;;  %v2444_v7 = vld [vmem:[%s3033_s0 + $0x210] ss:$36 sps:$4 sm:$0xff]   ;;  %v2448_v10 = vld [vmem:[%s3033_s0 + $0x68] ss:$36 sps:$4 sm:$0xff]  }
  0x37   :  { %2160 = vmatprep.subr.bf16.mxu1 %v2367_v11  ;;  %v2449_v11 = vld [vmem:[%s3033_s0 + $0x188] ss:$36 sps:$4 sm:$0xff]  }
  0x39   :  { %2097 = vmatpush3.bf16.msra.mxu0 %v2368_v13  ;;  %v2451_v13 = vld [vmem:[%s3033_s0 + $0x1d0] ss:$36 sps:$4 sm:$0xff]  }
  0x3a   :  { %2161 = vmatpush3.bf16.msra.mxu1 %v2369_v14  ;;  %2098 = vmatprep.subr.bf16.mxu0 %v2376_v18  ;;  %v2452_v14 = vld [vmem:[%s3033_s0 + $0xf8] ss:$36 sps:$4 sm:$0xff]  }
  0x3b   :  { %1132 = vmatmul.mubr.bf16.gmra.mrb[12].mxu0 %v2344_v58  ;;  %2162 = vmatprep.subr.bf16.mxu1 %v2377_v19  ;;  %v2422_v58 = vld [vmem:[%s3033_s0 + $0x130] ss:$36 sps:$4 sm:$0xff]  }
  0x3c   :  { %1229 = vmatmul.mubr.bf16.gmra.mrb[12].mxu1 %v2345_v59  ;;  %1139 = vmatprep.mubr.bf16.mxu0 %v2350_v0  ;;  %v2423_v59 = vld [vmem:[%s3033_s0 + $0x138] ss:$36 sps:$4 sm:$0xff]   ;;  %v2432_v0 = vld [vmem:[%s3033_s0 + $0x1c4] ss:$36 sps:$4 sm:$0xff]  }
  0x3d   :  { %1236 = vmatprep.mubr.bf16.mxu1 %v2352_v1  ;;  %2099 = vmatpush3.bf16.msra.mxu0 %v2378_v20  ;;  %v2434_v1 = vld [vmem:[%s3033_s0 + $0x1cc] ss:$36 sps:$4 sm:$0xff]  }
  0x3e   :  { %2163 = vmatpush3.bf16.msra.mxu1 %v2379_v21  ;;  %2100 = vmatprep.subr.bf16.mxu0 %v2386_v26 }
  0x3f   :  { %2164 = vmatprep.subr.bf16.mxu1 %v2387_v27 }
  0x41   :  { %2101 = vmatpush3.bf16.msra.mxu0 %v2388_v28 }
  0x42   :  { %2165 = vmatpush3.bf16.msra.mxu1 %v2389_v29  ;;  %2230 = vmatprep.subr.bf16.mxu0 %v2396_v32 }
  0x43   :  { %1140 = vmatmul.mubr.bf16.gmra.mrb[16].mxu0 %v2354_v2  ;;  %2262 = vmatprep.subr.bf16.mxu1 %v2396_v32  ;;  %v2436_v2 = vld [vmem:[%s3033_s0 + $0x1c0] ss:$36 sps:$4 sm:$0xff]  }
  0x44   :  { %1237 = vmatmul.mubr.bf16.gmra.mrb[16].mxu1 %v2355_v4  ;;  %1147 = vmatprep.mubr.bf16.mxu0 %v2360_v8  ;;  %v2439_v4 = vld [vmem:[%s3033_s0 + $0x20c] ss:$36 sps:$4 sm:$0xff]   ;;  %v2446_v8 = vld [vmem:[%s3033_s0 + $0x20] ss:$36 sps:$4 sm:$0xff]  }
  0x45   :  { %1244 = vmatprep.mubr.bf16.mxu1 %v2362_v9  ;;  %v2447_v9 = vld [vmem:[%s3033_s0 + $0x140] ss:$36 sps:$4 sm:$0xff]  }
  0x4b   :  { %1148 = vmatmul.mubr.bf16.gmra.mrb[20].mxu0 %v2364_v12  ;;  %v2450_v12 = vld [vmem:[%s3033_s0 + $0xb0] ss:$36 sps:$4 sm:$0xff]  }
  0x4c   :  { %1245 = vmatmul.mubr.bf16.gmra.mrb[20].mxu1 %v2365_v15  ;;  %1155 = vmatprep.mubr.bf16.mxu0 %v2370_v16  ;;  %v2453_v15 = vld [vmem:[%s3033_s0 + $0x218] ss:$36 sps:$4 sm:$0xff]  }
  0x4d   :  { %1252 = vmatprep.mubr.bf16.mxu1 %v2372_v17 }
  0x53   :  { %1156 = vmatmul.mubr.bf16.gmra.mrb[24].mxu0 %v2374_v22 }
  0x54   :  { %1253 = vmatmul.mubr.bf16.gmra.mrb[24].mxu1 %v2375_v23  ;;  %1163 = vmatprep.mubr.bf16.mxu0 %v2380_v24 }
  0x55   :  { %1260 = vmatprep.mubr.bf16.mxu1 %v2382_v25 }
  0x5b   :  { %1164 = vmatmul.mubr.bf16.gmra.mrb[28].mxu0 %v2384_v30 }
  0x5c   :  { %1261 = vmatmul.mubr.bf16.gmra.mrb[28].mxu1 %v2385_v31  ;;  %1301 = vmatprep.mubr.bf16.mxu0 %v2392_v33 }
  0x5d   :  { %1398 = vmatprep.mubr.bf16.mxu1 %v2395_v34 }
  0x63   :  { %1302 = vmatmul.mubr.bf16.vlgmr.msra.gmra.mrb[32].mxu0 %v2390_v35 }
  0x64   :  { %1399 = vmatmul.mubr.bf16.vlgmr.msra.gmra.mrb[32].mxu1 %v2393_v36  ;;  %2231 = vmatpush3.bf16.msra.mxu0 %v2396_v32 }
  0x65   :  { %2270 = vmatpush3.bf16.msra.mxu1 %v2396_v32  ;;  %1309 = vmatprep.mubr.bf16.mxu0 %v2397_v37 }
  0x66   :  { %1406 = vmatprep.mubr.bf16.mxu1 %v2399_v38  ;;  %2232 = vmatprep.subr.bf16.mxu0 %v2403_v39 }
  0x67   :  { %2263 = vmatprep.subr.bf16.mxu1 %v2403_v39 }
  0x68   :  { %2233 = vmatpush3.bf16.msra.mxu0 %v2403_v39 }
  0x69   :  { %2271 = vmatpush3.bf16.msra.mxu1 %v2403_v39  ;;  %2234 = vmatprep.subr.bf16.mxu0 %v2410_v40 }
  0x6a   :  { %2264 = vmatprep.subr.bf16.mxu1 %v2410_v40 }
  0x6b   :  { %1310 = vmatmul.mubr.bf16.gmra.mrb[36].mxu0 %v2401_v41 }
  0x6c   :  { %1407 = vmatmul.mubr.bf16.gmra.mrb[36].mxu1 %v2402_v42  ;;  %1317 = vmatprep.mubr.bf16.mxu0 %v2404_v43 }
  0x6d   :  { %1414 = vmatprep.mubr.bf16.mxu1 %v2406_v44  ;;  %2235 = vmatpush3.bf16.msra.mxu0 %v2410_v40 }
  0x6e   :  { %2272 = vmatpush3.bf16.msra.mxu1 %v2410_v40  ;;  %2236 = vmatprep.subr.bf16.mxu0 %v2417_v45 }
  0x6f   :  { %2265 = vmatprep.subr.bf16.mxu1 %v2417_v45 }
  0x71   :  { %2237 = vmatpush3.bf16.msra.mxu0 %v2417_v45 }
  0x72   :  { %2273 = vmatpush3.bf16.msra.mxu1 %v2417_v45  ;;  %2238 = vmatprep.subr.bf16.mxu0 %v2424_v46 }
  0x73   :  { %1318 = vmatmul.mubr.bf16.gmra.mrb[40].mxu0 %v2408_v47  ;;  %2266 = vmatprep.subr.bf16.mxu1 %v2424_v46 }
  0x74   :  { %1415 = vmatmul.mubr.bf16.gmra.mrb[40].mxu1 %v2409_v48  ;;  %1325 = vmatprep.mubr.bf16.mxu0 %v2411_v49 }
  0x75   :  { %1422 = vmatprep.mubr.bf16.mxu1 %v2413_v50  ;;  %2239 = vmatpush3.bf16.msra.mxu0 %v2424_v46 }
  0x76   :  { %2274 = vmatpush3.bf16.msra.mxu1 %v2424_v46  ;;  %2240 = vmatprep.subr.bf16.mxu0 %v2431_v51 }
  0x77   :  { %2267 = vmatprep.subr.bf16.mxu1 %v2431_v51 }
  0x79   :  { %2241 = vmatpush3.bf16.msra.mxu0 %v2431_v51 }
  0x7a   :  { %2275 = vmatpush3.bf16.msra.mxu1 %v2431_v51  ;;  %2242 = vmatprep.subr.bf16.mxu0 %v2438_v53 }
  0x7b   :  { %1326 = vmatmul.mubr.bf16.gmra.mrb[44].mxu0 %v2415_v52  ;;  %2268 = vmatprep.subr.bf16.mxu1 %v2438_v53 }
  0x7c   :  { %1423 = vmatmul.mubr.bf16.gmra.mrb[44].mxu1 %v2416_v54  ;;  %1333 = vmatprep.mubr.bf16.mxu0 %v2418_v55 }
  0x7d   :  { %1430 = vmatprep.mubr.bf16.mxu1 %v2420_v56  ;;  %2243 = vmatpush3.bf16.msra.mxu0 %v2438_v53 }
  0x7e   :  { %2276 = vmatpush3.bf16.msra.mxu1 %v2438_v53  ;;  %2244 = vmatprep.subr.bf16.mxu0 %v2445_v57 }
  0x7f   :  { %2269 = vmatprep.subr.bf16.mxu1 %v2445_v57 }
  0x81   :  { %2245 = vmatpush3.bf16.msra.mxu0 %v2445_v57 }
  0x82   :  { %2277 = vmatpush3.bf16.msra.mxu1 %v2445_v57 }
  0x83   :  { %1334 = vmatmul.mubr.bf16.gmra.mrb[48].mxu0 %v2422_v58 }
  0x84   :  { %1431 = vmatmul.mubr.bf16.gmra.mrb[48].mxu1 %v2423_v59  ;;  %1341 = vmatprep.mubr.bf16.mxu0 %v2425_v60 }
  0x85   :  { %1438 = vmatprep.mubr.bf16.mxu1 %v2427_v61 }
  0x8b   :  { %1342 = vmatmul.mubr.bf16.gmra.mrb[52].mxu0 %v2429_v62 }
  0x8c   :  { %1439 = vmatmul.mubr.bf16.gmra.mrb[52].mxu1 %v2430_v63  ;;  %1349 = vmatprep.mubr.bf16.mxu0 %v2432_v0 }
  0x8d   :  { %1446 = vmatprep.mubr.bf16.mxu1 %v2434_v1 }
  0x93   :  { %1350 = vmatmul.mubr.bf16.gmra.mrb[56].mxu0 %v2436_v2 }
  0x94   :  { %1447 = vmatmul.mubr.bf16.gmra.mrb[56].mxu1 %v2437_v3  ;;  %1357 = vmatprep.mubr.bf16.mxu0 %v2439_v4 }
  0x95   :  { %1454 = vmatprep.mubr.bf16.mxu1 %v2441_v5 }
  0x9b   :  { %1358 = vmatmul.mubr.bf16.gmra.mrb[60].mxu0 %v2443_v6 }
  0x9c   :  { %1455 = vmatmul.mubr.bf16.gmra.mrb[60].mxu1 %v2444_v7  ;;  %2246 = vmatprep.mubr.bf16.mxu0 %v2446_v8 }
  0x9d   :  { %2254 = vmatprep.mubr.bf16.mxu1 %v2447_v9 }
  0xa3   :  { %2247 = vmatmul.mubr.bf16.vlgmr.msra.gmra.mrb[64].mxu0 %v2448_v10 }
  0xa4   :  { %2255 = vmatmul.mubr.bf16.vlgmr.msra.gmra.mrb[64].mxu1 %v2449_v11  ;;  %2250 = vmatprep.mubr.bf16.mxu0 %v2450_v12 }
  0xa5   :  { %2258 = vmatprep.mubr.bf16.mxu1 %v2451_v13 }
  0xab   :  { %2251 = vmatmul.mubr.bf16.gmra.mrb[68].mxu0 %v2452_v14 }
  0xac   :  { %2259 = vmatmul.mubr.bf16.gmra.mrb[68].mxu1 %v2453_v15 }
  0xf6   :  { %v1974_v16 = vpop.f32.mrb[0].mxu0 }
  0xf7   :  { %v2038_v17 = vpop.f32.mrb[0].mxu1  ;;  %v1975_v18 = vpop.f32.mrb[1].mxu0 }
  0xf8   :  { %v1976_v19 = vadd.f32 %v1975_v18, %v1974_v16  ;;  %v2039_v20 = vpop.f32.mrb[1].mxu1  ;;  %v1977_v21 = vpop.f32.mrb[2].mxu0 }
  0xf9   :  { %v2040_v22 = vadd.f32 %v2039_v20, %v2038_v17  ;;  %v2041_v23 = vpop.f32.mrb[2].mxu1  ;;  %v1978_v24 = vpop.f32.mrb[3].mxu0 }
  0xfa   :  { %v1979_v25 = vadd.f32 %v1978_v24, %v1977_v21  ;;  %v2042_v26 = vpop.f32.mrb[3].mxu1 }
  0xfb   :  { %v2906_v27 = vadd.f32 %v2040_v22, %v1976_v19  ;;  %v2043_v28 = vadd.f32 %v2042_v26, %v2041_v23 }
  0xfd   :  { %v2908_v29 = vadd.f32 %v2043_v28, %v1979_v25 }
  0xfe   :  { %v1980_v30 = vpop.f32.mrb[4].mxu0 }
  0xff   :  { %v2044_v31 = vpop.f32.mrb[4].mxu1  ;;  %v1981_v32 = vpop.f32.mrb[5].mxu0 }
 0x100   :  { %v1982_v33 = vadd.f32 %v1981_v32, %v1980_v30  ;;  %v2045_v34 = vpop.f32.mrb[5].mxu1  ;;  %v1983_v35 = vpop.f32.mrb[6].mxu0 }
 0x101   :  { %v2046_v36 = vadd.f32 %v2045_v34, %v2044_v31  ;;  %v2047_v37 = vpop.f32.mrb[6].mxu1  ;;  %v1984_v38 = vpop.f32.mrb[7].mxu0 }
 0x102   :  { %v1985_v39 = vadd.f32 %v1984_v38, %v1983_v35  ;;  %v2048_v40 = vpop.f32.mrb[7].mxu1 }
 0x103   :  { %v2910_v41 = vadd.f32 %v2046_v36, %v1982_v33  ;;  %v2049_v42 = vadd.f32 %v2048_v40, %v2047_v37 }
 0x105   :  { %v2912_v43 = vadd.f32 %v2049_v42, %v1985_v39 }
 0x106   :  { %v1986_v44 = vpop.f32.mrb[8].mxu0 }
 0x107   :  { %v2050_v45 = vpop.f32.mrb[8].mxu1  ;;  %v1987_v46 = vpop.f32.mrb[9].mxu0 }
 0x108   :  { %v1988_v47 = vadd.f32 %v1987_v46, %v1986_v44  ;;  %v2051_v48 = vpop.f32.mrb[9].mxu1  ;;  %v1989_v49 = vpop.f32.mrb[10].mxu0 }
 0x109   :  { %v2052_v50 = vadd.f32 %v2051_v48, %v2050_v45  ;;  %v2053_v51 = vpop.f32.mrb[10].mxu1  ;;  %v1990_v52 = vpop.f32.mrb[11].mxu0 }
 0x10a   :  { %v1991_v53 = vadd.f32 %v1990_v52, %v1989_v49  ;;  %v2054_v54 = vpop.f32.mrb[11].mxu1 }
 0x10b   :  { %v2914_v55 = vadd.f32 %v2052_v50, %v1988_v47  ;;  %v2055_v56 = vadd.f32 %v2054_v54, %v2053_v51 }
 0x10d   :  { %v2916_v57 = vadd.f32 %v2055_v56, %v1991_v53 }
 0x10e   :  { %v1992_v58 = vpop.f32.mrb[12].mxu0 }
 0x10f   :  { %v2056_v59 = vpop.f32.mrb[12].mxu1  ;;  %v1993_v60 = vpop.f32.mrb[13].mxu0 }
 0x110   :  { %v1994_v61 = vadd.f32 %v1993_v60, %v1992_v58  ;;  %v2057_v62 = vpop.f32.mrb[13].mxu1  ;;  %v1995_v63 = vpop.f32.mrb[14].mxu0 }
 0x111   :  { %v2058_v0 = vadd.f32 %v2057_v62, %v2056_v59  ;;  %v2059_v1 = vpop.f32.mrb[14].mxu1  ;;  %v1996_v2 = vpop.f32.mrb[15].mxu0 }
 0x112   :  { %v1997_v3 = vadd.f32 %v1996_v2, %v1995_v63  ;;  %v2060_v4 = vpop.f32.mrb[15].mxu1 }
 0x113   :  { %v2918_v5 = vadd.f32 %v2058_v0, %v1994_v61  ;;  %v2061_v6 = vadd.f32 %v2060_v4, %v2059_v1 }
 0x115   :  { %v2920_v7 = vadd.f32 %v2061_v6, %v1997_v3 }
 0x116   :  { %v1998_v8 = vpop.f32.mrb[16].mxu0 }
 0x117   :  { %v2062_v9 = vpop.f32.mrb[16].mxu1  ;;  %v1999_v10 = vpop.f32.mrb[17].mxu0 }
 0x118   :  { %v2000_v11 = vadd.f32 %v1999_v10, %v1998_v8  ;;  %v2063_v12 = vpop.f32.mrb[17].mxu1  ;;  %v2001_v13 = vpop.f32.mrb[18].mxu0 }
 0x119   :  { %v2064_v14 = vadd.f32 %v2063_v12, %v2062_v9  ;;  %v2065_v15 = vpop.f32.mrb[18].mxu1  ;;  %v2002_v16 = vpop.f32.mrb[19].mxu0 }
 0x11a   :  { %v2003_v17 = vadd.f32 %v2002_v16, %v2001_v13  ;;  %v2066_v18 = vpop.f32.mrb[19].mxu1 }
 0x11b   :  { %v2922_v19 = vadd.f32 %v2064_v14, %v2000_v11  ;;  %v2067_v20 = vadd.f32 %v2066_v18, %v2065_v15 }
 0x11d   :  { %v2924_v21 = vadd.f32 %v2067_v20, %v2003_v17 }
 0x11e   :  { %v2004_v22 = vpop.f32.mrb[20].mxu0 }
 0x11f   :  { %v2068_v23 = vpop.f32.mrb[20].mxu1  ;;  %v2005_v24 = vpop.f32.mrb[21].mxu0 }
 0x120   :  { %v2006_v25 = vadd.f32 %v2005_v24, %v2004_v22  ;;  %v2069_v26 = vpop.f32.mrb[21].mxu1  ;;  %v2007_v28 = vpop.f32.mrb[22].mxu0 }
 0x121   :  { %v2070_v30 = vadd.f32 %v2069_v26, %v2068_v23  ;;  %v2071_v31 = vpop.f32.mrb[22].mxu1  ;;  %v2008_v32 = vpop.f32.mrb[23].mxu0 }
 0x122   :  { %v2009_v33 = vadd.f32 %v2008_v32, %v2007_v28  ;;  %v2072_v34 = vpop.f32.mrb[23].mxu1 }
 0x123   :  { %v2926_v35 = vadd.f32 %v2070_v30, %v2006_v25  ;;  %v2073_v36 = vadd.f32 %v2072_v34, %v2071_v31 }
 0x125   :  { %v2928_v37 = vadd.f32 %v2073_v36, %v2009_v33 }
 0x126   :  { %v2010_v38 = vpop.f32.mrb[24].mxu0 }
 0x127   :  { %v2074_v39 = vpop.f32.mrb[24].mxu1  ;;  %v2011_v40 = vpop.f32.mrb[25].mxu0 }
 0x128   :  { %v2012_v42 = vadd.f32 %v2011_v40, %v2010_v38  ;;  %v2075_v44 = vpop.f32.mrb[25].mxu1  ;;  %v2013_v45 = vpop.f32.mrb[26].mxu0 }
 0x129   :  { %v2076_v46 = vadd.f32 %v2075_v44, %v2074_v39  ;;  %v2077_v47 = vpop.f32.mrb[26].mxu1  ;;  %v2014_v48 = vpop.f32.mrb[27].mxu0 }
 0x12a   :  { %v2015_v49 = vadd.f32 %v2014_v48, %v2013_v45  ;;  %v2078_v50 = vpop.f32.mrb[27].mxu1 }
 0x12b   :  { %v2930_v51 = vadd.f32 %v2076_v46, %v2012_v42  ;;  %v2079_v52 = vadd.f32 %v2078_v50, %v2077_v47 }
 0x12d   :  { %v2932_v53 = vadd.f32 %v2079_v52, %v2015_v49 }
 0x12e   :  { %v2016_v54 = vpop.f32.mrb[28].mxu0 }
 0x12f   :  { %v2080_v56 = vpop.f32.mrb[28].mxu1  ;;  %v2017_v58 = vpop.f32.mrb[29].mxu0 }
 0x130   :  { %v2018_v59 = vadd.f32 %v2017_v58, %v2016_v54  ;;  %v2081_v60 = vpop.f32.mrb[29].mxu1  ;;  %v2019_v61 = vpop.f32.mrb[30].mxu0 }
 0x131   :  { %v2082_v62 = vadd.f32 %v2081_v60, %v2080_v56  ;;  %v2083_v63 = vpop.f32.mrb[30].mxu1  ;;  %v2020_v0 = vpop.f32.mrb[31].mxu0 }
 0x132   :  { %v2021_v1 = vadd.f32 %v2020_v0, %v2019_v61  ;;  %v2084_v2 = vpop.f32.mrb[31].mxu1 }
 0x133   :  { %v2934_v3 = vadd.f32 %v2082_v62, %v2018_v59  ;;  %v2085_v4 = vadd.f32 %v2084_v2, %v2083_v63 }
 0x135   :  { %v2936_v6 = vadd.f32 %v2085_v4, %v2021_v1 }
 0x136   :  { %v2102_v8 = vpop.f32.mrb[32].mxu0 }
 0x137   :  { %v2166_v9 = vpop.f32.mrb[32].mxu1  ;;  %v2103_v10 = vpop.f32.mrb[33].mxu0 }
 0x138   :  { %v2104_v11 = vadd.f32 %v2103_v10, %v2102_v8  ;;  %v2167_v12 = vpop.f32.mrb[33].mxu1  ;;  %v2105_v13 = vpop.f32.mrb[34].mxu0 }
 0x139   :  { %v2168_v14 = vadd.f32 %v2167_v12, %v2166_v9  ;;  %v2169_v15 = vpop.f32.mrb[34].mxu1  ;;  %v2106_v16 = vpop.f32.mrb[35].mxu0 }
 0x13a   :  { %v1304_v17 = vadd.f32 %v2104_v11, %v2906_v27  ;;  %v2107_v18 = vadd.f32 %v2106_v16, %v2105_v13  ;;  %v2170_v20 = vpop.f32.mrb[35].mxu1 }
 0x13b   :  { %v2171_v22 = vadd.f32 %v2170_v20, %v2169_v15 }
 0x13c   :  { %v1307_v23 = vadd.f32 %v2107_v18, %v2908_v29  ;;  %v2940_v24 = vadd.f32 %v2168_v14, %v1304_v17 }
 0x13e   :  { %v2108_v25 = vpop.f32.mrb[36].mxu0  ;;  %v2942_v26 = vadd.f32 %v2171_v22, %v1307_v23 }
 0x13f   :  { %v2172_v28 = vpop.f32.mrb[36].mxu1  ;;  %v2109_v30 = vpop.f32.mrb[37].mxu0 }
 0x140   :  { %v2110_v31 = vadd.f32 %v2109_v30, %v2108_v25  ;;  %v2173_v32 = vpop.f32.mrb[37].mxu1  ;;  %v2111_v33 = vpop.f32.mrb[38].mxu0 }
 0x141   :  { %v2174_v34 = vadd.f32 %v2173_v32, %v2172_v28  ;;  %v2175_v36 = vpop.f32.mrb[38].mxu1  ;;  %v2112_v38 = vpop.f32.mrb[39].mxu0 }
 0x142   :  { %v1312_v27 = vadd.f32 %v2110_v31, %v2910_v41  ;;  %v2113_v39 = vadd.f32 %v2112_v38, %v2111_v33  ;;  %v2176_v40 = vpop.f32.mrb[39].mxu1 }
 0x143   :  { %v2177_v42 = vadd.f32 %v2176_v40, %v2175_v36 }
 0x144   :  { %v1315_v29 = vadd.f32 %v2113_v39, %v2912_v43  ;;  %v2946_v44 = vadd.f32 %v2174_v34, %v1312_v27 }
 0x146   :  { %v2114_v45 = vpop.f32.mrb[40].mxu0  ;;  %v2948_v46 = vadd.f32 %v2177_v42, %v1315_v29 }
 0x147   :  { %v2178_v47 = vpop.f32.mrb[40].mxu1  ;;  %v2115_v48 = vpop.f32.mrb[41].mxu0 }
 0x148   :  { %v2116_v49 = vadd.f32 %v2115_v48, %v2114_v45  ;;  %v2179_v50 = vpop.f32.mrb[41].mxu1  ;;  %v2117_v52 = vpop.f32.mrb[42].mxu0 }
 0x149   :  { %v2180_v54 = vadd.f32 %v2179_v50, %v2178_v47  ;;  %v2181_v56 = vpop.f32.mrb[42].mxu1  ;;  %v2118_v58 = vpop.f32.mrb[43].mxu0 }
 0x14a   :  { %v1320_v41 = vadd.f32 %v2116_v49, %v2914_v55  ;;  %v2119_v59 = vadd.f32 %v2118_v58, %v2117_v52  ;;  %v2182_v60 = vpop.f32.mrb[43].mxu1 }
 0x14b   :  { %v2183_v61 = vadd.f32 %v2182_v60, %v2181_v56 }
 0x14c   :  { %v1323_v43 = vadd.f32 %v2119_v59, %v2916_v57  ;;  %v2952_v62 = vadd.f32 %v2180_v54, %v1320_v41 }
 0x14e   :  { %v2120_v63 = vpop.f32.mrb[44].mxu0  ;;  %v2954_v0 = vadd.f32 %v2183_v61, %v1323_v43 }
 0x14f   :  { %v2184_v1 = vpop.f32.mrb[44].mxu1  ;;  %v2121_v2 = vpop.f32.mrb[45].mxu0 }
 0x150   :  { %v2122_v4 = vadd.f32 %v2121_v2, %v2120_v63  ;;  %v2185_v8 = vpop.f32.mrb[45].mxu1  ;;  %v2123_v9 = vpop.f32.mrb[46].mxu0 }
 0x151   :  { %v2186_v10 = vadd.f32 %v2185_v8, %v2184_v1  ;;  %v2187_v11 = vpop.f32.mrb[46].mxu1  ;;  %v2124_v12 = vpop.f32.mrb[47].mxu0 }
 0x152   :  { %v1328_v55 = vadd.f32 %v2122_v4, %v2918_v5  ;;  %v2125_v13 = vadd.f32 %v2124_v12, %v2123_v9  ;;  %v2188_v14 = vpop.f32.mrb[47].mxu1 }
 0x153   :  { %v2189_v15 = vadd.f32 %v2188_v14, %v2187_v11 }
 0x154   :  { %v1331_v57 = vadd.f32 %v2125_v13, %v2920_v7  ;;  %v2958_v16 = vadd.f32 %v2186_v10, %v1328_v55 }
 0x156   :  { %v2126_v17 = vpop.f32.mrb[48].mxu0  ;;  %v2960_v18 = vadd.f32 %v2189_v15, %v1331_v57 }
 0x157   :  { %v2190_v20 = vpop.f32.mrb[48].mxu1  ;;  %v2127_v22 = vpop.f32.mrb[49].mxu0 }
 0x158   :  { %v2128_v23 = vadd.f32 %v2127_v22, %v2126_v17  ;;  %v2191_v25 = vpop.f32.mrb[49].mxu1  ;;  %v2129_v28 = vpop.f32.mrb[50].mxu0 }
 0x159   :  { %v2192_v30 = vadd.f32 %v2191_v25, %v2190_v20  ;;  %v2193_v31 = vpop.f32.mrb[50].mxu1  ;;  %v2130_v32 = vpop.f32.mrb[51].mxu0 }
 0x15a   :  { %v1336_v5 = vadd.f32 %v2128_v23, %v2922_v19  ;;  %v2131_v33 = vadd.f32 %v2130_v32, %v2129_v28  ;;  %v2194_v34 = vpop.f32.mrb[51].mxu1 }
 0x15b   :  { %v2195_v36 = vadd.f32 %v2194_v34, %v2193_v31 }
 0x15c   :  { %v1339_v7 = vadd.f32 %v2131_v33, %v2924_v21  ;;  %v1433_v38 = vadd.f32 %v2192_v30, %v1336_v5  ;;  %v2979_v33 = vld [vmem:[%s3034_s2] ss:$0 sm:$0xff] }
 0x15e   :  { %v2132_v27 = vpop.f32.mrb[52].mxu0  ;;  %v2964_v39 = vadd.f32 %v2195_v36, %v1339_v7 }
 0x15f   :  { %v2196_v40 = vpop.f32.mrb[52].mxu1  ;;  %v2133_v42 = vpop.f32.mrb[53].mxu0 }
 0x160   :  { %v2134_v29 = vadd.f32 %v2133_v42, %v2132_v27  ;;  %v2197_v45 = vpop.f32.mrb[53].mxu1  ;;  %v2135_v47 = vpop.f32.mrb[54].mxu0 }
 0x161   :  { %v2198_v48 = vadd.f32 %v2197_v45, %v2196_v40  ;;  %v2199_v49 = vpop.f32.mrb[54].mxu1  ;;  %v2136_v50 = vpop.f32.mrb[55].mxu0 }
 0x162   :  { %v1344_v52 = vadd.f32 %v2134_v29, %v2926_v35  ;;  %v2137_v19 = vadd.f32 %v2136_v50, %v2135_v47  ;;  %v2200_v54 = vpop.f32.mrb[55].mxu1 }
 0x163   :  { %v2201_v56 = vadd.f32 %v2200_v54, %v2199_v49 }
 0x164   :  { %v1347_v58 = vadd.f32 %v2137_v19, %v2928_v37  ;;  %v1441_v21 = vadd.f32 %v2198_v48, %v1344_v52 }
 0x166   :  { %v2138_v41 = vpop.f32.mrb[56].mxu0  ;;  %v1444_v59 = vadd.f32 %v2201_v56, %v1347_v58 }
 0x167   :  { %v2202_v60 = vpop.f32.mrb[56].mxu1  ;;  %v2139_v61 = vpop.f32.mrb[57].mxu0 }
 0x168   :  { %v2140_v43 = vadd.f32 %v2139_v61, %v2138_v41  ;;  %v2203_v63 = vpop.f32.mrb[57].mxu1  ;;  %v2141_v1 = vpop.f32.mrb[58].mxu0 }
 0x169   :  { %v2204_v2 = vadd.f32 %v2203_v63, %v2202_v60  ;;  %v2205_v4 = vpop.f32.mrb[58].mxu1  ;;  %v2142_v8 = vpop.f32.mrb[59].mxu0 }
 0x16a   :  { %v1352_v9 = vadd.f32 %v2140_v43, %v2930_v51  ;;  %v2143_v10 = vadd.f32 %v2142_v8, %v2141_v1  ;;  %v2206_v35 = vpop.f32.mrb[59].mxu1 }
 0x16b   :  { %v2207_v11 = vadd.f32 %v2206_v35, %v2205_v4 }
 0x16c   :  { %v1355_v12 = vadd.f32 %v2143_v10, %v2932_v53  ;;  %v2970_v55 = vadd.f32 %v2204_v2, %v1352_v9 }
 0x16e   :  { %v2144_v37 = vpop.f32.mrb[60].mxu0  ;;  %v2972_v13 = vadd.f32 %v2207_v11, %v1355_v12 }
 0x16f   :  { %v2208_v14 = vpop.f32.mrb[60].mxu1  ;;  %v2145_v15 = vpop.f32.mrb[61].mxu0 }
 0x170   :  { %v2146_v57 = vadd.f32 %v2145_v15, %v2144_v37  ;;  %v2209_v17 = vpop.f32.mrb[61].mxu1  ;;  %v2147_v20 = vpop.f32.mrb[62].mxu0 }
 0x171   :  { %v2210_v22 = vadd.f32 %v2209_v17, %v2208_v14  ;;  %v2211_v23 = vpop.f32.mrb[62].mxu1  ;;  %v2148_v25 = vpop.f32.mrb[63].mxu0 }
 0x172   :  { %v1360_v51 = vadd.f32 %v2146_v57, %v2934_v3  ;;  %v2149_v28 = vadd.f32 %v2148_v25, %v2147_v20  ;;  %v2212_v30 = vpop.f32.mrb[63].mxu1 }
 0x173   :  { %v2213_v31 = vadd.f32 %v2212_v30, %v2211_v23 }
 0x174   :  { %v1363_v53 = vadd.f32 %v2149_v28, %v2936_v6  ;;  %v1457_v32 = vadd.f32 %v2210_v22, %v1360_v51 }
 0x176   :  { %v2248_v5 = vpop.f32.mrb[64].mxu0  ;;  %v1460_v34 = vadd.f32 %v2213_v31, %v1363_v53 }
 0x177   :  { %v1506_v36 = vadd.f32 %v2248_v5, %v2946_v44  ;;  %v2256_v7 = vpop.f32.mrb[64].mxu1  ;;  %v1497_v27 = vpop.f32.mrb[65].mxu0 }
 0x178   :  { %v1538_v40 = vadd.f32 %v2256_v7, %v1441_v21  ;;  %v1498_v3 = vadd.f32 %v1497_v27, %v2940_v24  ;;  %v1529_v42 = vpop.f32.mrb[65].mxu1  ;;  %v2249_v29 = vpop.f32.mrb[66].mxu0 }
 0x179   :  { %v1620_v45 = vadd.f32 %v2979_v33, %v1506_v36  ;;  %v1530_v6 = vadd.f32 %v1529_v42, %v1433_v38  ;;  %v1509_v47 = vadd.f32 %v2249_v29, %v2948_v46  ;;  %v2257_v48 = vpop.f32.mrb[66].mxu1  ;;  %v1500_v49 = vpop.f32.mrb[67].mxu0 }
 0x17a   :  { %v1628_v50 = vadd.f32 %v2979_v33, %v1538_v40  ;;  %v1618_v52 = vadd.f32 %v2979_v33, %v1498_v3  ;;  %v1541_v19 = vadd.f32 %v2257_v48, %v1444_v59  ;;  %v1501_v44 = vadd.f32 %v1500_v49, %v2942_v26  ;;  %v1532_v54 = vpop.f32.mrb[67].mxu1 }
 0x17b   :  { %v1626_v56 = vadd.f32 %v2979_v33, %v1530_v6  ;;  %v1621_v24 = vadd.f32 %v2979_v33, %v1509_v47  ;;  %v1533_v58 = vadd.f32 %v1532_v54, %v2964_v39  ;;  %v1636_v21 = vmax.f32 %v1620_v45, 0.0 }
 0x17c   :  { %v1629_v38 = vadd.f32 %v2979_v33, %v1541_v19  ;;  %v1619_v46 = vadd.f32 %v2979_v33, %v1501_v44  ;;  %v1644_v61 = vmax.f32 %v1628_v50, 0.0  ;;  %v1634_v43 = vmax.f32 %v1618_v52, 0.0 }
 0x17d   :  { %v1637_v41 = vmax.f32 %v1621_v24, 0.0  ;;  %v1627_v60 = vadd.f32 %v2979_v33, %v1533_v58  ;;  %v1642_v1 = vmax.f32 %v1626_v56, 0.0 }
 0x17e   :  { %v1645_v59 = vmax.f32 %v1629_v38, 0.0  ;;  %v1635_v63 = vmax.f32 %v1619_v46, 0.0  ;;  %v2252_v26 = vpop.f32.mrb[68].mxu0 }
 0x17f   :  { %v1919_v2 = vpack.c.bf16 %v1637_v41, %v1636_v21  ;;  %v1643_v4 = vmax.f32 %v1627_v60, 0.0  ;;  %v1522_v8 = vadd.f32 %v2252_v26, %v2958_v16  ;;  %v2260_v9 = vpop.f32.mrb[68].mxu1  ;;  %v1513_v39 = vpop.f32.mrb[69].mxu0 }
 0x180   :  { %v1939_v10 = vpack.c.bf16 %v1645_v59, %v1644_v61  ;;  %v1914_v35 = vpack.c.bf16 %v1635_v63, %v1634_v43  ;;  %v1554_v11 = vadd.f32 %v2260_v9, %v1457_v32  ;;  %v1514_v12 = vadd.f32 %v1513_v39, %v2952_v62  ;;  %v1545_v37 = vpop.f32.mrb[69].mxu1  ;;  %v2253_v14 = vpop.f32.mrb[70].mxu0 }
 0x181   :  { %1951 = vst [vmem:[%s3035_s3 + $0x8] sm:$0xff] %v1919_v2   ;;  %v1934_v15 = vpack.c.bf16 %v1643_v4, %v1642_v1  ;;  %v1624_v57 = vadd.f32 %v2979_v33, %v1522_v8  ;;  %v1546_v17 = vadd.f32 %v1545_v37, %v2970_v55  ;;  %v1525_v16 = vadd.f32 %v2253_v14, %v2960_v18  ;;  %v2261_v20 = vpop.f32.mrb[70].mxu1  ;;  %v1516_v22 = vpop.f32.mrb[71].mxu0 }
 0x182   :  { %1955 = vst [vmem:[%s3035_s3 + $0x28] sm:$0xff] %v1939_v10   ;;  %1915 = vst [vmem:[%s3035_s3] sm:$0xff] %v1914_v35   ;;  %v1632_v62 = vadd.f32 %v2979_v33, %v1554_v11  ;;  %v1622_v23 = vadd.f32 %v2979_v33, %v1514_v12  ;;  %v1557_v25 = vadd.f32 %v2261_v20, %v1460_v34  ;;  %v1548_v55 = vpop.f32.mrb[71].mxu1 }
 0x183   :  { %v1517_v51 = vadd.f32 %v1516_v22, %v2954_v0  ;;  %1954 = vst [vmem:[%s3035_s3 + $0x20] sm:$0xff] %v1934_v15   ;;  %v1630_v18 = vadd.f32 %v2979_v33, %v1546_v17  ;;  %v1625_v28 = vadd.f32 %v2979_v33, %v1525_v16  ;;  %v1549_v30 = vadd.f32 %v1548_v55, %v2972_v13 }
 0x184   :  { %v1633_v31 = vadd.f32 %v2979_v33, %v1557_v25  ;;  %v1640_v32 = vmax.f32 %v1624_v57, 0.0  ;;  %v1648_v0 = vmax.f32 %v1632_v62, 0.0  ;;  %v1638_v36 = vmax.f32 %v1622_v23, 0.0 }
 0x185   :  { %v1623_v53 = vadd.f32 %v2979_v33, %v1517_v51  ;;  %v1641_v5 = vmax.f32 %v1625_v28, 0.0  ;;  %v1631_v34 = vadd.f32 %v2979_v33, %v1549_v30  ;;  %v1646_v40 = vmax.f32 %v1630_v18, 0.0 }
 0x186   :  { %v1649_v7 = vmax.f32 %v1633_v31, 0.0 }
 0x187   :  { %v1639_v27 = vmax.f32 %v1623_v53, 0.0  ;;  %v1929_v3 = vpack.c.bf16 %v1641_v5, %v1640_v32  ;;  %v1647_v42 = vmax.f32 %v1631_v34, 0.0 }
 0x188   :  { %v1949_v29 = vpack.c.bf16 %v1649_v7, %v1648_v0 }
 0x189   :  { %v1924_v45 = vpack.c.bf16 %v1639_v27, %v1638_v36  ;;  %1953 = vst [vmem:[%s3035_s3 + $0x18] sm:$0xff] %v1929_v3   ;;  %v1944_v13 = vpack.c.bf16 %v1647_v42, %v1646_v40 }
 0x18a   :  { %1957 = vst [vmem:[%s3035_s3 + $0x38] sm:$0xff] %v1949_v29  }
 0x18b   :  { %1952 = vst [vmem:[%s3035_s3 + $0x10] sm:$0xff] %v1924_v45   ;;  %1956 = vst [vmem:[%s3035_s3 + $0x30] sm:$0xff] %v1944_v13  }

// kernel: inception_v3_forward.10
= control target key start
LH: loop header
LB: loop body
LE: loop exit
PB: predicated region body
PF: predicated region fallthrough
CT: control target
= control target key end

     0   :  { %s3485_s12 = smov 0   ;;  %s3487_s13 = smov 0   ;;  %s4223_s0 = inlined_call_operand.vmem [shape: bf16[128,512], index: 0, kind: input, shape index: {}]   ;;  %s4224_s1 = inlined_call_operand.vmem [shape: bf16[512,2048], index: 1, kind: input, shape index: {}]   ;;  %s4225_s2 = inlined_call_operand.vmem [shape: f32[1,2048], index: 2, kind: input, shape index: {}]   ;;  %s4226_s3 = inlined_call_operand.vmem [shape: bf16[128,2048], index: 3, kind: output, shape index: {}]  }
   0x1   :  { %s3489_s14 = smov 0   ;;  %s3491_s15 = smov 0  }
   0x2   :  { %s3493_s16 = smov 0  }
   0x3 LB: > { %s28_s17 = sadd.s32 1, %s3459_s15  ;;  %s2838_s18 = sadd.s32 4294967295, %s3463_s16   ;;  %s3463_s16 = sphi %s3493_s16, %s13_s16   ;;  %s3459_s15 = sphi %s3491_s15, %s4231_s15   ;;  %s3455_s14 = sphi %s3489_s14, %s4230_s14   ;;  %s3451_s13 = sphi %s3487_s13, %s4229_s13   ;;  %s3447_s12 = sphi %s3485_s12, %s4228_s12  }
   0x4   : > { %p30_p0 = scmp.ge.s32.totalorder %s28_s17, 4  ;;  %p76_p1 = scmp.ne.s32.totalorder %s3451_s13, %s3447_s12 }
   0x5   : > { %p77_p2 = scmp.eq.s32.totalorder %s3463_s16, 0  ;;  %p134_p4 = scmp.eq.s32.totalorder %s2838_s18, 3 }
   0x6   : > { %s4233_s17 = smov (%p30_p0, %s28_s17), 0  ;;  %s69_s20 = sadd.s32 1, %s3451_s13 }
   0x7   : > { %p78_p3 = por %p77_p2, %p76_p1  ;;  %s65_s19 = ssub.s32 %s3459_s15, %s4233_s17 }
   0x8   : > { %p67_p5 = scmp.eq.s32.totalorder %s65_s19, 0  ;;  %p3520_p6 = por %p134_p4, %p76_p1 }
   0x9   : > { %p2842_p7 = scmp.ge.s32.totalorder %s3463_s16, 4 }
   0xa   : > { %s3525_s22 = scalar_select %p67_p5, %s3451_s13, %s69_s20  }
   0xb   : > { %171 = sbr.rel (%p2842_p7) target bundleno = 86 (0x56), region = 20 }
  0x12   : > { %174 = sbr.rel (!%p78_p3) target bundleno = 86 (0x56), region = 24  ;;  %s176_s23 = sand.u32 (%p78_p3), 1, %s3451_s13  }
  0x13   : > { %s3047_s24 = sshll.u32 (%p78_p3), %s3459_s15, 4  ;;  %s2843_s25 = sshll.u32 (%p78_p3), %s176_s23, 10 }
  0x14   : > { %s3533_s28 = scalar_lea.vmem (%p78_p3), %s4224_s1, %s3047_s24  ;;  %s3538_s29 = scalar_lea.vmem (%p78_p3), [#allocation3], %s2843_s25 }
  0x15   : > { %v197_v0 = vld [vmem:[%s3533_s28] sm:$0xff] (%p78_p3)  ;;  %v199_v1 = vld [vmem:[%s3533_s28 + $0x8] sm:$0xff] (%p78_p3) }
  0x16   : > { %v201_v2 = vld [vmem:[%s3533_s28 + $0x40] sm:$0xff] (%p78_p3)  ;;  %198 = vst [vmem:[%s3538_s29] sm:$0xff] (%p78_p3), %v197_v0  ;;  %200 = vst [vmem:[%s3538_s29 + $0x8] sm:$0xff] (%p78_p3), %v199_v1  ;;  %v203_v3 = vld [vmem:[%s3533_s28 + $0x48] sm:$0xff] (%p78_p3) }
  0x17   : > { %202 = vst [vmem:[%s3538_s29 + $0x10] sm:$0xff] (%p78_p3), %v201_v2  ;;  %v205_v4 = vld [vmem:[%s3533_s28 + $0x80] sm:$0xff] (%p78_p3)  ;;  %v207_v5 = vld [vmem:[%s3533_s28 + $0x88] sm:$0xff] (%p78_p3)  ;;  %204 = vst [vmem:[%s3538_s29 + $0x18] sm:$0xff] (%p78_p3), %v203_v3 }
  0x18   : > { %206 = vst [vmem:[%s3538_s29 + $0x20] sm:$0xff] (%p78_p3), %v205_v4  ;;  %208 = vst [vmem:[%s3538_s29 + $0x28] sm:$0xff] (%p78_p3), %v207_v5  ;;  %v209_v6 = vld [vmem:[%s3533_s28 + $0xc0] sm:$0xff] (%p78_p3)  ;;  %v211_v7 = vld [vmem:[%s3533_s28 + $0xc8] sm:$0xff] (%p78_p3) }
  0x19   : > { %v213_v8 = vld [vmem:[%s3533_s28 + $0x100] sm:$0xff]  ;;  %210 = vst [vmem:[%s3538_s29 + $0x30] sm:$0xff] %v209_v6  ;;  %212 = vst [vmem:[%s3538_s29 + $0x38] sm:$0xff] %v211_v7  ;;  %v215_v9 = vld [vmem:[%s3533_s28 + $0x108] sm:$0xff] }
  0x1a   : > { %214 = vst [vmem:[%s3538_s29 + $0x40] sm:$0xff] %v213_v8  ;;  %v217_v10 = vld [vmem:[%s3533_s28 + $0x140] sm:$0xff]  ;;  %v219_v11 = vld [vmem:[%s3533_s28 + $0x148] sm:$0xff]  ;;  %216 = vst [vmem:[%s3538_s29 + $0x48] sm:$0xff] %v215_v9 }
  0x1b   : > { %218 = vst [vmem:[%s3538_s29 + $0x50] sm:$0xff] %v217_v10  ;;  %220 = vst [vmem:[%s3538_s29 + $0x58] sm:$0xff] %v219_v11  ;;  %v221_v12 = vld [vmem:[%s3533_s28 + $0x180] sm:$0xff]  ;;  %v223_v13 = vld [vmem:[%s3533_s28 + $0x188] sm:$0xff] }
  0x1c   : > { %v225_v14 = vld [vmem:[%s3533_s28 + $0x1c0] sm:$0xff]  ;;  %222 = vst [vmem:[%s3538_s29 + $0x60] sm:$0xff] %v221_v12  ;;  %224 = vst [vmem:[%s3538_s29 + $0x68] sm:$0xff] %v223_v13  ;;  %v227_v15 = vld [vmem:[%s3533_s28 + $0x1c8] sm:$0xff] }
  0x1d   : > { %226 = vst [vmem:[%s3538_s29 + $0x70] sm:$0xff] %v225_v14  ;;  %v229_v16 = vld [vmem:[%s3533_s28 + $0x200] sm:$0xff]  ;;  %v231_v17 = vld [vmem:[%s3533_s28 + $0x208] sm:$0xff]  ;;  %228 = vst [vmem:[%s3538_s29 + $0x78] sm:$0xff] %v227_v15 }
  0x1e   : > { %230 = vst [vmem:[%s3538_s29 + $0x80] sm:$0xff] %v229_v16  ;;  %232 = vst [vmem:[%s3538_s29 + $0x88] sm:$0xff] %v231_v17  ;;  %v233_v18 = vld [vmem:[%s3533_s28 + $0x240] sm:$0xff]  ;;  %v235_v19 = vld [vmem:[%s3533_s28 + $0x248] sm:$0xff] }
  0x1f   : > { %v237_v20 = vld [vmem:[%s3533_s28 + $0x280] sm:$0xff]  ;;  %234 = vst [vmem:[%s3538_s29 + $0x90] sm:$0xff] %v233_v18  ;;  %236 = vst [vmem:[%s3538_s29 + $0x98] sm:$0xff] %v235_v19  ;;  %v239_v21 = vld [vmem:[%s3533_s28 + $0x288] sm:$0xff] }
  0x20   : > { %238 = vst [vmem:[%s3538_s29 + $0xa0] sm:$0xff] %v237_v20  ;;  %v241_v22 = vld [vmem:[%s3533_s28 + $0x2c0] sm:$0xff]  ;;  %v243_v23 = vld [vmem:[%s3533_s28 + $0x2c8] sm:$0xff]  ;;  %240 = vst [vmem:[%s3538_s29 + $0xa8] sm:$0xff] %v239_v21 }
  0x21   : > { %242 = vst [vmem:[%s3538_s29 + $0xb0] sm:$0xff] %v241_v22  ;;  %244 = vst [vmem:[%s3538_s29 + $0xb8] sm:$0xff] %v243_v23  ;;  %v245_v24 = vld [vmem:[%s3533_s28 + $0x300] sm:$0xff]  ;;  %v247_v25 = vld [vmem:[%s3533_s28 + $0x308] sm:$0xff] }
  0x22   : > { %v249_v26 = vld [vmem:[%s3533_s28 + $0x340] sm:$0xff]  ;;  %246 = vst [vmem:[%s3538_s29 + $0xc0] sm:$0xff] %v245_v24  ;;  %248 = vst [vmem:[%s3538_s29 + $0xc8] sm:$0xff] %v247_v25  ;;  %v251_v27 = vld [vmem:[%s3533_s28 + $0x348] sm:$0xff] }
  0x23   : > { %250 = vst [vmem:[%s3538_s29 + $0xd0] sm:$0xff] %v249_v26  ;;  %v253_v28 = vld [vmem:[%s3533_s28 + $0x380] sm:$0xff]  ;;  %v255_v29 = vld [vmem:[%s3533_s28 + $0x388] sm:$0xff]  ;;  %252 = vst [vmem:[%s3538_s29 + $0xd8] sm:$0xff] %v251_v27 }
  0x24   : > { %254 = vst [vmem:[%s3538_s29 + $0xe0] sm:$0xff] %v253_v28  ;;  %256 = vst [vmem:[%s3538_s29 + $0xe8] sm:$0xff] %v255_v29  ;;  %v257_v30 = vld [vmem:[%s3533_s28 + $0x3c0] sm:$0xff]  ;;  %v259_v31 = vld [vmem:[%s3533_s28 + $0x3c8] sm:$0xff] }
  0x25   : > { %v261_v32 = vld [vmem:[%s3533_s28 + $0x400] sm:$0xff]  ;;  %258 = vst [vmem:[%s3538_s29 + $0xf0] sm:$0xff] %v257_v30  ;;  %260 = vst [vmem:[%s3538_s29 + $0xf8] sm:$0xff] %v259_v31  ;;  %v263_v33 = vld [vmem:[%s3533_s28 + $0x408] sm:$0xff] }
  0x26   : > { %262 = vst [vmem:[%s3538_s29 + $0x100] sm:$0xff] %v261_v32  ;;  %v265_v34 = vld [vmem:[%s3533_s28 + $0x440] sm:$0xff]  ;;  %v267_v35 = vld [vmem:[%s3533_s28 + $0x448] sm:$0xff]  ;;  %264 = vst [vmem:[%s3538_s29 + $0x108] sm:$0xff] %v263_v33 }
  0x27   : > { %266 = vst [vmem:[%s3538_s29 + $0x110] sm:$0xff] %v265_v34  ;;  %268 = vst [vmem:[%s3538_s29 + $0x118] sm:$0xff] %v267_v35  ;;  %v269_v36 = vld [vmem:[%s3533_s28 + $0x480] sm:$0xff]  ;;  %v271_v37 = vld [vmem:[%s3533_s28 + $0x488] sm:$0xff] }
  0x28   : > { %v273_v38 = vld [vmem:[%s3533_s28 + $0x4c0] sm:$0xff]  ;;  %270 = vst [vmem:[%s3538_s29 + $0x120] sm:$0xff] %v269_v36  ;;  %272 = vst [vmem:[%s3538_s29 + $0x128] sm:$0xff] %v271_v37  ;;  %v275_v39 = vld [vmem:[%s3533_s28 + $0x4c8] sm:$0xff] }
  0x29   : > { %274 = vst [vmem:[%s3538_s29 + $0x130] sm:$0xff] %v273_v38  ;;  %v277_v40 = vld [vmem:[%s3533_s28 + $0x500] sm:$0xff]  ;;  %v279_v41 = vld [vmem:[%s3533_s28 + $0x508] sm:$0xff]  ;;  %276 = vst [vmem:[%s3538_s29 + $0x138] sm:$0xff] %v275_v39 }
  0x2a   : > { %278 = vst [vmem:[%s3538_s29 + $0x140] sm:$0xff] %v277_v40  ;;  %280 = vst [vmem:[%s3538_s29 + $0x148] sm:$0xff] %v279_v41  ;;  %v281_v42 = vld [vmem:[%s3533_s28 + $0x540] sm:$0xff]  ;;  %v283_v43 = vld [vmem:[%s3533_s28 + $0x548] sm:$0xff] }
  0x2b   : > { %v285_v44 = vld [vmem:[%s3533_s28 + $0x580] sm:$0xff]  ;;  %282 = vst [vmem:[%s3538_s29 + $0x150] sm:$0xff] %v281_v42  ;;  %284 = vst [vmem:[%s3538_s29 + $0x158] sm:$0xff] %v283_v43  ;;  %v287_v45 = vld [vmem:[%s3533_s28 + $0x588] sm:$0xff] }
  0x2c   : > { %286 = vst [vmem:[%s3538_s29 + $0x160] sm:$0xff] %v285_v44  ;;  %v289_v46 = vld [vmem:[%s3533_s28 + $0x5c0] sm:$0xff]  ;;  %v291_v47 = vld [vmem:[%s3533_s28 + $0x5c8] sm:$0xff]  ;;  %288 = vst [vmem:[%s3538_s29 + $0x168] sm:$0xff] %v287_v45 }
  0x2d   : > { %290 = vst [vmem:[%s3538_s29 + $0x170] sm:$0xff] %v289_v46  ;;  %292 = vst [vmem:[%s3538_s29 + $0x178] sm:$0xff] %v291_v47  ;;  %v293_v48 = vld [vmem:[%s3533_s28 + $0x600] sm:$0xff]  ;;  %v295_v49 = vld [vmem:[%s3533_s28 + $0x608] sm:$0xff] }
  0x2e   : > { %v297_v50 = vld [vmem:[%s3533_s28 + $0x640] sm:$0xff]  ;;  %294 = vst [vmem:[%s3538_s29 + $0x180] sm:$0xff] %v293_v48  ;;  %296 = vst [vmem:[%s3538_s29 + $0x188] sm:$0xff] %v295_v49  ;;  %v299_v51 = vld [vmem:[%s3533_s28 + $0x648] sm:$0xff] }
  0x2f   : > { %298 = vst [vmem:[%s3538_s29 + $0x190] sm:$0xff] %v297_v50  ;;  %v301_v52 = vld [vmem:[%s3533_s28 + $0x680] sm:$0xff]  ;;  %v303_v53 = vld [vmem:[%s3533_s28 + $0x688] sm:$0xff]  ;;  %300 = vst [vmem:[%s3538_s29 + $0x198] sm:$0xff] %v299_v51 }
  0x30   : > { %302 = vst [vmem:[%s3538_s29 + $0x1a0] sm:$0xff] %v301_v52  ;;  %304 = vst [vmem:[%s3538_s29 + $0x1a8] sm:$0xff] %v303_v53  ;;  %v305_v54 = vld [vmem:[%s3533_s28 + $0x6c0] sm:$0xff]  ;;  %v307_v55 = vld [vmem:[%s3533_s28 + $0x6c8] sm:$0xff] }
  0x31   : > { %v309_v56 = vld [vmem:[%s3533_s28 + $0x700] sm:$0xff]  ;;  %306 = vst [vmem:[%s3538_s29 + $0x1b0] sm:$0xff] %v305_v54  ;;  %308 = vst [vmem:[%s3538_s29 + $0x1b8] sm:$0xff] %v307_v55  ;;  %v311_v57 = vld [vmem:[%s3533_s28 + $0x708] sm:$0xff] }
  0x32   : > { %310 = vst [vmem:[%s3538_s29 + $0x1c0] sm:$0xff] %v309_v56  ;;  %v313_v58 = vld [vmem:[%s3533_s28 + $0x740] sm:$0xff]  ;;  %v315_v59 = vld [vmem:[%s3533_s28 + $0x748] sm:$0xff]  ;;  %312 = vst [vmem:[%s3538_s29 + $0x1c8] sm:$0xff] %v311_v57 }
  0x33   : > { %314 = vst [vmem:[%s3538_s29 + $0x1d0] sm:$0xff] %v313_v58  ;;  %316 = vst [vmem:[%s3538_s29 + $0x1d8] sm:$0xff] %v315_v59  ;;  %v317_v60 = vld [vmem:[%s3533_s28 + $0x780] sm:$0xff]  ;;  %v319_v61 = vld [vmem:[%s3533_s28 + $0x788] sm:$0xff] }
  0x34   : > { %v321_v62 = vld [vmem:[%s3533_s28 + $0x7c0] sm:$0xff]  ;;  %318 = vst [vmem:[%s3538_s29 + $0x1e0] sm:$0xff] %v317_v60  ;;  %320 = vst [vmem:[%s3538_s29 + $0x1e8] sm:$0xff] %v319_v61  ;;  %v323_v63 = vld [vmem:[%s3533_s28 + $0x7c8] sm:$0xff] }
  0x35   : > { %322 = vst [vmem:[%s3538_s29 + $0x1f0] sm:$0xff] %v321_v62  ;;  %v325_v0 = vld [vmem:[%s3533_s28 + $0x800] sm:$0xff]  ;;  %v327_v1 = vld [vmem:[%s3533_s28 + $0x808] sm:$0xff]  ;;  %324 = vst [vmem:[%s3538_s29 + $0x1f8] sm:$0xff] %v323_v63 }
  0x36   : > { %326 = vst [vmem:[%s3538_s29 + $0x200] sm:$0xff] %v325_v0  ;;  %328 = vst [vmem:[%s3538_s29 + $0x208] sm:$0xff] %v327_v1  ;;  %v329_v2 = vld [vmem:[%s3533_s28 + $0x840] sm:$0xff]  ;;  %v331_v3 = vld [vmem:[%s3533_s28 + $0x848] sm:$0xff] }
  0x37   : > { %v333_v4 = vld [vmem:[%s3533_s28 + $0x880] sm:$0xff]  ;;  %330 = vst [vmem:[%s3538_s29 + $0x210] sm:$0xff] %v329_v2  ;;  %332 = vst [vmem:[%s3538_s29 + $0x218] sm:$0xff] %v331_v3  ;;  %v335_v5 = vld [vmem:[%s3533_s28 + $0x888] sm:$0xff] }
  0x38   : > { %334 = vst [vmem:[%s3538_s29 + $0x220] sm:$0xff] %v333_v4  ;;  %v337_v6 = vld [vmem:[%s3533_s28 + $0x8c0] sm:$0xff]  ;;  %v339_v7 = vld [vmem:[%s3533_s28 + $0x8c8] sm:$0xff]  ;;  %336 = vst [vmem:[%s3538_s29 + $0x228] sm:$0xff] %v335_v5 }
  0x39   : > { %338 = vst [vmem:[%s3538_s29 + $0x230] sm:$0xff] %v337_v6  ;;  %340 = vst [vmem:[%s3538_s29 + $0x238] sm:$0xff] %v339_v7  ;;  %v341_v8 = vld [vmem:[%s3533_s28 + $0x900] sm:$0xff]  ;;  %v343_v9 = vld [vmem:[%s3533_s28 + $0x908] sm:$0xff] }
  0x3a   : > { %v345_v10 = vld [vmem:[%s3533_s28 + $0x940] sm:$0xff]  ;;  %342 = vst [vmem:[%s3538_s29 + $0x240] sm:$0xff] %v341_v8  ;;  %344 = vst [vmem:[%s3538_s29 + $0x248] sm:$0xff] %v343_v9  ;;  %v347_v11 = vld [vmem:[%s3533_s28 + $0x948] sm:$0xff] }
  0x3b   : > { %346 = vst [vmem:[%s3538_s29 + $0x250] sm:$0xff] %v345_v10  ;;  %v349_v12 = vld [vmem:[%s3533_s28 + $0x980] sm:$0xff]  ;;  %v351_v13 = vld [vmem:[%s3533_s28 + $0x988] sm:$0xff]  ;;  %348 = vst [vmem:[%s3538_s29 + $0x258] sm:$0xff] %v347_v11 }
  0x3c   : > { %350 = vst [vmem:[%s3538_s29 + $0x260] sm:$0xff] %v349_v12  ;;  %352 = vst [vmem:[%s3538_s29 + $0x268] sm:$0xff] %v351_v13  ;;  %v353_v14 = vld [vmem:[%s3533_s28 + $0x9c0] sm:$0xff]  ;;  %v355_v15 = vld [vmem:[%s3533_s28 + $0x9c8] sm:$0xff] }
  0x3d   : > { %v357_v16 = vld [vmem:[%s3533_s28 + $0xa00] sm:$0xff]  ;;  %354 = vst [vmem:[%s3538_s29 + $0x270] sm:$0xff] %v353_v14  ;;  %356 = vst [vmem:[%s3538_s29 + $0x278] sm:$0xff] %v355_v15  ;;  %v359_v17 = vld [vmem:[%s3533_s28 + $0xa08] sm:$0xff] }
  0x3e   : > { %358 = vst [vmem:[%s3538_s29 + $0x280] sm:$0xff] %v357_v16  ;;  %v361_v18 = vld [vmem:[%s3533_s28 + $0xa40] sm:$0xff]  ;;  %v363_v19 = vld [vmem:[%s3533_s28 + $0xa48] sm:$0xff]  ;;  %360 = vst [vmem:[%s3538_s29 + $0x288] sm:$0xff] %v359_v17 }
  0x3f   : > { %362 = vst [vmem:[%s3538_s29 + $0x290] sm:$0xff] %v361_v18  ;;  %364 = vst [vmem:[%s3538_s29 + $0x298] sm:$0xff] %v363_v19  ;;  %v365_v20 = vld [vmem:[%s3533_s28 + $0xa80] sm:$0xff]  ;;  %v367_v21 = vld [vmem:[%s3533_s28 + $0xa88] sm:$0xff] }
  0x40   : > { %v369_v22 = vld [vmem:[%s3533_s28 + $0xac0] sm:$0xff]  ;;  %366 = vst [vmem:[%s3538_s29 + $0x2a0] sm:$0xff] %v365_v20  ;;  %368 = vst [vmem:[%s3538_s29 + $0x2a8] sm:$0xff] %v367_v21  ;;  %v371_v23 = vld [vmem:[%s3533_s28 + $0xac8] sm:$0xff] }
  0x41   : > { %370 = vst [vmem:[%s3538_s29 + $0x2b0] sm:$0xff] %v369_v22  ;;  %v373_v24 = vld [vmem:[%s3533_s28 + $0xb00] sm:$0xff]  ;;  %v375_v25 = vld [vmem:[%s3533_s28 + $0xb08] sm:$0xff]  ;;  %372 = vst [vmem:[%s3538_s29 + $0x2b8] sm:$0xff] %v371_v23 }
  0x42   : > { %374 = vst [vmem:[%s3538_s29 + $0x2c0] sm:$0xff] %v373_v24  ;;  %376 = vst [vmem:[%s3538_s29 + $0x2c8] sm:$0xff] %v375_v25  ;;  %v377_v26 = vld [vmem:[%s3533_s28 + $0xb40] sm:$0xff]  ;;  %v379_v27 = vld [vmem:[%s3533_s28 + $0xb48] sm:$0xff] }
  0x43   : > { %v381_v28 = vld [vmem:[%s3533_s28 + $0xb80] sm:$0xff]  ;;  %378 = vst [vmem:[%s3538_s29 + $0x2d0] sm:$0xff] %v377_v26  ;;  %380 = vst [vmem:[%s3538_s29 + $0x2d8] sm:$0xff] %v379_v27  ;;  %v383_v29 = vld [vmem:[%s3533_s28 + $0xb88] sm:$0xff] }
  0x44   : > { %382 = vst [vmem:[%s3538_s29 + $0x2e0] sm:$0xff] %v381_v28  ;;  %v385_v30 = vld [vmem:[%s3533_s28 + $0xbc0] sm:$0xff]  ;;  %v387_v31 = vld [vmem:[%s3533_s28 + $0xbc8] sm:$0xff]  ;;  %384 = vst [vmem:[%s3538_s29 + $0x2e8] sm:$0xff] %v383_v29 }
  0x45   : > { %386 = vst [vmem:[%s3538_s29 + $0x2f0] sm:$0xff] %v385_v30  ;;  %388 = vst [vmem:[%s3538_s29 + $0x2f8] sm:$0xff] %v387_v31  ;;  %v389_v32 = vld [vmem:[%s3533_s28 + $0xc00] sm:$0xff]  ;;  %v391_v33 = vld [vmem:[%s3533_s28 + $0xc08] sm:$0xff] }
  0x46   : > { %v393_v34 = vld [vmem:[%s3533_s28 + $0xc40] sm:$0xff]  ;;  %390 = vst [vmem:[%s3538_s29 + $0x300] sm:$0xff] %v389_v32  ;;  %392 = vst [vmem:[%s3538_s29 + $0x308] sm:$0xff] %v391_v33  ;;  %v395_v35 = vld [vmem:[%s3533_s28 + $0xc48] sm:$0xff] }
  0x47   : > { %394 = vst [vmem:[%s3538_s29 + $0x310] sm:$0xff] %v393_v34  ;;  %v397_v36 = vld [vmem:[%s3533_s28 + $0xc80] sm:$0xff]  ;;  %v399_v37 = vld [vmem:[%s3533_s28 + $0xc88] sm:$0xff]  ;;  %396 = vst [vmem:[%s3538_s29 + $0x318] sm:$0xff] %v395_v35 }
  0x48   : > { %398 = vst [vmem:[%s3538_s29 + $0x320] sm:$0xff] %v397_v36  ;;  %400 = vst [vmem:[%s3538_s29 + $0x328] sm:$0xff] %v399_v37  ;;  %v401_v38 = vld [vmem:[%s3533_s28 + $0xcc0] sm:$0xff]  ;;  %v403_v39 = vld [vmem:[%s3533_s28 + $0xcc8] sm:$0xff] }
  0x49   : > { %v405_v40 = vld [vmem:[%s3533_s28 + $0xd00] sm:$0xff]  ;;  %402 = vst [vmem:[%s3538_s29 + $0x330] sm:$0xff] %v401_v38  ;;  %404 = vst [vmem:[%s3538_s29 + $0x338] sm:$0xff] %v403_v39  ;;  %v407_v41 = vld [vmem:[%s3533_s28 + $0xd08] sm:$0xff] }
  0x4a   : > { %406 = vst [vmem:[%s3538_s29 + $0x340] sm:$0xff] %v405_v40  ;;  %v409_v42 = vld [vmem:[%s3533_s28 + $0xd40] sm:$0xff]  ;;  %v411_v43 = vld [vmem:[%s3533_s28 + $0xd48] sm:$0xff]  ;;  %408 = vst [vmem:[%s3538_s29 + $0x348] sm:$0xff] %v407_v41 }
  0x4b   : > { %410 = vst [vmem:[%s3538_s29 + $0x350] sm:$0xff] %v409_v42  ;;  %412 = vst [vmem:[%s3538_s29 + $0x358] sm:$0xff] %v411_v43  ;;  %v413_v44 = vld [vmem:[%s3533_s28 + $0xd80] sm:$0xff]  ;;  %v415_v45 = vld [vmem:[%s3533_s28 + $0xd88] sm:$0xff] }
  0x4c   : > { %v417_v46 = vld [vmem:[%s3533_s28 + $0xdc0] sm:$0xff]  ;;  %414 = vst [vmem:[%s3538_s29 + $0x360] sm:$0xff] %v413_v44  ;;  %416 = vst [vmem:[%s3538_s29 + $0x368] sm:$0xff] %v415_v45  ;;  %v419_v47 = vld [vmem:[%s3533_s28 + $0xdc8] sm:$0xff] }
  0x4d   : > { %418 = vst [vmem:[%s3538_s29 + $0x370] sm:$0xff] %v417_v46  ;;  %v421_v48 = vld [vmem:[%s3533_s28 + $0xe00] sm:$0xff]  ;;  %v423_v49 = vld [vmem:[%s3533_s28 + $0xe08] sm:$0xff]  ;;  %420 = vst [vmem:[%s3538_s29 + $0x378] sm:$0xff] %v419_v47 }
  0x4e   : > { %422 = vst [vmem:[%s3538_s29 + $0x380] sm:$0xff] %v421_v48  ;;  %424 = vst [vmem:[%s3538_s29 + $0x388] sm:$0xff] %v423_v49  ;;  %v425_v50 = vld [vmem:[%s3533_s28 + $0xe40] sm:$0xff]  ;;  %v427_v51 = vld [vmem:[%s3533_s28 + $0xe48] sm:$0xff] }
  0x4f   : > { %v429_v52 = vld [vmem:[%s3533_s28 + $0xe80] sm:$0xff]  ;;  %426 = vst [vmem:[%s3538_s29 + $0x390] sm:$0xff] %v425_v50  ;;  %428 = vst [vmem:[%s3538_s29 + $0x398] sm:$0xff] %v427_v51  ;;  %v431_v53 = vld [vmem:[%s3533_s28 + $0xe88] sm:$0xff] }
  0x50   : > { %430 = vst [vmem:[%s3538_s29 + $0x3a0] sm:$0xff] %v429_v52  ;;  %v433_v54 = vld [vmem:[%s3533_s28 + $0xec0] sm:$0xff]  ;;  %v435_v55 = vld [vmem:[%s3533_s28 + $0xec8] sm:$0xff]  ;;  %432 = vst [vmem:[%s3538_s29 + $0x3a8] sm:$0xff] %v431_v53 }
  0x51   : > { %434 = vst [vmem:[%s3538_s29 + $0x3b0] sm:$0xff] %v433_v54  ;;  %436 = vst [vmem:[%s3538_s29 + $0x3b8] sm:$0xff] %v435_v55  ;;  %v437_v56 = vld [vmem:[%s3533_s28 + $0xf00] sm:$0xff]  ;;  %v439_v57 = vld [vmem:[%s3533_s28 + $0xf08] sm:$0xff] }
  0x52   : > { %v441_v58 = vld [vmem:[%s3533_s28 + $0xf40] sm:$0xff]  ;;  %438 = vst [vmem:[%s3538_s29 + $0x3c0] sm:$0xff] %v437_v56  ;;  %440 = vst [vmem:[%s3538_s29 + $0x3c8] sm:$0xff] %v439_v57  ;;  %v443_v59 = vld [vmem:[%s3533_s28 + $0xf48] sm:$0xff] }
  0x53   : > { %442 = vst [vmem:[%s3538_s29 + $0x3d0] sm:$0xff] %v441_v58  ;;  %v445_v60 = vld [vmem:[%s3533_s28 + $0xf80] sm:$0xff]  ;;  %v447_v61 = vld [vmem:[%s3533_s28 + $0xf88] sm:$0xff]  ;;  %444 = vst [vmem:[%s3538_s29 + $0x3d8] sm:$0xff] %v443_v59 }
  0x54   : > { %446 = vst [vmem:[%s3538_s29 + $0x3e0] sm:$0xff] %v445_v60  ;;  %448 = vst [vmem:[%s3538_s29 + $0x3e8] sm:$0xff] %v447_v61  ;;  %v449_v62 = vld [vmem:[%s3533_s28 + $0xfc0] sm:$0xff]  ;;  %v451_v63 = vld [vmem:[%s3533_s28 + $0xfc8] sm:$0xff] }
  0x55   : > { %450 = vst [vmem:[%s3538_s29 + $0x3f0] sm:$0xff] %v449_v62  ;;  %452 = vst [vmem:[%s3538_s29 + $0x3f8] sm:$0xff] %v451_v63 }
  0x56 PF: > { %p2846_p8 = scmp.ge.s32.totalorder %s3463_s16, 1  ;;  %p465_p9 = scmp.lt.s32.totalorder %s3463_s16, 5 }
  0x58   : > { %p466_p10 = pnand %p2846_p8, %p465_p9 }
  0x59   : > { %s472_s30 = sand.u32 (!%p466_p10), 1, %s3447_s12   ;;  %v3283_v0 = vld [vmem:[%s4223_s0 + $0x4] ss:$16 sps:$4 sm:$0xff] (!%p466_p10)   ;;  %s2849_s25 = sshll.u32 (!%p466_p10), %s3455_s14, 2 }
  0x5a   : > { %469 = sbr.rel (%p466_p10) target bundleno = 507 (0x1fb), region = 51  ;;  %s2847_s4 = sshll.u32 (!%p466_p10), %s472_s30, 10  ;;  %1653 = vmatprep.mubr.bf16.mxu0 (!%p466_p10), %v3283_v0  ;;  %1879 = vmatprep.mubr.bf16.mxu1 (!%p466_p10), %v3283_v0 }
  0x5b   : > { %s3801_s7 = scalar_lea.vmem (!%p466_p10), [#allocation3], %s2847_s4  ;;  %p523_p11 = scmp.lt.s32.totalorder (!%p466_p10), %s2849_s25, 15 }
  0x5c   : > { %v3185_v1 = vld [vmem:[%s3801_s7 + $0x4] ss:$16 sps:$4 sm:$0xff] (!%p466_p10)   ;;  %v3187_v2 = vld [vmem:[%s3801_s7 + $0xc] ss:$16 sps:$4 sm:$0xff] (!%p466_p10)   ;;  %v3189_v3 = vld [vmem:[%s3801_s7] ss:$16 sps:$4 sm:$0xff] (!%p466_p10)  }
  0x5d   : > { %1621 = vmatprep.subr.bf16.mxu0 (!%p466_p10), %v3185_v1  ;;  %v3190_v4 = vld [vmem:[%s3801_s7 + $0x8] ss:$16 sps:$4 sm:$0xff] (!%p466_p10)   ;;  %1847 = vmatprep.subr.bf16.mxu1 (!%p466_p10), %v3187_v2  ;;  %v3191_v5 = vld [vmem:[%s3801_s7 + $0x24] ss:$16 sps:$4 sm:$0xff] (!%p466_p10)   ;;  %v3193_v6 = vld [vmem:[%s3801_s7 + $0x2c] ss:$16 sps:$4 sm:$0xff] (!%p466_p10)  }
  0x5e   : > { %1622 = vmatpush1.bf16.msra.mxu0 (!%p466_p10), %v3189_v3  ;;  %1848 = vmatpush1.bf16.msra.mxu1 (!%p466_p10), %v3190_v4  ;;  %v3195_v7 = vld [vmem:[%s3801_s7 + $0x20] ss:$16 sps:$4 sm:$0xff] (!%p466_p10)   ;;  %v3196_v8 = vld [vmem:[%s3801_s7 + $0x28] ss:$16 sps:$4 sm:$0xff] (!%p466_p10)   ;;  %v3197_v9 = vld [vmem:[%s3801_s7 + $0x44] ss:$16 sps:$4 sm:$0xff] (!%p466_p10)  }
  0x5f   : > { %1623 = vmatprep.subr.bf16.mxu0 (!%p466_p10), %v3191_v5  ;;  %1849 = vmatprep.subr.bf16.mxu1 (!%p466_p10), %v3193_v6  ;;  %v3199_v10 = vld [vmem:[%s3801_s7 + $0x4c] ss:$16 sps:$4 sm:$0xff] (!%p466_p10)   ;;  %v3201_v11 = vld [vmem:[%s3801_s7 + $0x40] ss:$16 sps:$4 sm:$0xff] (!%p466_p10)   ;;  %v3202_v12 = vld [vmem:[%s3801_s7 + $0x48] ss:$16 sps:$4 sm:$0xff] (!%p466_p10)  }
  0x60   : > { %v3203_v13 = vld [vmem:[%s3801_s7 + $0x64] ss:$16 sps:$4 sm:$0xff] (!%p466_p10)   ;;  %v3205_v14 = vld [vmem:[%s3801_s7 + $0x6c] ss:$16 sps:$4 sm:$0xff] (!%p466_p10)   ;;  %v3207_v15 = vld [vmem:[%s3801_s7 + $0x60] ss:$16 sps:$4 sm:$0xff] (!%p466_p10)  }
  0x61   : > { %v3208_v16 = vld [vmem:[%s3801_s7 + $0x68] ss:$16 sps:$4 sm:$0xff]   ;;  %v3209_v17 = vld [vmem:[%s3801_s7 + $0x84] ss:$16 sps:$4 sm:$0xff]   ;;  %v3211_v18 = vld [vmem:[%s3801_s7 + $0x8c] ss:$16 sps:$4 sm:$0xff]  }
  0x62   : > { %1624 = vmatpush1.bf16.msra.mxu0 %v3195_v7  ;;  %1850 = vmatpush1.bf16.msra.mxu1 %v3196_v8  ;;  %v3213_v19 = vld [vmem:[%s3801_s7 + $0x80] ss:$16 sps:$4 sm:$0xff]   ;;  %v3214_v20 = vld [vmem:[%s3801_s7 + $0x88] ss:$16 sps:$4 sm:$0xff]   ;;  %v3215_v21 = vld [vmem:[%s3801_s7 + $0xa4] ss:$16 sps:$4 sm:$0xff]  }
  0x63   : > { %1625 = vmatprep.subr.bf16.mxu0 %v3197_v9  ;;  %1851 = vmatprep.subr.bf16.mxu1 %v3199_v10  ;;  %v3217_v22 = vld [vmem:[%s3801_s7 + $0xac] ss:$16 sps:$4 sm:$0xff]   ;;  %v3219_v23 = vld [vmem:[%s3801_s7 + $0xa0] ss:$16 sps:$4 sm:$0xff]   ;;  %v3220_v24 = vld [vmem:[%s3801_s7 + $0xa8] ss:$16 sps:$4 sm:$0xff]  }
  0x64   : > { %v3221_v25 = vld [vmem:[%s3801_s7 + $0xc4] ss:$16 sps:$4 sm:$0xff]   ;;  %v3223_v26 = vld [vmem:[%s3801_s7 + $0xcc] ss:$16 sps:$4 sm:$0xff]   ;;  %v3225_v27 = vld [vmem:[%s3801_s7 + $0xc0] ss:$16 sps:$4 sm:$0xff]  }
  0x65   : > { %v3226_v28 = vld [vmem:[%s3801_s7 + $0xc8] ss:$16 sps:$4 sm:$0xff]   ;;  %v3227_v29 = vld [vmem:[%s3801_s7 + $0xe4] ss:$16 sps:$4 sm:$0xff]   ;;  %v3229_v30 = vld [vmem:[%s3801_s7 + $0xec] ss:$16 sps:$4 sm:$0xff]  }
  0x66   : > { %1626 = vmatpush1.bf16.msra.mxu0 %v3201_v11  ;;  %1852 = vmatpush1.bf16.msra.mxu1 %v3202_v12  ;;  %v3231_v31 = vld [vmem:[%s3801_s7 + $0xe0] ss:$16 sps:$4 sm:$0xff]   ;;  %v3232_v32 = vld [vmem:[%s3801_s7 + $0xe8] ss:$16 sps:$4 sm:$0xff]   ;;  %v3233_v33 = vld [vmem:[%s3801_s7 + $0x104] ss:$16 sps:$4 sm:$0xff]  }
  0x67   : > { %1627 = vmatprep.subr.bf16.mxu0 %v3203_v13  ;;  %1853 = vmatprep.subr.bf16.mxu1 %v3205_v14  ;;  %v3235_v34 = vld [vmem:[%s3801_s7 + $0x10c] ss:$16 sps:$4 sm:$0xff]   ;;  %v3237_v35 = vld [vmem:[%s3801_s7 + $0x100] ss:$16 sps:$4 sm:$0xff]   ;;  %v3238_v36 = vld [vmem:[%s3801_s7 + $0x108] ss:$16 sps:$4 sm:$0xff]  }
  0x68   : > { %v3239_v37 = vld [vmem:[%s3801_s7 + $0x124] ss:$16 sps:$4 sm:$0xff]   ;;  %v3241_v38 = vld [vmem:[%s3801_s7 + $0x12c] ss:$16 sps:$4 sm:$0xff]   ;;  %v3243_v39 = vld [vmem:[%s3801_s7 + $0x120] ss:$16 sps:$4 sm:$0xff]  }
  0x69   : > { %v3244_v40 = vld [vmem:[%s3801_s7 + $0x128] ss:$16 sps:$4 sm:$0xff]   ;;  %v3245_v41 = vld [vmem:[%s3801_s7 + $0x144] ss:$16 sps:$4 sm:$0xff]   ;;  %v3247_v42 = vld [vmem:[%s3801_s7 + $0x14c] ss:$16 sps:$4 sm:$0xff]  }
  0x6a   : > { %1628 = vmatpush1.bf16.msra.mxu0 %v3207_v15  ;;  %1854 = vmatpush1.bf16.msra.mxu1 %v3208_v16  ;;  %v3249_v43 = vld [vmem:[%s3801_s7 + $0x140] ss:$16 sps:$4 sm:$0xff]   ;;  %v3250_v44 = vld [vmem:[%s3801_s7 + $0x148] ss:$16 sps:$4 sm:$0xff]   ;;  %v3251_v45 = vld [vmem:[%s3801_s7 + $0x164] ss:$16 sps:$4 sm:$0xff]  }
  0x6b   : > { %1629 = vmatprep.subr.bf16.mxu0 %v3209_v17  ;;  %1855 = vmatprep.subr.bf16.mxu1 %v3211_v18  ;;  %v3253_v46 = vld [vmem:[%s3801_s7 + $0x16c] ss:$16 sps:$4 sm:$0xff]   ;;  %v3255_v47 = vld [vmem:[%s3801_s7 + $0x160] ss:$16 sps:$4 sm:$0xff]   ;;  %v3256_v48 = vld [vmem:[%s3801_s7 + $0x168] ss:$16 sps:$4 sm:$0xff]  }
  0x6c   : > { %v3257_v49 = vld [vmem:[%s3801_s7 + $0x184] ss:$16 sps:$4 sm:$0xff]   ;;  %v3259_v50 = vld [vmem:[%s3801_s7 + $0x18c] ss:$16 sps:$4 sm:$0xff]   ;;  %v3261_v51 = vld [vmem:[%s3801_s7 + $0x180] ss:$16 sps:$4 sm:$0xff]  }
  0x6d   : > { %v3262_v52 = vld [vmem:[%s3801_s7 + $0x188] ss:$16 sps:$4 sm:$0xff]   ;;  %v3263_v53 = vld [vmem:[%s3801_s7 + $0x1a4] ss:$16 sps:$4 sm:$0xff]   ;;  %v3265_v54 = vld [vmem:[%s3801_s7 + $0x1ac] ss:$16 sps:$4 sm:$0xff]  }
  0x6e   : > { %1630 = vmatpush1.bf16.msra.mxu0 %v3213_v19  ;;  %1856 = vmatpush1.bf16.msra.mxu1 %v3214_v20  ;;  %v3267_v55 = vld [vmem:[%s3801_s7 + $0x1a0] ss:$16 sps:$4 sm:$0xff]   ;;  %v3268_v56 = vld [vmem:[%s3801_s7 + $0x1a8] ss:$16 sps:$4 sm:$0xff]   ;;  %v3269_v57 = vld [vmem:[%s3801_s7 + $0x1c4] ss:$16 sps:$4 sm:$0xff]  }
  0x6f   : > { %1631 = vmatprep.subr.bf16.mxu0 %v3215_v21  ;;  %1857 = vmatprep.subr.bf16.mxu1 %v3217_v22  ;;  %v3271_v58 = vld [vmem:[%s3801_s7 + $0x1cc] ss:$16 sps:$4 sm:$0xff]   ;;  %v3273_v59 = vld [vmem:[%s3801_s7 + $0x1c0] ss:$16 sps:$4 sm:$0xff]   ;;  %v3274_v60 = vld [vmem:[%s3801_s7 + $0x1c8] ss:$16 sps:$4 sm:$0xff]  }
  0x70   : > { %v3275_v61 = vld [vmem:[%s3801_s7 + $0x1e4] ss:$16 sps:$4 sm:$0xff]   ;;  %v3277_v62 = vld [vmem:[%s3801_s7 + $0x1ec] ss:$16 sps:$4 sm:$0xff]   ;;  %v3279_v63 = vld [vmem:[%s3801_s7 + $0x1e0] ss:$16 sps:$4 sm:$0xff]  }
  0x71   : > { %v3280_v0 = vld [vmem:[%s3801_s7 + $0x1e8] ss:$16 sps:$4 sm:$0xff]   ;;  %v3286_v1 = vld [vmem:[%s3801_s7 + $0x204] ss:$16 sps:$4 sm:$0xff]   ;;  %v3289_v2 = vld [vmem:[%s3801_s7 + $0x20c] ss:$16 sps:$4 sm:$0xff]  }
  0x72   : > { %1632 = vmatpush1.bf16.msra.mxu0 %v3219_v23  ;;  %1858 = vmatpush1.bf16.msra.mxu1 %v3220_v24  ;;  %v3281_v3 = vld [vmem:[%s4223_s0] ss:$16 sps:$4 sm:$0xff]   ;;  %v3287_v5 = vld [vmem:[%s3801_s7 + $0x208] ss:$16 sps:$4 sm:$0xff]   ;;  %v3292_v6 = vld [vmem:[%s3801_s7 + $0x224] ss:$16 sps:$4 sm:$0xff]  }
  0x73   : > { %1633 = vmatprep.subr.bf16.mxu0 %v3221_v25  ;;  %1859 = vmatprep.subr.bf16.mxu1 %v3223_v26  ;;  %v3284_v4 = vld [vmem:[%s3801_s7 + $0x200] ss:$16 sps:$4 sm:$0xff]   ;;  %v3295_v7 = vld [vmem:[%s3801_s7 + $0x22c] ss:$16 sps:$4 sm:$0xff]   ;;  %v3296_v8 = vld [vmem:[%s4223_s0 + $0x24] ss:$16 sps:$4 sm:$0xff]  }
  0x74   : > { %v3290_v9 = vld [vmem:[%s3801_s7 + $0x220] ss:$16 sps:$4 sm:$0xff]   ;;  %v3293_v10 = vld [vmem:[%s3801_s7 + $0x228] ss:$16 sps:$4 sm:$0xff]   ;;  %v3301_v11 = vld [vmem:[%s3801_s7 + $0x244] ss:$16 sps:$4 sm:$0xff]  }
  0x75   : > { %v3304_v12 = vld [vmem:[%s3801_s7 + $0x24c] ss:$16 sps:$4 sm:$0xff]   ;;  %v3298_v13 = vld [vmem:[%s4223_s0 + $0x20] ss:$16 sps:$4 sm:$0xff]   ;;  %v3302_v15 = vld [vmem:[%s3801_s7 + $0x248] ss:$16 sps:$4 sm:$0xff]  }
  0x76   : > { %1634 = vmatpush1.bf16.msra.mxu0 %v3225_v27  ;;  %1860 = vmatpush1.bf16.msra.mxu1 %v3226_v28  ;;  %v3299_v14 = vld [vmem:[%s3801_s7 + $0x240] ss:$16 sps:$4 sm:$0xff]   ;;  %v3307_v16 = vld [vmem:[%s3801_s7 + $0x264] ss:$16 sps:$4 sm:$0xff]   ;;  %v3310_v17 = vld [vmem:[%s3801_s7 + $0x26c] ss:$16 sps:$4 sm:$0xff]  }
  0x77   : > { %1635 = vmatprep.subr.bf16.mxu0 %v3227_v29  ;;  %1861 = vmatprep.subr.bf16.mxu1 %v3229_v30  ;;  %v3311_v18 = vld [vmem:[%s4223_s0 + $0x44] ss:$16 sps:$4 sm:$0xff]   ;;  %v3305_v19 = vld [vmem:[%s3801_s7 + $0x260] ss:$16 sps:$4 sm:$0xff]   ;;  %v3308_v20 = vld [vmem:[%s3801_s7 + $0x268] ss:$16 sps:$4 sm:$0xff]  }
  0x78   : > { %v3316_v21 = vld [vmem:[%s3801_s7 + $0x284] ss:$16 sps:$4 sm:$0xff]   ;;  %v3319_v22 = vld [vmem:[%s3801_s7 + $0x28c] ss:$16 sps:$4 sm:$0xff]   ;;  %v3313_v23 = vld [vmem:[%s4223_s0 + $0x40] ss:$16 sps:$4 sm:$0xff]  }
  0x79   : > { %v3314_v24 = vld [vmem:[%s3801_s7 + $0x280] ss:$16 sps:$4 sm:$0xff]   ;;  %v3317_v25 = vld [vmem:[%s3801_s7 + $0x288] ss:$16 sps:$4 sm:$0xff]   ;;  %v3322_v26 = vld [vmem:[%s3801_s7 + $0x2a4] ss:$16 sps:$4 sm:$0xff]  }
  0x7a   : > { %1636 = vmatpush1.bf16.msra.mxu0 %v3231_v31  ;;  %1862 = vmatpush1.bf16.msra.mxu1 %v3232_v32  ;;  %v3325_v27 = vld [vmem:[%s3801_s7 + $0x2ac] ss:$16 sps:$4 sm:$0xff]   ;;  %v3326_v28 = vld [vmem:[%s4223_s0 + $0x64] ss:$16 sps:$4 sm:$0xff]   ;;  %v3320_v29 = vld [vmem:[%s3801_s7 + $0x2a0] ss:$16 sps:$4 sm:$0xff]  }
  0x7b   : > { %1637 = vmatprep.subr.bf16.mxu0 %v3233_v33  ;;  %1863 = vmatprep.subr.bf16.mxu1 %v3235_v34  ;;  %v3323_v30 = vld [vmem:[%s3801_s7 + $0x2a8] ss:$16 sps:$4 sm:$0xff]   ;;  %v3331_v31 = vld [vmem:[%s3801_s7 + $0x2c4] ss:$16 sps:$4 sm:$0xff]   ;;  %v3334_v32 = vld [vmem:[%s3801_s7 + $0x2cc] ss:$16 sps:$4 sm:$0xff]  }
  0x7c   : > { %v3328_v33 = vld [vmem:[%s4223_s0 + $0x60] ss:$16 sps:$4 sm:$0xff]   ;;  %s4235_s25 = smov (!%p523_p11, %s2849_s25), 15  ;;  %s2848_s29 = sshll.u32 %s472_s30, 8 }
  0x7d   : > { %v3329_v34 = vld [vmem:[%s3801_s7 + $0x2c0] ss:$16 sps:$4 sm:$0xff]   ;;  %s525_s28 = scalar_lea.vmem %s4225_s2, %s4235_s25  ;;  %s4046_s12 = scalar_lea.vmem [#allocation4], %s2848_s29 }
  0x7e   : > { %1638 = vmatpush1.bf16.msra.mxu0 %v3237_v35  ;;  %1864 = vmatpush1.bf16.msra.mxu1 %v3238_v36  ;;  %v3332_v35 = vld [vmem:[%s3801_s7 + $0x2c8] ss:$16 sps:$4 sm:$0xff]   ;;  %v3337_v36 = vld [vmem:[%s3801_s7 + $0x2e4] ss:$16 sps:$4 sm:$0xff]   ;;  %s3080_s30 = sshll.u32 (%p3520_p6), %s3455_s14, 4 }
  0x7f   : > { %1639 = vmatprep.subr.bf16.mxu0 %v3239_v37  ;;  %1865 = vmatprep.subr.bf16.mxu1 %v3241_v38  ;;  %v3340_v37 = vld [vmem:[%s3801_s7 + $0x2ec] ss:$16 sps:$4 sm:$0xff]   ;;  %v3341_v38 = vld [vmem:[%s4223_s0 + $0x84] ss:$16 sps:$4 sm:$0xff]   ;;  %s4145_s6 = scalar_lea.vmem (%p3520_p6), %s4226_s3, %s3080_s30 }
  0x82   : > { %1640 = vmatpush1.bf16.msra.mxu0 %v3243_v39  ;;  %1866 = vmatpush1.bf16.msra.mxu1 %v3244_v40  ;;  %v3335_v39 = vld [vmem:[%s3801_s7 + $0x2e0] ss:$16 sps:$4 sm:$0xff]   ;;  %v3338_v40 = vld [vmem:[%s3801_s7 + $0x2e8] ss:$16 sps:$4 sm:$0xff]  }
  0x83   : > { %1641 = vmatprep.subr.bf16.mxu0 %v3245_v41  ;;  %1867 = vmatprep.subr.bf16.mxu1 %v3247_v42  ;;  %v3346_v41 = vld [vmem:[%s3801_s7 + $0x304] ss:$16 sps:$4 sm:$0xff]   ;;  %v3349_v42 = vld [vmem:[%s3801_s7 + $0x30c] ss:$16 sps:$4 sm:$0xff]  }
  0x86   : > { %1642 = vmatpush1.bf16.msra.mxu0 %v3249_v43  ;;  %1868 = vmatpush1.bf16.msra.mxu1 %v3250_v44  ;;  %v3343_v43 = vld [vmem:[%s4223_s0 + $0x80] ss:$16 sps:$4 sm:$0xff]  }
  0x87   : > { %1643 = vmatprep.subr.bf16.mxu0 %v3251_v45  ;;  %1869 = vmatprep.subr.bf16.mxu1 %v3253_v46  ;;  %v3344_v44 = vld [vmem:[%s3801_s7 + $0x300] ss:$16 sps:$4 sm:$0xff]   ;;  %v3347_v45 = vld [vmem:[%s3801_s7 + $0x308] ss:$16 sps:$4 sm:$0xff]   ;;  %v3352_v46 = vld [vmem:[%s3801_s7 + $0x324] ss:$16 sps:$4 sm:$0xff]  }
  0x8a   : > { %1644 = vmatpush1.bf16.msra.mxu0 %v3255_v47  ;;  %1870 = vmatpush1.bf16.msra.mxu1 %v3256_v48  ;;  %v3355_v47 = vld [vmem:[%s3801_s7 + $0x32c] ss:$16 sps:$4 sm:$0xff]   ;;  %v3356_v48 = vld [vmem:[%s4223_s0 + $0xa4] ss:$16 sps:$4 sm:$0xff]  }
  0x8b   : > { %1645 = vmatprep.subr.bf16.mxu0 %v3257_v49  ;;  %1871 = vmatprep.subr.bf16.mxu1 %v3259_v50  ;;  %v3350_v49 = vld [vmem:[%s3801_s7 + $0x320] ss:$16 sps:$4 sm:$0xff]   ;;  %v3353_v50 = vld [vmem:[%s3801_s7 + $0x328] ss:$16 sps:$4 sm:$0xff]  }
  0x8e   : > { %1646 = vmatpush1.bf16.msra.mxu0 %v3261_v51  ;;  %1872 = vmatpush1.bf16.msra.mxu1 %v3262_v52  ;;  %v3361_v51 = vld [vmem:[%s3801_s7 + $0x344] ss:$16 sps:$4 sm:$0xff]   ;;  %v3364_v52 = vld [vmem:[%s3801_s7 + $0x34c] ss:$16 sps:$4 sm:$0xff]  }
  0x8f   : > { %1647 = vmatprep.subr.bf16.mxu0 %v3263_v53  ;;  %1873 = vmatprep.subr.bf16.mxu1 %v3265_v54  ;;  %v3358_v53 = vld [vmem:[%s4223_s0 + $0xa0] ss:$16 sps:$4 sm:$0xff]  }
  0x90   : > { %v3359_v54 = vld [vmem:[%s3801_s7 + $0x340] ss:$16 sps:$4 sm:$0xff]  }
  0x92   : > { %1648 = vmatpush1.bf16.msra.mxu0 %v3267_v55  ;;  %1874 = vmatpush1.bf16.msra.mxu1 %v3268_v56  ;;  %v3362_v55 = vld [vmem:[%s3801_s7 + $0x348] ss:$16 sps:$4 sm:$0xff]   ;;  %v3367_v56 = vld [vmem:[%s3801_s7 + $0x364] ss:$16 sps:$4 sm:$0xff]  }
  0x93   : > { %1649 = vmatprep.subr.bf16.mxu0 %v3269_v57  ;;  %1875 = vmatprep.subr.bf16.mxu1 %v3271_v58  ;;  %v3370_v57 = vld [vmem:[%s3801_s7 + $0x36c] ss:$16 sps:$4 sm:$0xff]   ;;  %v3371_v58 = vld [vmem:[%s4223_s0 + $0xc4] ss:$16 sps:$4 sm:$0xff]  }
  0x96   : > { %1650 = vmatpush1.bf16.msra.mxu0 %v3273_v59  ;;  %1876 = vmatpush1.bf16.msra.mxu1 %v3274_v60  ;;  %v3365_v59 = vld [vmem:[%s3801_s7 + $0x360] ss:$16 sps:$4 sm:$0xff]   ;;  %v3368_v60 = vld [vmem:[%s3801_s7 + $0x368] ss:$16 sps:$4 sm:$0xff]  }
  0x97   : > { %1651 = vmatprep.subr.bf16.mxu0 %v3275_v61  ;;  %1877 = vmatprep.subr.bf16.mxu1 %v3277_v62  ;;  %v3376_v61 = vld [vmem:[%s3801_s7 + $0x384] ss:$16 sps:$4 sm:$0xff]   ;;  %v3379_v62 = vld [vmem:[%s3801_s7 + $0x38c] ss:$16 sps:$4 sm:$0xff]  }
  0x9a   : > { %1652 = vmatpush1.bf16.msra.mxu0 %v3279_v63  ;;  %1878 = vmatpush1.bf16.msra.mxu1 %v3280_v0  ;;  %v3373_v63 = vld [vmem:[%s4223_s0 + $0xc0] ss:$16 sps:$4 sm:$0xff]  }
  0x9b   : > { %1734 = vmatprep.subr.bf16.mxu0 %v3286_v1  ;;  %1960 = vmatprep.subr.bf16.mxu1 %v3289_v2  ;;  %v3374_v0 = vld [vmem:[%s3801_s7 + $0x380] ss:$16 sps:$4 sm:$0xff]   ;;  %v3377_v1 = vld [vmem:[%s3801_s7 + $0x388] ss:$16 sps:$4 sm:$0xff]   ;;  %v3382_v2 = vld [vmem:[%s3801_s7 + $0x3a4] ss:$16 sps:$4 sm:$0xff]  }
  0x9d   : > { %1654 = vmatmul.mubr.bf16.vlgmr.msra.gmra.mrb[0].mxu0 %v3281_v3  ;;  %1880 = vmatmul.mubr.bf16.vlgmr.msra.gmra.mrb[0].mxu1 %v3281_v3  ;;  %v3385_v3 = vld [vmem:[%s3801_s7 + $0x3ac] ss:$16 sps:$4 sm:$0xff]  }
  0x9e   : > { %1735 = vmatpush1.bf16.msra.mxu0 %v3284_v4  ;;  %1961 = vmatpush1.bf16.msra.mxu1 %v3287_v5  ;;  %v3386_v4 = vld [vmem:[%s4223_s0 + $0xe4] ss:$16 sps:$4 sm:$0xff]   ;;  %v3380_v5 = vld [vmem:[%s3801_s7 + $0x3a0] ss:$16 sps:$4 sm:$0xff]  }
  0x9f   : > { %1736 = vmatprep.subr.bf16.mxu0 %v3292_v6  ;;  %1962 = vmatprep.subr.bf16.mxu1 %v3295_v7  ;;  %v3383_v6 = vld [vmem:[%s3801_s7 + $0x3a8] ss:$16 sps:$4 sm:$0xff]   ;;  %v3391_v7 = vld [vmem:[%s3801_s7 + $0x3c4] ss:$16 sps:$4 sm:$0xff]  }
  0xa0   : > { %1663 = vmatprep.mubr.bf16.mxu0 %v3296_v8  ;;  %1889 = vmatprep.mubr.bf16.mxu1 %v3296_v8  ;;  %v3394_v8 = vld [vmem:[%s3801_s7 + $0x3cc] ss:$16 sps:$4 sm:$0xff]  }
  0xa2   : > { %1737 = vmatpush1.bf16.msra.mxu0 %v3290_v9  ;;  %1963 = vmatpush1.bf16.msra.mxu1 %v3293_v10  ;;  %v3388_v9 = vld [vmem:[%s4223_s0 + $0xe0] ss:$16 sps:$4 sm:$0xff]  }
  0xa3   : > { %1738 = vmatprep.subr.bf16.mxu0 %v3301_v11  ;;  %1964 = vmatprep.subr.bf16.mxu1 %v3304_v12  ;;  %v3389_v10 = vld [vmem:[%s3801_s7 + $0x3c0] ss:$16 sps:$4 sm:$0xff]   ;;  %v3392_v11 = vld [vmem:[%s3801_s7 + $0x3c8] ss:$16 sps:$4 sm:$0xff]   ;;  %v3397_v12 = vld [vmem:[%s3801_s7 + $0x3e4] ss:$16 sps:$4 sm:$0xff]  }
  0xa5   : > { %1664 = vmatmul.mubr.bf16.gmra.mrb[4].mxu0 %v3298_v13  ;;  %1890 = vmatmul.mubr.bf16.gmra.mrb[4].mxu1 %v3298_v13  ;;  %v3400_v13 = vld [vmem:[%s3801_s7 + $0x3ec] ss:$16 sps:$4 sm:$0xff]  }
  0xa6   : > { %1739 = vmatpush1.bf16.msra.mxu0 %v3299_v14  ;;  %1965 = vmatpush1.bf16.msra.mxu1 %v3302_v15  ;;  %v3403_v14 = vld [vmem:[%s4223_s0 + $0xc] ss:$16 sps:$4 sm:$0xff]   ;;  %v3395_v15 = vld [vmem:[%s3801_s7 + $0x3e0] ss:$16 sps:$4 sm:$0xff]  }
  0xa7   : > { %1740 = vmatprep.subr.bf16.mxu0 %v3307_v16  ;;  %1966 = vmatprep.subr.bf16.mxu1 %v3310_v17  ;;  %v3398_v16 = vld [vmem:[%s3801_s7 + $0x3e8] ss:$16 sps:$4 sm:$0xff]  }
  0xa8   : > { %1673 = vmatprep.mubr.bf16.mxu0 %v3311_v18  ;;  %1899 = vmatprep.mubr.bf16.mxu1 %v3311_v18  ;;  %v3401_v17 = vld [vmem:[%s4223_s0 + $0x8] ss:$16 sps:$4 sm:$0xff]   ;;  %v3404_v18 = vld [vmem:[%s4223_s0 + $0x2c] ss:$16 sps:$4 sm:$0xff]  }
  0xaa   : > { %1741 = vmatpush1.bf16.msra.mxu0 %v3305_v19  ;;  %1967 = vmatpush1.bf16.msra.mxu1 %v3308_v20  ;;  %v3406_v19 = vld [vmem:[%s4223_s0 + $0x28] ss:$16 sps:$4 sm:$0xff]   ;;  %v3407_v20 = vld [vmem:[%s4223_s0 + $0x4c] ss:$16 sps:$4 sm:$0xff]  }
  0xab   : > { %1742 = vmatprep.subr.bf16.mxu0 %v3316_v21  ;;  %1968 = vmatprep.subr.bf16.mxu1 %v3319_v22  ;;  %v3409_v21 = vld [vmem:[%s4223_s0 + $0x48] ss:$16 sps:$4 sm:$0xff]   ;;  %v3410_v22 = vld [vmem:[%s4223_s0 + $0x6c] ss:$16 sps:$4 sm:$0xff]  }
  0xad   : > { %1674 = vmatmul.mubr.bf16.gmra.mrb[8].mxu0 %v3313_v23  ;;  %1900 = vmatmul.mubr.bf16.gmra.mrb[8].mxu1 %v3313_v23  ;;  %v3412_v23 = vld [vmem:[%s4223_s0 + $0x68] ss:$16 sps:$4 sm:$0xff]  }
  0xae   : > { %1743 = vmatpush1.bf16.msra.mxu0 %v3314_v24  ;;  %1969 = vmatpush1.bf16.msra.mxu1 %v3317_v25  ;;  %v3413_v24 = vld [vmem:[%s4223_s0 + $0x8c] ss:$16 sps:$4 sm:$0xff]   ;;  %v3415_v25 = vld [vmem:[%s4223_s0 + $0x88] ss:$16 sps:$4 sm:$0xff]  }
  0xaf   : > { %1744 = vmatprep.subr.bf16.mxu0 %v3322_v26  ;;  %1970 = vmatprep.subr.bf16.mxu1 %v3325_v27  ;;  %v3416_v26 = vld [vmem:[%s4223_s0 + $0xac] ss:$16 sps:$4 sm:$0xff]   ;;  %v3418_v27 = vld [vmem:[%s4223_s0 + $0xa8] ss:$16 sps:$4 sm:$0xff]  }
  0xb0   : > { %1683 = vmatprep.mubr.bf16.mxu0 %v3326_v28  ;;  %1909 = vmatprep.mubr.bf16.mxu1 %v3326_v28  ;;  %v3419_v28 = vld [vmem:[%s4223_s0 + $0xcc] ss:$16 sps:$4 sm:$0xff]  }
  0xb2   : > { %1745 = vmatpush1.bf16.msra.mxu0 %v3320_v29  ;;  %1971 = vmatpush1.bf16.msra.mxu1 %v3323_v30  ;;  %v3421_v29 = vld [vmem:[%s4223_s0 + $0xc8] ss:$16 sps:$4 sm:$0xff]   ;;  %v3422_v30 = vld [vmem:[%s4223_s0 + $0xec] ss:$16 sps:$4 sm:$0xff]  }
  0xb3   : > { %1746 = vmatprep.subr.bf16.mxu0 %v3331_v31  ;;  %1972 = vmatprep.subr.bf16.mxu1 %v3334_v32  ;;  %v3424_v31 = vld [vmem:[%s4223_s0 + $0xe8] ss:$16 sps:$4 sm:$0xff]   ;;  %v2270_v32 = vlaneseq }
  0xb5   : > { %1684 = vmatmul.mubr.bf16.gmra.mrb[12].mxu0 %v3328_v33  ;;  %1910 = vmatmul.mubr.bf16.gmra.mrb[12].mxu1 %v3328_v33  ;;  %v2271_v33 = vshrl.u32 %v2270_v32, 7 }
  0xb6   : > { %1747 = vmatpush1.bf16.msra.mxu0 %v3329_v34  ;;  %1973 = vmatpush1.bf16.msra.mxu1 %v3332_v35 }
  0xb7   : > { %1748 = vmatprep.subr.bf16.mxu0 %v3337_v36  ;;  %1974 = vmatprep.subr.bf16.mxu1 %v3340_v37  ;;  %v2272_v34 = vsub.s32 0, %v2271_v33  ;;  %v2280_v35 = vsub.s32 2, %v2271_v33  ;;  %v2268_v36 = vld [vmem:[%s525_s28] sm:$0xf]  ;;  %v2276_v37 = vsub.s32 1, %v2271_v33 }
  0xb8   : > { %1693 = vmatprep.mubr.bf16.mxu0 %v3341_v38  ;;  %1919 = vmatprep.mubr.bf16.mxu1 %v3341_v38  ;;  %v2284_v38 = vsub.s32 3, %v2271_v33 }
  0xba   : > { %1749 = vmatpush1.bf16.msra.mxu0 %v3335_v39  ;;  %1975 = vmatpush1.bf16.msra.mxu1 %v3338_v40  ;;  %v4028_v39 = vrot.slane %v2268_v36, %v2272_v34  ;;  %v4030_v40 = vrot.slane %v2268_v36, %v2280_v35 }
  0xbb   : > { %1750 = vmatprep.subr.bf16.mxu0 %v3346_v41  ;;  %1976 = vmatprep.subr.bf16.mxu1 %v3349_v42  ;;  %v4032_v41 = vrot.slane %v2268_v36, %v2276_v37  ;;  %v4034_v42 = vrot.slane %v2268_v36, %v2284_v38 }
  0xbd   : > { %1694 = vmatmul.mubr.bf16.gmra.mrb[16].mxu0 %v3343_v43  ;;  %1920 = vmatmul.mubr.bf16.gmra.mrb[16].mxu1 %v3343_v43 }
  0xbe   : > { %1751 = vmatpush1.bf16.msra.mxu0 %v3344_v44  ;;  %1977 = vmatpush1.bf16.msra.mxu1 %v3347_v45 }
  0xbf   : > { %1752 = vmatprep.subr.bf16.mxu0 %v3352_v46  ;;  %1978 = vmatprep.subr.bf16.mxu1 %v3355_v47 }
  0xc0   : > { %1703 = vmatprep.mubr.bf16.mxu0 %v3356_v48  ;;  %1929 = vmatprep.mubr.bf16.mxu1 %v3356_v48 }
  0xc2   : > { %1753 = vmatpush1.bf16.msra.mxu0 %v3350_v49  ;;  %1979 = vmatpush1.bf16.msra.mxu1 %v3353_v50 }
  0xc3   : > { %1754 = vmatprep.subr.bf16.mxu0 %v3361_v51  ;;  %1980 = vmatprep.subr.bf16.mxu1 %v3364_v52 }
  0xc5   : > { %1704 = vmatmul.mubr.bf16.gmra.mrb[20].mxu0 %v3358_v53  ;;  %1930 = vmatmul.mubr.bf16.gmra.mrb[20].mxu1 %v3358_v53 }
  0xc6   : > { %1755 = vmatpush1.bf16.msra.mxu0 %v3359_v54  ;;  %1981 = vmatpush1.bf16.msra.mxu1 %v3362_v55 }
  0xc7   : > { %1756 = vmatprep.subr.bf16.mxu0 %v3367_v56  ;;  %1982 = vmatprep.subr.bf16.mxu1 %v3370_v57 }
  0xc8   : > { %1713 = vmatprep.mubr.bf16.mxu0 %v3371_v58  ;;  %1939 = vmatprep.mubr.bf16.mxu1 %v3371_v58 }
  0xca   : > { %1757 = vmatpush1.bf16.msra.mxu0 %v3365_v59  ;;  %1983 = vmatpush1.bf16.msra.mxu1 %v3368_v60 }
  0xcb   : > { %1758 = vmatprep.subr.bf16.mxu0 %v3376_v61  ;;  %1984 = vmatprep.subr.bf16.mxu1 %v3379_v62 }
  0xcd   : > { %1714 = vmatmul.mubr.bf16.gmra.mrb[24].mxu0 %v3373_v63  ;;  %1940 = vmatmul.mubr.bf16.gmra.mrb[24].mxu1 %v3373_v63 }
  0xce   : > { %1759 = vmatpush1.bf16.msra.mxu0 %v3374_v0  ;;  %1985 = vmatpush1.bf16.msra.mxu1 %v3377_v1 }
  0xcf   : > { %1760 = vmatprep.subr.bf16.mxu0 %v3382_v2  ;;  %1986 = vmatprep.subr.bf16.mxu1 %v3385_v3 }
  0xd0   : > { %1723 = vmatprep.mubr.bf16.mxu0 %v3386_v4  ;;  %1949 = vmatprep.mubr.bf16.mxu1 %v3386_v4 }
  0xd2   : > { %1761 = vmatpush1.bf16.msra.mxu0 %v3380_v5  ;;  %1987 = vmatpush1.bf16.msra.mxu1 %v3383_v6 }
  0xd3   : > { %1762 = vmatprep.subr.bf16.mxu0 %v3391_v7  ;;  %1988 = vmatprep.subr.bf16.mxu1 %v3394_v8 }
  0xd5   : > { %1724 = vmatmul.mubr.bf16.gmra.mrb[28].mxu0 %v3388_v9  ;;  %1950 = vmatmul.mubr.bf16.gmra.mrb[28].mxu1 %v3388_v9 }
  0xd6   : > { %1763 = vmatpush1.bf16.msra.mxu0 %v3389_v10  ;;  %1989 = vmatpush1.bf16.msra.mxu1 %v3392_v11 }
  0xd7   : > { %1764 = vmatprep.subr.bf16.mxu0 %v3397_v12  ;;  %1990 = vmatprep.subr.bf16.mxu1 %v3400_v13 }
  0xd8   : > { %1766 = vmatprep.mubr.bf16.mxu0 %v3403_v14  ;;  %1992 = vmatprep.mubr.bf16.mxu1 %v3403_v14 }
  0xda   : > { %1765 = vmatpush1.bf16.msra.mxu0 %v3395_v15  ;;  %1991 = vmatpush1.bf16.msra.mxu1 %v3398_v16 }
  0xdd   : > { %1767 = vmatmul.mubr.bf16.vlgmr.msra.gmra.mrb[0].mxu0 %v3401_v17  ;;  %1993 = vmatmul.mubr.bf16.vlgmr.msra.gmra.mrb[0].mxu1 %v3401_v17 }
  0xde   : > { %1776 = vmatprep.mubr.bf16.mxu0 %v3404_v18  ;;  %2002 = vmatprep.mubr.bf16.mxu1 %v3404_v18 }
  0xe5   : > { %1777 = vmatmul.mubr.bf16.gmra.mrb[4].mxu0 %v3406_v19  ;;  %2003 = vmatmul.mubr.bf16.gmra.mrb[4].mxu1 %v3406_v19 }
  0xe6   : > { %1786 = vmatprep.mubr.bf16.mxu0 %v3407_v20  ;;  %2012 = vmatprep.mubr.bf16.mxu1 %v3407_v20 }
  0xed   : > { %1787 = vmatmul.mubr.bf16.gmra.mrb[8].mxu0 %v3409_v21  ;;  %2013 = vmatmul.mubr.bf16.gmra.mrb[8].mxu1 %v3409_v21 }
  0xee   : > { %1796 = vmatprep.mubr.bf16.mxu0 %v3410_v22  ;;  %2022 = vmatprep.mubr.bf16.mxu1 %v3410_v22 }
  0xf5   : > { %1797 = vmatmul.mubr.bf16.gmra.mrb[12].mxu0 %v3412_v23  ;;  %2023 = vmatmul.mubr.bf16.gmra.mrb[12].mxu1 %v3412_v23 }
  0xf6   : > { %1806 = vmatprep.mubr.bf16.mxu0 %v3413_v24  ;;  %2032 = vmatprep.mubr.bf16.mxu1 %v3413_v24 }
  0xfd   : > { %1807 = vmatmul.mubr.bf16.gmra.mrb[16].mxu0 %v3415_v25  ;;  %2033 = vmatmul.mubr.bf16.gmra.mrb[16].mxu1 %v3415_v25 }
  0xfe   : > { %1816 = vmatprep.mubr.bf16.mxu0 %v3416_v26  ;;  %2042 = vmatprep.mubr.bf16.mxu1 %v3416_v26 }
 0x105   : > { %1817 = vmatmul.mubr.bf16.gmra.mrb[20].mxu0 %v3418_v27  ;;  %2043 = vmatmul.mubr.bf16.gmra.mrb[20].mxu1 %v3418_v27 }
 0x106   : > { %1826 = vmatprep.mubr.bf16.mxu0 %v3419_v28  ;;  %2052 = vmatprep.mubr.bf16.mxu1 %v3419_v28 }
 0x10d   : > { %1827 = vmatmul.mubr.bf16.gmra.mrb[24].mxu0 %v3421_v29  ;;  %2053 = vmatmul.mubr.bf16.gmra.mrb[24].mxu1 %v3421_v29 }
 0x10e   : > { %1836 = vmatprep.mubr.bf16.mxu0 %v3422_v30  ;;  %2062 = vmatprep.mubr.bf16.mxu1 %v3422_v30 }
 0x115   : > { %1837 = vmatmul.mubr.bf16.gmra.mrb[28].mxu0 %v3424_v31  ;;  %2063 = vmatmul.mubr.bf16.gmra.mrb[28].mxu1 %v3424_v31 }
 0x1b0   : > { %v1768_v43 = vpop.f32.mrb[0].mxu0  ;;  %v1994_v44 = vpop.f32.mrb[0].mxu1 }
 0x1b1   : > { %v2290_v45 = vadd.f32 %v4028_v39, %v1768_v43  ;;  %v2292_v46 = vadd.f32 %v4030_v40, %v1994_v44  ;;  %v1770_v47 = vpop.f32.mrb[1].mxu0  ;;  %v1996_v48 = vpop.f32.mrb[1].mxu1 }
 0x1b2   : > { %v2291_v49 = vadd.f32 %v4032_v41, %v1770_v47  ;;  %v2293_v50 = vadd.f32 %v4034_v42, %v1996_v48  ;;  %v1772_v51 = vpop.f32.mrb[2].mxu0  ;;  %v1998_v52 = vpop.f32.mrb[2].mxu1 }
 0x1b3   : > { %v2354_v53 = vmax.f32 %v2290_v45, 0.0  ;;  %v2356_v54 = vmax.f32 %v2292_v46, 0.0  ;;  %v2294_v55 = vadd.f32 %v4028_v39, %v1772_v51  ;;  %v2296_v56 = vadd.f32 %v4030_v40, %v1998_v52  ;;  %v1774_v57 = vpop.f32.mrb[3].mxu0  ;;  %v2000_v58 = vpop.f32.mrb[3].mxu1 }
 0x1b4   : > { %v2355_v59 = vmax.f32 %v2291_v49, 0.0  ;;  %v2357_v60 = vmax.f32 %v2293_v50, 0.0  ;;  %v2295_v61 = vadd.f32 %v4032_v41, %v1774_v57  ;;  %v2297_v62 = vadd.f32 %v4034_v42, %v2000_v58 }
 0x1b5   : > { %v2358_v63 = vmax.f32 %v2294_v55, 0.0  ;;  %v2360_v0 = vmax.f32 %v2296_v56, 0.0 }
 0x1b6   : > { %v3048_v1 = vpack.c.bf16 %v2355_v59, %v2354_v53  ;;  %v3049_v2 = vpack.c.bf16 %v2357_v60, %v2356_v54  ;;  %v2359_v3 = vmax.f32 %v2295_v61, 0.0  ;;  %v2361_v4 = vmax.f32 %v2297_v62, 0.0 }
 0x1b8   : > { %2610 = vst [vmem:[%s4046_s12] sm:$0xff] %v3048_v1  ;;  %2611 = vst [vmem:[%s4046_s12 + $0x8] sm:$0xff] %v3049_v2  ;;  %v3050_v5 = vpack.c.bf16 %v2359_v3, %v2358_v63  ;;  %v3051_v6 = vpack.c.bf16 %v2361_v4, %v2360_v0  ;;  %v1778_v7 = vpop.f32.mrb[4].mxu0  ;;  %v2004_v8 = vpop.f32.mrb[4].mxu1 }
 0x1b9   : > { %v2298_v9 = vadd.f32 %v4028_v39, %v1778_v7  ;;  %v2300_v10 = vadd.f32 %v4030_v40, %v2004_v8  ;;  %v1780_v11 = vpop.f32.mrb[5].mxu0  ;;  %v2006_v12 = vpop.f32.mrb[5].mxu1 }
 0x1ba   : > { %2612 = vst [vmem:[%s4046_s12 + $0x10] sm:$0xff] %v3050_v5  ;;  %2613 = vst [vmem:[%s4046_s12 + $0x18] sm:$0xff] %v3051_v6  ;;  %v2299_v13 = vadd.f32 %v4032_v41, %v1780_v11  ;;  %v2301_v14 = vadd.f32 %v4034_v42, %v2006_v12  ;;  %v1782_v15 = vpop.f32.mrb[6].mxu0  ;;  %v2008_v16 = vpop.f32.mrb[6].mxu1 }
 0x1bb   : > { %v2362_v17 = vmax.f32 %v2298_v9, 0.0  ;;  %v2364_v18 = vmax.f32 %v2300_v10, 0.0  ;;  %v2302_v19 = vadd.f32 %v4028_v39, %v1782_v15  ;;  %v2304_v20 = vadd.f32 %v4030_v40, %v2008_v16  ;;  %v1784_v21 = vpop.f32.mrb[7].mxu0  ;;  %v2010_v22 = vpop.f32.mrb[7].mxu1 }
 0x1bc   : > { %v2363_v23 = vmax.f32 %v2299_v13, 0.0  ;;  %v2365_v24 = vmax.f32 %v2301_v14, 0.0  ;;  %v2303_v25 = vadd.f32 %v4032_v41, %v1784_v21  ;;  %v2305_v26 = vadd.f32 %v4034_v42, %v2010_v22 }
 0x1bd   : > { %v2366_v27 = vmax.f32 %v2302_v19, 0.0  ;;  %v2368_v28 = vmax.f32 %v2304_v20, 0.0 }
 0x1be   : > { %v3052_v29 = vpack.c.bf16 %v2363_v23, %v2362_v17  ;;  %v3053_v30 = vpack.c.bf16 %v2365_v24, %v2364_v18  ;;  %v2367_v31 = vmax.f32 %v2303_v25, 0.0  ;;  %v2369_v32 = vmax.f32 %v2305_v26, 0.0 }
 0x1c0   : > { %2614 = vst [vmem:[%s4046_s12 + $0x20] sm:$0xff] %v3052_v29  ;;  %2615 = vst [vmem:[%s4046_s12 + $0x28] sm:$0xff] %v3053_v30  ;;  %v3054_v33 = vpack.c.bf16 %v2367_v31, %v2366_v27  ;;  %v3055_v34 = vpack.c.bf16 %v2369_v32, %v2368_v28  ;;  %v1788_v35 = vpop.f32.mrb[8].mxu0  ;;  %v2014_v36 = vpop.f32.mrb[8].mxu1 }
 0x1c1   : > { %v2306_v37 = vadd.f32 %v4028_v39, %v1788_v35  ;;  %v2308_v38 = vadd.f32 %v4030_v40, %v2014_v36  ;;  %v1790_v43 = vpop.f32.mrb[9].mxu0  ;;  %v2016_v44 = vpop.f32.mrb[9].mxu1 }
 0x1c2   : > { %2616 = vst [vmem:[%s4046_s12 + $0x30] sm:$0xff] %v3054_v33  ;;  %2617 = vst [vmem:[%s4046_s12 + $0x38] sm:$0xff] %v3055_v34  ;;  %v2307_v45 = vadd.f32 %v4032_v41, %v1790_v43  ;;  %v2309_v46 = vadd.f32 %v4034_v42, %v2016_v44  ;;  %v1792_v47 = vpop.f32.mrb[10].mxu0  ;;  %v2018_v48 = vpop.f32.mrb[10].mxu1 }
 0x1c3   : > { %v2370_v49 = vmax.f32 %v2306_v37, 0.0  ;;  %v2372_v50 = vmax.f32 %v2308_v38, 0.0  ;;  %v2310_v51 = vadd.f32 %v4028_v39, %v1792_v47  ;;  %v2312_v52 = vadd.f32 %v4030_v40, %v2018_v48  ;;  %v1794_v53 = vpop.f32.mrb[11].mxu0  ;;  %v2020_v54 = vpop.f32.mrb[11].mxu1 }
 0x1c4   : > { %v2371_v55 = vmax.f32 %v2307_v45, 0.0  ;;  %v2373_v56 = vmax.f32 %v2309_v46, 0.0  ;;  %v2311_v57 = vadd.f32 %v4032_v41, %v1794_v53  ;;  %v2313_v58 = vadd.f32 %v4034_v42, %v2020_v54 }
 0x1c5   : > { %v2374_v59 = vmax.f32 %v2310_v51, 0.0  ;;  %v2376_v60 = vmax.f32 %v2312_v52, 0.0 }
 0x1c6   : > { %v3056_v61 = vpack.c.bf16 %v2371_v55, %v2370_v49  ;;  %v3057_v62 = vpack.c.bf16 %v2373_v56, %v2372_v50  ;;  %v2375_v63 = vmax.f32 %v2311_v57, 0.0  ;;  %v2377_v0 = vmax.f32 %v2313_v58, 0.0 }
 0x1c8   : > { %2618 = vst [vmem:[%s4046_s12 + $0x40] sm:$0xff] %v3056_v61  ;;  %2619 = vst [vmem:[%s4046_s12 + $0x48] sm:$0xff] %v3057_v62  ;;  %v3058_v1 = vpack.c.bf16 %v2375_v63, %v2374_v59  ;;  %v3059_v2 = vpack.c.bf16 %v2377_v0, %v2376_v60  ;;  %v1798_v3 = vpop.f32.mrb[12].mxu0  ;;  %v2024_v4 = vpop.f32.mrb[12].mxu1 }
 0x1c9   : > { %v2314_v5 = vadd.f32 %v4028_v39, %v1798_v3  ;;  %v2316_v6 = vadd.f32 %v4030_v40, %v2024_v4  ;;  %v1800_v7 = vpop.f32.mrb[13].mxu0  ;;  %v2026_v8 = vpop.f32.mrb[13].mxu1 }
 0x1ca   : > { %2620 = vst [vmem:[%s4046_s12 + $0x50] sm:$0xff] %v3058_v1  ;;  %2621 = vst [vmem:[%s4046_s12 + $0x58] sm:$0xff] %v3059_v2  ;;  %v2315_v9 = vadd.f32 %v4032_v41, %v1800_v7  ;;  %v2317_v10 = vadd.f32 %v4034_v42, %v2026_v8  ;;  %v1802_v11 = vpop.f32.mrb[14].mxu0  ;;  %v2028_v12 = vpop.f32.mrb[14].mxu1 }
 0x1cb   : > { %v2378_v13 = vmax.f32 %v2314_v5, 0.0  ;;  %v2380_v14 = vmax.f32 %v2316_v6, 0.0  ;;  %v2318_v15 = vadd.f32 %v4028_v39, %v1802_v11  ;;  %v2320_v16 = vadd.f32 %v4030_v40, %v2028_v12  ;;  %v1804_v17 = vpop.f32.mrb[15].mxu0  ;;  %v2030_v18 = vpop.f32.mrb[15].mxu1 }
 0x1cc   : > { %v2379_v19 = vmax.f32 %v2315_v9, 0.0  ;;  %v2381_v20 = vmax.f32 %v2317_v10, 0.0  ;;  %v2319_v21 = vadd.f32 %v4032_v41, %v1804_v17  ;;  %v2321_v22 = vadd.f32 %v4034_v42, %v2030_v18 }
 0x1cd   : > { %v2382_v23 = vmax.f32 %v2318_v15, 0.0  ;;  %v2384_v24 = vmax.f32 %v2320_v16, 0.0 }
 0x1ce   : > { %v3060_v25 = vpack.c.bf16 %v2379_v19, %v2378_v13  ;;  %v3061_v26 = vpack.c.bf16 %v2381_v20, %v2380_v14  ;;  %v2383_v27 = vmax.f32 %v2319_v21, 0.0  ;;  %v2385_v28 = vmax.f32 %v2321_v22, 0.0 }
 0x1d0   : > { %2622 = vst [vmem:[%s4046_s12 + $0x60] sm:$0xff] %v3060_v25  ;;  %2623 = vst [vmem:[%s4046_s12 + $0x68] sm:$0xff] %v3061_v26  ;;  %v3062_v29 = vpack.c.bf16 %v2383_v27, %v2382_v23  ;;  %v3063_v30 = vpack.c.bf16 %v2385_v28, %v2384_v24  ;;  %v1808_v31 = vpop.f32.mrb[16].mxu0  ;;  %v2034_v32 = vpop.f32.mrb[16].mxu1 }
 0x1d1   : > { %v2322_v33 = vadd.f32 %v4028_v39, %v1808_v31  ;;  %v2324_v34 = vadd.f32 %v4030_v40, %v2034_v32  ;;  %v1810_v35 = vpop.f32.mrb[17].mxu0  ;;  %v2036_v36 = vpop.f32.mrb[17].mxu1 }
 0x1d2   : > { %2624 = vst [vmem:[%s4046_s12 + $0x70] sm:$0xff] %v3062_v29  ;;  %2625 = vst [vmem:[%s4046_s12 + $0x78] sm:$0xff] %v3063_v30  ;;  %v2323_v37 = vadd.f32 %v4032_v41, %v1810_v35  ;;  %v2325_v38 = vadd.f32 %v4034_v42, %v2036_v36  ;;  %v1812_v43 = vpop.f32.mrb[18].mxu0  ;;  %v2038_v44 = vpop.f32.mrb[18].mxu1 }
 0x1d3   : > { %v2386_v45 = vmax.f32 %v2322_v33, 0.0  ;;  %v2388_v46 = vmax.f32 %v2324_v34, 0.0  ;;  %v2326_v47 = vadd.f32 %v4028_v39, %v1812_v43  ;;  %v2328_v48 = vadd.f32 %v4030_v40, %v2038_v44  ;;  %v1814_v49 = vpop.f32.mrb[19].mxu0  ;;  %v2040_v50 = vpop.f32.mrb[19].mxu1 }
 0x1d4   : > { %v2387_v51 = vmax.f32 %v2323_v37, 0.0  ;;  %v2389_v52 = vmax.f32 %v2325_v38, 0.0  ;;  %v2327_v53 = vadd.f32 %v4032_v41, %v1814_v49  ;;  %v2329_v54 = vadd.f32 %v4034_v42, %v2040_v50 }
 0x1d5   : > { %v2390_v55 = vmax.f32 %v2326_v47, 0.0  ;;  %v2392_v56 = vmax.f32 %v2328_v48, 0.0 }
 0x1d6   : > { %v3064_v57 = vpack.c.bf16 %v2387_v51, %v2386_v45  ;;  %v3065_v58 = vpack.c.bf16 %v2389_v52, %v2388_v46  ;;  %v2391_v59 = vmax.f32 %v2327_v53, 0.0  ;;  %v2393_v60 = vmax.f32 %v2329_v54, 0.0 }
 0x1d8   : > { %2626 = vst [vmem:[%s4046_s12 + $0x80] sm:$0xff] %v3064_v57  ;;  %2627 = vst [vmem:[%s4046_s12 + $0x88] sm:$0xff] %v3065_v58  ;;  %v3066_v61 = vpack.c.bf16 %v2391_v59, %v2390_v55  ;;  %v3067_v62 = vpack.c.bf16 %v2393_v60, %v2392_v56  ;;  %v1818_v63 = vpop.f32.mrb[20].mxu0  ;;  %v2044_v0 = vpop.f32.mrb[20].mxu1 }
 0x1d9   : > { %v2330_v1 = vadd.f32 %v4028_v39, %v1818_v63  ;;  %v2332_v2 = vadd.f32 %v4030_v40, %v2044_v0  ;;  %v1820_v3 = vpop.f32.mrb[21].mxu0  ;;  %v2046_v4 = vpop.f32.mrb[21].mxu1 }
 0x1da   : > { %2628 = vst [vmem:[%s4046_s12 + $0x90] sm:$0xff] %v3066_v61  ;;  %2629 = vst [vmem:[%s4046_s12 + $0x98] sm:$0xff] %v3067_v62  ;;  %v2331_v5 = vadd.f32 %v4032_v41, %v1820_v3  ;;  %v2333_v6 = vadd.f32 %v4034_v42, %v2046_v4  ;;  %v1822_v7 = vpop.f32.mrb[22].mxu0  ;;  %v2048_v8 = vpop.f32.mrb[22].mxu1 }
 0x1db   : > { %v2394_v9 = vmax.f32 %v2330_v1, 0.0  ;;  %v2396_v10 = vmax.f32 %v2332_v2, 0.0  ;;  %v2334_v11 = vadd.f32 %v4028_v39, %v1822_v7  ;;  %v2336_v12 = vadd.f32 %v4030_v40, %v2048_v8  ;;  %v1824_v13 = vpop.f32.mrb[23].mxu0  ;;  %v2050_v14 = vpop.f32.mrb[23].mxu1 }
 0x1dc   : > { %v2395_v15 = vmax.f32 %v2331_v5, 0.0  ;;  %v2397_v16 = vmax.f32 %v2333_v6, 0.0  ;;  %v2335_v17 = vadd.f32 %v4032_v41, %v1824_v13  ;;  %v2337_v18 = vadd.f32 %v4034_v42, %v2050_v14 }
 0x1dd   : > { %v2398_v19 = vmax.f32 %v2334_v11, 0.0  ;;  %v2400_v20 = vmax.f32 %v2336_v12, 0.0 }
 0x1de   : > { %v3068_v21 = vpack.c.bf16 %v2395_v15, %v2394_v9  ;;  %v3069_v22 = vpack.c.bf16 %v2397_v16, %v2396_v10  ;;  %v2399_v23 = vmax.f32 %v2335_v17, 0.0  ;;  %v2401_v24 = vmax.f32 %v2337_v18, 0.0 }
 0x1e0   : > { %2630 = vst [vmem:[%s4046_s12 + $0xa0] sm:$0xff] %v3068_v21  ;;  %2631 = vst [vmem:[%s4046_s12 + $0xa8] sm:$0xff] %v3069_v22  ;;  %v3070_v25 = vpack.c.bf16 %v2399_v23, %v2398_v19  ;;  %v3071_v26 = vpack.c.bf16 %v2401_v24, %v2400_v20  ;;  %v1828_v27 = vpop.f32.mrb[24].mxu0  ;;  %v2054_v28 = vpop.f32.mrb[24].mxu1  ;;  %v2671_v21 = vld [vmem:[%s4046_s12 + $0x10] sm:$0xff] (%p3520_p6)  ;;  %v2673_v22 = vld [vmem:[%s4046_s12 + $0x18] sm:$0xff] (%p3520_p6) }
 0x1e1   : > { %v2338_v29 = vadd.f32 %v4028_v39, %v1828_v27  ;;  %v2340_v30 = vadd.f32 %v4030_v40, %v2054_v28  ;;  %v1830_v31 = vpop.f32.mrb[25].mxu0  ;;  %v2056_v32 = vpop.f32.mrb[25].mxu1  ;;  %v2675_v23 = vld [vmem:[%s4046_s12 + $0x20] sm:$0xff] (%p3520_p6)  ;;  %v2677_v24 = vld [vmem:[%s4046_s12 + $0x28] sm:$0xff] (%p3520_p6)  ;;  %2672 = vst [vmem:[%s4145_s6 + $0x40] sm:$0xff] (%p3520_p6), %v2671_v21  ;;  %2674 = vst [vmem:[%s4145_s6 + $0x48] sm:$0xff] (%p3520_p6), %v2673_v22 }
 0x1e2   : > { %2632 = vst [vmem:[%s4046_s12 + $0xb0] sm:$0xff] %v3070_v25  ;;  %2633 = vst [vmem:[%s4046_s12 + $0xb8] sm:$0xff] %v3071_v26  ;;  %v2339_v33 = vadd.f32 %v4032_v41, %v1830_v31  ;;  %v2341_v34 = vadd.f32 %v4034_v42, %v2056_v32  ;;  %v1832_v35 = vpop.f32.mrb[26].mxu0  ;;  %v2058_v36 = vpop.f32.mrb[26].mxu1  ;;  %v2679_v25 = vld [vmem:[%s4046_s12 + $0x30] sm:$0xff] (%p3520_p6)  ;;  %v2681_v26 = vld [vmem:[%s4046_s12 + $0x38] sm:$0xff] (%p3520_p6) }
 0x1e3   : > { %v2402_v37 = vmax.f32 %v2338_v29, 0.0  ;;  %v2404_v38 = vmax.f32 %v2340_v30, 0.0  ;;  %v2342_v43 = vadd.f32 %v4028_v39, %v1832_v35  ;;  %v2344_v44 = vadd.f32 %v4030_v40, %v2058_v36  ;;  %v1834_v45 = vpop.f32.mrb[27].mxu0  ;;  %v2060_v46 = vpop.f32.mrb[27].mxu1  ;;  %2676 = vst [vmem:[%s4145_s6 + $0x80] sm:$0xff] (%p3520_p6), %v2675_v23  ;;  %2678 = vst [vmem:[%s4145_s6 + $0x88] sm:$0xff] (%p3520_p6), %v2677_v24 }
 0x1e4   : > { %v2403_v47 = vmax.f32 %v2339_v33, 0.0  ;;  %v2405_v48 = vmax.f32 %v2341_v34, 0.0  ;;  %v2343_v49 = vadd.f32 %v4032_v41, %v1834_v45  ;;  %v2345_v50 = vadd.f32 %v4034_v42, %v2060_v46  ;;  %v2683_v27 = vld [vmem:[%s4046_s12 + $0x40] sm:$0xff] (%p3520_p6)  ;;  %2680 = vst [vmem:[%s4145_s6 + $0xc0] sm:$0xff] (%p3520_p6), %v2679_v25  ;;  %2682 = vst [vmem:[%s4145_s6 + $0xc8] sm:$0xff] (%p3520_p6), %v2681_v26  ;;  %v2685_v28 = vld [vmem:[%s4046_s12 + $0x48] sm:$0xff] (%p3520_p6) }
 0x1e5   : > { %v2406_v51 = vmax.f32 %v2342_v43, 0.0  ;;  %v2408_v52 = vmax.f32 %v2344_v44, 0.0  ;;  %2684 = vst [vmem:[%s4145_s6 + $0x100] sm:$0xff] (%p3520_p6), %v2683_v27  ;;  %v2687_v29 = vld [vmem:[%s4046_s12 + $0x50] sm:$0xff] (%p3520_p6)  ;;  %v2689_v30 = vld [vmem:[%s4046_s12 + $0x58] sm:$0xff] (%p3520_p6)  ;;  %2686 = vst [vmem:[%s4145_s6 + $0x108] sm:$0xff] (%p3520_p6), %v2685_v28 }
 0x1e6   : > { %v3072_v53 = vpack.c.bf16 %v2403_v47, %v2402_v37  ;;  %v3073_v54 = vpack.c.bf16 %v2405_v48, %v2404_v38  ;;  %v2407_v55 = vmax.f32 %v2343_v49, 0.0  ;;  %v2409_v56 = vmax.f32 %v2345_v50, 0.0  ;;  %2688 = vst [vmem:[%s4145_s6 + $0x140] sm:$0xff] (%p3520_p6), %v2687_v29  ;;  %2690 = vst [vmem:[%s4145_s6 + $0x148] sm:$0xff] (%p3520_p6), %v2689_v30  ;;  %v2691_v31 = vld [vmem:[%s4046_s12 + $0x60] sm:$0xff] (%p3520_p6)  ;;  %v2693_v32 = vld [vmem:[%s4046_s12 + $0x68] sm:$0xff] (%p3520_p6) }
 0x1e7   : > { %v2695_v33 = vld [vmem:[%s4046_s12 + $0x70] sm:$0xff] (%p3520_p6)  ;;  %2692 = vst [vmem:[%s4145_s6 + $0x180] sm:$0xff] (%p3520_p6), %v2691_v31  ;;  %2694 = vst [vmem:[%s4145_s6 + $0x188] sm:$0xff] (%p3520_p6), %v2693_v32  ;;  %v2697_v34 = vld [vmem:[%s4046_s12 + $0x78] sm:$0xff] (%p3520_p6) }
 0x1e8   : > { %2634 = vst [vmem:[%s4046_s12 + $0xc0] sm:$0xff] %v3072_v53  ;;  %2635 = vst [vmem:[%s4046_s12 + $0xc8] sm:$0xff] %v3073_v54  ;;  %v3074_v57 = vpack.c.bf16 %v2407_v55, %v2406_v51  ;;  %v3075_v58 = vpack.c.bf16 %v2409_v56, %v2408_v52  ;;  %v1838_v59 = vpop.f32.mrb[28].mxu0  ;;  %v2064_v60 = vpop.f32.mrb[28].mxu1  ;;  %v2699_v35 = vld [vmem:[%s4046_s12 + $0x80] sm:$0xff] (%p3520_p6)  ;;  %v2701_v36 = vld [vmem:[%s4046_s12 + $0x88] sm:$0xff] (%p3520_p6) }
 0x1e9   : > { %v2346_v61 = vadd.f32 %v4028_v39, %v1838_v59  ;;  %v2348_v62 = vadd.f32 %v4030_v40, %v2064_v60  ;;  %v1840_v63 = vpop.f32.mrb[29].mxu0  ;;  %v2066_v0 = vpop.f32.mrb[29].mxu1  ;;  %2696 = vst [vmem:[%s4145_s6 + $0x1c0] sm:$0xff] (%p3520_p6), %v2695_v33  ;;  %2698 = vst [vmem:[%s4145_s6 + $0x1c8] sm:$0xff] (%p3520_p6), %v2697_v34  ;;  %v2703_v37 = vld [vmem:[%s4046_s12 + $0x90] sm:$0xff] (%p3520_p6)  ;;  %v2705_v38 = vld [vmem:[%s4046_s12 + $0x98] sm:$0xff] (%p3520_p6) }
 0x1ea   : > { %2636 = vst [vmem:[%s4046_s12 + $0xd0] sm:$0xff] %v3074_v57  ;;  %2637 = vst [vmem:[%s4046_s12 + $0xd8] sm:$0xff] %v3075_v58  ;;  %v2347_v1 = vadd.f32 %v4032_v41, %v1840_v63  ;;  %v2349_v2 = vadd.f32 %v4034_v42, %v2066_v0  ;;  %v1842_v3 = vpop.f32.mrb[30].mxu0  ;;  %v2068_v4 = vpop.f32.mrb[30].mxu1  ;;  %v2707_v43 = vld [vmem:[%s4046_s12 + $0xa0] sm:$0xff] (%p3520_p6)  ;;  %v2709_v44 = vld [vmem:[%s4046_s12 + $0xa8] sm:$0xff] (%p3520_p6) }
 0x1eb   : > { %v2410_v5 = vmax.f32 %v2346_v61, 0.0  ;;  %v2412_v6 = vmax.f32 %v2348_v62, 0.0  ;;  %v2350_v7 = vadd.f32 %v4028_v39, %v1842_v3  ;;  %v2352_v8 = vadd.f32 %v4030_v40, %v2068_v4  ;;  %v1844_v9 = vpop.f32.mrb[31].mxu0  ;;  %v2070_v10 = vpop.f32.mrb[31].mxu1  ;;  %2700 = vst [vmem:[%s4145_s6 + $0x200] sm:$0xff] (%p3520_p6), %v2699_v35  ;;  %2702 = vst [vmem:[%s4145_s6 + $0x208] sm:$0xff] (%p3520_p6), %v2701_v36 }
 0x1ec   : > { %v2411_v11 = vmax.f32 %v2347_v1, 0.0  ;;  %v2413_v12 = vmax.f32 %v2349_v2, 0.0  ;;  %v2351_v13 = vadd.f32 %v4032_v41, %v1844_v9  ;;  %v2353_v14 = vadd.f32 %v4034_v42, %v2070_v10  ;;  %2648 = sbr.rel (!%p3520_p6) target bundleno = 507 (0x1fb), region = 67  ;;  %v2667_v41 = vld [vmem:[%s4046_s12] sm:$0xff] (%p3520_p6)  ;;  %v2669_v42 = vld [vmem:[%s4046_s12 + $0x8] sm:$0xff] (%p3520_p6)  ;;  %2704 = vst [vmem:[%s4145_s6 + $0x240] sm:$0xff] (%p3520_p6), %v2703_v37 }
 0x1ed   : > { %v2414_v15 = vmax.f32 %v2350_v7, 0.0  ;;  %v2416_v16 = vmax.f32 %v2352_v8, 0.0  ;;  %2668 = vst [vmem:[%s4145_s6] sm:$0xff] (%p3520_p6), %v2667_v41  ;;  %2670 = vst [vmem:[%s4145_s6 + $0x8] sm:$0xff] (%p3520_p6), %v2669_v42  ;;  %v2711_v45 = vld [vmem:[%s4046_s12 + $0xb0] sm:$0xff] (%p3520_p6)  ;;  %v2713_v46 = vld [vmem:[%s4046_s12 + $0xb8] sm:$0xff] (%p3520_p6) }
 0x1ee   : > { %v3076_v17 = vpack.c.bf16 %v2411_v11, %v2410_v5  ;;  %v3077_v18 = vpack.c.bf16 %v2413_v12, %v2412_v6  ;;  %v2415_v19 = vmax.f32 %v2351_v13, 0.0  ;;  %v2417_v20 = vmax.f32 %v2353_v14, 0.0  ;;  %2706 = vst [vmem:[%s4145_s6 + $0x248] sm:$0xff] (%p3520_p6), %v2705_v38  ;;  %2708 = vst [vmem:[%s4145_s6 + $0x280] sm:$0xff] (%p3520_p6), %v2707_v43 }
 0x1ef   : > { %2710 = vst [vmem:[%s4145_s6 + $0x288] sm:$0xff] (%p3520_p6), %v2709_v44  ;;  %2712 = vst [vmem:[%s4145_s6 + $0x2c0] sm:$0xff] (%p3520_p6), %v2711_v45  ;;  %v2715_v47 = vld [vmem:[%s4046_s12 + $0xc0] sm:$0xff] (%p3520_p6)  ;;  %v2717_v48 = vld [vmem:[%s4046_s12 + $0xc8] sm:$0xff] (%p3520_p6) }
 0x1f0   : > { %2638 = vst [vmem:[%s4046_s12 + $0xe0] sm:$0xff] %v3076_v17  ;;  %2639 = vst [vmem:[%s4046_s12 + $0xe8] sm:$0xff] %v3077_v18  ;;  %v3078_v39 = vpack.c.bf16 %v2415_v19, %v2414_v15  ;;  %v3079_v40 = vpack.c.bf16 %v2417_v20, %v2416_v16 }
 0x1f1   : > { %2714 = vst [vmem:[%s4145_s6 + $0x2c8] sm:$0xff] (%p3520_p6), %v2713_v46  ;;  %v2719_v49 = vld [vmem:[%s4046_s12 + $0xd0] sm:$0xff] (%p3520_p6)  ;;  %2716 = vst [vmem:[%s4145_s6 + $0x300] sm:$0xff] (%p3520_p6), %v2715_v47  ;;  %v2721_v50 = vld [vmem:[%s4046_s12 + $0xd8] sm:$0xff] (%p3520_p6) }
 0x1f2   : > { %2640 = vst [vmem:[%s4046_s12 + $0xf0] sm:$0xff] %v3078_v39  ;;  %2641 = vst [vmem:[%s4046_s12 + $0xf8] sm:$0xff] %v3079_v40 }
 0x1f3   : > { %2718 = vst [vmem:[%s4145_s6 + $0x308] sm:$0xff] %v2717_v48  ;;  %2720 = vst [vmem:[%s4145_s6 + $0x340] sm:$0xff] %v2719_v49 }
 0x1f4   : > { %2722 = vst [vmem:[%s4145_s6 + $0x348] sm:$0xff] %v2721_v50 }
 0x1f7   : > { %v2723_v51 = vld [vmem:[%s4046_s12 + $0xe0] sm:$0xff]  ;;  %v2725_v52 = vld [vmem:[%s4046_s12 + $0xe8] sm:$0xff] }
 0x1f8   : > { %2724 = vst [vmem:[%s4145_s6 + $0x380] sm:$0xff] %v2723_v51  ;;  %2726 = vst [vmem:[%s4145_s6 + $0x388] sm:$0xff] %v2725_v52 }
 0x1f9   : > { %v2727_v53 = vld [vmem:[%s4046_s12 + $0xf0] sm:$0xff]  ;;  %v2729_v54 = vld [vmem:[%s4046_s12 + $0xf8] sm:$0xff] }
 0x1fa   : > { %2728 = vst [vmem:[%s4145_s6 + $0x3c0] sm:$0xff] %v2727_v53  ;;  %2730 = vst [vmem:[%s4145_s6 + $0x3c8] sm:$0xff] %v2729_v54 }
 0x1fb PF: > { %s13_s16 = sadd.s32 1, %s3463_s16   ;;  %s4228_s12 = smov %s3451_s13 }
 0x1fc   : > { %p10_p12 = scmp.ge.s32.totalorder %s13_s16, 6   ;;  %s4229_s13 = smov %s3525_s22 }
 0x1fd   : > { %s4230_s14 = smov %s3459_s15  ;;  %s4231_s15 = smov %s4233_s17 }
 0x1fe   :  { %12 = sbr.rel (!%p10_p12) target bundleno = 3 (0x3), region = 127 }

// kernel: inception_v3_forward.11
= control target key start
LH: loop header
LB: loop body
LE: loop exit
PB: predicated region body
PF: predicated region fallthrough
CT: control target
= control target key end

     0   :  { %v3822_v3 = vmov 0   ;;  %s5064_s1 = inlined_call_operand.vmem [shape: bf16[128,2048], index: 1, kind: input, shape index: {}]   ;;  %s5065_s0 = inlined_call_operand.vmem [shape: bf16[2,128], index: 0, kind: input, shape index: {}]   ;;  %s5066_s2 = inlined_call_operand.vmem [shape: bf16[2048,256], index: 2, kind: input, shape index: {}]   ;;  %s5067_s3 = inlined_call_operand.vmem [shape: f32[1,256], index: 3, kind: input, shape index: {}]   ;;  %s5068_s4 = inlined_call_operand.vmem [shape: f32[2,256], index: 4, kind: output, shape index: {}]  }
   0x1   :  { %v19_v0 = vld [vmem:[%s5064_s1] sm:$0xff]  ;;  %819 = vmatprep.mubr.bf16.mxu0 %v3822_v3  ;;  %860 = vmatprep.mubr.bf16.mxu1 %v3822_v3  ;;  %v20_v16 = vld [vmem:[%s5064_s1 + $0x8] sm:$0xff]  ;;  %v21_v53 = vld [vmem:[%s5064_s1 + $0x10] sm:$0xff] }
   0x2   :  { %v27_v1 = vld [vmem:[%s5064_s1 + $0x40] sm:$0xff]  ;;  %v28_v19 = vld [vmem:[%s5064_s1 + $0x48] sm:$0xff]  ;;  %v29_v54 = vld [vmem:[%s5064_s1 + $0x50] sm:$0xff] }
   0x3   :  { %v35_v2 = vld [vmem:[%s5064_s1 + $0x80] sm:$0xff]  ;;  %v3024_v4 = vcombine.high %v19_v0, %v27_v1  ;;  %v3023_v5 = vcombine.low %v19_v0, %v27_v1  ;;  %v3026_v20 = vcombine.high %v20_v16, %v28_v19  ;;  %v3025_v21 = vcombine.low %v20_v16, %v28_v19  ;;  %v36_v22 = vld [vmem:[%s5064_s1 + $0x88] sm:$0xff]  ;;  %v37_v61 = vld [vmem:[%s5064_s1 + $0x90] sm:$0xff] }
   0x4   :  { %v43_v6 = vld [vmem:[%s5064_s1 + $0xc0] sm:$0xff]  ;;  %v44_v23 = vld [vmem:[%s5064_s1 + $0xc8] sm:$0xff]  ;;  %v3028_v60 = vcombine.high %v21_v53, %v29_v54  ;;  %v45_v62 = vld [vmem:[%s5064_s1 + $0xd0] sm:$0xff] }
   0x5   :  { %v3040_v7 = vcombine.high %v35_v2, %v43_v6  ;;  %v51_v8 = vld [vmem:[%s5064_s1 + $0x100] sm:$0xff]  ;;  %787 = vmatprep.subr.bf16.mxu0 %v3024_v4  ;;  %v3039_v10 = vcombine.low %v35_v2, %v43_v6  ;;  %v3042_v25 = vcombine.high %v36_v22, %v44_v23  ;;  %v52_v26 = vld [vmem:[%s5064_s1 + $0x108] sm:$0xff]  ;;  %828 = vmatprep.subr.bf16.mxu1 %v3026_v20  ;;  %v77_v16 = vld [vmem:[%s5064_s1 + $0x1d0] sm:$0xff] }
   0x6   :  { %v59_v9 = vld [vmem:[%s5064_s1 + $0x140] sm:$0xff]  ;;  %788 = vmatpush1.bf16.msra.mxu0 %v3023_v5  ;;  %v60_v27 = vld [vmem:[%s5064_s1 + $0x148] sm:$0xff]  ;;  %829 = vmatpush1.bf16.msra.mxu1 %v3025_v21  ;;  %v3041_v31 = vcombine.low %v36_v22, %v44_v23  ;;  %v3027_v2 = vcombine.low %v21_v53, %v29_v54  ;;  %v3044_v6 = vcombine.high %v37_v61, %v45_v62  ;;  %v38_v20 = vld [vmem:[%s5064_s1 + $0x98] sm:$0xff] }
   0x7   :  { %789 = vmatprep.subr.bf16.mxu0 %v3040_v7  ;;  %v3056_v11 = vcombine.high %v51_v8, %v59_v9  ;;  %v67_v12 = vld [vmem:[%s5064_s1 + $0x180] sm:$0xff]  ;;  %v3055_v14 = vcombine.low %v51_v8, %v59_v9  ;;  %830 = vmatprep.subr.bf16.mxu1 %v3042_v25  ;;  %v3058_v32 = vcombine.high %v52_v26, %v60_v27  ;;  %v68_v34 = vld [vmem:[%s5064_s1 + $0x188] sm:$0xff]  ;;  %v53_v7 = vld [vmem:[%s5064_s1 + $0x110] sm:$0xff] }
   0x8   :  { %v75_v13 = vld [vmem:[%s5064_s1 + $0x1c0] sm:$0xff]  ;;  %v76_v35 = vld [vmem:[%s5064_s1 + $0x1c8] sm:$0xff]  ;;  %v3057_v39 = vcombine.low %v52_v26, %v60_v27  ;;  %v61_v8 = vld [vmem:[%s5064_s1 + $0x150] sm:$0xff] }
   0x9   :  { %v3072_v15 = vcombine.high %v67_v12, %v75_v13  ;;  %v83_v17 = vld [vmem:[%s5064_s1 + $0x200] sm:$0xff]  ;;  %v3071_v24 = vcombine.low %v67_v12, %v75_v13  ;;  %v3074_v40 = vcombine.high %v68_v34, %v76_v35  ;;  %v84_v42 = vld [vmem:[%s5064_s1 + $0x208] sm:$0xff]  ;;  %v3073_v47 = vcombine.low %v68_v34, %v76_v35  ;;  %v22_v12 = vld [vmem:[%s5064_s1 + $0x18] sm:$0xff] }
   0xa   :  { %790 = vmatpush1.bf16.msra.mxu0 %v3039_v10  ;;  %v91_v18 = vld [vmem:[%s5064_s1 + $0x240] sm:$0xff]  ;;  %831 = vmatpush1.bf16.msra.mxu1 %v3041_v31  ;;  %v92_v43 = vld [vmem:[%s5064_s1 + $0x248] sm:$0xff]  ;;  %v30_v13 = vld [vmem:[%s5064_s1 + $0x58] sm:$0xff]  ;;  %v3059_v19 = vcombine.low %v53_v7, %v61_v8 }
   0xb   :  { %791 = vmatprep.subr.bf16.mxu0 %v3056_v11  ;;  %v3088_v28 = vcombine.high %v83_v17, %v91_v18  ;;  %v99_v29 = vld [vmem:[%s5064_s1 + $0x280] sm:$0xff]  ;;  %v3087_v33 = vcombine.low %v83_v17, %v91_v18  ;;  %832 = vmatprep.subr.bf16.mxu1 %v3058_v32  ;;  %v3090_v48 = vcombine.high %v84_v42, %v92_v43  ;;  %v100_v50 = vld [vmem:[%s5064_s1 + $0x288] sm:$0xff]  ;;  %v46_v21 = vld [vmem:[%s5064_s1 + $0xd8] sm:$0xff] }
   0xc   :  { %v107_v30 = vld [vmem:[%s5064_s1 + $0x2c0] sm:$0xff]  ;;  %v108_v51 = vld [vmem:[%s5064_s1 + $0x2c8] sm:$0xff]  ;;  %v3089_v55 = vcombine.low %v84_v42, %v92_v43  ;;  %v3043_v11 = vcombine.low %v37_v61, %v45_v62  ;;  %v3030_v18 = vcombine.high %v22_v12, %v30_v13  ;;  %v85_v23 = vld [vmem:[%s5064_s1 + $0x210] sm:$0xff]  ;;  %v3029_v25 = vcombine.low %v22_v12, %v30_v13 }
   0xd   :  { %v3104_v36 = vcombine.high %v99_v29, %v107_v30  ;;  %v115_v37 = vld [vmem:[%s5064_s1 + $0x300] sm:$0xff]  ;;  %v3103_v41 = vcombine.low %v99_v29, %v107_v30  ;;  %v3106_v56 = vcombine.high %v100_v50, %v108_v51  ;;  %v116_v58 = vld [vmem:[%s5064_s1 + $0x308] sm:$0xff]  ;;  %v3105_v63 = vcombine.low %v100_v50, %v108_v51  ;;  %v62_v29 = vld [vmem:[%s5064_s1 + $0x158] sm:$0xff] }
   0xe   :  { %792 = vmatpush1.bf16.msra.mxu0 %v3055_v14  ;;  %v123_v38 = vld [vmem:[%s5064_s1 + $0x340] sm:$0xff]  ;;  %833 = vmatpush1.bf16.msra.mxu1 %v3057_v39  ;;  %v124_v59 = vld [vmem:[%s5064_s1 + $0x348] sm:$0xff]  ;;  %v3060_v14 = vcombine.high %v53_v7, %v61_v8  ;;  %v3046_v26 = vcombine.high %v38_v20, %v46_v21  ;;  %v101_v31 = vld [vmem:[%s5064_s1 + $0x290] sm:$0xff] }
   0xf   :  { %793 = vmatprep.subr.bf16.mxu0 %v3072_v15  ;;  %v3120_v44 = vcombine.high %v115_v37, %v123_v38  ;;  %v131_v45 = vld [vmem:[%s5064_s1 + $0x380] sm:$0xff]  ;;  %834 = vmatprep.subr.bf16.mxu1 %v3074_v40  ;;  %v3119_v49 = vcombine.low %v115_v37, %v123_v38  ;;  %v3122_v0 = vcombine.high %v116_v58, %v124_v59  ;;  %v132_v4 = vld [vmem:[%s5064_s1 + $0x388] sm:$0xff]  ;;  %v69_v15 = vld [vmem:[%s5064_s1 + $0x190] sm:$0xff] }
  0x10   :  { %v139_v46 = vld [vmem:[%s5064_s1 + $0x3c0] sm:$0xff]  ;;  %v140_v5 = vld [vmem:[%s5064_s1 + $0x3c8] sm:$0xff]  ;;  %v3121_v9 = vcombine.low %v116_v58, %v124_v59  ;;  %v3076_v22 = vcombine.high %v69_v15, %v77_v16  ;;  %v3075_v27 = vcombine.low %v69_v15, %v77_v16  ;;  %v109_v32 = vld [vmem:[%s5064_s1 + $0x2d0] sm:$0xff] }
  0x11   :  { %v3136_v52 = vcombine.high %v131_v45, %v139_v46  ;;  %v3135_v57 = vcombine.low %v131_v45, %v139_v46  ;;  %v3955_v1 = vld [vmem:[%s5065_s0] sm:$0x1]  ;;  %v3138_v10 = vcombine.high %v132_v4, %v140_v5  ;;  %v3137_v17 = vcombine.low %v132_v4, %v140_v5  ;;  %v78_v37 = vld [vmem:[%s5064_s1 + $0x1d8] sm:$0xff]  ;;  %v117_v39 = vld [vmem:[%s5064_s1 + $0x310] sm:$0xff] }
  0x12   :  { %794 = vmatpush1.bf16.msra.mxu0 %v3071_v24  ;;  %835 = vmatpush1.bf16.msra.mxu1 %v3073_v47  ;;  %v93_v24 = vld [vmem:[%s5064_s1 + $0x250] sm:$0xff]  ;;  %v3108_v38 = vcombine.high %v101_v31, %v109_v32  ;;  %v3107_v43 = vcombine.low %v101_v31, %v109_v32  ;;  %v94_v45 = vld [vmem:[%s5064_s1 + $0x258] sm:$0xff]  ;;  %v39_v61 = vld [vmem:[%s5064_s1 + $0xa0] sm:$0xff] }
  0x13   :  { %795 = vmatprep.subr.bf16.mxu0 %v3088_v28  ;;  %836 = vmatprep.subr.bf16.mxu1 %v3090_v48  ;;  %v54_v28 = vld [vmem:[%s5064_s1 + $0x118] sm:$0xff]  ;;  %v3092_v30 = vcombine.high %v85_v23, %v93_v24  ;;  %v3091_v35 = vcombine.low %v85_v23, %v93_v24  ;;  %v125_v40 = vld [vmem:[%s5064_s1 + $0x350] sm:$0xff]  ;;  %v47_v62 = vld [vmem:[%s5064_s1 + $0xe0] sm:$0xff] }
  0x14   :  { %v3062_v34 = vcombine.high %v54_v28, %v62_v29  ;;  %v3124_v46 = vcombine.high %v117_v39, %v125_v40  ;;  %v133_v47 = vld [vmem:[%s5064_s1 + $0x390] sm:$0xff]  ;;  %v102_v51 = vld [vmem:[%s5064_s1 + $0x298] sm:$0xff]  ;;  %v55_v8 = vld [vmem:[%s5064_s1 + $0x120] sm:$0xff]  ;;  %v3047_v15 = vcombine.low %v39_v61, %v47_v62 }
  0x15   :  { %v141_v48 = vld [vmem:[%s5064_s1 + $0x3d0] sm:$0xff]  ;;  %v110_v53 = vld [vmem:[%s5064_s1 + $0x2d8] sm:$0xff]  ;;  %v24_v12 = vld [vmem:[%s5064_s1 + $0x28] sm:$0xff] }
  0x16   :  { %796 = vmatpush1.bf16.msra.mxu0 %v3087_v33  ;;  %837 = vmatpush1.bf16.msra.mxu1 %v3089_v55  ;;  %v3045_v33 = vcombine.low %v38_v20, %v46_v21  ;;  %v3140_v54 = vcombine.high %v133_v47, %v141_v48  ;;  %v23_v55 = vld [vmem:[%s5064_s1 + $0x20] sm:$0xff]  ;;  %v3110_v58 = vcombine.high %v102_v51, %v110_v53  ;;  %v118_v59 = vld [vmem:[%s5064_s1 + $0x318] sm:$0xff]  ;;  %v32_v13 = vld [vmem:[%s5064_s1 + $0x68] sm:$0xff] }
  0x17   :  { %797 = vmatprep.subr.bf16.mxu0 %v3104_v36  ;;  %838 = vmatprep.subr.bf16.mxu1 %v3106_v56  ;;  %v70_v36 = vld [vmem:[%s5064_s1 + $0x198] sm:$0xff]  ;;  %v31_v56 = vld [vmem:[%s5064_s1 + $0x60] sm:$0xff]  ;;  %v40_v20 = vld [vmem:[%s5064_s1 + $0xa8] sm:$0xff] }
  0x18   :  { %v3078_v42 = vcombine.high %v70_v36, %v78_v37  ;;  %v134_v4 = vld [vmem:[%s5064_s1 + $0x398] sm:$0xff]  ;;  %v3031_v7 = vcombine.low %v23_v55, %v31_v56  ;;  %v71_v16 = vld [vmem:[%s5064_s1 + $0x1a0] sm:$0xff]  ;;  %v48_v21 = vld [vmem:[%s5064_s1 + $0xe8] sm:$0xff] }
  0x19   :  { %v142_v5 = vld [vmem:[%s5064_s1 + $0x3d8] sm:$0xff]  ;;  %v87_v24 = vld [vmem:[%s5064_s1 + $0x220] sm:$0xff] }
  0x1a   :  { %798 = vmatpush1.bf16.msra.mxu0 %v3103_v41  ;;  %839 = vmatpush1.bf16.msra.mxu1 %v3105_v63  ;;  %v3061_v41 = vcombine.low %v54_v28, %v62_v29  ;;  %v126_v63 = vld [vmem:[%s5064_s1 + $0x358] sm:$0xff]  ;;  %v56_v28 = vld [vmem:[%s5064_s1 + $0x128] sm:$0xff]  ;;  %v103_v32 = vld [vmem:[%s5064_s1 + $0x2a0] sm:$0xff] }
  0x1b   :  { %799 = vmatprep.subr.bf16.mxu0 %v3120_v44  ;;  %840 = vmatprep.subr.bf16.mxu1 %v3122_v0  ;;  %v86_v44 = vld [vmem:[%s5064_s1 + $0x218] sm:$0xff]  ;;  %v3032_v0 = vcombine.high %v23_v55, %v31_v56  ;;  %v64_v29 = vld [vmem:[%s5064_s1 + $0x168] sm:$0xff]  ;;  %v25_v56 = vld [vmem:[%s5064_s1 + $0x30] sm:$0xff] }
  0x1c   :  { %v3094_v50 = vcombine.high %v86_v44, %v94_v45 }
  0x1e   :  { %800 = vmatpush1.bf16.msra.mxu0 %v3119_v49  ;;  %841 = vmatpush1.bf16.msra.mxu1 %v3121_v9  ;;  %v3077_v49 = vcombine.low %v70_v36, %v78_v37  ;;  %v63_v9 = vld [vmem:[%s5064_s1 + $0x160] sm:$0xff]  ;;  %v72_v36 = vld [vmem:[%s5064_s1 + $0x1a8] sm:$0xff] }
  0x1f   :  { %801 = vmatprep.subr.bf16.mxu0 %v3136_v52  ;;  %842 = vmatprep.subr.bf16.mxu1 %v3138_v10  ;;  %v3123_v52 = vcombine.low %v117_v39, %v125_v40  ;;  %v3048_v10 = vcombine.high %v39_v61, %v47_v62  ;;  %v3063_v23 = vcombine.low %v55_v8, %v63_v9  ;;  %v80_v37 = vld [vmem:[%s5064_s1 + $0x1e8] sm:$0xff]  ;;  %v119_v40 = vld [vmem:[%s5064_s1 + $0x320] sm:$0xff] }
  0x20   :  { %v128_v61 = vld [vmem:[%s5064_s1 + $0x368] sm:$0xff] }
  0x22   :  { %802 = vmatpush1.bf16.msra.mxu0 %v3135_v57  ;;  %843 = vmatpush1.bf16.msra.mxu1 %v3137_v17  ;;  %v3093_v57 = vcombine.low %v86_v44, %v94_v45  ;;  %v79_v17 = vld [vmem:[%s5064_s1 + $0x1e0] sm:$0xff]  ;;  %v88_v44 = vld [vmem:[%s5064_s1 + $0x228] sm:$0xff] }
  0x23   :  { %869 = vmatprep.subr.bf16.mxu0 %v3028_v60  ;;  %910 = vmatprep.subr.bf16.mxu1 %v3030_v18  ;;  %v3139_v60 = vcombine.low %v133_v47, %v141_v48  ;;  %v3064_v18 = vcombine.high %v55_v8, %v63_v9  ;;  %v3079_v31 = vcombine.low %v71_v16, %v79_v17  ;;  %v96_v45 = vld [vmem:[%s5064_s1 + $0x268] sm:$0xff]  ;;  %v135_v48 = vld [vmem:[%s5064_s1 + $0x3a0] sm:$0xff] }
  0x25   :  { %820 = vmatmul.mubr.bf16.vlgmr.msra.gmra.mrb[0].mxu0 %v3955_v1  ;;  %861 = vmatmul.mubr.bf16.vlgmr.msra.gmra.mrb[0].mxu1 %v3955_v1 }
  0x26   :  { %870 = vmatpush1.bf16.msra.mxu0 %v3027_v2  ;;  %901 = vmatprep.mubr.bf16.mxu0 %v3822_v3  ;;  %v3109_v2 = vcombine.low %v102_v51, %v110_v53  ;;  %v3081_v51 = vcombine.low %v72_v36, %v80_v37  ;;  %v112_v53 = vld [vmem:[%s5064_s1 + $0x2e8] sm:$0xff] }
  0x27   :  { %871 = vmatprep.subr.bf16.mxu0 %v3044_v6  ;;  %911 = vmatpush1.bf16.msra.mxu1 %v3029_v25  ;;  %v3126_v6 = vcombine.high %v118_v59, %v126_v63  ;;  %v95_v25 = vld [vmem:[%s5064_s1 + $0x260] sm:$0xff] }
  0x28   :  { %942 = vmatprep.mubr.bf16.mxu1 %v3822_v3  ;;  %912 = vmatprep.subr.bf16.mxu1 %v3046_v26  ;;  %v3080_v26 = vcombine.high %v71_v16, %v79_v17  ;;  %v3095_v39 = vcombine.low %v87_v24, %v95_v25 }
  0x2a   :  { %872 = vmatpush1.bf16.msra.mxu0 %v3043_v11  ;;  %v3125_v11 = vcombine.low %v118_v59, %v126_v63  ;;  %v3097_v59 = vcombine.low %v88_v44, %v96_v45 }
  0x2b   :  { %873 = vmatprep.subr.bf16.mxu0 %v3060_v14  ;;  %913 = vmatpush1.bf16.msra.mxu1 %v3045_v33  ;;  %v3142_v14 = vcombine.high %v134_v4, %v142_v5  ;;  %v111_v33 = vld [vmem:[%s5064_s1 + $0x2e0] sm:$0xff] }
  0x2c   :  { %914 = vmatprep.subr.bf16.mxu1 %v3062_v34  ;;  %v3096_v34 = vcombine.high %v87_v24, %v95_v25  ;;  %v3111_v47 = vcombine.low %v103_v32, %v111_v33 }
  0x2e   :  { %874 = vmatpush1.bf16.msra.mxu0 %v3059_v19  ;;  %v3141_v19 = vcombine.low %v134_v4, %v142_v5 }
  0x2f   :  { %875 = vmatprep.subr.bf16.mxu0 %v3076_v22  ;;  %915 = vmatpush1.bf16.msra.mxu1 %v3061_v41  ;;  %v3034_v22 = vcombine.high %v24_v12, %v32_v13  ;;  %v127_v41 = vld [vmem:[%s5064_s1 + $0x360] sm:$0xff] }
  0x30   :  { %916 = vmatprep.subr.bf16.mxu1 %v3078_v42  ;;  %v3112_v42 = vcombine.high %v103_v32, %v111_v33  ;;  %v3127_v55 = vcombine.low %v119_v40, %v127_v41 }
  0x32   :  { %876 = vmatpush1.bf16.msra.mxu0 %v3075_v27  ;;  %v3033_v27 = vcombine.low %v24_v12, %v32_v13 }
  0x33   :  { %877 = vmatprep.subr.bf16.mxu0 %v3092_v30  ;;  %917 = vmatpush1.bf16.msra.mxu1 %v3077_v49  ;;  %v3050_v30 = vcombine.high %v40_v20, %v48_v21  ;;  %v143_v49 = vld [vmem:[%s5064_s1 + $0x3e0] sm:$0xff] }
  0x34   :  { %918 = vmatprep.subr.bf16.mxu1 %v3094_v50  ;;  %v3128_v50 = vcombine.high %v119_v40, %v127_v41  ;;  %v3143_v63 = vcombine.low %v135_v48, %v143_v49 }
  0x36   :  { %878 = vmatpush1.bf16.msra.mxu0 %v3091_v35  ;;  %v3049_v35 = vcombine.low %v40_v20, %v48_v21 }
  0x37   :  { %879 = vmatprep.subr.bf16.mxu0 %v3108_v38  ;;  %919 = vmatpush1.bf16.msra.mxu1 %v3093_v57  ;;  %v3066_v38 = vcombine.high %v56_v28, %v64_v29  ;;  %v33_v57 = vld [vmem:[%s5064_s1 + $0x70] sm:$0xff] }
  0x38   :  { %920 = vmatprep.subr.bf16.mxu1 %v3110_v58  ;;  %v3144_v58 = vcombine.high %v135_v48, %v143_v49  ;;  %v3036_v4 = vcombine.high %v25_v56, %v33_v57  ;;  %v3035_v9 = vcombine.low %v25_v56, %v33_v57  ;;  %v137_v48 = vld [vmem:[%s5064_s1 + $0x3b0] sm:$0xff] }
  0x3a   :  { %880 = vmatpush1.bf16.msra.mxu0 %v3107_v43  ;;  %v3065_v43 = vcombine.low %v56_v28, %v64_v29 }
  0x3b   :  { %881 = vmatprep.subr.bf16.mxu0 %v3124_v46  ;;  %921 = vmatpush1.bf16.msra.mxu1 %v3109_v2  ;;  %v3082_v46 = vcombine.high %v72_v36, %v80_v37  ;;  %v49_v2 = vld [vmem:[%s5064_s1 + $0xf0] sm:$0xff] }
  0x3c   :  { %922 = vmatprep.subr.bf16.mxu1 %v3126_v6  ;;  %v136_v6 = vld [vmem:[%s5064_s1 + $0x3a8] sm:$0xff] }
  0x3e   :  { %882 = vmatpush1.bf16.msra.mxu0 %v3123_v52  ;;  %v104_v52 = vld [vmem:[%s5064_s1 + $0x2a8] sm:$0xff] }
  0x3f   :  { %883 = vmatprep.subr.bf16.mxu0 %v3140_v54  ;;  %923 = vmatpush1.bf16.msra.mxu1 %v3125_v11  ;;  %v3098_v54 = vcombine.high %v88_v44, %v96_v45  ;;  %v3114_v62 = vcombine.high %v104_v52, %v112_v53  ;;  %v3113_v5 = vcombine.low %v104_v52, %v112_v53  ;;  %v65_v11 = vld [vmem:[%s5064_s1 + $0x170] sm:$0xff]  ;;  %v98_v45 = vld [vmem:[%s5064_s1 + $0x278] sm:$0xff] }
  0x40   :  { %924 = vmatprep.subr.bf16.mxu1 %v3142_v14  ;;  %v26_v14 = vld [vmem:[%s5064_s1 + $0x38] sm:$0xff] }
  0x41   :  { %v106_v53 = vld [vmem:[%s5064_s1 + $0x2b8] sm:$0xff] }
  0x42   :  { %884 = vmatpush1.bf16.msra.mxu0 %v3139_v60  ;;  %v120_v60 = vld [vmem:[%s5064_s1 + $0x328] sm:$0xff] }
  0x43   :  { %951 = vmatprep.subr.bf16.mxu0 %v3032_v0  ;;  %925 = vmatpush1.bf16.msra.mxu1 %v3141_v19  ;;  %v41_v0 = vld [vmem:[%s5064_s1 + $0xb0] sm:$0xff]  ;;  %v3130_v8 = vcombine.high %v120_v60, %v128_v61  ;;  %v3129_v13 = vcombine.low %v120_v60, %v128_v61  ;;  %v130_v60 = vld [vmem:[%s5064_s1 + $0x378] sm:$0xff] }
  0x44   :  { %992 = vmatprep.subr.bf16.mxu1 %v3034_v22  ;;  %v3052_v12 = vcombine.high %v41_v0, %v49_v2  ;;  %v3051_v17 = vcombine.low %v41_v0, %v49_v2  ;;  %v81_v19 = vld [vmem:[%s5064_s1 + $0x1f0] sm:$0xff]  ;;  %v42_v22 = vld [vmem:[%s5064_s1 + $0xb8] sm:$0xff] }
  0x45   :  { %902 = vmatmul.mubr.bf16.vlgmr.msra.gmra.mrb[4].mxu0 %v3955_v1  ;;  %v138_v0 = vld [vmem:[%s5064_s1 + $0x3b8] sm:$0xff] }
  0x46   :  { %952 = vmatpush1.bf16.msra.mxu0 %v3031_v7  ;;  %983 = vmatprep.mubr.bf16.mxu0 %v3822_v3  ;;  %v144_v7 = vld [vmem:[%s5064_s1 + $0x3e8] sm:$0xff] }
  0x47   :  { %953 = vmatprep.subr.bf16.mxu0 %v3048_v10  ;;  %943 = vmatmul.mubr.bf16.vlgmr.msra.gmra.mrb[4].mxu1 %v3955_v1  ;;  %v57_v10 = vld [vmem:[%s5064_s1 + $0x130] sm:$0xff]  ;;  %v3146_v16 = vcombine.high %v136_v6, %v144_v7  ;;  %v3145_v21 = vcombine.low %v136_v6, %v144_v7 }
  0x48   :  { %993 = vmatpush1.bf16.msra.mxu1 %v3033_v27  ;;  %1024 = vmatprep.mubr.bf16.mxu1 %v3822_v3  ;;  %v3068_v20 = vcombine.high %v57_v10, %v65_v11  ;;  %v3067_v25 = vcombine.low %v57_v10, %v65_v11  ;;  %v97_v27 = vld [vmem:[%s5064_s1 + $0x270] sm:$0xff]  ;;  %v3439_v11 = vld [vmem:[%s5066_s2 + $0x4] ss:$8 sps:$4 sm:$0xff]  }
  0x49   :  { %994 = vmatprep.subr.bf16.mxu1 %v3050_v30  ;;  %v58_v30 = vld [vmem:[%s5064_s1 + $0x138] sm:$0xff] }
  0x4a   :  { %954 = vmatpush1.bf16.msra.mxu0 %v3047_v15  ;;  %v34_v15 = vld [vmem:[%s5064_s1 + $0x78] sm:$0xff] }
  0x4b   :  { %955 = vmatprep.subr.bf16.mxu0 %v3064_v18  ;;  %v73_v18 = vld [vmem:[%s5064_s1 + $0x1b0] sm:$0xff]  ;;  %v3038_v24 = vcombine.high %v26_v14, %v34_v15  ;;  %v3037_v29 = vcombine.low %v26_v14, %v34_v15  ;;  %v3437_v14 = vld [vmem:[%s5066_s2] ss:$8 sps:$4 sm:$0xff]  }
  0x4c   :  { %995 = vmatpush1.bf16.msra.mxu1 %v3049_v35  ;;  %v3084_v28 = vcombine.high %v73_v18, %v81_v19  ;;  %v3083_v33 = vcombine.low %v73_v18, %v81_v19  ;;  %v113_v35 = vld [vmem:[%s5064_s1 + $0x2f0] sm:$0xff]  ;;  %v3500_v15 = vld [vmem:[%s5066_s2 + $0x420] ss:$8 sps:$4 sm:$0xff]  }
  0x4d   :  { %996 = vmatprep.subr.bf16.mxu1 %v3066_v38  ;;  %v74_v38 = vld [vmem:[%s5064_s1 + $0x1b8] sm:$0xff] }
  0x4e   :  { %956 = vmatpush1.bf16.msra.mxu0 %v3063_v23  ;;  %v50_v23 = vld [vmem:[%s5064_s1 + $0xf8] sm:$0xff] }
  0x4f   :  { %957 = vmatprep.subr.bf16.mxu0 %v3080_v26  ;;  %v89_v26 = vld [vmem:[%s5064_s1 + $0x230] sm:$0xff]  ;;  %v3054_v32 = vcombine.high %v42_v22, %v50_v23  ;;  %v3053_v37 = vcombine.low %v42_v22, %v50_v23  ;;  %v3443_v22 = vld [vmem:[%s5066_s2 + $0x20] ss:$8 sps:$4 sm:$0xff]  }
  0x50   :  { %997 = vmatpush1.bf16.msra.mxu1 %v3065_v43  ;;  %v3100_v36 = vcombine.high %v89_v26, %v97_v27  ;;  %v3099_v41 = vcombine.low %v89_v26, %v97_v27  ;;  %v3496_v6 = vld [vmem:[%s5066_s2 + $0x414] ss:$8 sps:$4 sm:$0xff]   ;;  %v3494_v10 = vld [vmem:[%s5066_s2 + $0x410] ss:$8 sps:$4 sm:$0xff]   ;;  %v3512_v23 = vld [vmem:[%s5066_s2 + $0x440] ss:$8 sps:$4 sm:$0xff]  }
  0x51   :  { %998 = vmatprep.subr.bf16.mxu1 %v3082_v46  ;;  %v3440_v18 = vld [vmem:[%s5066_s2 + $0x10] ss:$8 sps:$4 sm:$0xff]   ;;  %v3526_v27 = vld [vmem:[%s5066_s2 + $0x464] ss:$8 sps:$4 sm:$0xff]  }
  0x52   :  { %958 = vmatpush1.bf16.msra.mxu0 %v3079_v31  ;;  %v66_v31 = vld [vmem:[%s5064_s1 + $0x178] sm:$0xff] }
  0x53   :  { %959 = vmatprep.subr.bf16.mxu0 %v3096_v34  ;;  %v105_v34 = vld [vmem:[%s5064_s1 + $0x2b0] sm:$0xff]  ;;  %v3070_v40 = vcombine.high %v58_v30, %v66_v31  ;;  %v3069_v44 = vcombine.low %v58_v30, %v66_v31  ;;  %v3524_v30 = vld [vmem:[%s5066_s2 + $0x460] ss:$8 sps:$4 sm:$0xff]  }
  0x54   :  { %999 = vmatpush1.bf16.msra.mxu1 %v3081_v51  ;;  %v3116_v43 = vcombine.high %v105_v34, %v113_v35  ;;  %v3506_v19 = vld [vmem:[%s5066_s2 + $0x430] ss:$8 sps:$4 sm:$0xff]   ;;  %v3532_v31 = vld [vmem:[%s5066_s2 + $0x474] ss:$8 sps:$4 sm:$0xff]  }
  0x55   :  { %1000 = vmatprep.subr.bf16.mxu1 %v3098_v54  ;;  %v114_v54 = vld [vmem:[%s5064_s1 + $0x2f8] sm:$0xff] }
  0x56   :  { %960 = vmatpush1.bf16.msra.mxu0 %v3095_v39  ;;  %v82_v39 = vld [vmem:[%s5064_s1 + $0x1f8] sm:$0xff] }
  0x57   :  { %961 = vmatprep.subr.bf16.mxu0 %v3112_v42  ;;  %v129_v42 = vld [vmem:[%s5064_s1 + $0x370] sm:$0xff]  ;;  %v3086_v46 = vcombine.high %v74_v38, %v82_v39  ;;  %v3085_v51 = vcombine.low %v74_v38, %v82_v39  ;;  %v3536_v38 = vld [vmem:[%s5066_s2 + $0x480] ss:$8 sps:$4 sm:$0xff]  }
  0x58   :  { %1001 = vmatpush1.bf16.msra.mxu1 %v3097_v59  ;;  %v122_v59 = vld [vmem:[%s5064_s1 + $0x338] sm:$0xff] }
  0x59   :  { %1002 = vmatprep.subr.bf16.mxu1 %v3114_v62  ;;  %v3490_v62 = vld [vmem:[%s5066_s2 + $0x404] ss:$8 sps:$4 sm:$0xff]   ;;  %v3134_v2 = vcombine.high %v122_v59, %v130_v60  ;;  %v3133_v7 = vcombine.low %v122_v59, %v130_v60  ;;  %v3518_v26 = vld [vmem:[%s5066_s2 + $0x450] ss:$8 sps:$4 sm:$0xff]   ;;  %v3544_v39 = vld [vmem:[%s5066_s2 + $0x494] ss:$8 sps:$4 sm:$0xff]  }
  0x5a   :  { %962 = vmatpush1.bf16.msra.mxu0 %v3111_v47  ;;  %v3115_v47 = vcombine.low %v105_v34, %v113_v35  ;;  %v3530_v34 = vld [vmem:[%s5066_s2 + $0x470] ss:$8 sps:$4 sm:$0xff]   ;;  %v3538_v35 = vld [vmem:[%s5066_s2 + $0x484] ss:$8 sps:$4 sm:$0xff]   ;;  %v3572_v60 = vld [vmem:[%s5066_s2 + $0x4e0] ss:$8 sps:$4 sm:$0xff]  }
  0x5b   :  { %963 = vmatprep.subr.bf16.mxu0 %v3128_v50  ;;  %v145_v50 = vld [vmem:[%s5064_s1 + $0x3f0] sm:$0xff]  ;;  %v3475_v59 = vld [vmem:[%s5066_s2 + $0xc4] ss:$8 sps:$4 sm:$0xff]  }
  0x5c   :  { %1003 = vmatpush1.bf16.msra.mxu1 %v3113_v5  ;;  %v3148_v56 = vcombine.high %v137_v48, %v145_v50  ;;  %v3147_v61 = vcombine.low %v137_v48, %v145_v50  ;;  %v3488_v5 = vld [vmem:[%s5066_s2 + $0x400] ss:$8 sps:$4 sm:$0xff]   ;;  %v3554_v48 = vld [vmem:[%s5066_s2 + $0x4b0] ss:$8 sps:$4 sm:$0xff]  }
  0x5d   :  { %1004 = vmatprep.subr.bf16.mxu1 %v3130_v8  ;;  %v3464_v50 = vld [vmem:[%s5066_s2 + $0x90] ss:$8 sps:$4 sm:$0xff]  }
  0x5e   :  { %964 = vmatpush1.bf16.msra.mxu0 %v3127_v55 }
  0x5f   :  { %965 = vmatprep.subr.bf16.mxu0 %v3144_v58  ;;  %v3118_v58 = vcombine.high %v106_v53, %v114_v54 }
  0x60   :  { %1005 = vmatpush1.bf16.msra.mxu1 %v3129_v13 }
  0x61   :  { %1006 = vmatprep.subr.bf16.mxu1 %v3146_v16  ;;  %v3442_v16 = vld [vmem:[%s5066_s2 + $0x14] ss:$8 sps:$4 sm:$0xff]  }
  0x62   :  { %966 = vmatpush1.bf16.msra.mxu0 %v3143_v63  ;;  %v3117_v63 = vcombine.low %v106_v53, %v114_v54  ;;  %v3568_v53 = vld [vmem:[%s5066_s2 + $0x4d4] ss:$8 sps:$4 sm:$0xff]   ;;  %v3467_v54 = vld [vmem:[%s5066_s2 + $0xa0] ss:$8 sps:$4 sm:$0xff]  }
  0x63   :  { %1033 = vmatprep.subr.bf16.mxu0 %v3036_v4  ;;  %v146_v4 = vld [vmem:[%s5064_s1 + $0x3f8] sm:$0xff] }
  0x64   :  { %1007 = vmatpush1.bf16.msra.mxu1 %v3145_v21  ;;  %v3150_v8 = vcombine.high %v138_v0, %v146_v4  ;;  %v3149_v13 = vcombine.low %v138_v0, %v146_v4  ;;  %v3514_v21 = vld [vmem:[%s5066_s2 + $0x444] ss:$8 sps:$4 sm:$0xff]   ;;  %v3578_v0 = vld [vmem:[%s5066_s2 + $0x4f0] ss:$8 sps:$4 sm:$0xff]  }
  0x65   :  { %984 = vmatmul.mubr.bf16.vlgmr.msra.gmra.mrb[8].mxu0 %v3955_v1  ;;  %1074 = vmatprep.subr.bf16.mxu1 %v3038_v24  ;;  %v3448_v24 = vld [vmem:[%s5066_s2 + $0x34] ss:$8 sps:$4 sm:$0xff]   ;;  %v3476_v4 = vld [vmem:[%s5066_s2 + $0xd0] ss:$8 sps:$4 sm:$0xff]  }
  0x66   :  { %1034 = vmatpush1.bf16.msra.mxu0 %v3035_v9  ;;  %1065 = vmatprep.mubr.bf16.mxu0 %v3822_v3  ;;  %v3821_v9 = vld [vmem:[%s5065_s0] sm:$0x1] }
  0x67   :  { %1035 = vmatprep.subr.bf16.mxu0 %v3052_v12  ;;  %1025 = vmatmul.mubr.bf16.vlgmr.msra.gmra.mrb[8].mxu1 %v3955_v1  ;;  %v121_v1 = vld [vmem:[%s5064_s1 + $0x330] sm:$0xff]  ;;  %v3502_v12 = vld [vmem:[%s5066_s2 + $0x424] ss:$8 sps:$4 sm:$0xff]  }
  0x68   :  { %1075 = vmatpush1.bf16.msra.mxu1 %v3037_v29  ;;  %1106 = vmatprep.mubr.bf16.mxu1 %v3822_v3  ;;  %v90_v3 = vld [vmem:[%s5064_s1 + $0x238] sm:$0xff]  ;;  %v3132_v49 = vcombine.high %v121_v1, %v129_v42  ;;  %v3131_v55 = vcombine.low %v121_v1, %v129_v42  ;;  %v3451_v29 = vld [vmem:[%s5066_s2 + $0x44] ss:$8 sps:$4 sm:$0xff]  }
  0x69   :  { %1076 = vmatprep.subr.bf16.mxu1 %v3054_v32  ;;  %v3102_v52 = vcombine.high %v90_v3, %v98_v45  ;;  %v3101_v57 = vcombine.low %v90_v3, %v98_v45  ;;  %v3449_v32 = vld [vmem:[%s5066_s2 + $0x40] ss:$8 sps:$4 sm:$0xff]   ;;  %v3542_v1 = vld [vmem:[%s5066_s2 + $0x490] ss:$8 sps:$4 sm:$0xff]   ;;  %v3550_v42 = vld [vmem:[%s5066_s2 + $0x4a4] ss:$8 sps:$4 sm:$0xff]  }
  0x6a   :  { %1036 = vmatpush1.bf16.msra.mxu0 %v3051_v17  ;;  %v3508_v17 = vld [vmem:[%s5066_s2 + $0x434] ss:$8 sps:$4 sm:$0xff]   ;;  %v3548_v3 = vld [vmem:[%s5066_s2 + $0x4a0] ss:$8 sps:$4 sm:$0xff]  }
  0x6b   :  { %1037 = vmatprep.subr.bf16.mxu0 %v3068_v20  ;;  %v3445_v20 = vld [vmem:[%s5066_s2 + $0x24] ss:$8 sps:$4 sm:$0xff]   ;;  %v3556_v45 = vld [vmem:[%s5066_s2 + $0x4b4] ss:$8 sps:$4 sm:$0xff]  }
  0x6c   :  { %1077 = vmatpush1.bf16.msra.mxu1 %v3053_v37  ;;  %v3457_v37 = vld [vmem:[%s5066_s2 + $0x64] ss:$8 sps:$4 sm:$0xff]  }
  0x6d   :  { %1078 = vmatprep.subr.bf16.mxu1 %v3070_v40  ;;  %v3455_v40 = vld [vmem:[%s5066_s2 + $0x60] ss:$8 sps:$4 sm:$0xff]  }
  0x6e   :  { %1038 = vmatpush1.bf16.msra.mxu0 %v3067_v25  ;;  %v3520_v25 = vld [vmem:[%s5066_s2 + $0x454] ss:$8 sps:$4 sm:$0xff]  }
  0x6f   :  { %1039 = vmatprep.subr.bf16.mxu0 %v3084_v28  ;;  %v3446_v28 = vld [vmem:[%s5066_s2 + $0x30] ss:$8 sps:$4 sm:$0xff]  }
  0x70   :  { %1079 = vmatpush1.bf16.msra.mxu1 %v3069_v44  ;;  %v3463_v44 = vld [vmem:[%s5066_s2 + $0x84] ss:$8 sps:$4 sm:$0xff]  }
  0x71   :  { %1080 = vmatprep.subr.bf16.mxu1 %v3086_v46  ;;  %v3461_v46 = vld [vmem:[%s5066_s2 + $0x80] ss:$8 sps:$4 sm:$0xff]  }
  0x72   :  { %1040 = vmatpush1.bf16.msra.mxu0 %v3083_v33  ;;  %v3454_v33 = vld [vmem:[%s5066_s2 + $0x54] ss:$8 sps:$4 sm:$0xff]  }
  0x73   :  { %1041 = vmatprep.subr.bf16.mxu0 %v3100_v36  ;;  %v3452_v36 = vld [vmem:[%s5066_s2 + $0x50] ss:$8 sps:$4 sm:$0xff]  }
  0x74   :  { %1081 = vmatpush1.bf16.msra.mxu1 %v3085_v51  ;;  %v3469_v51 = vld [vmem:[%s5066_s2 + $0xa4] ss:$8 sps:$4 sm:$0xff]  }
  0x75   :  { %1082 = vmatprep.subr.bf16.mxu1 %v3102_v52  ;;  %v3560_v52 = vld [vmem:[%s5066_s2 + $0x4c0] ss:$8 sps:$4 sm:$0xff]  }
  0x76   :  { %1042 = vmatpush1.bf16.msra.mxu0 %v3099_v41  ;;  %v3460_v41 = vld [vmem:[%s5066_s2 + $0x74] ss:$8 sps:$4 sm:$0xff]  }
  0x77   :  { %1043 = vmatprep.subr.bf16.mxu0 %v3116_v43  ;;  %v3458_v43 = vld [vmem:[%s5066_s2 + $0x70] ss:$8 sps:$4 sm:$0xff]  }
  0x78   :  { %1083 = vmatpush1.bf16.msra.mxu1 %v3101_v57  ;;  %v3574_v57 = vld [vmem:[%s5066_s2 + $0x4e4] ss:$8 sps:$4 sm:$0xff]  }
  0x79   :  { %1084 = vmatprep.subr.bf16.mxu1 %v3118_v58  ;;  %v3470_v58 = vld [vmem:[%s5066_s2 + $0xb0] ss:$8 sps:$4 sm:$0xff]  }
  0x7a   :  { %1044 = vmatpush1.bf16.msra.mxu0 %v3115_v47  ;;  %v3466_v47 = vld [vmem:[%s5066_s2 + $0x94] ss:$8 sps:$4 sm:$0xff]  }
  0x7b   :  { %1045 = vmatprep.subr.bf16.mxu0 %v3132_v49  ;;  %v3562_v49 = vld [vmem:[%s5066_s2 + $0x4c4] ss:$8 sps:$4 sm:$0xff]  }
  0x7c   :  { %1085 = vmatpush1.bf16.msra.mxu1 %v3117_v63  ;;  %v3478_v63 = vld [vmem:[%s5066_s2 + $0xd4] ss:$8 sps:$4 sm:$0xff]  }
  0x7d   :  { %1086 = vmatprep.subr.bf16.mxu1 %v3134_v2  ;;  %v3586_v2 = vld [vmem:[%s5066_s2 + $0x504] ss:$8 sps:$4 sm:$0xff]  }
  0x7e   :  { %1046 = vmatpush1.bf16.msra.mxu0 %v3131_v55  ;;  %v3472_v55 = vld [vmem:[%s5066_s2 + $0xb4] ss:$8 sps:$4 sm:$0xff]  }
  0x7f   :  { %1047 = vmatprep.subr.bf16.mxu0 %v3148_v56  ;;  %v3566_v56 = vld [vmem:[%s5066_s2 + $0x4d0] ss:$8 sps:$4 sm:$0xff]  }
  0x80   :  { %1087 = vmatpush1.bf16.msra.mxu1 %v3133_v7  ;;  %v3484_v7 = vld [vmem:[%s5066_s2 + $0xf4] ss:$8 sps:$4 sm:$0xff]  }
  0x81   :  { %1088 = vmatprep.subr.bf16.mxu1 %v3150_v8  ;;  %v3482_v8 = vld [vmem:[%s5066_s2 + $0xf0] ss:$8 sps:$4 sm:$0xff]  }
  0x82   :  { %1048 = vmatpush1.bf16.msra.mxu0 %v3147_v61  ;;  %v3580_v61 = vld [vmem:[%s5066_s2 + $0x4f4] ss:$8 sps:$4 sm:$0xff]  }
  0x83   :  { %2843 = vmatprep.subr.bf16.mxu0 %v3490_v62  ;;  %v3473_v62 = vld [vmem:[%s5066_s2 + $0xc0] ss:$8 sps:$4 sm:$0xff]  }
  0x84   :  { %1089 = vmatpush1.bf16.msra.mxu1 %v3149_v13 }
  0x85   :  { %1066 = vmatmul.mubr.bf16.vlgmr.msra.gmra.mrb[12].mxu0 %v3821_v9  ;;  %2679 = vmatprep.subr.bf16.mxu1 %v3439_v11 }
  0x86   :  { %2844 = vmatpush1.bf16.msra.mxu0 %v3488_v5  ;;  %v3481_v5 = vld [vmem:[%s5066_s2 + $0xe4] ss:$8 sps:$4 sm:$0xff]  }
  0x87   :  { %2845 = vmatprep.subr.bf16.mxu0 %v3496_v6  ;;  %1107 = vmatmul.mubr.bf16.vlgmr.msra.gmra.mrb[12].mxu1 %v3821_v9  ;;  %v3479_v6 = vld [vmem:[%s5066_s2 + $0xe0] ss:$8 sps:$4 sm:$0xff]   ;;  %v3487_v9 = vld [vmem:[%s5066_s2 + $0x104] ss:$8 sps:$4 sm:$0xff]  }
  0x88   :  { %2680 = vmatpush1.bf16.msra.mxu1 %v3437_v14 }
  0x89   :  { %2681 = vmatprep.subr.bf16.mxu1 %v3442_v16 }
  0x8a   :  { %2846 = vmatpush1.bf16.msra.mxu0 %v3494_v10 }
  0x8b   :  { %2847 = vmatprep.subr.bf16.mxu0 %v3502_v12 }
  0x8c   :  { %2682 = vmatpush1.bf16.msra.mxu1 %v3440_v18  ;;  %v3491_v18 = vld [vmem:[%s5066_s2 + $0x110] ss:$8 sps:$4 sm:$0xff]  }
  0x8d   :  { %2683 = vmatprep.subr.bf16.mxu1 %v3445_v20  ;;  %v3497_v20 = vld [vmem:[%s5066_s2 + $0x120] ss:$8 sps:$4 sm:$0xff]  }
  0x8e   :  { %2848 = vmatpush1.bf16.msra.mxu0 %v3500_v15  ;;  %v3485_v15 = vld [vmem:[%s5066_s2 + $0x100] ss:$8 sps:$4 sm:$0xff]  }
  0x8f   :  { %2849 = vmatprep.subr.bf16.mxu0 %v3508_v17  ;;  %v3493_v17 = vld [vmem:[%s5066_s2 + $0x114] ss:$8 sps:$4 sm:$0xff]  }
  0x90   :  { %2684 = vmatpush1.bf16.msra.mxu1 %v3443_v22  ;;  %v3505_v22 = vld [vmem:[%s5066_s2 + $0x134] ss:$8 sps:$4 sm:$0xff]  }
  0x91   :  { %2685 = vmatprep.subr.bf16.mxu1 %v3448_v24 }
  0x92   :  { %2850 = vmatpush1.bf16.msra.mxu0 %v3506_v19  ;;  %v3499_v19 = vld [vmem:[%s5066_s2 + $0x124] ss:$8 sps:$4 sm:$0xff]  }
  0x93   :  { %2851 = vmatprep.subr.bf16.mxu0 %v3514_v21 }
  0x94   :  { %2686 = vmatpush1.bf16.msra.mxu1 %v3446_v28  ;;  %v3511_v28 = vld [vmem:[%s5066_s2 + $0x144] ss:$8 sps:$4 sm:$0xff]  }
  0x95   :  { %2687 = vmatprep.subr.bf16.mxu1 %v3451_v29  ;;  %v3509_v29 = vld [vmem:[%s5066_s2 + $0x140] ss:$8 sps:$4 sm:$0xff]  }
  0x96   :  { %2852 = vmatpush1.bf16.msra.mxu0 %v3512_v23 }
  0x97   :  { %2853 = vmatprep.subr.bf16.mxu0 %v3520_v25 }
  0x98   :  { %2688 = vmatpush1.bf16.msra.mxu1 %v3449_v32  ;;  %v3523_v32 = vld [vmem:[%s5066_s2 + $0x164] ss:$8 sps:$4 sm:$0xff]  }
  0x99   :  { %2689 = vmatprep.subr.bf16.mxu1 %v3454_v33  ;;  %v3521_v33 = vld [vmem:[%s5066_s2 + $0x160] ss:$8 sps:$4 sm:$0xff]  }
  0x9a   :  { %2854 = vmatpush1.bf16.msra.mxu0 %v3518_v26 }
  0x9b   :  { %2855 = vmatprep.subr.bf16.mxu0 %v3526_v27  ;;  %v3503_v27 = vld [vmem:[%s5066_s2 + $0x130] ss:$8 sps:$4 sm:$0xff]  }
  0x9c   :  { %2690 = vmatpush1.bf16.msra.mxu1 %v3452_v36  ;;  %v3535_v36 = vld [vmem:[%s5066_s2 + $0x184] ss:$8 sps:$4 sm:$0xff]  }
  0x9d   :  { %2691 = vmatprep.subr.bf16.mxu1 %v3457_v37 }
  0x9e   :  { %2856 = vmatpush1.bf16.msra.mxu0 %v3524_v30  ;;  %v3517_v30 = vld [vmem:[%s5066_s2 + $0x154] ss:$8 sps:$4 sm:$0xff]  }
  0x9f   :  { %2857 = vmatprep.subr.bf16.mxu0 %v3532_v31  ;;  %v3515_v31 = vld [vmem:[%s5066_s2 + $0x150] ss:$8 sps:$4 sm:$0xff]  }
  0xa0   :  { %2692 = vmatpush1.bf16.msra.mxu1 %v3455_v40  ;;  %v3533_v40 = vld [vmem:[%s5066_s2 + $0x180] ss:$8 sps:$4 sm:$0xff]  }
  0xa1   :  { %2693 = vmatprep.subr.bf16.mxu1 %v3460_v41 }
  0xa2   :  { %2858 = vmatpush1.bf16.msra.mxu0 %v3530_v34  ;;  %v3529_v34 = vld [vmem:[%s5066_s2 + $0x174] ss:$8 sps:$4 sm:$0xff]  }
  0xa3   :  { %2859 = vmatprep.subr.bf16.mxu0 %v3538_v35  ;;  %v3527_v35 = vld [vmem:[%s5066_s2 + $0x170] ss:$8 sps:$4 sm:$0xff]  }
  0xa4   :  { %2694 = vmatpush1.bf16.msra.mxu1 %v3458_v43  ;;  %v3547_v43 = vld [vmem:[%s5066_s2 + $0x1a4] ss:$8 sps:$4 sm:$0xff]  }
  0xa5   :  { %2695 = vmatprep.subr.bf16.mxu1 %v3463_v44  ;;  %v3545_v44 = vld [vmem:[%s5066_s2 + $0x1a0] ss:$8 sps:$4 sm:$0xff]  }
  0xa6   :  { %2860 = vmatpush1.bf16.msra.mxu0 %v3536_v38 }
  0xa7   :  { %2861 = vmatprep.subr.bf16.mxu0 %v3544_v39 }
  0xa8   :  { %2696 = vmatpush1.bf16.msra.mxu1 %v3461_v46 }
  0xa9   :  { %2697 = vmatprep.subr.bf16.mxu1 %v3466_v47 }
  0xaa   :  { %2862 = vmatpush1.bf16.msra.mxu0 %v3542_v1  ;;  %v3541_v1 = vld [vmem:[%s5066_s2 + $0x194] ss:$8 sps:$4 sm:$0xff]  }
  0xab   :  { %2863 = vmatprep.subr.bf16.mxu0 %v3550_v42  ;;  %v3539_v42 = vld [vmem:[%s5066_s2 + $0x190] ss:$8 sps:$4 sm:$0xff]  }
  0xac   :  { %2698 = vmatpush1.bf16.msra.mxu1 %v3464_v50  ;;  %v3559_v50 = vld [vmem:[%s5066_s2 + $0x1c4] ss:$8 sps:$4 sm:$0xff]  }
  0xad   :  { %2699 = vmatprep.subr.bf16.mxu1 %v3469_v51  ;;  %v3557_v51 = vld [vmem:[%s5066_s2 + $0x1c0] ss:$8 sps:$4 sm:$0xff]  }
  0xae   :  { %2864 = vmatpush1.bf16.msra.mxu0 %v3548_v3 }
  0xaf   :  { %2865 = vmatprep.subr.bf16.mxu0 %v3556_v45  ;;  %v3553_v45 = vld [vmem:[%s5066_s2 + $0x1b4] ss:$8 sps:$4 sm:$0xff]  }
  0xb0   :  { %2700 = vmatpush1.bf16.msra.mxu1 %v3467_v54  ;;  %v3571_v54 = vld [vmem:[%s5066_s2 + $0x1e4] ss:$8 sps:$4 sm:$0xff]  }
  0xb1   :  { %2701 = vmatprep.subr.bf16.mxu1 %v3472_v55  ;;  %v3569_v55 = vld [vmem:[%s5066_s2 + $0x1e0] ss:$8 sps:$4 sm:$0xff]  }
  0xb2   :  { %2866 = vmatpush1.bf16.msra.mxu0 %v3554_v48 }
  0xb3   :  { %2867 = vmatprep.subr.bf16.mxu0 %v3562_v49  ;;  %v3551_v49 = vld [vmem:[%s5066_s2 + $0x1b0] ss:$8 sps:$4 sm:$0xff]  }
  0xb4   :  { %2702 = vmatpush1.bf16.msra.mxu1 %v3470_v58  ;;  %v3583_v58 = vld [vmem:[%s5066_s2 + $0x204] ss:$8 sps:$4 sm:$0xff]  }
  0xb5   :  { %2703 = vmatprep.subr.bf16.mxu1 %v3475_v59 }
  0xb6   :  { %2868 = vmatpush1.bf16.msra.mxu0 %v3560_v52  ;;  %v3565_v52 = vld [vmem:[%s5066_s2 + $0x1d4] ss:$8 sps:$4 sm:$0xff]  }
  0xb7   :  { %2869 = vmatprep.subr.bf16.mxu0 %v3568_v53  ;;  %v3563_v53 = vld [vmem:[%s5066_s2 + $0x1d0] ss:$8 sps:$4 sm:$0xff]  }
  0xb8   :  { %2704 = vmatpush1.bf16.msra.mxu1 %v3473_v62 }
  0xb9   :  { %2705 = vmatprep.subr.bf16.mxu1 %v3478_v63 }
  0xba   :  { %2870 = vmatpush1.bf16.msra.mxu0 %v3566_v56  ;;  %v3577_v56 = vld [vmem:[%s5066_s2 + $0x1f4] ss:$8 sps:$4 sm:$0xff]  }
  0xbb   :  { %2871 = vmatprep.subr.bf16.mxu0 %v3574_v57  ;;  %v3575_v57 = vld [vmem:[%s5066_s2 + $0x1f0] ss:$8 sps:$4 sm:$0xff]  }
  0xbc   :  { %2706 = vmatpush1.bf16.msra.mxu1 %v3476_v4 }
  0xbd   :  { %2707 = vmatprep.subr.bf16.mxu1 %v3481_v5  ;;  %v3584_v5 = vld [vmem:[%s5066_s2 + $0x500] ss:$8 sps:$4 sm:$0xff]  }
  0xbe   :  { %2872 = vmatpush1.bf16.msra.mxu0 %v3572_v60 }
  0xbf   :  { %2873 = vmatprep.subr.bf16.mxu0 %v3580_v61 }
  0xc0   :  { %2708 = vmatpush1.bf16.msra.mxu1 %v3479_v6  ;;  %v3589_v6 = vld [vmem:[%s5066_s2 + $0x214] ss:$8 sps:$4 sm:$0xff]  }
  0xc1   :  { %2709 = vmatprep.subr.bf16.mxu1 %v3484_v7 }
  0xc2   :  { %2874 = vmatpush1.bf16.msra.mxu0 %v3578_v0  ;;  %v3581_v0 = vld [vmem:[%s5066_s2 + $0x200] ss:$8 sps:$4 sm:$0xff]  }
  0xc3   :  { %2884 = vmatprep.subr.bf16.mxu0 %v3586_v2 }
  0xc4   :  { %2710 = vmatpush1.bf16.msra.mxu1 %v3482_v8  ;;  %v3592_v8 = vld [vmem:[%s5066_s2 + $0x514] ss:$8 sps:$4 sm:$0xff]  }
  0xc5   :  { %2720 = vmatprep.subr.bf16.mxu1 %v3487_v9  ;;  %v3587_v9 = vld [vmem:[%s5066_s2 + $0x210] ss:$8 sps:$4 sm:$0xff]  }
  0xf8   :  { %v821_v10 = vpop.f32.mrb[0].mxu0  ;;  %v4467_v21 = vpop.f32.mrb[0].mxu1 }
  0xf9   :  { %v1115_v11 = vpack.c.bf16 %v821_v10, %v821_v10  ;;  %v823_v12 = vpop.f32.mrb[1].mxu0  ;;  %v864_v23 = vpop.f32.mrb[1].mxu1  ;;  %v1117_v60 = vpack.c.bf16 %v4467_v21, %v4467_v21  ;;  %v3590_v10 = vld [vmem:[%s5066_s2 + $0x510] ss:$8 sps:$4 sm:$0xff]  }
  0xfa   :  { %v1116_v13 = vpack.c.bf16 %v823_v12, %v823_v12  ;;  %v825_v14 = vpop.f32.mrb[2].mxu0  ;;  %v1118_v24 = vpack.c.bf16 %v864_v23, %v864_v23  ;;  %v866_v25 = vpop.f32.mrb[2].mxu1  ;;  %v3598_v12 = vld [vmem:[%s5066_s2 + $0x524] ss:$8 sps:$4 sm:$0xff]   ;;  %v3602_v23 = vld [vmem:[%s5066_s2 + $0x530] ss:$8 sps:$4 sm:$0xff]  }
  0xfb   :  { %v826_v16 = vpop.f32.mrb[3].mxu0  ;;  %v867_v26 = vpop.f32.mrb[3].mxu1  ;;  %v3610_v25 = vld [vmem:[%s5066_s2 + $0x544] ss:$8 sps:$4 sm:$0xff]  }
  0xfc   :  { %2711 = vmatprep.mubr.bf16.mxu1 %v1116_v13  ;;  %v3593_v13 = vld [vmem:[%s5066_s2 + $0x220] ss:$8 sps:$4 sm:$0xff]   ;;  %v3601_v16 = vld [vmem:[%s5066_s2 + $0x234] ss:$8 sps:$4 sm:$0xff]  }
  0xfd   :  { %2712 = vmatmul.mubr.bf16.vlgmr.msra.gmra.mrb[16].mxu1 %v1115_v11  ;;  %v3595_v11 = vld [vmem:[%s5066_s2 + $0x224] ss:$8 sps:$4 sm:$0xff]   ;;  %v3605_v26 = vld [vmem:[%s5066_s2 + $0x240] ss:$8 sps:$4 sm:$0xff]  }
  0xfe   :  { %2721 = vmatpush1.bf16.msra.mxu1 %v3485_v15  ;;  %2752 = vmatprep.mubr.bf16.mxu1 %v1118_v24  ;;  %v3596_v15 = vld [vmem:[%s5066_s2 + $0x520] ss:$8 sps:$4 sm:$0xff]   ;;  %v3607_v24 = vld [vmem:[%s5066_s2 + $0x244] ss:$8 sps:$4 sm:$0xff]  }
  0xff   :  { %2722 = vmatprep.subr.bf16.mxu1 %v3493_v17 }
 0x102   :  { %2723 = vmatpush1.bf16.msra.mxu1 %v3491_v18  ;;  %v3604_v18 = vld [vmem:[%s5066_s2 + $0x534] ss:$8 sps:$4 sm:$0xff]  }
 0x103   :  { %2724 = vmatprep.subr.bf16.mxu1 %v3499_v19 }
 0x106   :  { %2725 = vmatpush1.bf16.msra.mxu1 %v3497_v20 }
 0x107   :  { %2726 = vmatprep.subr.bf16.mxu1 %v3505_v22  ;;  %v3599_v22 = vld [vmem:[%s5066_s2 + $0x230] ss:$8 sps:$4 sm:$0xff]  }
 0x10a   :  { %2727 = vmatpush1.bf16.msra.mxu1 %v3503_v27  ;;  %v3608_v27 = vld [vmem:[%s5066_s2 + $0x540] ss:$8 sps:$4 sm:$0xff]  }
 0x10b   :  { %2728 = vmatprep.subr.bf16.mxu1 %v3511_v28  ;;  %v3613_v28 = vld [vmem:[%s5066_s2 + $0x254] ss:$8 sps:$4 sm:$0xff]  }
 0x10e   :  { %2729 = vmatpush1.bf16.msra.mxu1 %v3509_v29  ;;  %v3616_v29 = vld [vmem:[%s5066_s2 + $0x554] ss:$8 sps:$4 sm:$0xff]  }
 0x10f   :  { %2730 = vmatprep.subr.bf16.mxu1 %v3517_v30  ;;  %v3611_v30 = vld [vmem:[%s5066_s2 + $0x250] ss:$8 sps:$4 sm:$0xff]  }
 0x112   :  { %2731 = vmatpush1.bf16.msra.mxu1 %v3515_v31  ;;  %v3614_v31 = vld [vmem:[%s5066_s2 + $0x550] ss:$8 sps:$4 sm:$0xff]  }
 0x113   :  { %2732 = vmatprep.subr.bf16.mxu1 %v3523_v32  ;;  %v3619_v32 = vld [vmem:[%s5066_s2 + $0x264] ss:$8 sps:$4 sm:$0xff]  }
 0x116   :  { %2733 = vmatpush1.bf16.msra.mxu1 %v3521_v33  ;;  %v3622_v33 = vld [vmem:[%s5066_s2 + $0x564] ss:$8 sps:$4 sm:$0xff]  }
 0x117   :  { %2734 = vmatprep.subr.bf16.mxu1 %v3529_v34  ;;  %v3617_v34 = vld [vmem:[%s5066_s2 + $0x260] ss:$8 sps:$4 sm:$0xff]  }
 0x118   :  { %v4502_v37 = vpop.f32.mrb[4].mxu0 }
 0x119   :  { %v905_v38 = vpop.f32.mrb[5].mxu0 }
 0x11a   :  { %2735 = vmatpush1.bf16.msra.mxu1 %v3527_v35  ;;  %v907_v39 = vpop.f32.mrb[6].mxu0  ;;  %v4519_v3 = vpop.f32.mrb[4].mxu1  ;;  %v1120_v7 = vpack.c.bf16 %v905_v38, %v905_v38  ;;  %v3620_v35 = vld [vmem:[%s5066_s2 + $0x560] ss:$8 sps:$4 sm:$0xff]   ;;  %v3628_v38 = vld [vmem:[%s5066_s2 + $0x574] ss:$8 sps:$4 sm:$0xff]  }
 0x11b   :  { %v908_v41 = vpop.f32.mrb[7].mxu0  ;;  %2736 = vmatprep.subr.bf16.mxu1 %v3535_v36  ;;  %v4524_v46 = vpop.f32.mrb[5].mxu1  ;;  %v3625_v36 = vld [vmem:[%s5066_s2 + $0x274] ss:$8 sps:$4 sm:$0xff]   ;;  %v3623_v39 = vld [vmem:[%s5066_s2 + $0x270] ss:$8 sps:$4 sm:$0xff]  }
 0x11c   :  { %v948_v47 = vpop.f32.mrb[6].mxu1  ;;  %v3631_v41 = vld [vmem:[%s5066_s2 + $0x284] ss:$8 sps:$4 sm:$0xff]  }
 0x11d   :  { %v949_v48 = vpop.f32.mrb[7].mxu1  ;;  %v3632_v47 = vld [vmem:[%s5066_s2 + $0x580] ss:$8 sps:$4 sm:$0xff]  }
 0x11e   :  { %2737 = vmatpush1.bf16.msra.mxu1 %v3533_v40  ;;  %v3626_v40 = vld [vmem:[%s5066_s2 + $0x570] ss:$8 sps:$4 sm:$0xff]   ;;  %v3637_v48 = vld [vmem:[%s5066_s2 + $0x294] ss:$8 sps:$4 sm:$0xff]  }
 0x11f   :  { %2738 = vmatprep.subr.bf16.mxu1 %v3541_v1  ;;  %v3634_v1 = vld [vmem:[%s5066_s2 + $0x584] ss:$8 sps:$4 sm:$0xff]  }
 0x122   :  { %2739 = vmatpush1.bf16.msra.mxu1 %v3539_v42 }
 0x123   :  { %2740 = vmatprep.subr.bf16.mxu1 %v3547_v43 }
 0x126   :  { %2741 = vmatpush1.bf16.msra.mxu1 %v3545_v44  ;;  %v3629_v44 = vld [vmem:[%s5066_s2 + $0x280] ss:$8 sps:$4 sm:$0xff]  }
 0x127   :  { %2742 = vmatprep.subr.bf16.mxu1 %v3553_v45 }
 0x12a   :  { %2743 = vmatpush1.bf16.msra.mxu1 %v3551_v49 }
 0x12b   :  { %2744 = vmatprep.subr.bf16.mxu1 %v3559_v50  ;;  %v3640_v50 = vld [vmem:[%s5066_s2 + $0x594] ss:$8 sps:$4 sm:$0xff]  }
 0x12e   :  { %2745 = vmatpush1.bf16.msra.mxu1 %v3557_v51  ;;  %v3635_v51 = vld [vmem:[%s5066_s2 + $0x290] ss:$8 sps:$4 sm:$0xff]  }
 0x12f   :  { %2746 = vmatprep.subr.bf16.mxu1 %v3565_v52  ;;  %v3638_v52 = vld [vmem:[%s5066_s2 + $0x590] ss:$8 sps:$4 sm:$0xff]  }
 0x132   :  { %2747 = vmatpush1.bf16.msra.mxu1 %v3563_v53  ;;  %v3643_v53 = vld [vmem:[%s5066_s2 + $0x2a4] ss:$8 sps:$4 sm:$0xff]  }
 0x133   :  { %2748 = vmatprep.subr.bf16.mxu1 %v3571_v54  ;;  %v3646_v54 = vld [vmem:[%s5066_s2 + $0x5a4] ss:$8 sps:$4 sm:$0xff]  }
 0x136   :  { %2749 = vmatpush1.bf16.msra.mxu1 %v3569_v55  ;;  %v3641_v55 = vld [vmem:[%s5066_s2 + $0x2a0] ss:$8 sps:$4 sm:$0xff]  }
 0x137   :  { %2750 = vmatprep.subr.bf16.mxu1 %v3577_v56 }
 0x138   :  { %v985_v59 = vpop.f32.mrb[8].mxu0 }
 0x139   :  { %v987_v61 = vpop.f32.mrb[9].mxu0  ;;  %v1123_v2 = vpack.c.bf16 %v985_v59, %v985_v59 }
 0x13a   :  { %v1124_v62 = vpack.c.bf16 %v987_v61, %v987_v61  ;;  %2751 = vmatpush1.bf16.msra.mxu1 %v3575_v57  ;;  %v989_v63 = vpop.f32.mrb[10].mxu0  ;;  %v4585_v14 = vpop.f32.mrb[8].mxu1  ;;  %v3644_v57 = vld [vmem:[%s5066_s2 + $0x5a0] ss:$8 sps:$4 sm:$0xff]  }
 0x13b   :  { %v990_v4 = vpop.f32.mrb[11].mxu0  ;;  %2761 = vmatprep.subr.bf16.mxu1 %v3583_v58  ;;  %v1028_v17 = vpop.f32.mrb[9].mxu1  ;;  %v3649_v58 = vld [vmem:[%s5066_s2 + $0x2b4] ss:$8 sps:$4 sm:$0xff]   ;;  %v3647_v63 = vld [vmem:[%s5066_s2 + $0x2b0] ss:$8 sps:$4 sm:$0xff]  }
 0x13c   :  { %2875 = vmatprep.mubr.bf16.mxu0 %v1124_v62  ;;  %v1126_v19 = vpack.c.bf16 %v1028_v17, %v1028_v17  ;;  %v1030_v20 = vpop.f32.mrb[10].mxu1  ;;  %v3658_v4 = vld [vmem:[%s5066_s2 + $0x5c4] ss:$8 sps:$4 sm:$0xff]   ;;  %v3676_v17 = vld [vmem:[%s5066_s2 + $0x5f4] ss:$8 sps:$4 sm:$0xff]  }
 0x13d   :  { %2753 = vmatmul.mubr.bf16.vlgmr.msra.gmra.mrb[16].mxu1 %v1117_v60  ;;  %2876 = vmatmul.mubr.bf16.vlgmr.msra.gmra.mrb[16].mxu0 %v1123_v2  ;;  %v1031_v21 = vpop.f32.mrb[11].mxu1  ;;  %v3652_v60 = vld [vmem:[%s5066_s2 + $0x5b4] ss:$8 sps:$4 sm:$0xff]   ;;  %v3655_v2 = vld [vmem:[%s5066_s2 + $0x2c4] ss:$8 sps:$4 sm:$0xff]  }
 0x13e   :  { %2762 = vmatpush1.bf16.msra.mxu1 %v3581_v0  ;;  %2793 = vmatprep.mubr.bf16.mxu1 %v1120_v7  ;;  %v3650_v0 = vld [vmem:[%s5066_s2 + $0x5b0] ss:$8 sps:$4 sm:$0xff]   ;;  %v3661_v7 = vld [vmem:[%s5066_s2 + $0x2d4] ss:$8 sps:$4 sm:$0xff]   ;;  %v3679_v20 = vld [vmem:[%s5066_s2 + $0x304] ss:$8 sps:$4 sm:$0xff]  }
 0x13f   :  { %2885 = vmatpush1.bf16.msra.mxu0 %v3584_v5  ;;  %2763 = vmatprep.subr.bf16.mxu1 %v3589_v6  ;;  %v3653_v5 = vld [vmem:[%s5066_s2 + $0x2c0] ss:$8 sps:$4 sm:$0xff]   ;;  %v3682_v21 = vld [vmem:[%s5066_s2 + $0x604] ss:$8 sps:$4 sm:$0xff]  }
 0x140   :  { %2886 = vmatprep.subr.bf16.mxu0 %v3592_v8  ;;  %2916 = vmatprep.mubr.bf16.mxu0 %v1126_v19  ;;  %v3656_v6 = vld [vmem:[%s5066_s2 + $0x5c0] ss:$8 sps:$4 sm:$0xff]   ;;  %v3664_v8 = vld [vmem:[%s5066_s2 + $0x5d4] ss:$8 sps:$4 sm:$0xff]   ;;  %v3674_v19 = vld [vmem:[%s5066_s2 + $0x5f0] ss:$8 sps:$4 sm:$0xff]  }
 0x142   :  { %2764 = vmatpush1.bf16.msra.mxu1 %v3587_v9  ;;  %v3659_v9 = vld [vmem:[%s5066_s2 + $0x2d0] ss:$8 sps:$4 sm:$0xff]  }
 0x143   :  { %2887 = vmatpush1.bf16.msra.mxu0 %v3590_v10  ;;  %2765 = vmatprep.subr.bf16.mxu1 %v3595_v11  ;;  %v3662_v10 = vld [vmem:[%s5066_s2 + $0x5d0] ss:$8 sps:$4 sm:$0xff]   ;;  %v3667_v11 = vld [vmem:[%s5066_s2 + $0x2e4] ss:$8 sps:$4 sm:$0xff]  }
 0x144   :  { %2888 = vmatprep.subr.bf16.mxu0 %v3598_v12  ;;  %v3670_v12 = vld [vmem:[%s5066_s2 + $0x5e4] ss:$8 sps:$4 sm:$0xff]  }
 0x146   :  { %2766 = vmatpush1.bf16.msra.mxu1 %v3593_v13  ;;  %v3665_v13 = vld [vmem:[%s5066_s2 + $0x2e0] ss:$8 sps:$4 sm:$0xff]  }
 0x147   :  { %2889 = vmatpush1.bf16.msra.mxu0 %v3596_v15  ;;  %2767 = vmatprep.subr.bf16.mxu1 %v3601_v16  ;;  %v3668_v15 = vld [vmem:[%s5066_s2 + $0x5e0] ss:$8 sps:$4 sm:$0xff]   ;;  %v3673_v16 = vld [vmem:[%s5066_s2 + $0x2f4] ss:$8 sps:$4 sm:$0xff]  }
 0x148   :  { %2890 = vmatprep.subr.bf16.mxu0 %v3604_v18  ;;  %v3671_v18 = vld [vmem:[%s5066_s2 + $0x2f0] ss:$8 sps:$4 sm:$0xff]  }
 0x14a   :  { %2768 = vmatpush1.bf16.msra.mxu1 %v3599_v22  ;;  %v1125_v22 = vpack.c.bf16 %v4585_v14, %v4585_v14  ;;  %v3688_v14 = vld [vmem:[%s5066_s2 + $0x614] ss:$8 sps:$4 sm:$0xff]  }
 0x14b   :  { %2891 = vmatpush1.bf16.msra.mxu0 %v3602_v23  ;;  %2769 = vmatprep.subr.bf16.mxu1 %v3607_v24  ;;  %v3677_v23 = vld [vmem:[%s5066_s2 + $0x300] ss:$8 sps:$4 sm:$0xff]   ;;  %v1119_v24 = vpack.c.bf16 %v4502_v37, %v4502_v37 }
 0x14c   :  { %2892 = vmatprep.subr.bf16.mxu0 %v3610_v25  ;;  %v3680_v25 = vld [vmem:[%s5066_s2 + $0x600] ss:$8 sps:$4 sm:$0xff]  }
 0x14e   :  { %2770 = vmatpush1.bf16.msra.mxu1 %v3605_v26  ;;  %v3685_v26 = vld [vmem:[%s5066_s2 + $0x314] ss:$8 sps:$4 sm:$0xff]  }
 0x14f   :  { %2893 = vmatpush1.bf16.msra.mxu0 %v3608_v27  ;;  %2771 = vmatprep.subr.bf16.mxu1 %v3613_v28  ;;  %v1122_v27 = vpack.c.bf16 %v4524_v46, %v4524_v46  ;;  %v3683_v28 = vld [vmem:[%s5066_s2 + $0x310] ss:$8 sps:$4 sm:$0xff]   ;;  %v3691_v46 = vld [vmem:[%s5066_s2 + $0x324] ss:$8 sps:$4 sm:$0xff]  }
 0x150   :  { %2894 = vmatprep.subr.bf16.mxu0 %v3616_v29  ;;  %v3686_v29 = vld [vmem:[%s5066_s2 + $0x610] ss:$8 sps:$4 sm:$0xff]  }
 0x152   :  { %2772 = vmatpush1.bf16.msra.mxu1 %v3611_v30  ;;  %v3694_v30 = vld [vmem:[%s5066_s2 + $0x624] ss:$8 sps:$4 sm:$0xff]  }
 0x153   :  { %2895 = vmatpush1.bf16.msra.mxu0 %v3614_v31  ;;  %2773 = vmatprep.subr.bf16.mxu1 %v3619_v32  ;;  %v3689_v31 = vld [vmem:[%s5066_s2 + $0x320] ss:$8 sps:$4 sm:$0xff]  }
 0x154   :  { %2896 = vmatprep.subr.bf16.mxu0 %v3622_v33  ;;  %v3692_v32 = vld [vmem:[%s5066_s2 + $0x620] ss:$8 sps:$4 sm:$0xff]   ;;  %v3697_v33 = vld [vmem:[%s5066_s2 + $0x334] ss:$8 sps:$4 sm:$0xff]  }
 0x156   :  { %2774 = vmatpush1.bf16.msra.mxu1 %v3617_v34  ;;  %v3700_v34 = vld [vmem:[%s5066_s2 + $0x634] ss:$8 sps:$4 sm:$0xff]  }
 0x157   :  { %2897 = vmatpush1.bf16.msra.mxu0 %v3620_v35  ;;  %2775 = vmatprep.subr.bf16.mxu1 %v3625_v36  ;;  %v3695_v35 = vld [vmem:[%s5066_s2 + $0x330] ss:$8 sps:$4 sm:$0xff]  }
 0x158   :  { %2898 = vmatprep.subr.bf16.mxu0 %v3628_v38  ;;  %v4656_v42 = vpop.f32.mrb[12].mxu0  ;;  %v3698_v36 = vld [vmem:[%s5066_s2 + $0x630] ss:$8 sps:$4 sm:$0xff]   ;;  %v3703_v38 = vld [vmem:[%s5066_s2 + $0x344] ss:$8 sps:$4 sm:$0xff]  }
 0x159   :  { %v4658_v43 = vpop.f32.mrb[13].mxu0 }
 0x15a   :  { %2776 = vmatpush1.bf16.msra.mxu1 %v3623_v39  ;;  %v1071_v45 = vpop.f32.mrb[14].mxu0  ;;  %v4687_v56 = vpop.f32.mrb[12].mxu1  ;;  %v1128_v37 = vpack.c.bf16 %v4658_v43, %v4658_v43  ;;  %v3706_v39 = vld [vmem:[%s5066_s2 + $0x644] ss:$8 sps:$4 sm:$0xff]   ;;  %v3712_v43 = vld [vmem:[%s5066_s2 + $0x654] ss:$8 sps:$4 sm:$0xff]  }
 0x15b   :  { %2899 = vmatpush1.bf16.msra.mxu0 %v3626_v40  ;;  %2777 = vmatprep.subr.bf16.mxu1 %v3631_v41  ;;  %v1072_v49 = vpop.f32.mrb[15].mxu0  ;;  %v4695_v59 = vpop.f32.mrb[13].mxu1  ;;  %v3701_v40 = vld [vmem:[%s5066_s2 + $0x340] ss:$8 sps:$4 sm:$0xff]   ;;  %v3710_v45 = vld [vmem:[%s5066_s2 + $0x650] ss:$8 sps:$4 sm:$0xff]  }
 0x15c   :  { %2900 = vmatprep.subr.bf16.mxu0 %v3634_v1  ;;  %v1112_v61 = vpop.f32.mrb[14].mxu1  ;;  %v3704_v41 = vld [vmem:[%s5066_s2 + $0x640] ss:$8 sps:$4 sm:$0xff]   ;;  %v3709_v1 = vld [vmem:[%s5066_s2 + $0x354] ss:$8 sps:$4 sm:$0xff]  }
 0x15d   :  { %v1113_v62 = vpop.f32.mrb[15].mxu1  ;;  %v3713_v49 = vld [vmem:[%s5066_s2 + $0x360] ss:$8 sps:$4 sm:$0xff]   ;;  %v3733_v61 = vld [vmem:[%s5066_s2 + $0x394] ss:$8 sps:$4 sm:$0xff]  }
 0x15e   :  { %2778 = vmatpush1.bf16.msra.mxu1 %v3629_v44  ;;  %v3707_v44 = vld [vmem:[%s5066_s2 + $0x350] ss:$8 sps:$4 sm:$0xff]   ;;  %v3736_v62 = vld [vmem:[%s5066_s2 + $0x694] ss:$8 sps:$4 sm:$0xff]  }
 0x15f   :  { %2901 = vmatpush1.bf16.msra.mxu0 %v3632_v47  ;;  %2779 = vmatprep.subr.bf16.mxu1 %v3637_v48  ;;  %v3715_v47 = vld [vmem:[%s5066_s2 + $0x364] ss:$8 sps:$4 sm:$0xff]  }
 0x160   :  { %2902 = vmatprep.subr.bf16.mxu0 %v3640_v50  ;;  %v3718_v48 = vld [vmem:[%s5066_s2 + $0x664] ss:$8 sps:$4 sm:$0xff]   ;;  %v3716_v50 = vld [vmem:[%s5066_s2 + $0x660] ss:$8 sps:$4 sm:$0xff]  }
 0x162   :  { %2780 = vmatpush1.bf16.msra.mxu1 %v3635_v51  ;;  %v3721_v51 = vld [vmem:[%s5066_s2 + $0x374] ss:$8 sps:$4 sm:$0xff]  }
 0x163   :  { %2903 = vmatpush1.bf16.msra.mxu0 %v3638_v52  ;;  %2781 = vmatprep.subr.bf16.mxu1 %v3643_v53  ;;  %v3724_v52 = vld [vmem:[%s5066_s2 + $0x674] ss:$8 sps:$4 sm:$0xff]   ;;  %v3719_v53 = vld [vmem:[%s5066_s2 + $0x370] ss:$8 sps:$4 sm:$0xff]  }
 0x164   :  { %2904 = vmatprep.subr.bf16.mxu0 %v3646_v54  ;;  %v3722_v54 = vld [vmem:[%s5066_s2 + $0x670] ss:$8 sps:$4 sm:$0xff]  }
 0x166   :  { %2782 = vmatpush1.bf16.msra.mxu1 %v3641_v55  ;;  %v3727_v55 = vld [vmem:[%s5066_s2 + $0x384] ss:$8 sps:$4 sm:$0xff]  }
 0x167   :  { %2905 = vmatpush1.bf16.msra.mxu0 %v3644_v57  ;;  %2783 = vmatprep.subr.bf16.mxu1 %v3649_v58  ;;  %v3730_v57 = vld [vmem:[%s5066_s2 + $0x684] ss:$8 sps:$4 sm:$0xff]   ;;  %v3725_v58 = vld [vmem:[%s5066_s2 + $0x380] ss:$8 sps:$4 sm:$0xff]  }
 0x168   :  { %2906 = vmatprep.subr.bf16.mxu0 %v3652_v60  ;;  %v3728_v60 = vld [vmem:[%s5066_s2 + $0x680] ss:$8 sps:$4 sm:$0xff]  }
 0x16a   :  { %2784 = vmatpush1.bf16.msra.mxu1 %v3647_v63  ;;  %v3731_v63 = vld [vmem:[%s5066_s2 + $0x390] ss:$8 sps:$4 sm:$0xff]  }
 0x16b   :  { %2907 = vmatpush1.bf16.msra.mxu0 %v3650_v0  ;;  %2785 = vmatprep.subr.bf16.mxu1 %v3655_v2  ;;  %v3734_v0 = vld [vmem:[%s5066_s2 + $0x690] ss:$8 sps:$4 sm:$0xff]   ;;  %v3739_v2 = vld [vmem:[%s5066_s2 + $0x3a4] ss:$8 sps:$4 sm:$0xff]  }
 0x16c   :  { %2908 = vmatprep.subr.bf16.mxu0 %v3658_v4  ;;  %v3742_v4 = vld [vmem:[%s5066_s2 + $0x6a4] ss:$8 sps:$4 sm:$0xff]  }
 0x16e   :  { %2786 = vmatpush1.bf16.msra.mxu1 %v3653_v5  ;;  %v3737_v5 = vld [vmem:[%s5066_s2 + $0x3a0] ss:$8 sps:$4 sm:$0xff]  }
 0x16f   :  { %2909 = vmatpush1.bf16.msra.mxu0 %v3656_v6  ;;  %2787 = vmatprep.subr.bf16.mxu1 %v3661_v7  ;;  %v3740_v6 = vld [vmem:[%s5066_s2 + $0x6a0] ss:$8 sps:$4 sm:$0xff]   ;;  %v3745_v7 = vld [vmem:[%s5066_s2 + $0x3b4] ss:$8 sps:$4 sm:$0xff]  }
 0x170   :  { %2910 = vmatprep.subr.bf16.mxu0 %v3664_v8  ;;  %v3748_v8 = vld [vmem:[%s5066_s2 + $0x6b4] ss:$8 sps:$4 sm:$0xff]  }
 0x172   :  { %2788 = vmatpush1.bf16.msra.mxu1 %v3659_v9  ;;  %v3743_v9 = vld [vmem:[%s5066_s2 + $0x3b0] ss:$8 sps:$4 sm:$0xff]  }
 0x173   :  { %2911 = vmatpush1.bf16.msra.mxu0 %v3662_v10  ;;  %2789 = vmatprep.subr.bf16.mxu1 %v3667_v11  ;;  %v3746_v10 = vld [vmem:[%s5066_s2 + $0x6b0] ss:$8 sps:$4 sm:$0xff]   ;;  %v3751_v11 = vld [vmem:[%s5066_s2 + $0x3c4] ss:$8 sps:$4 sm:$0xff]  }
 0x174   :  { %2912 = vmatprep.subr.bf16.mxu0 %v3670_v12  ;;  %v3754_v12 = vld [vmem:[%s5066_s2 + $0x6c4] ss:$8 sps:$4 sm:$0xff]  }
 0x176   :  { %2790 = vmatpush1.bf16.msra.mxu1 %v3665_v13  ;;  %v3749_v13 = vld [vmem:[%s5066_s2 + $0x3c0] ss:$8 sps:$4 sm:$0xff]  }
 0x177   :  { %2913 = vmatpush1.bf16.msra.mxu0 %v3668_v15  ;;  %2791 = vmatprep.subr.bf16.mxu1 %v3673_v16  ;;  %v3752_v15 = vld [vmem:[%s5066_s2 + $0x6c0] ss:$8 sps:$4 sm:$0xff]   ;;  %v3757_v16 = vld [vmem:[%s5066_s2 + $0x3d4] ss:$8 sps:$4 sm:$0xff]  }
 0x178   :  { %2914 = vmatprep.subr.bf16.mxu0 %v3676_v17  ;;  %v3760_v17 = vld [vmem:[%s5066_s2 + $0x6d4] ss:$8 sps:$4 sm:$0xff]  }
 0x17a   :  { %2792 = vmatpush1.bf16.msra.mxu1 %v3671_v18  ;;  %v3755_v18 = vld [vmem:[%s5066_s2 + $0x3d0] ss:$8 sps:$4 sm:$0xff]  }
 0x17b   :  { %2915 = vmatpush1.bf16.msra.mxu0 %v3674_v19  ;;  %2802 = vmatprep.subr.bf16.mxu1 %v3679_v20  ;;  %v3758_v19 = vld [vmem:[%s5066_s2 + $0x6d0] ss:$8 sps:$4 sm:$0xff]   ;;  %v3763_v20 = vld [vmem:[%s5066_s2 + $0x3e4] ss:$8 sps:$4 sm:$0xff]  }
 0x17c   :  { %2925 = vmatprep.subr.bf16.mxu0 %v3682_v21  ;;  %v3766_v21 = vld [vmem:[%s5066_s2 + $0x6e4] ss:$8 sps:$4 sm:$0xff]  }
 0x17d   :  { %2794 = vmatmul.mubr.bf16.vlgmr.msra.gmra.mrb[16].mxu1 %v1119_v24  ;;  %v3769_v24 = vld [vmem:[%s5066_s2 + $0x3f4] ss:$8 sps:$4 sm:$0xff]  }
 0x17e   :  { %2917 = vmatmul.mubr.bf16.vlgmr.msra.gmra.mrb[16].mxu0 %v1125_v22  ;;  %2803 = vmatpush1.bf16.msra.mxu1 %v3677_v23  ;;  %v3761_v22 = vld [vmem:[%s5066_s2 + $0x3e0] ss:$8 sps:$4 sm:$0xff]  }
 0x17f   :  { %2834 = vmatprep.mubr.bf16.mxu1 %v1122_v27  ;;  %2926 = vmatpush1.bf16.msra.mxu0 %v3680_v25  ;;  %v3764_v23 = vld [vmem:[%s5066_s2 + $0x6e0] ss:$8 sps:$4 sm:$0xff]   ;;  %v3772_v25 = vld [vmem:[%s5066_s2 + $0x6f4] ss:$8 sps:$4 sm:$0xff]   ;;  %v3775_v27 = vld [vmem:[%s5066_s2 + $0x704] ss:$8 sps:$4 sm:$0xff]  }
 0x180   :  { %2804 = vmatprep.subr.bf16.mxu1 %v3685_v26  ;;  %2927 = vmatprep.subr.bf16.mxu0 %v3688_v14  ;;  %v3767_v26 = vld [vmem:[%s5066_s2 + $0x3f0] ss:$8 sps:$4 sm:$0xff]  }
 0x181   :  { %2957 = vmatprep.mubr.bf16.mxu0 %v1128_v37  ;;  %v3770_v14 = vld [vmem:[%s5066_s2 + $0x6f0] ss:$8 sps:$4 sm:$0xff]   ;;  %v1127_v37 = vpack.c.bf16 %v4656_v42, %v4656_v42  ;;  %v3781_v42 = vld [vmem:[%s5066_s2 + $0x724] ss:$8 sps:$4 sm:$0xff]  }
 0x182   :  { %2805 = vmatpush1.bf16.msra.mxu1 %v3683_v28  ;;  %v1121_v28 = vpack.c.bf16 %v4519_v3, %v4519_v3  ;;  %v3776_v3 = vld [vmem:[%s5066_s2 + $0x710] ss:$8 sps:$4 sm:$0xff]  }
 0x183   :  { %2928 = vmatpush1.bf16.msra.mxu0 %v3686_v29  ;;  %2806 = vmatprep.subr.bf16.mxu1 %v3691_v46  ;;  %v3773_v29 = vld [vmem:[%s5066_s2 + $0x700] ss:$8 sps:$4 sm:$0xff]   ;;  %v1130_v46 = vpack.c.bf16 %v4695_v59, %v4695_v59 }
 0x184   :  { %2929 = vmatprep.subr.bf16.mxu0 %v3694_v30  ;;  %v3778_v30 = vld [vmem:[%s5066_s2 + $0x714] ss:$8 sps:$4 sm:$0xff]   ;;  %v3779_v59 = vld [vmem:[%s5066_s2 + $0x720] ss:$8 sps:$4 sm:$0xff]  }
 0x186   :  { %2807 = vmatpush1.bf16.msra.mxu1 %v3689_v31  ;;  %v3784_v31 = vld [vmem:[%s5066_s2 + $0x734] ss:$8 sps:$4 sm:$0xff]  }
 0x187   :  { %2930 = vmatpush1.bf16.msra.mxu0 %v3692_v32  ;;  %2808 = vmatprep.subr.bf16.mxu1 %v3697_v33  ;;  %v3782_v32 = vld [vmem:[%s5066_s2 + $0x730] ss:$8 sps:$4 sm:$0xff]   ;;  %v3787_v33 = vld [vmem:[%s5066_s2 + $0x744] ss:$8 sps:$4 sm:$0xff]  }
 0x188   :  { %2931 = vmatprep.subr.bf16.mxu0 %v3700_v34  ;;  %v3785_v34 = vld [vmem:[%s5066_s2 + $0x740] ss:$8 sps:$4 sm:$0xff]  }
 0x18a   :  { %2809 = vmatpush1.bf16.msra.mxu1 %v3695_v35  ;;  %v3790_v35 = vld [vmem:[%s5066_s2 + $0x754] ss:$8 sps:$4 sm:$0xff]  }
 0x18b   :  { %2932 = vmatpush1.bf16.msra.mxu0 %v3698_v36  ;;  %2810 = vmatprep.subr.bf16.mxu1 %v3703_v38  ;;  %v3788_v36 = vld [vmem:[%s5066_s2 + $0x750] ss:$8 sps:$4 sm:$0xff]   ;;  %v3793_v38 = vld [vmem:[%s5066_s2 + $0x764] ss:$8 sps:$4 sm:$0xff]  }
 0x18c   :  { %2933 = vmatprep.subr.bf16.mxu0 %v3706_v39  ;;  %v3791_v39 = vld [vmem:[%s5066_s2 + $0x760] ss:$8 sps:$4 sm:$0xff]  }
 0x18e   :  { %2811 = vmatpush1.bf16.msra.mxu1 %v3701_v40  ;;  %v3796_v40 = vld [vmem:[%s5066_s2 + $0x774] ss:$8 sps:$4 sm:$0xff]  }
 0x18f   :  { %2934 = vmatpush1.bf16.msra.mxu0 %v3704_v41  ;;  %2812 = vmatprep.subr.bf16.mxu1 %v3709_v1  ;;  %v3794_v41 = vld [vmem:[%s5066_s2 + $0x770] ss:$8 sps:$4 sm:$0xff]   ;;  %v3799_v1 = vld [vmem:[%s5066_s2 + $0x784] ss:$8 sps:$4 sm:$0xff]  }
 0x190   :  { %2935 = vmatprep.subr.bf16.mxu0 %v3712_v43  ;;  %v3797_v43 = vld [vmem:[%s5066_s2 + $0x780] ss:$8 sps:$4 sm:$0xff]  }
 0x192   :  { %2813 = vmatpush1.bf16.msra.mxu1 %v3707_v44  ;;  %v3802_v44 = vld [vmem:[%s5066_s2 + $0x794] ss:$8 sps:$4 sm:$0xff]  }
 0x193   :  { %2936 = vmatpush1.bf16.msra.mxu0 %v3710_v45  ;;  %2814 = vmatprep.subr.bf16.mxu1 %v3715_v47  ;;  %v3800_v45 = vld [vmem:[%s5066_s2 + $0x790] ss:$8 sps:$4 sm:$0xff]   ;;  %v3805_v47 = vld [vmem:[%s5066_s2 + $0x7a4] ss:$8 sps:$4 sm:$0xff]  }
 0x194   :  { %2937 = vmatprep.subr.bf16.mxu0 %v3718_v48  ;;  %v3803_v48 = vld [vmem:[%s5066_s2 + $0x7a0] ss:$8 sps:$4 sm:$0xff]  }
 0x196   :  { %2815 = vmatpush1.bf16.msra.mxu1 %v3713_v49  ;;  %v3808_v49 = vld [vmem:[%s5066_s2 + $0x7b4] ss:$8 sps:$4 sm:$0xff]  }
 0x197   :  { %2938 = vmatpush1.bf16.msra.mxu0 %v3716_v50  ;;  %2816 = vmatprep.subr.bf16.mxu1 %v3721_v51  ;;  %v3806_v50 = vld [vmem:[%s5066_s2 + $0x7b0] ss:$8 sps:$4 sm:$0xff]   ;;  %v3811_v51 = vld [vmem:[%s5066_s2 + $0x7c4] ss:$8 sps:$4 sm:$0xff]  }
 0x198   :  { %2939 = vmatprep.subr.bf16.mxu0 %v3724_v52  ;;  %v3809_v52 = vld [vmem:[%s5066_s2 + $0x7c0] ss:$8 sps:$4 sm:$0xff]  }
 0x19a   :  { %2817 = vmatpush1.bf16.msra.mxu1 %v3719_v53  ;;  %v3814_v53 = vld [vmem:[%s5066_s2 + $0x7d4] ss:$8 sps:$4 sm:$0xff]  }
 0x19b   :  { %2940 = vmatpush1.bf16.msra.mxu0 %v3722_v54  ;;  %2818 = vmatprep.subr.bf16.mxu1 %v3727_v55  ;;  %v3812_v54 = vld [vmem:[%s5066_s2 + $0x7d0] ss:$8 sps:$4 sm:$0xff]   ;;  %v3817_v55 = vld [vmem:[%s5066_s2 + $0x7e4] ss:$8 sps:$4 sm:$0xff]  }
 0x19c   :  { %2941 = vmatprep.subr.bf16.mxu0 %v3730_v57  ;;  %v3815_v57 = vld [vmem:[%s5066_s2 + $0x7e0] ss:$8 sps:$4 sm:$0xff]  }
 0x19e   :  { %2819 = vmatpush1.bf16.msra.mxu1 %v3725_v58  ;;  %v3820_v58 = vld [vmem:[%s5066_s2 + $0x7f4] ss:$8 sps:$4 sm:$0xff]  }
 0x19f   :  { %2942 = vmatpush1.bf16.msra.mxu0 %v3728_v60  ;;  %2820 = vmatprep.subr.bf16.mxu1 %v3733_v61  ;;  %v3818_v60 = vld [vmem:[%s5066_s2 + $0x7f0] ss:$8 sps:$4 sm:$0xff]   ;;  %v1129_v61 = vpack.c.bf16 %v4687_v56, %v4687_v56 }
 0x1a0   :  { %2943 = vmatprep.subr.bf16.mxu0 %v3736_v62 }
 0x1a2   :  { %2821 = vmatpush1.bf16.msra.mxu1 %v3731_v63 }
 0x1a3   :  { %2944 = vmatpush1.bf16.msra.mxu0 %v3734_v0  ;;  %2822 = vmatprep.subr.bf16.mxu1 %v3739_v2 }
 0x1a4   :  { %2945 = vmatprep.subr.bf16.mxu0 %v3742_v4  ;;  %v1389_v4 = vlaneseq }
 0x1a6   :  { %2823 = vmatpush1.bf16.msra.mxu1 %v3737_v5  ;;  %v1390_v5 = vshrl.u32 %v1389_v4, 7 }
 0x1a7   :  { %2946 = vmatpush1.bf16.msra.mxu0 %v3740_v6  ;;  %2824 = vmatprep.subr.bf16.mxu1 %v3745_v7  ;;  %v1387_v7 = vld [vmem:[%s5067_s3] sm:$0x3] }
 0x1a8   :  { %2947 = vmatprep.subr.bf16.mxu0 %v3748_v8  ;;  %v1391_v6 = vsub.s32 0, %v1390_v5  ;;  %v1395_v8 = vsub.s32 1, %v1390_v5 }
 0x1aa   :  { %2825 = vmatpush1.bf16.msra.mxu1 %v3743_v9  ;;  %v1392_v9 = vrot.slane %v1387_v7, %v1391_v6 }
 0x1ab   :  { %2948 = vmatpush1.bf16.msra.mxu0 %v3746_v10  ;;  %2826 = vmatprep.subr.bf16.mxu1 %v3751_v11  ;;  %v1396_v10 = vrot.slane %v1387_v7, %v1395_v8 }
 0x1ac   :  { %2949 = vmatprep.subr.bf16.mxu0 %v3754_v12 }
 0x1ae   :  { %2827 = vmatpush1.bf16.msra.mxu1 %v3749_v13 }
 0x1af   :  { %2950 = vmatpush1.bf16.msra.mxu0 %v3752_v15  ;;  %2828 = vmatprep.subr.bf16.mxu1 %v3757_v16 }
 0x1b0   :  { %2951 = vmatprep.subr.bf16.mxu0 %v3760_v17 }
 0x1b2   :  { %2829 = vmatpush1.bf16.msra.mxu1 %v3755_v18 }
 0x1b3   :  { %2952 = vmatpush1.bf16.msra.mxu0 %v3758_v19  ;;  %2830 = vmatprep.subr.bf16.mxu1 %v3763_v20 }
 0x1b4   :  { %2953 = vmatprep.subr.bf16.mxu0 %v3766_v21 }
 0x1b6   :  { %2831 = vmatpush1.bf16.msra.mxu1 %v3761_v22 }
 0x1b7   :  { %2954 = vmatpush1.bf16.msra.mxu0 %v3764_v23  ;;  %2832 = vmatprep.subr.bf16.mxu1 %v3769_v24 }
 0x1b8   :  { %2955 = vmatprep.subr.bf16.mxu0 %v3772_v25 }
 0x1ba   :  { %2833 = vmatpush1.bf16.msra.mxu1 %v3767_v26 }
 0x1bb   :  { %2956 = vmatpush1.bf16.msra.mxu0 %v3770_v14 }
 0x1bc   :  { %2966 = vmatprep.subr.bf16.mxu0 %v3775_v27 }
 0x1bd   :  { %2835 = vmatmul.mubr.bf16.vlgmr.msra.gmra.mrb[16].mxu1 %v1121_v28 }
 0x1be   :  { %2958 = vmatmul.mubr.bf16.vlgmr.msra.gmra.mrb[16].mxu0 %v1127_v37 }
 0x1bf   :  { %2967 = vmatpush1.bf16.msra.mxu0 %v3773_v29  ;;  %2998 = vmatprep.mubr.bf16.mxu0 %v1130_v46 }
 0x1c0   :  { %2968 = vmatprep.subr.bf16.mxu0 %v3778_v30 }
 0x1c3   :  { %2969 = vmatpush1.bf16.msra.mxu0 %v3776_v3 }
 0x1c4   :  { %2970 = vmatprep.subr.bf16.mxu0 %v3781_v42 }
 0x1c7   :  { %2971 = vmatpush1.bf16.msra.mxu0 %v3779_v59 }
 0x1c8   :  { %2972 = vmatprep.subr.bf16.mxu0 %v3784_v31 }
 0x1cb   :  { %2973 = vmatpush1.bf16.msra.mxu0 %v3782_v32 }
 0x1cc   :  { %2974 = vmatprep.subr.bf16.mxu0 %v3787_v33 }
 0x1cf   :  { %2975 = vmatpush1.bf16.msra.mxu0 %v3785_v34 }
 0x1d0   :  { %2976 = vmatprep.subr.bf16.mxu0 %v3790_v35 }
 0x1d3   :  { %2977 = vmatpush1.bf16.msra.mxu0 %v3788_v36 }
 0x1d4   :  { %2978 = vmatprep.subr.bf16.mxu0 %v3793_v38 }
 0x1d7   :  { %2979 = vmatpush1.bf16.msra.mxu0 %v3791_v39 }
 0x1d8   :  { %2980 = vmatprep.subr.bf16.mxu0 %v3796_v40 }
 0x1db   :  { %2981 = vmatpush1.bf16.msra.mxu0 %v3794_v41 }
 0x1dc   :  { %2982 = vmatprep.subr.bf16.mxu0 %v3799_v1 }
 0x1df   :  { %2983 = vmatpush1.bf16.msra.mxu0 %v3797_v43 }
 0x1e0   :  { %2984 = vmatprep.subr.bf16.mxu0 %v3802_v44 }
 0x1e3   :  { %2985 = vmatpush1.bf16.msra.mxu0 %v3800_v45 }
 0x1e4   :  { %2986 = vmatprep.subr.bf16.mxu0 %v3805_v47 }
 0x1e7   :  { %2987 = vmatpush1.bf16.msra.mxu0 %v3803_v48 }
 0x1e8   :  { %2988 = vmatprep.subr.bf16.mxu0 %v3808_v49 }
 0x1eb   :  { %2989 = vmatpush1.bf16.msra.mxu0 %v3806_v50 }
 0x1ec   :  { %2990 = vmatprep.subr.bf16.mxu0 %v3811_v51 }
 0x1ef   :  { %2991 = vmatpush1.bf16.msra.mxu0 %v3809_v52 }
 0x1f0   :  { %2992 = vmatprep.subr.bf16.mxu0 %v3814_v53 }
 0x1f3   :  { %2993 = vmatpush1.bf16.msra.mxu0 %v3812_v54 }
 0x1f4   :  { %2994 = vmatprep.subr.bf16.mxu0 %v3817_v55 }
 0x1f7   :  { %2995 = vmatpush1.bf16.msra.mxu0 %v3815_v57 }
 0x1f8   :  { %2996 = vmatprep.subr.bf16.mxu0 %v3820_v58 }
 0x1fb   :  { %2997 = vmatpush1.bf16.msra.mxu0 %v3818_v60 }
 0x1fe   :  { %2999 = vmatmul.mubr.bf16.vlgmr.msra.gmra.mrb[16].mxu0 %v1129_v61 }
 0x290   :  { %v2836_v62 = vpop.f32.mrb[16].mxu1 }
 0x291   :  { %v2838_v63 = vpop.f32.mrb[17].mxu1  ;;  %v3408_v11 = vadd.f32 %v2836_v62, %v1392_v9 }
 0x292   :  { %v2840_v0 = vpop.f32.mrb[18].mxu1  ;;  %v3410_v12 = vadd.f32 %v2838_v63, %v1396_v10 }
 0x293   :  { %v2841_v2 = vpop.f32.mrb[19].mxu1 }
 0x2d1   :  { %v3000_v13 = vpop.f32.mrb[16].mxu0 }
 0x2d2   :  { %v3409_v15 = vadd.f32 %v3408_v11, %v3000_v13  ;;  %v3002_v56 = vpop.f32.mrb[17].mxu0 }
 0x2d3   :  { %v3411_v16 = vadd.f32 %v3410_v12, %v3002_v56  ;;  %v3004_v17 = vpop.f32.mrb[18].mxu0 }
 0x2d4   :  { %v3005_v18 = vpop.f32.mrb[19].mxu0 }
 0x2d5   :  { %v3009_v19 = vcombine.low %v3409_v15, %v3411_v16 }
 0x2d7   :  { %3407 = vst.sshfl [vmem:[%s5068_s4] sm:$0x33 pattern:$0x76325410] %v3009_v19 }

// kernel: inception_v3_forward.9
= control target key start
LH: loop header
LB: loop body
LE: loop exit
PB: predicated region body
PF: predicated region fallthrough
CT: control target
= control target key end

     0   :  { %s6515_s1 = inlined_call_operand.vmem [shape: bf16[1152,512], index: 1, kind: input, shape index: {}]   ;;  %s6516_s0 = inlined_call_operand.vmem [shape: bf16[128,1152], index: 0, kind: input, shape index: {}]   ;;  %s6517_s2 = inlined_call_operand.vmem [shape: f32[1,512], index: 2, kind: input, shape index: {}]   ;;  %s6518_s3 = inlined_call_operand.vmem [shape: bf16[128,512], index: 3, kind: output, shape index: {}]  }
   0x1   :  { %v4707_v0 = vld [vmem:[%s6515_s1 + $0x4] ss:$16 sps:$4 sm:$0xff]   ;;  %v4709_v1 = vld [vmem:[%s6515_s1 + $0xc] ss:$16 sps:$4 sm:$0xff]   ;;  %v4711_v2 = vld [vmem:[%s6515_s1] ss:$16 sps:$4 sm:$0xff]  }
   0x2   :  { %2323 = vmatprep.subr.bf16.mxu0 %v4707_v0  ;;  %v4712_v3 = vld [vmem:[%s6515_s1 + $0x8] ss:$16 sps:$4 sm:$0xff]   ;;  %2888 = vmatprep.subr.bf16.mxu1 %v4709_v1  ;;  %v4713_v4 = vld [vmem:[%s6515_s1 + $0x24] ss:$16 sps:$4 sm:$0xff]   ;;  %v4715_v5 = vld [vmem:[%s6515_s1 + $0x2c] ss:$16 sps:$4 sm:$0xff]  }
   0x3   :  { %2324 = vmatpush1.bf16.msra.mxu0 %v4711_v2  ;;  %2889 = vmatpush1.bf16.msra.mxu1 %v4712_v3  ;;  %v4717_v6 = vld [vmem:[%s6515_s1 + $0x20] ss:$16 sps:$4 sm:$0xff]   ;;  %v4718_v7 = vld [vmem:[%s6515_s1 + $0x28] ss:$16 sps:$4 sm:$0xff]   ;;  %v4719_v8 = vld [vmem:[%s6515_s1 + $0x44] ss:$16 sps:$4 sm:$0xff]  }
   0x4   :  { %2325 = vmatprep.subr.bf16.mxu0 %v4713_v4  ;;  %2890 = vmatprep.subr.bf16.mxu1 %v4715_v5  ;;  %v4721_v9 = vld [vmem:[%s6515_s1 + $0x4c] ss:$16 sps:$4 sm:$0xff]   ;;  %v4723_v10 = vld [vmem:[%s6515_s1 + $0x40] ss:$16 sps:$4 sm:$0xff]   ;;  %v4724_v11 = vld [vmem:[%s6515_s1 + $0x48] ss:$16 sps:$4 sm:$0xff]  }
   0x5   :  { %v4725_v12 = vld [vmem:[%s6515_s1 + $0x64] ss:$16 sps:$4 sm:$0xff]   ;;  %v4727_v13 = vld [vmem:[%s6515_s1 + $0x6c] ss:$16 sps:$4 sm:$0xff]   ;;  %v4729_v14 = vld [vmem:[%s6515_s1 + $0x60] ss:$16 sps:$4 sm:$0xff]  }
   0x6   :  { %v4730_v15 = vld [vmem:[%s6515_s1 + $0x68] ss:$16 sps:$4 sm:$0xff]   ;;  %v4731_v16 = vld [vmem:[%s6515_s1 + $0x84] ss:$16 sps:$4 sm:$0xff]   ;;  %v4733_v17 = vld [vmem:[%s6515_s1 + $0x8c] ss:$16 sps:$4 sm:$0xff]  }
   0x7   :  { %2326 = vmatpush1.bf16.msra.mxu0 %v4717_v6  ;;  %2891 = vmatpush1.bf16.msra.mxu1 %v4718_v7  ;;  %v4735_v18 = vld [vmem:[%s6515_s1 + $0x80] ss:$16 sps:$4 sm:$0xff]   ;;  %v4736_v19 = vld [vmem:[%s6515_s1 + $0x88] ss:$16 sps:$4 sm:$0xff]   ;;  %v4737_v20 = vld [vmem:[%s6515_s1 + $0xa4] ss:$16 sps:$4 sm:$0xff]  }
   0x8   :  { %2327 = vmatprep.subr.bf16.mxu0 %v4719_v8  ;;  %2892 = vmatprep.subr.bf16.mxu1 %v4721_v9  ;;  %v4739_v21 = vld [vmem:[%s6515_s1 + $0xac] ss:$16 sps:$4 sm:$0xff]   ;;  %v4741_v22 = vld [vmem:[%s6515_s1 + $0xa0] ss:$16 sps:$4 sm:$0xff]   ;;  %v4742_v23 = vld [vmem:[%s6515_s1 + $0xa8] ss:$16 sps:$4 sm:$0xff]  }
   0x9   :  { %v4743_v24 = vld [vmem:[%s6515_s1 + $0xc4] ss:$16 sps:$4 sm:$0xff]   ;;  %v4745_v25 = vld [vmem:[%s6515_s1 + $0xcc] ss:$16 sps:$4 sm:$0xff]   ;;  %v4747_v26 = vld [vmem:[%s6515_s1 + $0xc0] ss:$16 sps:$4 sm:$0xff]  }
   0xa   :  { %v4748_v27 = vld [vmem:[%s6515_s1 + $0xc8] ss:$16 sps:$4 sm:$0xff]   ;;  %v4749_v28 = vld [vmem:[%s6515_s1 + $0xe4] ss:$16 sps:$4 sm:$0xff]   ;;  %v4751_v29 = vld [vmem:[%s6515_s1 + $0xec] ss:$16 sps:$4 sm:$0xff]  }
   0xb   :  { %2328 = vmatpush1.bf16.msra.mxu0 %v4723_v10  ;;  %2893 = vmatpush1.bf16.msra.mxu1 %v4724_v11  ;;  %v4753_v30 = vld [vmem:[%s6515_s1 + $0xe0] ss:$16 sps:$4 sm:$0xff]   ;;  %v4754_v31 = vld [vmem:[%s6515_s1 + $0xe8] ss:$16 sps:$4 sm:$0xff]   ;;  %v4755_v32 = vld [vmem:[%s6515_s1 + $0x104] ss:$16 sps:$4 sm:$0xff]  }
   0xc   :  { %2329 = vmatprep.subr.bf16.mxu0 %v4725_v12  ;;  %2894 = vmatprep.subr.bf16.mxu1 %v4727_v13  ;;  %v4757_v33 = vld [vmem:[%s6515_s1 + $0x10c] ss:$16 sps:$4 sm:$0xff]   ;;  %v4759_v34 = vld [vmem:[%s6515_s1 + $0x100] ss:$16 sps:$4 sm:$0xff]   ;;  %v4760_v35 = vld [vmem:[%s6515_s1 + $0x108] ss:$16 sps:$4 sm:$0xff]  }
   0xd   :  { %v4761_v36 = vld [vmem:[%s6515_s1 + $0x124] ss:$16 sps:$4 sm:$0xff]   ;;  %v4763_v37 = vld [vmem:[%s6515_s1 + $0x12c] ss:$16 sps:$4 sm:$0xff]   ;;  %v4765_v38 = vld [vmem:[%s6515_s1 + $0x120] ss:$16 sps:$4 sm:$0xff]  }
   0xe   :  { %v4766_v39 = vld [vmem:[%s6515_s1 + $0x128] ss:$16 sps:$4 sm:$0xff]   ;;  %v4767_v40 = vld [vmem:[%s6515_s1 + $0x144] ss:$16 sps:$4 sm:$0xff]   ;;  %v4769_v41 = vld [vmem:[%s6515_s1 + $0x14c] ss:$16 sps:$4 sm:$0xff]  }
   0xf   :  { %2330 = vmatpush1.bf16.msra.mxu0 %v4729_v14  ;;  %2895 = vmatpush1.bf16.msra.mxu1 %v4730_v15  ;;  %v4771_v42 = vld [vmem:[%s6515_s1 + $0x140] ss:$16 sps:$4 sm:$0xff]   ;;  %v4772_v43 = vld [vmem:[%s6515_s1 + $0x148] ss:$16 sps:$4 sm:$0xff]   ;;  %v4773_v44 = vld [vmem:[%s6515_s1 + $0x164] ss:$16 sps:$4 sm:$0xff]  }
  0x10   :  { %2331 = vmatprep.subr.bf16.mxu0 %v4731_v16  ;;  %2896 = vmatprep.subr.bf16.mxu1 %v4733_v17  ;;  %v4775_v45 = vld [vmem:[%s6515_s1 + $0x16c] ss:$16 sps:$4 sm:$0xff]   ;;  %v4777_v46 = vld [vmem:[%s6515_s1 + $0x160] ss:$16 sps:$4 sm:$0xff]   ;;  %v4778_v47 = vld [vmem:[%s6515_s1 + $0x168] ss:$16 sps:$4 sm:$0xff]  }
  0x11   :  { %v4805_v48 = vld [vmem:[%s6516_s0 + $0x4] ss:$36 sps:$4 sm:$0xff]   ;;  %v4781_v50 = vld [vmem:[%s6515_s1 + $0x18c] ss:$16 sps:$4 sm:$0xff]   ;;  %v4783_v51 = vld [vmem:[%s6515_s1 + $0x180] ss:$16 sps:$4 sm:$0xff]  }
  0x12   :  { %v4779_v49 = vld [vmem:[%s6515_s1 + $0x184] ss:$16 sps:$4 sm:$0xff]   ;;  %2355 = vmatprep.mubr.bf16.mxu0 %v4805_v48  ;;  %2920 = vmatprep.mubr.bf16.mxu1 %v4805_v48  ;;  %v4784_v52 = vld [vmem:[%s6515_s1 + $0x188] ss:$16 sps:$4 sm:$0xff]   ;;  %v4787_v54 = vld [vmem:[%s6515_s1 + $0x1ac] ss:$16 sps:$4 sm:$0xff]  }
  0x13   :  { %2332 = vmatpush1.bf16.msra.mxu0 %v4735_v18  ;;  %2897 = vmatpush1.bf16.msra.mxu1 %v4736_v19  ;;  %v4785_v53 = vld [vmem:[%s6515_s1 + $0x1a4] ss:$16 sps:$4 sm:$0xff]   ;;  %v4789_v55 = vld [vmem:[%s6515_s1 + $0x1a0] ss:$16 sps:$4 sm:$0xff]   ;;  %v4790_v56 = vld [vmem:[%s6515_s1 + $0x1a8] ss:$16 sps:$4 sm:$0xff]  }
  0x14   :  { %2333 = vmatprep.subr.bf16.mxu0 %v4737_v20  ;;  %2898 = vmatprep.subr.bf16.mxu1 %v4739_v21  ;;  %v4791_v57 = vld [vmem:[%s6515_s1 + $0x1c4] ss:$16 sps:$4 sm:$0xff]   ;;  %v4793_v58 = vld [vmem:[%s6515_s1 + $0x1cc] ss:$16 sps:$4 sm:$0xff]   ;;  %v4795_v59 = vld [vmem:[%s6515_s1 + $0x1c0] ss:$16 sps:$4 sm:$0xff]  }
  0x15   :  { %v4796_v60 = vld [vmem:[%s6515_s1 + $0x1c8] ss:$16 sps:$4 sm:$0xff]   ;;  %v4797_v61 = vld [vmem:[%s6515_s1 + $0x1e4] ss:$16 sps:$4 sm:$0xff]   ;;  %v4799_v62 = vld [vmem:[%s6515_s1 + $0x1ec] ss:$16 sps:$4 sm:$0xff]  }
  0x16   :  { %v4801_v63 = vld [vmem:[%s6515_s1 + $0x1e0] ss:$16 sps:$4 sm:$0xff]   ;;  %v4802_v0 = vld [vmem:[%s6515_s1 + $0x1e8] ss:$16 sps:$4 sm:$0xff]   ;;  %v4808_v1 = vld [vmem:[%s6515_s1 + $0x204] ss:$16 sps:$4 sm:$0xff]  }
  0x17   :  { %2334 = vmatpush1.bf16.msra.mxu0 %v4741_v22  ;;  %2899 = vmatpush1.bf16.msra.mxu1 %v4742_v23  ;;  %v4811_v2 = vld [vmem:[%s6515_s1 + $0x20c] ss:$16 sps:$4 sm:$0xff]   ;;  %v4803_v3 = vld [vmem:[%s6516_s0] ss:$36 sps:$4 sm:$0xff]   ;;  %v4809_v5 = vld [vmem:[%s6515_s1 + $0x208] ss:$16 sps:$4 sm:$0xff]  }
  0x18   :  { %2335 = vmatprep.subr.bf16.mxu0 %v4743_v24  ;;  %2900 = vmatprep.subr.bf16.mxu1 %v4745_v25  ;;  %v4806_v4 = vld [vmem:[%s6515_s1 + $0x200] ss:$16 sps:$4 sm:$0xff]   ;;  %v4814_v6 = vld [vmem:[%s6515_s1 + $0x224] ss:$16 sps:$4 sm:$0xff]   ;;  %v4817_v7 = vld [vmem:[%s6515_s1 + $0x22c] ss:$16 sps:$4 sm:$0xff]  }
  0x19   :  { %v4818_v8 = vld [vmem:[%s6516_s0 + $0x4c] ss:$36 sps:$4 sm:$0xff]   ;;  %v4815_v10 = vld [vmem:[%s6515_s1 + $0x228] ss:$16 sps:$4 sm:$0xff]   ;;  %v4823_v11 = vld [vmem:[%s6515_s1 + $0x244] ss:$16 sps:$4 sm:$0xff]  }
  0x1a   :  { %v4812_v9 = vld [vmem:[%s6515_s1 + $0x220] ss:$16 sps:$4 sm:$0xff]   ;;  %v4826_v12 = vld [vmem:[%s6515_s1 + $0x24c] ss:$16 sps:$4 sm:$0xff]   ;;  %v4824_v15 = vld [vmem:[%s6515_s1 + $0x248] ss:$16 sps:$4 sm:$0xff]  }
  0x1b   :  { %2336 = vmatpush1.bf16.msra.mxu0 %v4747_v26  ;;  %2901 = vmatpush1.bf16.msra.mxu1 %v4748_v27  ;;  %v4820_v13 = vld [vmem:[%s6516_s0 + $0x48] ss:$36 sps:$4 sm:$0xff]   ;;  %v4821_v14 = vld [vmem:[%s6515_s1 + $0x240] ss:$16 sps:$4 sm:$0xff]   ;;  %v4829_v16 = vld [vmem:[%s6515_s1 + $0x264] ss:$16 sps:$4 sm:$0xff]  }
  0x1c   :  { %2337 = vmatprep.subr.bf16.mxu0 %v4749_v28  ;;  %2902 = vmatprep.subr.bf16.mxu1 %v4751_v29  ;;  %v4832_v17 = vld [vmem:[%s6515_s1 + $0x26c] ss:$16 sps:$4 sm:$0xff]   ;;  %v4833_v18 = vld [vmem:[%s6516_s0 + $0x94] ss:$36 sps:$4 sm:$0xff]   ;;  %v4827_v19 = vld [vmem:[%s6515_s1 + $0x260] ss:$16 sps:$4 sm:$0xff]  }
  0x1d   :  { %v4830_v20 = vld [vmem:[%s6515_s1 + $0x268] ss:$16 sps:$4 sm:$0xff]   ;;  %v4838_v21 = vld [vmem:[%s6515_s1 + $0x284] ss:$16 sps:$4 sm:$0xff]   ;;  %v4841_v22 = vld [vmem:[%s6515_s1 + $0x28c] ss:$16 sps:$4 sm:$0xff]  }
  0x1e   :  { %v4835_v23 = vld [vmem:[%s6516_s0 + $0x90] ss:$36 sps:$4 sm:$0xff]   ;;  %v4839_v25 = vld [vmem:[%s6515_s1 + $0x288] ss:$16 sps:$4 sm:$0xff]   ;;  %v4847_v27 = vld [vmem:[%s6515_s1 + $0x2ac] ss:$16 sps:$4 sm:$0xff]  }
  0x1f   :  { %2338 = vmatpush1.bf16.msra.mxu0 %v4753_v30  ;;  %2903 = vmatpush1.bf16.msra.mxu1 %v4754_v31  ;;  %v4836_v24 = vld [vmem:[%s6515_s1 + $0x280] ss:$16 sps:$4 sm:$0xff]   ;;  %v4844_v26 = vld [vmem:[%s6515_s1 + $0x2a4] ss:$16 sps:$4 sm:$0xff]   ;;  %v4845_v30 = vld [vmem:[%s6515_s1 + $0x2a8] ss:$16 sps:$4 sm:$0xff]  }
  0x20   :  { %2339 = vmatprep.subr.bf16.mxu0 %v4755_v32  ;;  %2904 = vmatprep.subr.bf16.mxu1 %v4757_v33  ;;  %v4848_v28 = vld [vmem:[%s6516_s0 + $0xdc] ss:$36 sps:$4 sm:$0xff]   ;;  %v4853_v31 = vld [vmem:[%s6515_s1 + $0x2c4] ss:$16 sps:$4 sm:$0xff]   ;;  %v4878_v48 = vld [vmem:[%s6516_s0 + $0x16c] ss:$36 sps:$4 sm:$0xff]  }
  0x21   :  { %v4842_v29 = vld [vmem:[%s6515_s1 + $0x2a0] ss:$16 sps:$4 sm:$0xff]   ;;  %v4856_v32 = vld [vmem:[%s6515_s1 + $0x2cc] ss:$16 sps:$4 sm:$0xff]  }
  0x22   :  { %v4850_v33 = vld [vmem:[%s6516_s0 + $0xd8] ss:$36 sps:$4 sm:$0xff]  }
  0x23   :  { %2340 = vmatpush1.bf16.msra.mxu0 %v4759_v34  ;;  %2905 = vmatpush1.bf16.msra.mxu1 %v4760_v35  ;;  %v4851_v34 = vld [vmem:[%s6515_s1 + $0x2c0] ss:$16 sps:$4 sm:$0xff]   ;;  %v4854_v35 = vld [vmem:[%s6515_s1 + $0x2c8] ss:$16 sps:$4 sm:$0xff]  }
  0x24   :  { %2341 = vmatprep.subr.bf16.mxu0 %v4761_v36  ;;  %2906 = vmatprep.subr.bf16.mxu1 %v4763_v37  ;;  %v4859_v36 = vld [vmem:[%s6515_s1 + $0x2e4] ss:$16 sps:$4 sm:$0xff]   ;;  %v4862_v37 = vld [vmem:[%s6515_s1 + $0x2ec] ss:$16 sps:$4 sm:$0xff]  }
  0x27   :  { %2342 = vmatpush1.bf16.msra.mxu0 %v4765_v38  ;;  %2907 = vmatpush1.bf16.msra.mxu1 %v4766_v39  ;;  %v4863_v38 = vld [vmem:[%s6516_s0 + $0x124] ss:$36 sps:$4 sm:$0xff]   ;;  %v4857_v39 = vld [vmem:[%s6515_s1 + $0x2e0] ss:$16 sps:$4 sm:$0xff]  }
  0x28   :  { %2343 = vmatprep.subr.bf16.mxu0 %v4767_v40  ;;  %2908 = vmatprep.subr.bf16.mxu1 %v4769_v41  ;;  %v4860_v40 = vld [vmem:[%s6515_s1 + $0x2e8] ss:$16 sps:$4 sm:$0xff]   ;;  %v4868_v41 = vld [vmem:[%s6515_s1 + $0x304] ss:$16 sps:$4 sm:$0xff]  }
  0x2b   :  { %2344 = vmatpush1.bf16.msra.mxu0 %v4771_v42  ;;  %2909 = vmatpush1.bf16.msra.mxu1 %v4772_v43  ;;  %v4871_v42 = vld [vmem:[%s6515_s1 + $0x30c] ss:$16 sps:$4 sm:$0xff]   ;;  %v4865_v43 = vld [vmem:[%s6516_s0 + $0x120] ss:$36 sps:$4 sm:$0xff]  }
  0x2c   :  { %2345 = vmatprep.subr.bf16.mxu0 %v4773_v44  ;;  %2910 = vmatprep.subr.bf16.mxu1 %v4775_v45  ;;  %v4866_v44 = vld [vmem:[%s6515_s1 + $0x300] ss:$16 sps:$4 sm:$0xff]   ;;  %v4869_v45 = vld [vmem:[%s6515_s1 + $0x308] ss:$16 sps:$4 sm:$0xff]  }
  0x2f   :  { %2346 = vmatpush1.bf16.msra.mxu0 %v4777_v46  ;;  %2911 = vmatpush1.bf16.msra.mxu1 %v4778_v47  ;;  %v4874_v46 = vld [vmem:[%s6515_s1 + $0x324] ss:$16 sps:$4 sm:$0xff]   ;;  %v4877_v47 = vld [vmem:[%s6515_s1 + $0x32c] ss:$16 sps:$4 sm:$0xff]  }
  0x30   :  { %2347 = vmatprep.subr.bf16.mxu0 %v4779_v49  ;;  %2912 = vmatprep.subr.bf16.mxu1 %v4781_v50  ;;  %v4872_v49 = vld [vmem:[%s6515_s1 + $0x320] ss:$16 sps:$4 sm:$0xff]   ;;  %v4875_v50 = vld [vmem:[%s6515_s1 + $0x328] ss:$16 sps:$4 sm:$0xff]  }
  0x33   :  { %2348 = vmatpush1.bf16.msra.mxu0 %v4783_v51  ;;  %2913 = vmatpush1.bf16.msra.mxu1 %v4784_v52  ;;  %v4883_v51 = vld [vmem:[%s6515_s1 + $0x344] ss:$16 sps:$4 sm:$0xff]   ;;  %v4886_v52 = vld [vmem:[%s6515_s1 + $0x34c] ss:$16 sps:$4 sm:$0xff]  }
  0x34   :  { %2349 = vmatprep.subr.bf16.mxu0 %v4785_v53  ;;  %2914 = vmatprep.subr.bf16.mxu1 %v4787_v54  ;;  %v4880_v53 = vld [vmem:[%s6516_s0 + $0x168] ss:$36 sps:$4 sm:$0xff]   ;;  %v4881_v54 = vld [vmem:[%s6515_s1 + $0x340] ss:$16 sps:$4 sm:$0xff]  }
  0x37   :  { %2350 = vmatpush1.bf16.msra.mxu0 %v4789_v55  ;;  %2915 = vmatpush1.bf16.msra.mxu1 %v4790_v56  ;;  %v4884_v55 = vld [vmem:[%s6515_s1 + $0x348] ss:$16 sps:$4 sm:$0xff]   ;;  %v4889_v56 = vld [vmem:[%s6515_s1 + $0x364] ss:$16 sps:$4 sm:$0xff]  }
  0x38   :  { %2351 = vmatprep.subr.bf16.mxu0 %v4791_v57  ;;  %2916 = vmatprep.subr.bf16.mxu1 %v4793_v58  ;;  %v4892_v57 = vld [vmem:[%s6515_s1 + $0x36c] ss:$16 sps:$4 sm:$0xff]   ;;  %v4893_v58 = vld [vmem:[%s6516_s0 + $0x1b4] ss:$36 sps:$4 sm:$0xff]  }
  0x3b   :  { %2352 = vmatpush1.bf16.msra.mxu0 %v4795_v59  ;;  %2917 = vmatpush1.bf16.msra.mxu1 %v4796_v60  ;;  %v4887_v59 = vld [vmem:[%s6515_s1 + $0x360] ss:$16 sps:$4 sm:$0xff]   ;;  %v4890_v60 = vld [vmem:[%s6515_s1 + $0x368] ss:$16 sps:$4 sm:$0xff]  }
  0x3c   :  { %2353 = vmatprep.subr.bf16.mxu0 %v4797_v61  ;;  %2918 = vmatprep.subr.bf16.mxu1 %v4799_v62  ;;  %v4898_v61 = vld [vmem:[%s6515_s1 + $0x384] ss:$16 sps:$4 sm:$0xff]   ;;  %v4901_v62 = vld [vmem:[%s6515_s1 + $0x38c] ss:$16 sps:$4 sm:$0xff]  }
  0x3f   :  { %2354 = vmatpush1.bf16.msra.mxu0 %v4801_v63  ;;  %2919 = vmatpush1.bf16.msra.mxu1 %v4802_v0  ;;  %v4895_v63 = vld [vmem:[%s6516_s0 + $0x1b0] ss:$36 sps:$4 sm:$0xff]  }
  0x40   :  { %2436 = vmatprep.subr.bf16.mxu0 %v4808_v1  ;;  %3001 = vmatprep.subr.bf16.mxu1 %v4811_v2  ;;  %v4896_v0 = vld [vmem:[%s6515_s1 + $0x380] ss:$16 sps:$4 sm:$0xff]   ;;  %v4899_v1 = vld [vmem:[%s6515_s1 + $0x388] ss:$16 sps:$4 sm:$0xff]   ;;  %v4904_v2 = vld [vmem:[%s6515_s1 + $0x3a4] ss:$16 sps:$4 sm:$0xff]  }
  0x42   :  { %2356 = vmatmul.mubr.bf16.vlgmr.msra.gmra.mrb[0].mxu0 %v4803_v3  ;;  %2921 = vmatmul.mubr.bf16.vlgmr.msra.gmra.mrb[0].mxu1 %v4803_v3  ;;  %v4907_v3 = vld [vmem:[%s6515_s1 + $0x3ac] ss:$16 sps:$4 sm:$0xff]  }
  0x43   :  { %2437 = vmatpush1.bf16.msra.mxu0 %v4806_v4  ;;  %3002 = vmatpush1.bf16.msra.mxu1 %v4809_v5  ;;  %v4908_v4 = vld [vmem:[%s6516_s0 + $0x1fc] ss:$36 sps:$4 sm:$0xff]  }
  0x44   :  { %2438 = vmatprep.subr.bf16.mxu0 %v4814_v6  ;;  %3003 = vmatprep.subr.bf16.mxu1 %v4817_v7  ;;  %v4902_v5 = vld [vmem:[%s6515_s1 + $0x3a0] ss:$16 sps:$4 sm:$0xff]   ;;  %v4905_v6 = vld [vmem:[%s6515_s1 + $0x3a8] ss:$16 sps:$4 sm:$0xff]   ;;  %v4913_v7 = vld [vmem:[%s6515_s1 + $0x3c4] ss:$16 sps:$4 sm:$0xff]  }
  0x45   :  { %2365 = vmatprep.mubr.bf16.mxu0 %v4818_v8  ;;  %2930 = vmatprep.mubr.bf16.mxu1 %v4818_v8  ;;  %v4916_v8 = vld [vmem:[%s6515_s1 + $0x3cc] ss:$16 sps:$4 sm:$0xff]  }
  0x47   :  { %2439 = vmatpush1.bf16.msra.mxu0 %v4812_v9  ;;  %3004 = vmatpush1.bf16.msra.mxu1 %v4815_v10  ;;  %v4910_v9 = vld [vmem:[%s6516_s0 + $0x1f8] ss:$36 sps:$4 sm:$0xff]   ;;  %v4911_v10 = vld [vmem:[%s6515_s1 + $0x3c0] ss:$16 sps:$4 sm:$0xff]  }
  0x48   :  { %2440 = vmatprep.subr.bf16.mxu0 %v4823_v11  ;;  %3005 = vmatprep.subr.bf16.mxu1 %v4826_v12  ;;  %v4914_v11 = vld [vmem:[%s6515_s1 + $0x3c8] ss:$16 sps:$4 sm:$0xff]   ;;  %v4919_v12 = vld [vmem:[%s6515_s1 + $0x3e4] ss:$16 sps:$4 sm:$0xff]  }
  0x4a   :  { %2366 = vmatmul.mubr.bf16.gmra.mrb[4].mxu0 %v4820_v13  ;;  %2931 = vmatmul.mubr.bf16.gmra.mrb[4].mxu1 %v4820_v13  ;;  %v4922_v13 = vld [vmem:[%s6515_s1 + $0x3ec] ss:$16 sps:$4 sm:$0xff]  }
  0x4b   :  { %2441 = vmatpush1.bf16.msra.mxu0 %v4821_v14  ;;  %3006 = vmatpush1.bf16.msra.mxu1 %v4824_v15  ;;  %v4925_v14 = vld [vmem:[%s6516_s0 + $0xc] ss:$36 sps:$4 sm:$0xff]  }
  0x4c   :  { %2442 = vmatprep.subr.bf16.mxu0 %v4829_v16  ;;  %3007 = vmatprep.subr.bf16.mxu1 %v4832_v17  ;;  %v4917_v15 = vld [vmem:[%s6515_s1 + $0x3e0] ss:$16 sps:$4 sm:$0xff]   ;;  %v4920_v16 = vld [vmem:[%s6515_s1 + $0x3e8] ss:$16 sps:$4 sm:$0xff]   ;;  %v4928_v17 = vld [vmem:[%s6515_s1 + $0x404] ss:$16 sps:$4 sm:$0xff]  }
  0x4d   :  { %2375 = vmatprep.mubr.bf16.mxu0 %v4833_v18  ;;  %2940 = vmatprep.mubr.bf16.mxu1 %v4833_v18  ;;  %v4931_v18 = vld [vmem:[%s6515_s1 + $0x40c] ss:$16 sps:$4 sm:$0xff]  }
  0x4f   :  { %2443 = vmatpush1.bf16.msra.mxu0 %v4827_v19  ;;  %3008 = vmatpush1.bf16.msra.mxu1 %v4830_v20  ;;  %v4923_v19 = vld [vmem:[%s6516_s0 + $0x8] ss:$36 sps:$4 sm:$0xff]   ;;  %v4926_v20 = vld [vmem:[%s6515_s1 + $0x400] ss:$16 sps:$4 sm:$0xff]  }
  0x50   :  { %2444 = vmatprep.subr.bf16.mxu0 %v4838_v21  ;;  %3009 = vmatprep.subr.bf16.mxu1 %v4841_v22  ;;  %v4929_v21 = vld [vmem:[%s6515_s1 + $0x408] ss:$16 sps:$4 sm:$0xff]   ;;  %v4934_v22 = vld [vmem:[%s6515_s1 + $0x424] ss:$16 sps:$4 sm:$0xff]  }
  0x52   :  { %2376 = vmatmul.mubr.bf16.gmra.mrb[8].mxu0 %v4835_v23  ;;  %2941 = vmatmul.mubr.bf16.gmra.mrb[8].mxu1 %v4835_v23  ;;  %v4937_v23 = vld [vmem:[%s6515_s1 + $0x42c] ss:$16 sps:$4 sm:$0xff]  }
  0x53   :  { %2445 = vmatpush1.bf16.msra.mxu0 %v4836_v24  ;;  %3010 = vmatpush1.bf16.msra.mxu1 %v4839_v25  ;;  %v4938_v24 = vld [vmem:[%s6516_s0 + $0x54] ss:$36 sps:$4 sm:$0xff]   ;;  %v4932_v25 = vld [vmem:[%s6515_s1 + $0x420] ss:$16 sps:$4 sm:$0xff]  }
  0x54   :  { %2446 = vmatprep.subr.bf16.mxu0 %v4844_v26  ;;  %3011 = vmatprep.subr.bf16.mxu1 %v4847_v27  ;;  %v4935_v26 = vld [vmem:[%s6515_s1 + $0x428] ss:$16 sps:$4 sm:$0xff]   ;;  %v4943_v27 = vld [vmem:[%s6515_s1 + $0x444] ss:$16 sps:$4 sm:$0xff]  }
  0x55   :  { %2385 = vmatprep.mubr.bf16.mxu0 %v4848_v28  ;;  %2950 = vmatprep.mubr.bf16.mxu1 %v4848_v28  ;;  %v4946_v28 = vld [vmem:[%s6515_s1 + $0x44c] ss:$16 sps:$4 sm:$0xff]  }
  0x57   :  { %2447 = vmatpush1.bf16.msra.mxu0 %v4842_v29  ;;  %3012 = vmatpush1.bf16.msra.mxu1 %v4845_v30  ;;  %v4940_v29 = vld [vmem:[%s6516_s0 + $0x50] ss:$36 sps:$4 sm:$0xff]  }
  0x58   :  { %2448 = vmatprep.subr.bf16.mxu0 %v4853_v31  ;;  %3013 = vmatprep.subr.bf16.mxu1 %v4856_v32  ;;  %v4941_v30 = vld [vmem:[%s6515_s1 + $0x440] ss:$16 sps:$4 sm:$0xff]   ;;  %v4944_v31 = vld [vmem:[%s6515_s1 + $0x448] ss:$16 sps:$4 sm:$0xff]   ;;  %v4949_v32 = vld [vmem:[%s6515_s1 + $0x464] ss:$16 sps:$4 sm:$0xff]  }
  0x5a   :  { %2386 = vmatmul.mubr.bf16.gmra.mrb[12].mxu0 %v4850_v33  ;;  %2951 = vmatmul.mubr.bf16.gmra.mrb[12].mxu1 %v4850_v33  ;;  %v4952_v33 = vld [vmem:[%s6515_s1 + $0x46c] ss:$16 sps:$4 sm:$0xff]  }
  0x5b   :  { %2449 = vmatpush1.bf16.msra.mxu0 %v4851_v34  ;;  %3014 = vmatpush1.bf16.msra.mxu1 %v4854_v35  ;;  %v4953_v34 = vld [vmem:[%s6516_s0 + $0x9c] ss:$36 sps:$4 sm:$0xff]  }
  0x5c   :  { %2450 = vmatprep.subr.bf16.mxu0 %v4859_v36  ;;  %3015 = vmatprep.subr.bf16.mxu1 %v4862_v37  ;;  %v4947_v35 = vld [vmem:[%s6515_s1 + $0x460] ss:$16 sps:$4 sm:$0xff]   ;;  %v4950_v36 = vld [vmem:[%s6515_s1 + $0x468] ss:$16 sps:$4 sm:$0xff]   ;;  %v4958_v37 = vld [vmem:[%s6515_s1 + $0x484] ss:$16 sps:$4 sm:$0xff]  }
  0x5d   :  { %2395 = vmatprep.mubr.bf16.mxu0 %v4863_v38  ;;  %2960 = vmatprep.mubr.bf16.mxu1 %v4863_v38  ;;  %v4961_v38 = vld [vmem:[%s6515_s1 + $0x48c] ss:$16 sps:$4 sm:$0xff]  }
  0x5f   :  { %2451 = vmatpush1.bf16.msra.mxu0 %v4857_v39  ;;  %3016 = vmatpush1.bf16.msra.mxu1 %v4860_v40  ;;  %v4955_v39 = vld [vmem:[%s6516_s0 + $0x98] ss:$36 sps:$4 sm:$0xff]   ;;  %v4956_v40 = vld [vmem:[%s6515_s1 + $0x480] ss:$16 sps:$4 sm:$0xff]  }
  0x60   :  { %2452 = vmatprep.subr.bf16.mxu0 %v4868_v41  ;;  %3017 = vmatprep.subr.bf16.mxu1 %v4871_v42  ;;  %v4959_v41 = vld [vmem:[%s6515_s1 + $0x488] ss:$16 sps:$4 sm:$0xff]   ;;  %v4964_v42 = vld [vmem:[%s6515_s1 + $0x4a4] ss:$16 sps:$4 sm:$0xff]  }
  0x62   :  { %2396 = vmatmul.mubr.bf16.gmra.mrb[16].mxu0 %v4865_v43  ;;  %2961 = vmatmul.mubr.bf16.gmra.mrb[16].mxu1 %v4865_v43  ;;  %v4967_v43 = vld [vmem:[%s6515_s1 + $0x4ac] ss:$16 sps:$4 sm:$0xff]  }
  0x63   :  { %2453 = vmatpush1.bf16.msra.mxu0 %v4866_v44  ;;  %3018 = vmatpush1.bf16.msra.mxu1 %v4869_v45  ;;  %v4968_v44 = vld [vmem:[%s6516_s0 + $0xe4] ss:$36 sps:$4 sm:$0xff]   ;;  %v4962_v45 = vld [vmem:[%s6515_s1 + $0x4a0] ss:$16 sps:$4 sm:$0xff]  }
  0x64   :  { %2454 = vmatprep.subr.bf16.mxu0 %v4874_v46  ;;  %3019 = vmatprep.subr.bf16.mxu1 %v4877_v47  ;;  %v4965_v46 = vld [vmem:[%s6515_s1 + $0x4a8] ss:$16 sps:$4 sm:$0xff]   ;;  %v4973_v47 = vld [vmem:[%s6515_s1 + $0x4c4] ss:$16 sps:$4 sm:$0xff]  }
  0x65   :  { %2405 = vmatprep.mubr.bf16.mxu0 %v4878_v48  ;;  %2970 = vmatprep.mubr.bf16.mxu1 %v4878_v48  ;;  %v4976_v48 = vld [vmem:[%s6515_s1 + $0x4cc] ss:$16 sps:$4 sm:$0xff]  }
  0x67   :  { %2455 = vmatpush1.bf16.msra.mxu0 %v4872_v49  ;;  %3020 = vmatpush1.bf16.msra.mxu1 %v4875_v50  ;;  %v4970_v49 = vld [vmem:[%s6516_s0 + $0xe0] ss:$36 sps:$4 sm:$0xff]  }
  0x68   :  { %2456 = vmatprep.subr.bf16.mxu0 %v4883_v51  ;;  %3021 = vmatprep.subr.bf16.mxu1 %v4886_v52  ;;  %v4971_v50 = vld [vmem:[%s6515_s1 + $0x4c0] ss:$16 sps:$4 sm:$0xff]   ;;  %v4974_v51 = vld [vmem:[%s6515_s1 + $0x4c8] ss:$16 sps:$4 sm:$0xff]   ;;  %v4979_v52 = vld [vmem:[%s6515_s1 + $0x4e4] ss:$16 sps:$4 sm:$0xff]  }
  0x6a   :  { %2406 = vmatmul.mubr.bf16.gmra.mrb[20].mxu0 %v4880_v53  ;;  %2971 = vmatmul.mubr.bf16.gmra.mrb[20].mxu1 %v4880_v53  ;;  %v4982_v53 = vld [vmem:[%s6515_s1 + $0x4ec] ss:$16 sps:$4 sm:$0xff]  }
  0x6b   :  { %2457 = vmatpush1.bf16.msra.mxu0 %v4881_v54  ;;  %3022 = vmatpush1.bf16.msra.mxu1 %v4884_v55  ;;  %v4983_v54 = vld [vmem:[%s6516_s0 + $0x12c] ss:$36 sps:$4 sm:$0xff]  }
  0x6c   :  { %2458 = vmatprep.subr.bf16.mxu0 %v4889_v56  ;;  %3023 = vmatprep.subr.bf16.mxu1 %v4892_v57  ;;  %v4977_v55 = vld [vmem:[%s6515_s1 + $0x4e0] ss:$16 sps:$4 sm:$0xff]   ;;  %v4980_v56 = vld [vmem:[%s6515_s1 + $0x4e8] ss:$16 sps:$4 sm:$0xff]   ;;  %v4988_v57 = vld [vmem:[%s6515_s1 + $0x504] ss:$16 sps:$4 sm:$0xff]  }
  0x6d   :  { %2415 = vmatprep.mubr.bf16.mxu0 %v4893_v58  ;;  %2980 = vmatprep.mubr.bf16.mxu1 %v4893_v58  ;;  %v4991_v58 = vld [vmem:[%s6515_s1 + $0x50c] ss:$16 sps:$4 sm:$0xff]  }
  0x6f   :  { %2459 = vmatpush1.bf16.msra.mxu0 %v4887_v59  ;;  %3024 = vmatpush1.bf16.msra.mxu1 %v4890_v60  ;;  %v4985_v59 = vld [vmem:[%s6516_s0 + $0x128] ss:$36 sps:$4 sm:$0xff]   ;;  %v4986_v60 = vld [vmem:[%s6515_s1 + $0x500] ss:$16 sps:$4 sm:$0xff]  }
  0x70   :  { %2460 = vmatprep.subr.bf16.mxu0 %v4898_v61  ;;  %3025 = vmatprep.subr.bf16.mxu1 %v4901_v62  ;;  %v4989_v61 = vld [vmem:[%s6515_s1 + $0x508] ss:$16 sps:$4 sm:$0xff]   ;;  %v4994_v62 = vld [vmem:[%s6515_s1 + $0x524] ss:$16 sps:$4 sm:$0xff]  }
  0x72   :  { %2416 = vmatmul.mubr.bf16.gmra.mrb[24].mxu0 %v4895_v63  ;;  %2981 = vmatmul.mubr.bf16.gmra.mrb[24].mxu1 %v4895_v63  ;;  %v4997_v63 = vld [vmem:[%s6515_s1 + $0x52c] ss:$16 sps:$4 sm:$0xff]  }
  0x73   :  { %2461 = vmatpush1.bf16.msra.mxu0 %v4896_v0  ;;  %3026 = vmatpush1.bf16.msra.mxu1 %v4899_v1  ;;  %v4998_v0 = vld [vmem:[%s6516_s0 + $0x174] ss:$36 sps:$4 sm:$0xff]   ;;  %v4992_v1 = vld [vmem:[%s6515_s1 + $0x520] ss:$16 sps:$4 sm:$0xff]  }
  0x74   :  { %2462 = vmatprep.subr.bf16.mxu0 %v4904_v2  ;;  %3027 = vmatprep.subr.bf16.mxu1 %v4907_v3  ;;  %v4995_v2 = vld [vmem:[%s6515_s1 + $0x528] ss:$16 sps:$4 sm:$0xff]   ;;  %v5003_v3 = vld [vmem:[%s6515_s1 + $0x544] ss:$16 sps:$4 sm:$0xff]  }
  0x75   :  { %2425 = vmatprep.mubr.bf16.mxu0 %v4908_v4  ;;  %2990 = vmatprep.mubr.bf16.mxu1 %v4908_v4  ;;  %v5006_v4 = vld [vmem:[%s6515_s1 + $0x54c] ss:$16 sps:$4 sm:$0xff]  }
  0x77   :  { %2463 = vmatpush1.bf16.msra.mxu0 %v4902_v5  ;;  %3028 = vmatpush1.bf16.msra.mxu1 %v4905_v6  ;;  %v5000_v5 = vld [vmem:[%s6516_s0 + $0x170] ss:$36 sps:$4 sm:$0xff]  }
  0x78   :  { %2464 = vmatprep.subr.bf16.mxu0 %v4913_v7  ;;  %3029 = vmatprep.subr.bf16.mxu1 %v4916_v8  ;;  %v5001_v6 = vld [vmem:[%s6515_s1 + $0x540] ss:$16 sps:$4 sm:$0xff]   ;;  %v5004_v7 = vld [vmem:[%s6515_s1 + $0x548] ss:$16 sps:$4 sm:$0xff]   ;;  %v5009_v8 = vld [vmem:[%s6515_s1 + $0x564] ss:$16 sps:$4 sm:$0xff]  }
  0x7a   :  { %2426 = vmatmul.mubr.bf16.gmra.mrb[28].mxu0 %v4910_v9  ;;  %2991 = vmatmul.mubr.bf16.gmra.mrb[28].mxu1 %v4910_v9  ;;  %v5012_v9 = vld [vmem:[%s6515_s1 + $0x56c] ss:$16 sps:$4 sm:$0xff]  }
  0x7b   :  { %2465 = vmatpush1.bf16.msra.mxu0 %v4911_v10  ;;  %3030 = vmatpush1.bf16.msra.mxu1 %v4914_v11  ;;  %v5013_v10 = vld [vmem:[%s6516_s0 + $0x1bc] ss:$36 sps:$4 sm:$0xff]  }
  0x7c   :  { %2466 = vmatprep.subr.bf16.mxu0 %v4919_v12  ;;  %3031 = vmatprep.subr.bf16.mxu1 %v4922_v13  ;;  %v5007_v11 = vld [vmem:[%s6515_s1 + $0x560] ss:$16 sps:$4 sm:$0xff]   ;;  %v5010_v12 = vld [vmem:[%s6515_s1 + $0x568] ss:$16 sps:$4 sm:$0xff]   ;;  %v5018_v13 = vld [vmem:[%s6515_s1 + $0x584] ss:$16 sps:$4 sm:$0xff]  }
  0x7d   :  { %2468 = vmatprep.mubr.bf16.mxu0 %v4925_v14  ;;  %3033 = vmatprep.mubr.bf16.mxu1 %v4925_v14  ;;  %v5021_v14 = vld [vmem:[%s6515_s1 + $0x58c] ss:$16 sps:$4 sm:$0xff]  }
  0x7f   :  { %2467 = vmatpush1.bf16.msra.mxu0 %v4917_v15  ;;  %3032 = vmatpush1.bf16.msra.mxu1 %v4920_v16  ;;  %v5015_v15 = vld [vmem:[%s6516_s0 + $0x1b8] ss:$36 sps:$4 sm:$0xff]   ;;  %v5016_v16 = vld [vmem:[%s6515_s1 + $0x580] ss:$16 sps:$4 sm:$0xff]  }
  0x80   :  { %2549 = vmatprep.subr.bf16.mxu0 %v4928_v17  ;;  %3114 = vmatprep.subr.bf16.mxu1 %v4931_v18  ;;  %v5019_v17 = vld [vmem:[%s6515_s1 + $0x588] ss:$16 sps:$4 sm:$0xff]   ;;  %v5024_v18 = vld [vmem:[%s6515_s1 + $0x5a4] ss:$16 sps:$4 sm:$0xff]  }
  0x82   :  { %2469 = vmatmul.mubr.bf16.vlgmr.msra.gmra.mrb[0].mxu0 %v4923_v19  ;;  %3034 = vmatmul.mubr.bf16.vlgmr.msra.gmra.mrb[0].mxu1 %v4923_v19  ;;  %v5027_v19 = vld [vmem:[%s6515_s1 + $0x5ac] ss:$16 sps:$4 sm:$0xff]  }
  0x83   :  { %2550 = vmatpush1.bf16.msra.mxu0 %v4926_v20  ;;  %3115 = vmatpush1.bf16.msra.mxu1 %v4929_v21  ;;  %v5028_v20 = vld [vmem:[%s6516_s0 + $0x204] ss:$36 sps:$4 sm:$0xff]   ;;  %v5022_v21 = vld [vmem:[%s6515_s1 + $0x5a0] ss:$16 sps:$4 sm:$0xff]  }
  0x84   :  { %2551 = vmatprep.subr.bf16.mxu0 %v4934_v22  ;;  %3116 = vmatprep.subr.bf16.mxu1 %v4937_v23  ;;  %v5025_v22 = vld [vmem:[%s6515_s1 + $0x5a8] ss:$16 sps:$4 sm:$0xff]   ;;  %v5033_v23 = vld [vmem:[%s6515_s1 + $0x5c4] ss:$16 sps:$4 sm:$0xff]  }
  0x85   :  { %2478 = vmatprep.mubr.bf16.mxu0 %v4938_v24  ;;  %3043 = vmatprep.mubr.bf16.mxu1 %v4938_v24  ;;  %v5036_v24 = vld [vmem:[%s6515_s1 + $0x5cc] ss:$16 sps:$4 sm:$0xff]  }
  0x87   :  { %2552 = vmatpush1.bf16.msra.mxu0 %v4932_v25  ;;  %3117 = vmatpush1.bf16.msra.mxu1 %v4935_v26  ;;  %v5030_v25 = vld [vmem:[%s6516_s0 + $0x200] ss:$36 sps:$4 sm:$0xff]  }
  0x88   :  { %2553 = vmatprep.subr.bf16.mxu0 %v4943_v27  ;;  %3118 = vmatprep.subr.bf16.mxu1 %v4946_v28  ;;  %v5031_v26 = vld [vmem:[%s6515_s1 + $0x5c0] ss:$16 sps:$4 sm:$0xff]   ;;  %v5034_v27 = vld [vmem:[%s6515_s1 + $0x5c8] ss:$16 sps:$4 sm:$0xff]   ;;  %v5039_v28 = vld [vmem:[%s6515_s1 + $0x5e4] ss:$16 sps:$4 sm:$0xff]  }
  0x8a   :  { %2479 = vmatmul.mubr.bf16.gmra.mrb[4].mxu0 %v4940_v29  ;;  %3044 = vmatmul.mubr.bf16.gmra.mrb[4].mxu1 %v4940_v29  ;;  %v5042_v29 = vld [vmem:[%s6515_s1 + $0x5ec] ss:$16 sps:$4 sm:$0xff]  }
  0x8b   :  { %2554 = vmatpush1.bf16.msra.mxu0 %v4941_v30  ;;  %3119 = vmatpush1.bf16.msra.mxu1 %v4944_v31  ;;  %v5045_v30 = vld [vmem:[%s6516_s0 + $0x14] ss:$36 sps:$4 sm:$0xff]   ;;  %v5037_v31 = vld [vmem:[%s6515_s1 + $0x5e0] ss:$16 sps:$4 sm:$0xff]  }
  0x8c   :  { %2555 = vmatprep.subr.bf16.mxu0 %v4949_v32  ;;  %3120 = vmatprep.subr.bf16.mxu1 %v4952_v33  ;;  %v5040_v32 = vld [vmem:[%s6515_s1 + $0x5e8] ss:$16 sps:$4 sm:$0xff]   ;;  %v5048_v33 = vld [vmem:[%s6515_s1 + $0x604] ss:$16 sps:$4 sm:$0xff]  }
  0x8d   :  { %2488 = vmatprep.mubr.bf16.mxu0 %v4953_v34  ;;  %3053 = vmatprep.mubr.bf16.mxu1 %v4953_v34  ;;  %v5051_v34 = vld [vmem:[%s6515_s1 + $0x60c] ss:$16 sps:$4 sm:$0xff]  }
  0x8f   :  { %2556 = vmatpush1.bf16.msra.mxu0 %v4947_v35  ;;  %3121 = vmatpush1.bf16.msra.mxu1 %v4950_v36  ;;  %v5043_v35 = vld [vmem:[%s6516_s0 + $0x10] ss:$36 sps:$4 sm:$0xff]  }
  0x90   :  { %2557 = vmatprep.subr.bf16.mxu0 %v4958_v37  ;;  %3122 = vmatprep.subr.bf16.mxu1 %v4961_v38  ;;  %v5046_v36 = vld [vmem:[%s6515_s1 + $0x600] ss:$16 sps:$4 sm:$0xff]   ;;  %v5049_v37 = vld [vmem:[%s6515_s1 + $0x608] ss:$16 sps:$4 sm:$0xff]   ;;  %v5054_v38 = vld [vmem:[%s6515_s1 + $0x624] ss:$16 sps:$4 sm:$0xff]  }
  0x92   :  { %2489 = vmatmul.mubr.bf16.gmra.mrb[8].mxu0 %v4955_v39  ;;  %3054 = vmatmul.mubr.bf16.gmra.mrb[8].mxu1 %v4955_v39  ;;  %v5057_v39 = vld [vmem:[%s6515_s1 + $0x62c] ss:$16 sps:$4 sm:$0xff]  }
  0x93   :  { %2558 = vmatpush1.bf16.msra.mxu0 %v4956_v40  ;;  %3123 = vmatpush1.bf16.msra.mxu1 %v4959_v41  ;;  %v5058_v40 = vld [vmem:[%s6516_s0 + $0x5c] ss:$36 sps:$4 sm:$0xff]  }
  0x94   :  { %2559 = vmatprep.subr.bf16.mxu0 %v4964_v42  ;;  %3124 = vmatprep.subr.bf16.mxu1 %v4967_v43  ;;  %v5052_v41 = vld [vmem:[%s6515_s1 + $0x620] ss:$16 sps:$4 sm:$0xff]   ;;  %v5055_v42 = vld [vmem:[%s6515_s1 + $0x628] ss:$16 sps:$4 sm:$0xff]   ;;  %v5063_v43 = vld [vmem:[%s6515_s1 + $0x644] ss:$16 sps:$4 sm:$0xff]  }
  0x95   :  { %2498 = vmatprep.mubr.bf16.mxu0 %v4968_v44  ;;  %3063 = vmatprep.mubr.bf16.mxu1 %v4968_v44  ;;  %v5066_v44 = vld [vmem:[%s6515_s1 + $0x64c] ss:$16 sps:$4 sm:$0xff]  }
  0x97   :  { %2560 = vmatpush1.bf16.msra.mxu0 %v4962_v45  ;;  %3125 = vmatpush1.bf16.msra.mxu1 %v4965_v46  ;;  %v5060_v45 = vld [vmem:[%s6516_s0 + $0x58] ss:$36 sps:$4 sm:$0xff]   ;;  %v5061_v46 = vld [vmem:[%s6515_s1 + $0x640] ss:$16 sps:$4 sm:$0xff]  }
  0x98   :  { %2561 = vmatprep.subr.bf16.mxu0 %v4973_v47  ;;  %3126 = vmatprep.subr.bf16.mxu1 %v4976_v48  ;;  %v5064_v47 = vld [vmem:[%s6515_s1 + $0x648] ss:$16 sps:$4 sm:$0xff]   ;;  %v5069_v48 = vld [vmem:[%s6515_s1 + $0x664] ss:$16 sps:$4 sm:$0xff]  }
  0x9a   :  { %2499 = vmatmul.mubr.bf16.gmra.mrb[12].mxu0 %v4970_v49  ;;  %3064 = vmatmul.mubr.bf16.gmra.mrb[12].mxu1 %v4970_v49  ;;  %v5072_v49 = vld [vmem:[%s6515_s1 + $0x66c] ss:$16 sps:$4 sm:$0xff]  }
  0x9b   :  { %2562 = vmatpush1.bf16.msra.mxu0 %v4971_v50  ;;  %3127 = vmatpush1.bf16.msra.mxu1 %v4974_v51  ;;  %v5073_v50 = vld [vmem:[%s6516_s0 + $0xa4] ss:$36 sps:$4 sm:$0xff]   ;;  %v5067_v51 = vld [vmem:[%s6515_s1 + $0x660] ss:$16 sps:$4 sm:$0xff]  }
  0x9c   :  { %2563 = vmatprep.subr.bf16.mxu0 %v4979_v52  ;;  %3128 = vmatprep.subr.bf16.mxu1 %v4982_v53  ;;  %v5070_v52 = vld [vmem:[%s6515_s1 + $0x668] ss:$16 sps:$4 sm:$0xff]   ;;  %v5078_v53 = vld [vmem:[%s6515_s1 + $0x684] ss:$16 sps:$4 sm:$0xff]  }
  0x9d   :  { %2508 = vmatprep.mubr.bf16.mxu0 %v4983_v54  ;;  %3073 = vmatprep.mubr.bf16.mxu1 %v4983_v54  ;;  %v5081_v54 = vld [vmem:[%s6515_s1 + $0x68c] ss:$16 sps:$4 sm:$0xff]  }
  0x9f   :  { %2564 = vmatpush1.bf16.msra.mxu0 %v4977_v55  ;;  %3129 = vmatpush1.bf16.msra.mxu1 %v4980_v56  ;;  %v5075_v55 = vld [vmem:[%s6516_s0 + $0xa0] ss:$36 sps:$4 sm:$0xff]  }
  0xa0   :  { %2565 = vmatprep.subr.bf16.mxu0 %v4988_v57  ;;  %3130 = vmatprep.subr.bf16.mxu1 %v4991_v58  ;;  %v5076_v56 = vld [vmem:[%s6515_s1 + $0x680] ss:$16 sps:$4 sm:$0xff]   ;;  %v5079_v57 = vld [vmem:[%s6515_s1 + $0x688] ss:$16 sps:$4 sm:$0xff]   ;;  %v5084_v58 = vld [vmem:[%s6515_s1 + $0x6a4] ss:$16 sps:$4 sm:$0xff]  }
  0xa2   :  { %2509 = vmatmul.mubr.bf16.gmra.mrb[16].mxu0 %v4985_v59  ;;  %3074 = vmatmul.mubr.bf16.gmra.mrb[16].mxu1 %v4985_v59  ;;  %v5087_v59 = vld [vmem:[%s6515_s1 + $0x6ac] ss:$16 sps:$4 sm:$0xff]  }
  0xa3   :  { %2566 = vmatpush1.bf16.msra.mxu0 %v4986_v60  ;;  %3131 = vmatpush1.bf16.msra.mxu1 %v4989_v61  ;;  %v5088_v60 = vld [vmem:[%s6516_s0 + $0xec] ss:$36 sps:$4 sm:$0xff]  }
  0xa4   :  { %2567 = vmatprep.subr.bf16.mxu0 %v4994_v62  ;;  %3132 = vmatprep.subr.bf16.mxu1 %v4997_v63  ;;  %v5082_v61 = vld [vmem:[%s6515_s1 + $0x6a0] ss:$16 sps:$4 sm:$0xff]   ;;  %v5085_v62 = vld [vmem:[%s6515_s1 + $0x6a8] ss:$16 sps:$4 sm:$0xff]   ;;  %v5093_v63 = vld [vmem:[%s6515_s1 + $0x6c4] ss:$16 sps:$4 sm:$0xff]  }
  0xa5   :  { %2518 = vmatprep.mubr.bf16.mxu0 %v4998_v0  ;;  %3083 = vmatprep.mubr.bf16.mxu1 %v4998_v0  ;;  %v5096_v0 = vld [vmem:[%s6515_s1 + $0x6cc] ss:$16 sps:$4 sm:$0xff]  }
  0xa7   :  { %2568 = vmatpush1.bf16.msra.mxu0 %v4992_v1  ;;  %3133 = vmatpush1.bf16.msra.mxu1 %v4995_v2  ;;  %v5090_v1 = vld [vmem:[%s6516_s0 + $0xe8] ss:$36 sps:$4 sm:$0xff]   ;;  %v5091_v2 = vld [vmem:[%s6515_s1 + $0x6c0] ss:$16 sps:$4 sm:$0xff]  }
  0xa8   :  { %2569 = vmatprep.subr.bf16.mxu0 %v5003_v3  ;;  %3134 = vmatprep.subr.bf16.mxu1 %v5006_v4  ;;  %v5094_v3 = vld [vmem:[%s6515_s1 + $0x6c8] ss:$16 sps:$4 sm:$0xff]   ;;  %v5099_v4 = vld [vmem:[%s6515_s1 + $0x6e4] ss:$16 sps:$4 sm:$0xff]  }
  0xaa   :  { %2519 = vmatmul.mubr.bf16.gmra.mrb[20].mxu0 %v5000_v5  ;;  %3084 = vmatmul.mubr.bf16.gmra.mrb[20].mxu1 %v5000_v5  ;;  %v5102_v5 = vld [vmem:[%s6515_s1 + $0x6ec] ss:$16 sps:$4 sm:$0xff]  }
  0xab   :  { %2570 = vmatpush1.bf16.msra.mxu0 %v5001_v6  ;;  %3135 = vmatpush1.bf16.msra.mxu1 %v5004_v7  ;;  %v5103_v6 = vld [vmem:[%s6516_s0 + $0x134] ss:$36 sps:$4 sm:$0xff]   ;;  %v5097_v7 = vld [vmem:[%s6515_s1 + $0x6e0] ss:$16 sps:$4 sm:$0xff]  }
  0xac   :  { %2571 = vmatprep.subr.bf16.mxu0 %v5009_v8  ;;  %3136 = vmatprep.subr.bf16.mxu1 %v5012_v9  ;;  %v5100_v8 = vld [vmem:[%s6515_s1 + $0x6e8] ss:$16 sps:$4 sm:$0xff]   ;;  %v5108_v9 = vld [vmem:[%s6515_s1 + $0x704] ss:$16 sps:$4 sm:$0xff]  }
  0xad   :  { %2528 = vmatprep.mubr.bf16.mxu0 %v5013_v10  ;;  %3093 = vmatprep.mubr.bf16.mxu1 %v5013_v10  ;;  %v5111_v10 = vld [vmem:[%s6515_s1 + $0x70c] ss:$16 sps:$4 sm:$0xff]  }
  0xaf   :  { %2572 = vmatpush1.bf16.msra.mxu0 %v5007_v11  ;;  %3137 = vmatpush1.bf16.msra.mxu1 %v5010_v12  ;;  %v5105_v11 = vld [vmem:[%s6516_s0 + $0x130] ss:$36 sps:$4 sm:$0xff]  }
  0xb0   :  { %2573 = vmatprep.subr.bf16.mxu0 %v5018_v13  ;;  %3138 = vmatprep.subr.bf16.mxu1 %v5021_v14  ;;  %v5106_v12 = vld [vmem:[%s6515_s1 + $0x700] ss:$16 sps:$4 sm:$0xff]   ;;  %v5109_v13 = vld [vmem:[%s6515_s1 + $0x708] ss:$16 sps:$4 sm:$0xff]   ;;  %v5114_v14 = vld [vmem:[%s6515_s1 + $0x724] ss:$16 sps:$4 sm:$0xff]  }
  0xb2   :  { %2529 = vmatmul.mubr.bf16.gmra.mrb[24].mxu0 %v5015_v15  ;;  %3094 = vmatmul.mubr.bf16.gmra.mrb[24].mxu1 %v5015_v15  ;;  %v5117_v15 = vld [vmem:[%s6515_s1 + $0x72c] ss:$16 sps:$4 sm:$0xff]  }
  0xb3   :  { %2574 = vmatpush1.bf16.msra.mxu0 %v5016_v16  ;;  %3139 = vmatpush1.bf16.msra.mxu1 %v5019_v17  ;;  %v5118_v16 = vld [vmem:[%s6516_s0 + $0x17c] ss:$36 sps:$4 sm:$0xff]  }
  0xb4   :  { %2575 = vmatprep.subr.bf16.mxu0 %v5024_v18  ;;  %3140 = vmatprep.subr.bf16.mxu1 %v5027_v19  ;;  %v5112_v17 = vld [vmem:[%s6515_s1 + $0x720] ss:$16 sps:$4 sm:$0xff]   ;;  %v5115_v18 = vld [vmem:[%s6515_s1 + $0x728] ss:$16 sps:$4 sm:$0xff]   ;;  %v5123_v19 = vld [vmem:[%s6515_s1 + $0x744] ss:$16 sps:$4 sm:$0xff]  }
  0xb5   :  { %2538 = vmatprep.mubr.bf16.mxu0 %v5028_v20  ;;  %3103 = vmatprep.mubr.bf16.mxu1 %v5028_v20  ;;  %v5126_v20 = vld [vmem:[%s6515_s1 + $0x74c] ss:$16 sps:$4 sm:$0xff]  }
  0xb7   :  { %2576 = vmatpush1.bf16.msra.mxu0 %v5022_v21  ;;  %3141 = vmatpush1.bf16.msra.mxu1 %v5025_v22  ;;  %v5120_v21 = vld [vmem:[%s6516_s0 + $0x178] ss:$36 sps:$4 sm:$0xff]   ;;  %v5121_v22 = vld [vmem:[%s6515_s1 + $0x740] ss:$16 sps:$4 sm:$0xff]  }
  0xb8   :  { %2577 = vmatprep.subr.bf16.mxu0 %v5033_v23  ;;  %3142 = vmatprep.subr.bf16.mxu1 %v5036_v24  ;;  %v5124_v23 = vld [vmem:[%s6515_s1 + $0x748] ss:$16 sps:$4 sm:$0xff]   ;;  %v5129_v24 = vld [vmem:[%s6515_s1 + $0x764] ss:$16 sps:$4 sm:$0xff]  }
  0xba   :  { %2539 = vmatmul.mubr.bf16.gmra.mrb[28].mxu0 %v5030_v25  ;;  %3104 = vmatmul.mubr.bf16.gmra.mrb[28].mxu1 %v5030_v25  ;;  %v5132_v25 = vld [vmem:[%s6515_s1 + $0x76c] ss:$16 sps:$4 sm:$0xff]  }
  0xbb   :  { %2578 = vmatpush1.bf16.msra.mxu0 %v5031_v26  ;;  %3143 = vmatpush1.bf16.msra.mxu1 %v5034_v27  ;;  %v5127_v26 = vld [vmem:[%s6515_s1 + $0x760] ss:$16 sps:$4 sm:$0xff]   ;;  %v5133_v27 = vld [vmem:[%s6516_s0 + $0x1c4] ss:$36 sps:$4 sm:$0xff]  }
  0xbc   :  { %2579 = vmatprep.subr.bf16.mxu0 %v5039_v28  ;;  %3144 = vmatprep.subr.bf16.mxu1 %v5042_v29  ;;  %v5130_v28 = vld [vmem:[%s6515_s1 + $0x768] ss:$16 sps:$4 sm:$0xff]   ;;  %v5138_v29 = vld [vmem:[%s6515_s1 + $0x784] ss:$16 sps:$4 sm:$0xff]  }
  0xbd   :  { %2581 = vmatprep.mubr.bf16.mxu0 %v5045_v30  ;;  %3146 = vmatprep.mubr.bf16.mxu1 %v5045_v30  ;;  %v5135_v30 = vld [vmem:[%s6516_s0 + $0x1c0] ss:$36 sps:$4 sm:$0xff]  }
  0xbf   :  { %2580 = vmatpush1.bf16.msra.mxu0 %v5037_v31  ;;  %3145 = vmatpush1.bf16.msra.mxu1 %v5040_v32  ;;  %v5141_v31 = vld [vmem:[%s6515_s1 + $0x78c] ss:$16 sps:$4 sm:$0xff]   ;;  %v5136_v32 = vld [vmem:[%s6515_s1 + $0x780] ss:$16 sps:$4 sm:$0xff]  }
  0xc0   :  { %2662 = vmatprep.subr.bf16.mxu0 %v5048_v33  ;;  %3227 = vmatprep.subr.bf16.mxu1 %v5051_v34  ;;  %v5139_v33 = vld [vmem:[%s6515_s1 + $0x788] ss:$16 sps:$4 sm:$0xff]   ;;  %v5144_v34 = vld [vmem:[%s6515_s1 + $0x7a4] ss:$16 sps:$4 sm:$0xff]  }
  0xc2   :  { %2582 = vmatmul.mubr.bf16.vlgmr.msra.gmra.mrb[0].mxu0 %v5043_v35  ;;  %3147 = vmatmul.mubr.bf16.vlgmr.msra.gmra.mrb[0].mxu1 %v5043_v35  ;;  %v5147_v35 = vld [vmem:[%s6515_s1 + $0x7ac] ss:$16 sps:$4 sm:$0xff]  }
  0xc3   :  { %2663 = vmatpush1.bf16.msra.mxu0 %v5046_v36  ;;  %3228 = vmatpush1.bf16.msra.mxu1 %v5049_v37  ;;  %v5148_v36 = vld [vmem:[%s6516_s0 + $0x20c] ss:$36 sps:$4 sm:$0xff]  }
  0xc4   :  { %2664 = vmatprep.subr.bf16.mxu0 %v5054_v38  ;;  %3229 = vmatprep.subr.bf16.mxu1 %v5057_v39  ;;  %v5142_v37 = vld [vmem:[%s6515_s1 + $0x7a0] ss:$16 sps:$4 sm:$0xff]   ;;  %v5145_v38 = vld [vmem:[%s6515_s1 + $0x7a8] ss:$16 sps:$4 sm:$0xff]   ;;  %v5153_v39 = vld [vmem:[%s6515_s1 + $0x7c4] ss:$16 sps:$4 sm:$0xff]  }
  0xc5   :  { %2591 = vmatprep.mubr.bf16.mxu0 %v5058_v40  ;;  %3156 = vmatprep.mubr.bf16.mxu1 %v5058_v40  ;;  %v5156_v40 = vld [vmem:[%s6515_s1 + $0x7cc] ss:$16 sps:$4 sm:$0xff]  }
  0xc7   :  { %2665 = vmatpush1.bf16.msra.mxu0 %v5052_v41  ;;  %3230 = vmatpush1.bf16.msra.mxu1 %v5055_v42  ;;  %v5150_v41 = vld [vmem:[%s6516_s0 + $0x208] ss:$36 sps:$4 sm:$0xff]   ;;  %v5151_v42 = vld [vmem:[%s6515_s1 + $0x7c0] ss:$16 sps:$4 sm:$0xff]  }
  0xc8   :  { %2666 = vmatprep.subr.bf16.mxu0 %v5063_v43  ;;  %3231 = vmatprep.subr.bf16.mxu1 %v5066_v44  ;;  %v5154_v43 = vld [vmem:[%s6515_s1 + $0x7c8] ss:$16 sps:$4 sm:$0xff]   ;;  %v5159_v44 = vld [vmem:[%s6515_s1 + $0x7e4] ss:$16 sps:$4 sm:$0xff]  }
  0xca   :  { %2592 = vmatmul.mubr.bf16.gmra.mrb[4].mxu0 %v5060_v45  ;;  %3157 = vmatmul.mubr.bf16.gmra.mrb[4].mxu1 %v5060_v45  ;;  %v5162_v45 = vld [vmem:[%s6515_s1 + $0x7ec] ss:$16 sps:$4 sm:$0xff]  }
  0xcb   :  { %2667 = vmatpush1.bf16.msra.mxu0 %v5061_v46  ;;  %3232 = vmatpush1.bf16.msra.mxu1 %v5064_v47  ;;  %v5165_v46 = vld [vmem:[%s6516_s0 + $0x1c] ss:$36 sps:$4 sm:$0xff]  }
  0xcc   :  { %2668 = vmatprep.subr.bf16.mxu0 %v5069_v48  ;;  %3233 = vmatprep.subr.bf16.mxu1 %v5072_v49  ;;  %v5157_v47 = vld [vmem:[%s6515_s1 + $0x7e0] ss:$16 sps:$4 sm:$0xff]   ;;  %v5160_v48 = vld [vmem:[%s6515_s1 + $0x7e8] ss:$16 sps:$4 sm:$0xff]   ;;  %v5168_v49 = vld [vmem:[%s6515_s1 + $0x804] ss:$16 sps:$4 sm:$0xff]  }
  0xcd   :  { %2601 = vmatprep.mubr.bf16.mxu0 %v5073_v50  ;;  %3166 = vmatprep.mubr.bf16.mxu1 %v5073_v50  ;;  %v5171_v50 = vld [vmem:[%s6515_s1 + $0x80c] ss:$16 sps:$4 sm:$0xff]  }
  0xcf   :  { %2669 = vmatpush1.bf16.msra.mxu0 %v5067_v51  ;;  %3234 = vmatpush1.bf16.msra.mxu1 %v5070_v52  ;;  %v5163_v51 = vld [vmem:[%s6516_s0 + $0x18] ss:$36 sps:$4 sm:$0xff]   ;;  %v5166_v52 = vld [vmem:[%s6515_s1 + $0x800] ss:$16 sps:$4 sm:$0xff]  }
  0xd0   :  { %2670 = vmatprep.subr.bf16.mxu0 %v5078_v53  ;;  %3235 = vmatprep.subr.bf16.mxu1 %v5081_v54  ;;  %v5169_v53 = vld [vmem:[%s6515_s1 + $0x808] ss:$16 sps:$4 sm:$0xff]  }
  0xd1   :  { %v5172_v54 = vld [vmem:[%s6516_s0 + $0x64] ss:$36 sps:$4 sm:$0xff]  }
  0xd2   :  { %2602 = vmatmul.mubr.bf16.gmra.mrb[8].mxu0 %v5075_v55  ;;  %3167 = vmatmul.mubr.bf16.gmra.mrb[8].mxu1 %v5075_v55  ;;  %v5177_v55 = vld [vmem:[%s6515_s1 + $0x824] ss:$16 sps:$4 sm:$0xff]  }
  0xd3   :  { %2671 = vmatpush1.bf16.msra.mxu0 %v5076_v56  ;;  %3236 = vmatpush1.bf16.msra.mxu1 %v5079_v57  ;;  %v5180_v56 = vld [vmem:[%s6515_s1 + $0x82c] ss:$16 sps:$4 sm:$0xff]   ;;  %v5175_v57 = vld [vmem:[%s6515_s1 + $0x820] ss:$16 sps:$4 sm:$0xff]  }
  0xd4   :  { %2672 = vmatprep.subr.bf16.mxu0 %v5084_v58  ;;  %3237 = vmatprep.subr.bf16.mxu1 %v5087_v59  ;;  %v5178_v58 = vld [vmem:[%s6515_s1 + $0x828] ss:$16 sps:$4 sm:$0xff]   ;;  %v5186_v59 = vld [vmem:[%s6515_s1 + $0x844] ss:$16 sps:$4 sm:$0xff]  }
  0xd5   :  { %2611 = vmatprep.mubr.bf16.mxu0 %v5088_v60  ;;  %3176 = vmatprep.mubr.bf16.mxu1 %v5088_v60  ;;  %v5189_v60 = vld [vmem:[%s6515_s1 + $0x84c] ss:$16 sps:$4 sm:$0xff]  }
  0xd7   :  { %2673 = vmatpush1.bf16.msra.mxu0 %v5082_v61  ;;  %3238 = vmatpush1.bf16.msra.mxu1 %v5085_v62  ;;  %v5174_v61 = vld [vmem:[%s6516_s0 + $0x60] ss:$36 sps:$4 sm:$0xff]   ;;  %v5181_v62 = vld [vmem:[%s6516_s0 + $0xac] ss:$36 sps:$4 sm:$0xff]  }
  0xd8   :  { %2674 = vmatprep.subr.bf16.mxu0 %v5093_v63  ;;  %3239 = vmatprep.subr.bf16.mxu1 %v5096_v0  ;;  %v5184_v63 = vld [vmem:[%s6515_s1 + $0x840] ss:$16 sps:$4 sm:$0xff]   ;;  %v5187_v0 = vld [vmem:[%s6515_s1 + $0x848] ss:$16 sps:$4 sm:$0xff]  }
  0xda   :  { %2612 = vmatmul.mubr.bf16.gmra.mrb[12].mxu0 %v5090_v1  ;;  %3177 = vmatmul.mubr.bf16.gmra.mrb[12].mxu1 %v5090_v1  ;;  %v5195_v1 = vld [vmem:[%s6515_s1 + $0x864] ss:$16 sps:$4 sm:$0xff]  }
  0xdb   :  { %2675 = vmatpush1.bf16.msra.mxu0 %v5091_v2  ;;  %3240 = vmatpush1.bf16.msra.mxu1 %v5094_v3  ;;  %v5198_v2 = vld [vmem:[%s6515_s1 + $0x86c] ss:$16 sps:$4 sm:$0xff]   ;;  %v5193_v3 = vld [vmem:[%s6515_s1 + $0x860] ss:$16 sps:$4 sm:$0xff]  }
  0xdc   :  { %2676 = vmatprep.subr.bf16.mxu0 %v5099_v4  ;;  %3241 = vmatprep.subr.bf16.mxu1 %v5102_v5  ;;  %v5196_v4 = vld [vmem:[%s6515_s1 + $0x868] ss:$16 sps:$4 sm:$0xff]   ;;  %v5204_v5 = vld [vmem:[%s6515_s1 + $0x884] ss:$16 sps:$4 sm:$0xff]  }
  0xdd   :  { %2621 = vmatprep.mubr.bf16.mxu0 %v5103_v6  ;;  %3186 = vmatprep.mubr.bf16.mxu1 %v5103_v6  ;;  %v5207_v6 = vld [vmem:[%s6515_s1 + $0x88c] ss:$16 sps:$4 sm:$0xff]  }
  0xdf   :  { %2677 = vmatpush1.bf16.msra.mxu0 %v5097_v7  ;;  %3242 = vmatpush1.bf16.msra.mxu1 %v5100_v8  ;;  %v5183_v7 = vld [vmem:[%s6516_s0 + $0xa8] ss:$36 sps:$4 sm:$0xff]   ;;  %v5190_v8 = vld [vmem:[%s6516_s0 + $0xf4] ss:$36 sps:$4 sm:$0xff]  }
  0xe0   :  { %2678 = vmatprep.subr.bf16.mxu0 %v5108_v9  ;;  %3243 = vmatprep.subr.bf16.mxu1 %v5111_v10  ;;  %v5202_v9 = vld [vmem:[%s6515_s1 + $0x880] ss:$16 sps:$4 sm:$0xff]   ;;  %v5205_v10 = vld [vmem:[%s6515_s1 + $0x888] ss:$16 sps:$4 sm:$0xff]  }
  0xe2   :  { %2622 = vmatmul.mubr.bf16.gmra.mrb[16].mxu0 %v5105_v11  ;;  %3187 = vmatmul.mubr.bf16.gmra.mrb[16].mxu1 %v5105_v11  ;;  %v5213_v11 = vld [vmem:[%s6515_s1 + $0x8a4] ss:$16 sps:$4 sm:$0xff]  }
  0xe3   :  { %2679 = vmatpush1.bf16.msra.mxu0 %v5106_v12  ;;  %3244 = vmatpush1.bf16.msra.mxu1 %v5109_v13  ;;  %v5216_v12 = vld [vmem:[%s6515_s1 + $0x8ac] ss:$16 sps:$4 sm:$0xff]   ;;  %v5211_v13 = vld [vmem:[%s6515_s1 + $0x8a0] ss:$16 sps:$4 sm:$0xff]  }
  0xe4   :  { %2680 = vmatprep.subr.bf16.mxu0 %v5114_v14  ;;  %3245 = vmatprep.subr.bf16.mxu1 %v5117_v15  ;;  %v5214_v14 = vld [vmem:[%s6515_s1 + $0x8a8] ss:$16 sps:$4 sm:$0xff]   ;;  %v5222_v15 = vld [vmem:[%s6515_s1 + $0x8c4] ss:$16 sps:$4 sm:$0xff]  }
  0xe5   :  { %2631 = vmatprep.mubr.bf16.mxu0 %v5118_v16  ;;  %3196 = vmatprep.mubr.bf16.mxu1 %v5118_v16  ;;  %v5225_v16 = vld [vmem:[%s6515_s1 + $0x8cc] ss:$16 sps:$4 sm:$0xff]  }
  0xe7   :  { %2681 = vmatpush1.bf16.msra.mxu0 %v5112_v17  ;;  %3246 = vmatpush1.bf16.msra.mxu1 %v5115_v18  ;;  %v5192_v17 = vld [vmem:[%s6516_s0 + $0xf0] ss:$36 sps:$4 sm:$0xff]   ;;  %v5199_v18 = vld [vmem:[%s6516_s0 + $0x13c] ss:$36 sps:$4 sm:$0xff]  }
  0xe8   :  { %2682 = vmatprep.subr.bf16.mxu0 %v5123_v19  ;;  %3247 = vmatprep.subr.bf16.mxu1 %v5126_v20  ;;  %v5220_v19 = vld [vmem:[%s6515_s1 + $0x8c0] ss:$16 sps:$4 sm:$0xff]   ;;  %v5223_v20 = vld [vmem:[%s6515_s1 + $0x8c8] ss:$16 sps:$4 sm:$0xff]  }
  0xea   :  { %2632 = vmatmul.mubr.bf16.gmra.mrb[20].mxu0 %v5120_v21  ;;  %3197 = vmatmul.mubr.bf16.gmra.mrb[20].mxu1 %v5120_v21  ;;  %v5231_v21 = vld [vmem:[%s6515_s1 + $0x8e4] ss:$16 sps:$4 sm:$0xff]  }
  0xeb   :  { %2683 = vmatpush1.bf16.msra.mxu0 %v5121_v22  ;;  %3248 = vmatpush1.bf16.msra.mxu1 %v5124_v23  ;;  %v5234_v22 = vld [vmem:[%s6515_s1 + $0x8ec] ss:$16 sps:$4 sm:$0xff]   ;;  %v5229_v23 = vld [vmem:[%s6515_s1 + $0x8e0] ss:$16 sps:$4 sm:$0xff]  }
  0xec   :  { %2684 = vmatprep.subr.bf16.mxu0 %v5129_v24  ;;  %3249 = vmatprep.subr.bf16.mxu1 %v5132_v25  ;;  %v5232_v24 = vld [vmem:[%s6515_s1 + $0x8e8] ss:$16 sps:$4 sm:$0xff]  }
  0xed   :  { %2641 = vmatprep.mubr.bf16.mxu0 %v5133_v27  ;;  %3206 = vmatprep.mubr.bf16.mxu1 %v5133_v27  ;;  %v5201_v25 = vld [vmem:[%s6516_s0 + $0x138] ss:$36 sps:$4 sm:$0xff]   ;;  %v5210_v27 = vld [vmem:[%s6516_s0 + $0x180] ss:$36 sps:$4 sm:$0xff]  }
  0xef   :  { %2685 = vmatpush1.bf16.msra.mxu0 %v5127_v26  ;;  %3250 = vmatpush1.bf16.msra.mxu1 %v5130_v28  ;;  %v5208_v26 = vld [vmem:[%s6516_s0 + $0x184] ss:$36 sps:$4 sm:$0xff]   ;;  %v5217_v28 = vld [vmem:[%s6516_s0 + $0x1cc] ss:$36 sps:$4 sm:$0xff]  }
  0xf0   :  { %2686 = vmatprep.subr.bf16.mxu0 %v5138_v29  ;;  %3251 = vmatprep.subr.bf16.mxu1 %v5141_v31  ;;  %v5219_v29 = vld [vmem:[%s6516_s0 + $0x1c8] ss:$36 sps:$4 sm:$0xff]   ;;  %v5228_v31 = vld [vmem:[%s6516_s0 + $0x210] ss:$36 sps:$4 sm:$0xff]  }
  0xf2   :  { %2642 = vmatmul.mubr.bf16.gmra.mrb[24].mxu0 %v5135_v30  ;;  %3207 = vmatmul.mubr.bf16.gmra.mrb[24].mxu1 %v5135_v30  ;;  %v5226_v30 = vld [vmem:[%s6516_s0 + $0x214] ss:$36 sps:$4 sm:$0xff]  }
  0xf3   :  { %2687 = vmatpush1.bf16.msra.mxu0 %v5136_v32  ;;  %3252 = vmatpush1.bf16.msra.mxu1 %v5139_v33  ;;  %v5243_v32 = vmov 0   ;;  %v5235_v33 = vld [vmem:[%s6516_s0 + $0x20] ss:$36 sps:$4 sm:$0xff]  }
  0xf4   :  { %2688 = vmatprep.subr.bf16.mxu0 %v5144_v34  ;;  %3253 = vmatprep.subr.bf16.mxu1 %v5147_v35  ;;  %v5236_v34 = vld [vmem:[%s6516_s0 + $0x68] ss:$36 sps:$4 sm:$0xff]   ;;  %v5237_v35 = vld [vmem:[%s6516_s0 + $0xb0] ss:$36 sps:$4 sm:$0xff]  }
  0xf5   :  { %2651 = vmatprep.mubr.bf16.mxu0 %v5148_v36  ;;  %3216 = vmatprep.mubr.bf16.mxu1 %v5148_v36  ;;  %v5238_v36 = vld [vmem:[%s6516_s0 + $0xf8] ss:$36 sps:$4 sm:$0xff]  }
  0xf7   :  { %2689 = vmatpush1.bf16.msra.mxu0 %v5142_v37  ;;  %3254 = vmatpush1.bf16.msra.mxu1 %v5145_v38  ;;  %v5239_v37 = vld [vmem:[%s6516_s0 + $0x140] ss:$36 sps:$4 sm:$0xff]   ;;  %v5240_v38 = vld [vmem:[%s6516_s0 + $0x188] ss:$36 sps:$4 sm:$0xff]  }
  0xf8   :  { %2690 = vmatprep.subr.bf16.mxu0 %v5153_v39  ;;  %3255 = vmatprep.subr.bf16.mxu1 %v5156_v40  ;;  %v5241_v39 = vld [vmem:[%s6516_s0 + $0x1d0] ss:$36 sps:$4 sm:$0xff]   ;;  %v5242_v40 = vld [vmem:[%s6516_s0 + $0x218] ss:$36 sps:$4 sm:$0xff]  }
  0xfa   :  { %2652 = vmatmul.mubr.bf16.gmra.mrb[28].mxu0 %v5150_v41  ;;  %3217 = vmatmul.mubr.bf16.gmra.mrb[28].mxu1 %v5150_v41  ;;  %v3650_v41 = vlaneseq }
  0xfb   :  { %2691 = vmatpush1.bf16.msra.mxu0 %v5151_v42  ;;  %3256 = vmatpush1.bf16.msra.mxu1 %v5154_v43 }
  0xfc   :  { %2692 = vmatprep.subr.bf16.mxu0 %v5159_v44  ;;  %3257 = vmatprep.subr.bf16.mxu1 %v5162_v45  ;;  %v3651_v42 = vshrl.u32 %v3650_v41, 7  ;;  %v3648_v45 = vld [vmem:[%s6517_s2] sm:$0xf] }
  0xfd   :  { %2694 = vmatprep.mubr.bf16.mxu0 %v5165_v46  ;;  %3259 = vmatprep.mubr.bf16.mxu1 %v5165_v46 }
  0xfe   :  { %v3652_v43 = vsub.s32 0, %v3651_v42  ;;  %v3660_v44 = vsub.s32 2, %v3651_v42  ;;  %v3656_v46 = vsub.s32 1, %v3651_v42 }
  0xff   :  { %2693 = vmatpush1.bf16.msra.mxu0 %v5157_v47  ;;  %3258 = vmatpush1.bf16.msra.mxu1 %v5160_v48  ;;  %v3664_v47 = vsub.s32 3, %v3651_v42 }
 0x100   :  { %2775 = vmatprep.subr.bf16.mxu0 %v5168_v49  ;;  %3340 = vmatprep.subr.bf16.mxu1 %v5171_v50  ;;  %v6347_v48 = vrot.slane %v3648_v45, %v3652_v43  ;;  %v6349_v49 = vrot.slane %v3648_v45, %v3660_v44  ;;  %v6351_v50 = vrot.slane %v3648_v45, %v3656_v46 }
 0x102   :  { %2695 = vmatmul.mubr.bf16.vlgmr.msra.gmra.mrb[0].mxu0 %v5163_v51  ;;  %3260 = vmatmul.mubr.bf16.vlgmr.msra.gmra.mrb[0].mxu1 %v5163_v51  ;;  %v6353_v51 = vrot.slane %v3648_v45, %v3664_v47 }
 0x103   :  { %2776 = vmatpush1.bf16.msra.mxu0 %v5166_v52  ;;  %3341 = vmatpush1.bf16.msra.mxu1 %v5169_v53 }
 0x104   :  { %2704 = vmatprep.mubr.bf16.mxu0 %v5172_v54  ;;  %3269 = vmatprep.mubr.bf16.mxu1 %v5172_v54 }
 0x105   :  { %2777 = vmatprep.subr.bf16.mxu0 %v5177_v55  ;;  %3342 = vmatprep.subr.bf16.mxu1 %v5180_v56 }
 0x107   :  { %2778 = vmatpush1.bf16.msra.mxu0 %v5175_v57  ;;  %3343 = vmatpush1.bf16.msra.mxu1 %v5178_v58 }
 0x108   :  { %2779 = vmatprep.subr.bf16.mxu0 %v5186_v59  ;;  %3344 = vmatprep.subr.bf16.mxu1 %v5189_v60 }
 0x10a   :  { %2705 = vmatmul.mubr.bf16.gmra.mrb[4].mxu0 %v5174_v61  ;;  %3270 = vmatmul.mubr.bf16.gmra.mrb[4].mxu1 %v5174_v61 }
 0x10b   :  { %2714 = vmatprep.mubr.bf16.mxu0 %v5181_v62  ;;  %3279 = vmatprep.mubr.bf16.mxu1 %v5181_v62 }
 0x10c   :  { %2780 = vmatpush1.bf16.msra.mxu0 %v5184_v63  ;;  %3345 = vmatpush1.bf16.msra.mxu1 %v5187_v0 }
 0x10d   :  { %2781 = vmatprep.subr.bf16.mxu0 %v5195_v1  ;;  %3346 = vmatprep.subr.bf16.mxu1 %v5198_v2 }
 0x110   :  { %2782 = vmatpush1.bf16.msra.mxu0 %v5193_v3  ;;  %3347 = vmatpush1.bf16.msra.mxu1 %v5196_v4 }
 0x111   :  { %2783 = vmatprep.subr.bf16.mxu0 %v5204_v5  ;;  %3348 = vmatprep.subr.bf16.mxu1 %v5207_v6 }
 0x112   :  { %2715 = vmatmul.mubr.bf16.gmra.mrb[8].mxu0 %v5183_v7  ;;  %3280 = vmatmul.mubr.bf16.gmra.mrb[8].mxu1 %v5183_v7 }
 0x113   :  { %2724 = vmatprep.mubr.bf16.mxu0 %v5190_v8  ;;  %3289 = vmatprep.mubr.bf16.mxu1 %v5190_v8 }
 0x114   :  { %2784 = vmatpush1.bf16.msra.mxu0 %v5202_v9  ;;  %3349 = vmatpush1.bf16.msra.mxu1 %v5205_v10 }
 0x115   :  { %2785 = vmatprep.subr.bf16.mxu0 %v5213_v11  ;;  %3350 = vmatprep.subr.bf16.mxu1 %v5216_v12 }
 0x118   :  { %2786 = vmatpush1.bf16.msra.mxu0 %v5211_v13  ;;  %3351 = vmatpush1.bf16.msra.mxu1 %v5214_v14 }
 0x119   :  { %2787 = vmatprep.subr.bf16.mxu0 %v5222_v15  ;;  %3352 = vmatprep.subr.bf16.mxu1 %v5225_v16 }
 0x11a   :  { %2725 = vmatmul.mubr.bf16.gmra.mrb[12].mxu0 %v5192_v17  ;;  %3290 = vmatmul.mubr.bf16.gmra.mrb[12].mxu1 %v5192_v17 }
 0x11b   :  { %2734 = vmatprep.mubr.bf16.mxu0 %v5199_v18  ;;  %3299 = vmatprep.mubr.bf16.mxu1 %v5199_v18 }
 0x11c   :  { %2788 = vmatpush1.bf16.msra.mxu0 %v5220_v19  ;;  %3353 = vmatpush1.bf16.msra.mxu1 %v5223_v20 }
 0x11d   :  { %2789 = vmatprep.subr.bf16.mxu0 %v5231_v21  ;;  %3354 = vmatprep.subr.bf16.mxu1 %v5234_v22 }
 0x120   :  { %2790 = vmatpush1.bf16.msra.mxu0 %v5229_v23  ;;  %3355 = vmatpush1.bf16.msra.mxu1 %v5232_v24 }
 0x122   :  { %2735 = vmatmul.mubr.bf16.gmra.mrb[16].mxu0 %v5201_v25  ;;  %3300 = vmatmul.mubr.bf16.gmra.mrb[16].mxu1 %v5201_v25 }
 0x123   :  { %2744 = vmatprep.mubr.bf16.mxu0 %v5208_v26  ;;  %3309 = vmatprep.mubr.bf16.mxu1 %v5208_v26 }
 0x12a   :  { %2745 = vmatmul.mubr.bf16.gmra.mrb[20].mxu0 %v5210_v27  ;;  %3310 = vmatmul.mubr.bf16.gmra.mrb[20].mxu1 %v5210_v27 }
 0x12b   :  { %2754 = vmatprep.mubr.bf16.mxu0 %v5217_v28  ;;  %3319 = vmatprep.mubr.bf16.mxu1 %v5217_v28 }
 0x132   :  { %2755 = vmatmul.mubr.bf16.gmra.mrb[24].mxu0 %v5219_v29  ;;  %3320 = vmatmul.mubr.bf16.gmra.mrb[24].mxu1 %v5219_v29 }
 0x133   :  { %2764 = vmatprep.mubr.bf16.mxu0 %v5226_v30  ;;  %3329 = vmatprep.mubr.bf16.mxu1 %v5226_v30 }
 0x13a   :  { %2765 = vmatmul.mubr.bf16.gmra.mrb[28].mxu0 %v5228_v31  ;;  %3330 = vmatmul.mubr.bf16.gmra.mrb[28].mxu1 %v5228_v31 }
 0x13b   :  { %2807 = vmatprep.mubr.bf16.mxu0 %v5243_v32  ;;  %3372 = vmatprep.mubr.bf16.mxu1 %v5243_v32 }
 0x142   :  { %2808 = vmatmul.mubr.bf16.vlgmr.msra.gmra.mrb[0].mxu0 %v5235_v33  ;;  %3373 = vmatmul.mubr.bf16.vlgmr.msra.gmra.mrb[0].mxu1 %v5235_v33 }
 0x143   :  { %2817 = vmatprep.mubr.bf16.mxu0 %v5243_v32  ;;  %3382 = vmatprep.mubr.bf16.mxu1 %v5243_v32 }
 0x14a   :  { %2818 = vmatmul.mubr.bf16.gmra.mrb[4].mxu0 %v5236_v34  ;;  %3383 = vmatmul.mubr.bf16.gmra.mrb[4].mxu1 %v5236_v34 }
 0x14b   :  { %2827 = vmatprep.mubr.bf16.mxu0 %v5243_v32  ;;  %3392 = vmatprep.mubr.bf16.mxu1 %v5243_v32 }
 0x152   :  { %2828 = vmatmul.mubr.bf16.gmra.mrb[8].mxu0 %v5237_v35  ;;  %3393 = vmatmul.mubr.bf16.gmra.mrb[8].mxu1 %v5237_v35 }
 0x153   :  { %2837 = vmatprep.mubr.bf16.mxu0 %v5243_v32  ;;  %3402 = vmatprep.mubr.bf16.mxu1 %v5243_v32 }
 0x15a   :  { %2838 = vmatmul.mubr.bf16.gmra.mrb[12].mxu0 %v5238_v36  ;;  %3403 = vmatmul.mubr.bf16.gmra.mrb[12].mxu1 %v5238_v36 }
 0x15b   :  { %2847 = vmatprep.mubr.bf16.mxu0 %v5243_v32  ;;  %3412 = vmatprep.mubr.bf16.mxu1 %v5243_v32 }
 0x162   :  { %2848 = vmatmul.mubr.bf16.gmra.mrb[16].mxu0 %v5239_v37  ;;  %3413 = vmatmul.mubr.bf16.gmra.mrb[16].mxu1 %v5239_v37 }
 0x163   :  { %2857 = vmatprep.mubr.bf16.mxu0 %v5243_v32  ;;  %3422 = vmatprep.mubr.bf16.mxu1 %v5243_v32 }
 0x16a   :  { %2858 = vmatmul.mubr.bf16.gmra.mrb[20].mxu0 %v5240_v38  ;;  %3423 = vmatmul.mubr.bf16.gmra.mrb[20].mxu1 %v5240_v38 }
 0x16b   :  { %2867 = vmatprep.mubr.bf16.mxu0 %v5243_v32  ;;  %3432 = vmatprep.mubr.bf16.mxu1 %v5243_v32 }
 0x172   :  { %2868 = vmatmul.mubr.bf16.gmra.mrb[24].mxu0 %v5241_v39  ;;  %3433 = vmatmul.mubr.bf16.gmra.mrb[24].mxu1 %v5241_v39 }
 0x173   :  { %2877 = vmatprep.mubr.bf16.mxu0 %v5243_v32  ;;  %3442 = vmatprep.mubr.bf16.mxu1 %v5243_v32 }
 0x17a   :  { %2878 = vmatmul.mubr.bf16.gmra.mrb[28].mxu0 %v5242_v40  ;;  %3443 = vmatmul.mubr.bf16.gmra.mrb[28].mxu1 %v5242_v40 }
 0x215   :  { %v2809_v52 = vpop.f32.mrb[0].mxu0  ;;  %v3374_v53 = vpop.f32.mrb[0].mxu1 }
 0x216   :  { %v3670_v54 = vadd.f32 %v6347_v48, %v2809_v52  ;;  %v3672_v55 = vadd.f32 %v6349_v49, %v3374_v53  ;;  %v2811_v56 = vpop.f32.mrb[1].mxu0  ;;  %v3376_v57 = vpop.f32.mrb[1].mxu1 }
 0x217   :  { %v3671_v58 = vadd.f32 %v6351_v50, %v2811_v56  ;;  %v3673_v59 = vadd.f32 %v6353_v51, %v3376_v57  ;;  %v2813_v60 = vpop.f32.mrb[2].mxu0  ;;  %v3378_v61 = vpop.f32.mrb[2].mxu1 }
 0x218   :  { %v3734_v62 = vmax.f32 %v3670_v54, 0.0  ;;  %v3736_v63 = vmax.f32 %v3672_v55, 0.0  ;;  %v3674_v0 = vadd.f32 %v6347_v48, %v2813_v60  ;;  %v3676_v1 = vadd.f32 %v6349_v49, %v3378_v61  ;;  %v2815_v2 = vpop.f32.mrb[3].mxu0  ;;  %v3380_v3 = vpop.f32.mrb[3].mxu1 }
 0x219   :  { %v3735_v4 = vmax.f32 %v3671_v58, 0.0  ;;  %v3737_v5 = vmax.f32 %v3673_v59, 0.0  ;;  %v3675_v6 = vadd.f32 %v6351_v50, %v2815_v2  ;;  %v3677_v7 = vadd.f32 %v6353_v51, %v3380_v3 }
 0x21a   :  { %v3738_v8 = vmax.f32 %v3674_v0, 0.0  ;;  %v3740_v9 = vmax.f32 %v3676_v1, 0.0 }
 0x21b   :  { %v4418_v10 = vpack.c.bf16 %v3735_v4, %v3734_v62  ;;  %v4419_v11 = vpack.c.bf16 %v3737_v5, %v3736_v63  ;;  %v3739_v12 = vmax.f32 %v3675_v6, 0.0  ;;  %v3741_v13 = vmax.f32 %v3677_v7, 0.0 }
 0x21d   :  { %3990 = vst [vmem:[%s6518_s3] sm:$0xff] %v4418_v10  ;;  %3991 = vst [vmem:[%s6518_s3 + $0x8] sm:$0xff] %v4419_v11  ;;  %v4420_v14 = vpack.c.bf16 %v3739_v12, %v3738_v8  ;;  %v4421_v15 = vpack.c.bf16 %v3741_v13, %v3740_v9  ;;  %v2819_v16 = vpop.f32.mrb[4].mxu0  ;;  %v3384_v17 = vpop.f32.mrb[4].mxu1 }
 0x21e   :  { %v3678_v18 = vadd.f32 %v6347_v48, %v2819_v16  ;;  %v3680_v19 = vadd.f32 %v6349_v49, %v3384_v17  ;;  %v2821_v20 = vpop.f32.mrb[5].mxu0  ;;  %v3386_v21 = vpop.f32.mrb[5].mxu1 }
 0x21f   :  { %3992 = vst [vmem:[%s6518_s3 + $0x10] sm:$0xff] %v4420_v14  ;;  %3993 = vst [vmem:[%s6518_s3 + $0x18] sm:$0xff] %v4421_v15  ;;  %v3679_v22 = vadd.f32 %v6351_v50, %v2821_v20  ;;  %v3681_v23 = vadd.f32 %v6353_v51, %v3386_v21  ;;  %v2823_v24 = vpop.f32.mrb[6].mxu0  ;;  %v3388_v25 = vpop.f32.mrb[6].mxu1 }
 0x220   :  { %v3742_v26 = vmax.f32 %v3678_v18, 0.0  ;;  %v3744_v27 = vmax.f32 %v3680_v19, 0.0  ;;  %v3682_v28 = vadd.f32 %v6347_v48, %v2823_v24  ;;  %v3684_v29 = vadd.f32 %v6349_v49, %v3388_v25  ;;  %v2825_v30 = vpop.f32.mrb[7].mxu0  ;;  %v3390_v31 = vpop.f32.mrb[7].mxu1 }
 0x221   :  { %v3743_v32 = vmax.f32 %v3679_v22, 0.0  ;;  %v3745_v33 = vmax.f32 %v3681_v23, 0.0  ;;  %v3683_v34 = vadd.f32 %v6351_v50, %v2825_v30  ;;  %v3685_v35 = vadd.f32 %v6353_v51, %v3390_v31 }
 0x222   :  { %v3746_v36 = vmax.f32 %v3682_v28, 0.0  ;;  %v3748_v37 = vmax.f32 %v3684_v29, 0.0 }
 0x223   :  { %v4422_v38 = vpack.c.bf16 %v3743_v32, %v3742_v26  ;;  %v4423_v39 = vpack.c.bf16 %v3745_v33, %v3744_v27  ;;  %v3747_v40 = vmax.f32 %v3683_v34, 0.0  ;;  %v3749_v41 = vmax.f32 %v3685_v35, 0.0 }
 0x225   :  { %3994 = vst [vmem:[%s6518_s3 + $0x20] sm:$0xff] %v4422_v38  ;;  %3995 = vst [vmem:[%s6518_s3 + $0x28] sm:$0xff] %v4423_v39  ;;  %v4424_v42 = vpack.c.bf16 %v3747_v40, %v3746_v36  ;;  %v4425_v43 = vpack.c.bf16 %v3749_v41, %v3748_v37  ;;  %v2829_v44 = vpop.f32.mrb[8].mxu0  ;;  %v3394_v45 = vpop.f32.mrb[8].mxu1 }
 0x226   :  { %v3686_v46 = vadd.f32 %v6347_v48, %v2829_v44  ;;  %v3688_v47 = vadd.f32 %v6349_v49, %v3394_v45  ;;  %v2831_v52 = vpop.f32.mrb[9].mxu0  ;;  %v3396_v53 = vpop.f32.mrb[9].mxu1 }
 0x227   :  { %3996 = vst [vmem:[%s6518_s3 + $0x30] sm:$0xff] %v4424_v42  ;;  %3997 = vst [vmem:[%s6518_s3 + $0x38] sm:$0xff] %v4425_v43  ;;  %v3687_v54 = vadd.f32 %v6351_v50, %v2831_v52  ;;  %v3689_v55 = vadd.f32 %v6353_v51, %v3396_v53  ;;  %v2833_v56 = vpop.f32.mrb[10].mxu0  ;;  %v3398_v57 = vpop.f32.mrb[10].mxu1 }
 0x228   :  { %v3750_v58 = vmax.f32 %v3686_v46, 0.0  ;;  %v3752_v59 = vmax.f32 %v3688_v47, 0.0  ;;  %v3690_v60 = vadd.f32 %v6347_v48, %v2833_v56  ;;  %v3692_v61 = vadd.f32 %v6349_v49, %v3398_v57  ;;  %v2835_v62 = vpop.f32.mrb[11].mxu0  ;;  %v3400_v63 = vpop.f32.mrb[11].mxu1 }
 0x229   :  { %v3751_v0 = vmax.f32 %v3687_v54, 0.0  ;;  %v3753_v1 = vmax.f32 %v3689_v55, 0.0  ;;  %v3691_v2 = vadd.f32 %v6351_v50, %v2835_v62  ;;  %v3693_v3 = vadd.f32 %v6353_v51, %v3400_v63 }
 0x22a   :  { %v3754_v4 = vmax.f32 %v3690_v60, 0.0  ;;  %v3756_v5 = vmax.f32 %v3692_v61, 0.0 }
 0x22b   :  { %v4426_v6 = vpack.c.bf16 %v3751_v0, %v3750_v58  ;;  %v4427_v7 = vpack.c.bf16 %v3753_v1, %v3752_v59  ;;  %v3755_v8 = vmax.f32 %v3691_v2, 0.0  ;;  %v3757_v9 = vmax.f32 %v3693_v3, 0.0 }
 0x22d   :  { %3998 = vst [vmem:[%s6518_s3 + $0x40] sm:$0xff] %v4426_v6  ;;  %3999 = vst [vmem:[%s6518_s3 + $0x48] sm:$0xff] %v4427_v7  ;;  %v4428_v10 = vpack.c.bf16 %v3755_v8, %v3754_v4  ;;  %v4429_v11 = vpack.c.bf16 %v3757_v9, %v3756_v5  ;;  %v2839_v12 = vpop.f32.mrb[12].mxu0  ;;  %v3404_v13 = vpop.f32.mrb[12].mxu1 }
 0x22e   :  { %v3694_v14 = vadd.f32 %v6347_v48, %v2839_v12  ;;  %v3696_v15 = vadd.f32 %v6349_v49, %v3404_v13  ;;  %v2841_v16 = vpop.f32.mrb[13].mxu0  ;;  %v3406_v17 = vpop.f32.mrb[13].mxu1 }
 0x22f   :  { %4000 = vst [vmem:[%s6518_s3 + $0x50] sm:$0xff] %v4428_v10  ;;  %4001 = vst [vmem:[%s6518_s3 + $0x58] sm:$0xff] %v4429_v11  ;;  %v3695_v18 = vadd.f32 %v6351_v50, %v2841_v16  ;;  %v3697_v19 = vadd.f32 %v6353_v51, %v3406_v17  ;;  %v2843_v20 = vpop.f32.mrb[14].mxu0  ;;  %v3408_v21 = vpop.f32.mrb[14].mxu1 }
 0x230   :  { %v3758_v22 = vmax.f32 %v3694_v14, 0.0  ;;  %v3760_v23 = vmax.f32 %v3696_v15, 0.0  ;;  %v3698_v24 = vadd.f32 %v6347_v48, %v2843_v20  ;;  %v3700_v25 = vadd.f32 %v6349_v49, %v3408_v21  ;;  %v2845_v26 = vpop.f32.mrb[15].mxu0  ;;  %v3410_v27 = vpop.f32.mrb[15].mxu1 }
 0x231   :  { %v3759_v28 = vmax.f32 %v3695_v18, 0.0  ;;  %v3761_v29 = vmax.f32 %v3697_v19, 0.0  ;;  %v3699_v30 = vadd.f32 %v6351_v50, %v2845_v26  ;;  %v3701_v31 = vadd.f32 %v6353_v51, %v3410_v27 }
 0x232   :  { %v3762_v32 = vmax.f32 %v3698_v24, 0.0  ;;  %v3764_v33 = vmax.f32 %v3700_v25, 0.0 }
 0x233   :  { %v4430_v34 = vpack.c.bf16 %v3759_v28, %v3758_v22  ;;  %v4431_v35 = vpack.c.bf16 %v3761_v29, %v3760_v23  ;;  %v3763_v36 = vmax.f32 %v3699_v30, 0.0  ;;  %v3765_v37 = vmax.f32 %v3701_v31, 0.0 }
 0x235   :  { %4002 = vst [vmem:[%s6518_s3 + $0x60] sm:$0xff] %v4430_v34  ;;  %4003 = vst [vmem:[%s6518_s3 + $0x68] sm:$0xff] %v4431_v35  ;;  %v4432_v38 = vpack.c.bf16 %v3763_v36, %v3762_v32  ;;  %v4433_v39 = vpack.c.bf16 %v3765_v37, %v3764_v33  ;;  %v2849_v40 = vpop.f32.mrb[16].mxu0  ;;  %v3414_v41 = vpop.f32.mrb[16].mxu1 }
 0x236   :  { %v3702_v42 = vadd.f32 %v6347_v48, %v2849_v40  ;;  %v3704_v43 = vadd.f32 %v6349_v49, %v3414_v41  ;;  %v2851_v44 = vpop.f32.mrb[17].mxu0  ;;  %v3416_v45 = vpop.f32.mrb[17].mxu1 }
 0x237   :  { %4004 = vst [vmem:[%s6518_s3 + $0x70] sm:$0xff] %v4432_v38  ;;  %4005 = vst [vmem:[%s6518_s3 + $0x78] sm:$0xff] %v4433_v39  ;;  %v3703_v46 = vadd.f32 %v6351_v50, %v2851_v44  ;;  %v3705_v47 = vadd.f32 %v6353_v51, %v3416_v45  ;;  %v2853_v52 = vpop.f32.mrb[18].mxu0  ;;  %v3418_v53 = vpop.f32.mrb[18].mxu1 }
 0x238   :  { %v3766_v54 = vmax.f32 %v3702_v42, 0.0  ;;  %v3768_v55 = vmax.f32 %v3704_v43, 0.0  ;;  %v3706_v56 = vadd.f32 %v6347_v48, %v2853_v52  ;;  %v3708_v57 = vadd.f32 %v6349_v49, %v3418_v53  ;;  %v2855_v58 = vpop.f32.mrb[19].mxu0  ;;  %v3420_v59 = vpop.f32.mrb[19].mxu1 }
 0x239   :  { %v3767_v60 = vmax.f32 %v3703_v46, 0.0  ;;  %v3769_v61 = vmax.f32 %v3705_v47, 0.0  ;;  %v3707_v62 = vadd.f32 %v6351_v50, %v2855_v58  ;;  %v3709_v63 = vadd.f32 %v6353_v51, %v3420_v59 }
 0x23a   :  { %v3770_v0 = vmax.f32 %v3706_v56, 0.0  ;;  %v3772_v1 = vmax.f32 %v3708_v57, 0.0 }
 0x23b   :  { %v4434_v2 = vpack.c.bf16 %v3767_v60, %v3766_v54  ;;  %v4435_v3 = vpack.c.bf16 %v3769_v61, %v3768_v55  ;;  %v3771_v4 = vmax.f32 %v3707_v62, 0.0  ;;  %v3773_v5 = vmax.f32 %v3709_v63, 0.0 }
 0x23d   :  { %4006 = vst [vmem:[%s6518_s3 + $0x80] sm:$0xff] %v4434_v2  ;;  %4007 = vst [vmem:[%s6518_s3 + $0x88] sm:$0xff] %v4435_v3  ;;  %v4436_v6 = vpack.c.bf16 %v3771_v4, %v3770_v0  ;;  %v4437_v7 = vpack.c.bf16 %v3773_v5, %v3772_v1  ;;  %v2859_v8 = vpop.f32.mrb[20].mxu0  ;;  %v3424_v9 = vpop.f32.mrb[20].mxu1 }
 0x23e   :  { %v3710_v10 = vadd.f32 %v6347_v48, %v2859_v8  ;;  %v3712_v11 = vadd.f32 %v6349_v49, %v3424_v9  ;;  %v2861_v12 = vpop.f32.mrb[21].mxu0  ;;  %v3426_v13 = vpop.f32.mrb[21].mxu1 }
 0x23f   :  { %4008 = vst [vmem:[%s6518_s3 + $0x90] sm:$0xff] %v4436_v6  ;;  %4009 = vst [vmem:[%s6518_s3 + $0x98] sm:$0xff] %v4437_v7  ;;  %v3711_v14 = vadd.f32 %v6351_v50, %v2861_v12  ;;  %v3713_v15 = vadd.f32 %v6353_v51, %v3426_v13  ;;  %v2863_v16 = vpop.f32.mrb[22].mxu0  ;;  %v3428_v17 = vpop.f32.mrb[22].mxu1 }
 0x240   :  { %v3774_v18 = vmax.f32 %v3710_v10, 0.0  ;;  %v3776_v19 = vmax.f32 %v3712_v11, 0.0  ;;  %v3714_v20 = vadd.f32 %v6347_v48, %v2863_v16  ;;  %v3716_v21 = vadd.f32 %v6349_v49, %v3428_v17  ;;  %v2865_v22 = vpop.f32.mrb[23].mxu0  ;;  %v3430_v23 = vpop.f32.mrb[23].mxu1 }
 0x241   :  { %v3775_v24 = vmax.f32 %v3711_v14, 0.0  ;;  %v3777_v25 = vmax.f32 %v3713_v15, 0.0  ;;  %v3715_v26 = vadd.f32 %v6351_v50, %v2865_v22  ;;  %v3717_v27 = vadd.f32 %v6353_v51, %v3430_v23 }
 0x242   :  { %v3778_v28 = vmax.f32 %v3714_v20, 0.0  ;;  %v3780_v29 = vmax.f32 %v3716_v21, 0.0 }
 0x243   :  { %v4438_v30 = vpack.c.bf16 %v3775_v24, %v3774_v18  ;;  %v4439_v31 = vpack.c.bf16 %v3777_v25, %v3776_v19  ;;  %v3779_v32 = vmax.f32 %v3715_v26, 0.0  ;;  %v3781_v33 = vmax.f32 %v3717_v27, 0.0 }
 0x245   :  { %4010 = vst [vmem:[%s6518_s3 + $0xa0] sm:$0xff] %v4438_v30  ;;  %4011 = vst [vmem:[%s6518_s3 + $0xa8] sm:$0xff] %v4439_v31  ;;  %v4440_v34 = vpack.c.bf16 %v3779_v32, %v3778_v28  ;;  %v4441_v35 = vpack.c.bf16 %v3781_v33, %v3780_v29  ;;  %v2869_v36 = vpop.f32.mrb[24].mxu0  ;;  %v3434_v37 = vpop.f32.mrb[24].mxu1 }
 0x246   :  { %v3718_v38 = vadd.f32 %v6347_v48, %v2869_v36  ;;  %v3720_v39 = vadd.f32 %v6349_v49, %v3434_v37  ;;  %v2871_v40 = vpop.f32.mrb[25].mxu0  ;;  %v3436_v41 = vpop.f32.mrb[25].mxu1 }
 0x247   :  { %4012 = vst [vmem:[%s6518_s3 + $0xb0] sm:$0xff] %v4440_v34  ;;  %4013 = vst [vmem:[%s6518_s3 + $0xb8] sm:$0xff] %v4441_v35  ;;  %v3719_v42 = vadd.f32 %v6351_v50, %v2871_v40  ;;  %v3721_v43 = vadd.f32 %v6353_v51, %v3436_v41  ;;  %v2873_v44 = vpop.f32.mrb[26].mxu0  ;;  %v3438_v45 = vpop.f32.mrb[26].mxu1 }
 0x248   :  { %v3782_v46 = vmax.f32 %v3718_v38, 0.0  ;;  %v3784_v47 = vmax.f32 %v3720_v39, 0.0  ;;  %v3722_v52 = vadd.f32 %v6347_v48, %v2873_v44  ;;  %v3724_v53 = vadd.f32 %v6349_v49, %v3438_v45  ;;  %v2875_v54 = vpop.f32.mrb[27].mxu0  ;;  %v3440_v55 = vpop.f32.mrb[27].mxu1 }
 0x249   :  { %v3783_v56 = vmax.f32 %v3719_v42, 0.0  ;;  %v3785_v57 = vmax.f32 %v3721_v43, 0.0  ;;  %v3723_v58 = vadd.f32 %v6351_v50, %v2875_v54  ;;  %v3725_v59 = vadd.f32 %v6353_v51, %v3440_v55 }
 0x24a   :  { %v3786_v60 = vmax.f32 %v3722_v52, 0.0  ;;  %v3788_v61 = vmax.f32 %v3724_v53, 0.0 }
 0x24b   :  { %v4442_v62 = vpack.c.bf16 %v3783_v56, %v3782_v46  ;;  %v4443_v63 = vpack.c.bf16 %v3785_v57, %v3784_v47  ;;  %v3787_v0 = vmax.f32 %v3723_v58, 0.0  ;;  %v3789_v1 = vmax.f32 %v3725_v59, 0.0 }
 0x24d   :  { %4014 = vst [vmem:[%s6518_s3 + $0xc0] sm:$0xff] %v4442_v62  ;;  %4015 = vst [vmem:[%s6518_s3 + $0xc8] sm:$0xff] %v4443_v63  ;;  %v4444_v2 = vpack.c.bf16 %v3787_v0, %v3786_v60  ;;  %v4445_v3 = vpack.c.bf16 %v3789_v1, %v3788_v61  ;;  %v2879_v4 = vpop.f32.mrb[28].mxu0  ;;  %v3444_v5 = vpop.f32.mrb[28].mxu1 }
 0x24e   :  { %v3726_v6 = vadd.f32 %v6347_v48, %v2879_v4  ;;  %v3728_v7 = vadd.f32 %v6349_v49, %v3444_v5  ;;  %v2881_v8 = vpop.f32.mrb[29].mxu0  ;;  %v3446_v9 = vpop.f32.mrb[29].mxu1 }
 0x24f   :  { %4016 = vst [vmem:[%s6518_s3 + $0xd0] sm:$0xff] %v4444_v2  ;;  %4017 = vst [vmem:[%s6518_s3 + $0xd8] sm:$0xff] %v4445_v3  ;;  %v3727_v10 = vadd.f32 %v6351_v50, %v2881_v8  ;;  %v3729_v11 = vadd.f32 %v6353_v51, %v3446_v9  ;;  %v2883_v12 = vpop.f32.mrb[30].mxu0  ;;  %v3448_v13 = vpop.f32.mrb[30].mxu1 }
 0x250   :  { %v3790_v14 = vmax.f32 %v3726_v6, 0.0  ;;  %v3792_v15 = vmax.f32 %v3728_v7, 0.0  ;;  %v3730_v16 = vadd.f32 %v6347_v48, %v2883_v12  ;;  %v3732_v17 = vadd.f32 %v6349_v49, %v3448_v13  ;;  %v2885_v18 = vpop.f32.mrb[31].mxu0  ;;  %v3450_v19 = vpop.f32.mrb[31].mxu1 }
 0x251   :  { %v3791_v20 = vmax.f32 %v3727_v10, 0.0  ;;  %v3793_v21 = vmax.f32 %v3729_v11, 0.0  ;;  %v3731_v22 = vadd.f32 %v6351_v50, %v2885_v18  ;;  %v3733_v23 = vadd.f32 %v6353_v51, %v3450_v19 }
 0x252   :  { %v3794_v24 = vmax.f32 %v3730_v16, 0.0  ;;  %v3796_v25 = vmax.f32 %v3732_v17, 0.0 }
 0x253   :  { %v4446_v26 = vpack.c.bf16 %v3791_v20, %v3790_v14  ;;  %v4447_v27 = vpack.c.bf16 %v3793_v21, %v3792_v15  ;;  %v3795_v28 = vmax.f32 %v3731_v22, 0.0  ;;  %v3797_v29 = vmax.f32 %v3733_v23, 0.0 }
 0x255   :  { %4018 = vst [vmem:[%s6518_s3 + $0xe0] sm:$0xff] %v4446_v26  ;;  %4019 = vst [vmem:[%s6518_s3 + $0xe8] sm:$0xff] %v4447_v27  ;;  %v4448_v48 = vpack.c.bf16 %v3795_v28, %v3794_v24  ;;  %v4449_v49 = vpack.c.bf16 %v3797_v29, %v3796_v25 }
 0x257   :  { %4020 = vst [vmem:[%s6518_s3 + $0xf0] sm:$0xff] %v4448_v48  ;;  %4021 = vst [vmem:[%s6518_s3 + $0xf8] sm:$0xff] %v4449_v49 }

</bundles_post_ra>
